<compile_context>
chip_gen: v7x
topology: tpu7x:2x2x1
jax: 0.10.0
libtpu: 0.0.40
codegen_flags: <defaults>
</compile_context>

<pallas_src>
from functools import partial

import jax
import jax.numpy as jnp
from jax.experimental import pallas as pl
from jax.experimental.pallas import tpu as pltpu


def _round_up(v, m):
    return ((v + m - 1) // m) * m


def _round_down(v, m):
    return (v // m) * m


def _meta_mil_temp_kernel(x_ref, meta_ref, w_emb_ref, w_att_ref,
                          w_cls_z_ref, w_cls_m_ref, temp_ref, out_ref,
                          *, n_valid):
    """One grid step == TB bags.

    x_ref       : (TB, Np, D)  VMEM (compute dtype, Np = padded instance count)
    meta_ref    : (TB, M)      VMEM
    w_emb_ref   : (D, Hd)      VMEM
    w_att_ref   : (Hd, 1)      VMEM  (attention vector stored as a column)
    w_cls_z_ref : (Hd, Cp)     VMEM  (zero-padded to lane-dense Cp)
    w_cls_m_ref : (M, Cp)      VMEM
    temp_ref    : (1,)         SMEM  (scalar temperature)
    out_ref     : (TB, Cp)     VMEM  (f32)
    """
    TB, Np, D = x_ref.shape
    Hd = w_emb_ref.shape[1]
    cdt = x_ref.dtype                       # compute dtype (bf16 or f32)

    # Instance embedding: one (TB*Np, D) @ (D, Hd) MXU matmul, f32 accumulate.
    x2 = x_ref[...].reshape(TB * Np, D)     # free: Np multiple of sublane pack, D % 128 == 0
    h32 = jnp.tanh(jnp.dot(x2, w_emb_ref[...],
                           preferred_element_type=jnp.float32))
    h = h32.astype(cdt)                     # keep MXU operands / vregs narrow (bf16)

    # Attention logits as an MXU matvec: <h_i, w_att>.
    s = jnp.dot(h, w_att_ref[...], preferred_element_type=jnp.float32)  # (TB*Np, 1)
    s3 = s.reshape(TB, Np, 1)
    if n_valid < Np:
        # Mask zero-padded instances out of the softmax (they would otherwise
        # get nonzero attention weight and bias the pooled representation).
        inst = jax.lax.broadcasted_iota(jnp.int32, (TB, Np, 1), 1)
        s3 = jnp.where(inst < n_valid, s3, -1e30)

    # Per-bag softmax over the instance axis (sublane reduction only).
    # Exact reciprocal: these logits feed LBFGS temperature calibration.
    m = jnp.max(s3, axis=1, keepdims=True)                           # (TB, 1, 1)
    e = jnp.exp(s3 - m)                                              # (TB, Np, 1)
    denom = jnp.sum(e, axis=1, keepdims=True)                        # (TB, 1, 1)
    a = e * pl.reciprocal(denom, approx=False)

    # Attention-weighted bag representation (f32 accumulation over instances).
    h3 = h.reshape(TB, Np, Hd)
    z = jnp.sum(a.astype(cdt) * h3, axis=1, dtype=jnp.float32)       # (TB, Hd)
    z_c = z.astype(cdt)

    # Classifier split over [z, meta] (== concat + one linear), lane-dense Cp.
    logits = (jnp.dot(z_c, w_cls_z_ref[...],
                      preferred_element_type=jnp.float32)
              + jnp.dot(meta_ref[...], w_cls_m_ref[...],
                        preferred_element_type=jnp.float32))         # (TB, Cp)

    # Temperature scaling: logits / temperature.expand(B, C)  (scalar unit).
    inv_t = 1.0 / temp_ref[0]
    out_ref[...] = (logits * inv_t).astype(out_ref.dtype)


def _choose_bag_tile(B, Np, D, Hd, M, Cp, itemsize, bag_tile,
                     tile_vmem_budget=12 << 20, x_block_cap=4 << 20):
    """Pick TB (multiple of 16) from a full per-step VMEM accounting."""
    if bag_tile is not None:
        TB = max(16, _round_up(bag_tile, 16))
    else:
        per_bag = (2 * Np * D * itemsize      # double-buffered x block
                   + Np * Hd * 4              # f32 tanh(x @ w_emb) output
                   + Np * Hd * itemsize       # h cast to compute dtype
                   + Np * Hd * 4              # attention-weighted product (f32 accum)
                   + 2 * Cp * 4               # double-buffered output block
                   + 2 * M * itemsize)        # double-buffered meta block
        TB = min(tile_vmem_budget // per_bag,
                 x_block_cap // (Np * D * itemsize))
        TB = max(16, _round_down(max(TB, 16), 16))
    TB = min(TB, _round_up(B, 16))            # never larger than the batch
    if B >= 32:                               # keep >= 2 steps: v7x megacore + pipelining
        TB = min(TB, max(16, _round_up(-(-B // 2), 16)))
    nsteps = -(-B // TB)
    if nsteps > 1 and nsteps % 2 == 1:        # even step count -> no idle v7x core on tail
        TB = max(16, _round_up(-(-B // (nsteps + 1)), 16))
    return TB


def temperature_scaler_meta_mil(x, meta, params, *, bag_tile=None,
                                compute_dtype=jnp.bfloat16,
                                vmem_limit_bytes=None):
    """Forward pass of TemperatureScalerMetaMIL (cnn=False path)."""
    B, N, D = x.shape
    M = meta.shape[1]
    w_emb, w_att = params["w_emb"], params["w_att"]
    w_cls_z, w_cls_m = params["w_cls_z"], params["w_cls_m"]
    Hd = w_emb.shape[1]
    C = w_cls_z.shape[1]
    cdt = jnp.dtype(compute_dtype)
    itemsize = cdt.itemsize

    # Instance-axis padding: keeps the in-kernel (TB,Np,D)<->(TB*Np,D) reshapes
    # free (Np multiple of the sublane pack); padded rows are masked in-kernel.
    # (D / Hd should be multiples of 128 for lane density; demo uses 128.)
    pack = 16 if itemsize == 2 else 8
    Np = _round_up(N, pack)
    if Np != N:
        x = jnp.pad(x, ((0, 0), (0, Np - N), (0, 0)))

    # Lane-dense output: pad class dim to a multiple of 128 with zero columns.
    Cp = max(128, _round_up(C, 128))
    w_cls_z_p = jnp.zeros((Hd, Cp), w_cls_z.dtype).at[:, :C].set(w_cls_z)
    w_cls_m_p = jnp.zeros((M, Cp), w_cls_m.dtype).at[:, :C].set(w_cls_m)
    w_att_col = w_att.reshape(Hd, 1)      # attention score as an MXU matvec

    # Bag tile (multiple of 16) + batch padding.
    TB = _choose_bag_tile(B, Np, D, Hd, M, Cp, itemsize, bag_tile)
    Bp = _round_up(B, TB)
    if Bp != B:                           # padded bags' rows are sliced off below
        x = jnp.pad(x, ((0, Bp - B), (0, 0), (0, 0)))
        meta = jnp.pad(meta, ((0, Bp - B), (0, 0)))

    # Compute dtype for the HBM stream / MXU operands; accumulation stays f32.
    x_c = x.astype(cdt)
    meta_c = meta.astype(cdt)
    w_emb_c = w_emb.astype(cdt)
    w_att_c = w_att_col.astype(cdt)
    w_cls_z_c = w_cls_z_p.astype(cdt)
    w_cls_m_c = w_cls_m_p.astype(cdt)
    temp = params["temperature"].astype(jnp.float32)

    kernel = partial(_meta_mil_temp_kernel, n_valid=N)

    def _call(weight_mode):
        def wspec(shape):
            kw = {} if weight_mode is None else {"pipeline_mode": weight_mode}
            return pl.BlockSpec(shape, lambda b: (0,) * len(shape), **kw)

        grid_spec = pltpu.PrefetchScalarGridSpec(
            num_scalar_prefetch=0,
            grid=(Bp // TB,),
            in_specs=[
                pl.BlockSpec((TB, Np, D), lambda b: (b, 0, 0)),      # x
                pl.BlockSpec((TB, M), lambda b: (b, 0)),             # meta
                wspec((D, Hd)),                                      # w_emb
                wspec((Hd, 1)),                                      # w_att column
                wspec((Hd, Cp)),                                     # w_cls_z (padded)
                wspec((M, Cp)),                                      # w_cls_m (padded)
                pl.BlockSpec(memory_space=pltpu.MemorySpace.SMEM),   # temperature
            ],
            out_specs=pl.BlockSpec((TB, Cp), lambda b: (b, 0)),
        )
        out = pl.pallas_call(
            kernel,
            out_shape=jax.ShapeDtypeStruct((Bp, Cp), jnp.float32),
            grid_spec=grid_spec,
            compiler_params=pltpu.CompilerParams(
                dimension_semantics=("parallel",),   # bag-tile axis shards v7x TCs
                vmem_limit_bytes=vmem_limit_bytes),
        )(x_c, meta_c, w_emb_c, w_att_c, w_cls_z_c, w_cls_m_c, temp)
        return jax.block_until_ready(out)

    try:
        # Constant-index weights are never re-fetched: single-buffer them to
        # free VMEM for a bigger x tile (matters most on v7x's 64 MiB part).
        out_p = _call(pl.Buffered(1))
    except Exception:  # runtime/compiler may not accept buffer_count=1
        out_p = _call(None)

    # TODO(synk): for very large B the (Bp, 128) f32 writeback + this slice are
    # an extra HBM pass; fuse into the consumer or alias a (B, C) buffer then.
    return out_p[:B, :C]


def _reference(x, meta, params):
    """Pure-JAX reference of the same synthetic MetaMIL + temperature scaling."""
    h = jnp.tanh(jnp.einsum("bnd,dh->bnh", x, params["w_emb"]))
    s = jnp.einsum("bnh,h->bn", h, params["w_att"][0])
    a = jax.nn.softmax(s, axis=-1)
    z = jnp.einsum("bn,bnh->bh", a, h)
    logits = z @ params["w_cls_z"] + meta @ params["w_cls_m"]
    # TemperatureScalerMetaMIL.__temperature_scale (cnn=False, 2-D logits):
    return logits / params["temperature"][0]


if __name__ == "__main__":
    # Lane-dense MIL shapes: 64 bags of 16 instances, 128-d features (TB=32,
    # grid=2 -> exercises the multi-step, megacore-shardable path).
    B, N, D, Hd, M, C = 64, 16, 128, 128, 8, 2

    key = jax.random.PRNGKey(0)
    k_x, k_m, k_we, k_wa, k_wz, k_wm = jax.random.split(key, 6)

    x = jax.random.normal(k_x, (B, N, D), dtype=jnp.float32)
    meta = jax.random.normal(k_m, (B, M), dtype=jnp.float32)

    params = {
        "w_emb": jax.random.normal(k_we, (D, Hd), dtype=jnp.float32) * 0.1,
        "w_att": jax.random.normal(k_wa, (1, Hd), dtype=jnp.float32) * 0.1,
        "w_cls_z": jax.random.normal(k_wz, (Hd, C), dtype=jnp.float32) * 0.1,
        "w_cls_m": jax.random.normal(k_wm, (M, C), dtype=jnp.float32) * 0.1,
        # nn.Parameter(torch.ones(1) * 1.5)
        "temperature": jnp.ones((1,), dtype=jnp.float32) * 1.5,
    }

    ref = _reference(x, meta, params)

    # f32 compute path: strict numerical check against the reference.
    out32 = temperature_scaler_meta_mil(x, meta, params, compute_dtype=jnp.float32)
    out32 = jax.block_until_ready(out32)
    assert out32.shape == (B, C)
    assert jnp.allclose(out32, ref, atol=1e-3, rtol=1e-3), (out32, ref)

    # Default bf16-stream path (throughput configuration): looser tolerance.
    out_bf = temperature_scaler_meta_mil(x, meta, params)
    out_bf = jax.block_until_ready(out_bf)
    assert out_bf.shape == (B, C)
    assert jnp.allclose(out_bf, ref, atol=5e-2, rtol=5e-2), (out_bf, ref)

    # TODO(synk): the cnn=True branch (logits[0] of a backbone tuple) and
    # set_temperature (LBFGS NLL calibration) are host-side logic, not kernel work.
    print("KERNEL_OK")
</pallas_src>

<mosaic_0001>
module attributes {stable_mosaic.version = 11 : i64} {
  func.func @_meta_mil_temp_kernel(%arg0: i32, %arg1: memref<32x16x128xf32, #tpu.memory_space<vmem>>, %arg2: memref<32x8xf32, #tpu.memory_space<vmem>>, %arg3: memref<128x128xf32, #tpu.memory_space<vmem>>, %arg4: memref<128x1xf32, #tpu.memory_space<vmem>>, %arg5: memref<128x128xf32, #tpu.memory_space<vmem>>, %arg6: memref<8x128xf32, #tpu.memory_space<vmem>>, %arg7: memref<1xf32, #tpu.memory_space<smem>>, %arg8: memref<32x128xf32, #tpu.memory_space<vmem>>) attributes {dimension_semantics = [#tpu.dimension_semantics<parallel>], iteration_bounds = array<i64: 2>, scalar_prefetch = 0 : i64, scratch_operands = 0 : i64, tpu.core_type = #tpu.core_type<tc>, window_params = [{transform_indices = @transform_0, window_bounds = array<i64: 32, 16, 128>}, {transform_indices = @transform_1, window_bounds = array<i64: 32, 8>}, {pipeline_mode = #tpu.pipeline_mode<synchronous>, transform_indices = @transform_2, window_bounds = array<i64: 128, 128>}, {pipeline_mode = #tpu.pipeline_mode<synchronous>, transform_indices = @transform_3, window_bounds = array<i64: 128, 1>}, {pipeline_mode = #tpu.pipeline_mode<synchronous>, transform_indices = @transform_4, window_bounds = array<i64: 128, 128>}, {pipeline_mode = #tpu.pipeline_mode<synchronous>, transform_indices = @transform_5, window_bounds = array<i64: 8, 128>}, {transform_indices = @transform_6, window_bounds = array<i64: 1>}, {transform_indices = @transform_7, window_bounds = array<i64: 32, 128>}]} {
    %c0 = arith.constant 0 : index
    %c0_0 = arith.constant 0 : index
    %c0_1 = arith.constant 0 : index
    %0 = vector.load %arg1[%c0, %c0_0, %c0_1] : memref<32x16x128xf32, #tpu.memory_space<vmem>>, vector<32x16x128xf32>
    %1 = vector.shape_cast %0 : vector<32x16x128xf32> to vector<512x128xf32>
    %c0_2 = arith.constant 0 : index
    %c0_3 = arith.constant 0 : index
    %2 = vector.load %arg3[%c0_2, %c0_3] : memref<128x128xf32, #tpu.memory_space<vmem>>, vector<128x128xf32>
    %cst = arith.constant dense<0.000000e+00> : vector<512x128xf32>
    %3 = tpu.matmul %1, %2, %cst {dimension_numbers = #tpu.dot_dimension_numbers<[1], [0], [0], [1], [0, 0, 1, 1], [], []>} : vector<512x128xf32>, vector<128x128xf32>, vector<512x128xf32> -> vector<512x128xf32>
    %4 = math.tanh %3 : vector<512x128xf32>
    %c0_4 = arith.constant 0 : index
    %c0_5 = arith.constant 0 : index
    %5 = vector.load %arg4[%c0_4, %c0_5] : memref<128x1xf32, #tpu.memory_space<vmem>>, vector<128x1xf32>
    %cst_6 = arith.constant dense<0.000000e+00> : vector<512x1xf32>
    %6 = tpu.matmul %4, %5, %cst_6 {dimension_numbers = #tpu.dot_dimension_numbers<[1], [0], [0], [1], [0, 0, 1, 1], [], []>} : vector<512x128xf32>, vector<128x1xf32>, vector<512x1xf32> -> vector<512x1xf32>
    %7 = vector.shape_cast %6 : vector<512x1xf32> to vector<32x16x1xf32>
    %cst_7 = arith.constant dense<0xFF800000> : vector<32x1xf32>
    %8 = vector.multi_reduction <maximumf>, %7, %cst_7 [1] : vector<32x16x1xf32> to vector<32x1xf32>
    %9 = vector.shape_cast %8 : vector<32x1xf32> to vector<32x1x1xf32>
    %10 = vector.broadcast %9 : vector<32x1x1xf32> to vector<32x16x1xf32>
    %11 = arith.subf %7, %10 : vector<32x16x1xf32>
    %12 = math.exp %11 : vector<32x16x1xf32>
    %cst_8 = arith.constant dense<0.000000e+00> : vector<32x1xf32>
    %13 = vector.multi_reduction <add>, %12, %cst_8 [1] : vector<32x16x1xf32> to vector<32x1xf32>
    %14 = vector.shape_cast %13 : vector<32x1xf32> to vector<32x1x1xf32>
    %15 = tpu.reciprocal %14 : vector<32x1x1xf32> -> vector<32x1x1xf32>
    %16 = vector.broadcast %15 : vector<32x1x1xf32> to vector<32x16x1xf32>
    %17 = arith.mulf %12, %16 : vector<32x16x1xf32>
    %18 = vector.shape_cast %4 : vector<512x128xf32> to vector<32x16x128xf32>
    %19 = vector.broadcast %17 : vector<32x16x1xf32> to vector<32x16x128xf32>
    %20 = arith.mulf %19, %18 : vector<32x16x128xf32>
    %cst_9 = arith.constant dense<0.000000e+00> : vector<32x128xf32>
    %21 = vector.multi_reduction <add>, %20, %cst_9 [1] : vector<32x16x128xf32> to vector<32x128xf32>
    %c0_10 = arith.constant 0 : index
    %c0_11 = arith.constant 0 : index
    %22 = vector.load %arg5[%c0_10, %c0_11] : memref<128x128xf32, #tpu.memory_space<vmem>>, vector<128x128xf32>
    %cst_12 = arith.constant dense<0.000000e+00> : vector<32x128xf32>
    %23 = tpu.matmul %21, %22, %cst_12 {dimension_numbers = #tpu.dot_dimension_numbers<[1], [0], [0], [1], [0, 0, 1, 1], [], []>} : vector<32x128xf32>, vector<128x128xf32>, vector<32x128xf32> -> vector<32x128xf32>
    %c0_13 = arith.constant 0 : index
    %c0_14 = arith.constant 0 : index
    %24 = vector.load %arg2[%c0_13, %c0_14] : memref<32x8xf32, #tpu.memory_space<vmem>>, vector<32x8xf32>
    %c0_15 = arith.constant 0 : index
    %c0_16 = arith.constant 0 : index
    %25 = vector.load %arg6[%c0_15, %c0_16] : memref<8x128xf32, #tpu.memory_space<vmem>>, vector<8x128xf32>
    %cst_17 = arith.constant dense<0.000000e+00> : vector<32x128xf32>
    %26 = tpu.matmul %24, %25, %cst_17 {dimension_numbers = #tpu.dot_dimension_numbers<[1], [0], [0], [1], [0, 0, 1, 1], [], []>} : vector<32x8xf32>, vector<8x128xf32>, vector<32x128xf32> -> vector<32x128xf32>
    %27 = arith.addf %23, %26 : vector<32x128xf32>
    %c0_18 = arith.constant 0 : index
    %28 = memref.load %arg7[%c0_18] : memref<1xf32, #tpu.memory_space<smem>>
    %cst_19 = arith.constant 1.000000e+00 : f32
    %29 = arith.divf %cst_19, %28 : f32
    %30 = vector.broadcast %29 : f32 to vector<32x128xf32>
    %31 = arith.mulf %27, %30 : vector<32x128xf32>
    %c0_20 = arith.constant 0 : index
    %c0_21 = arith.constant 0 : index
    %32 = vector.load %arg8[%c0_20, %c0_21] : memref<32x128xf32, #tpu.memory_space<vmem>>, vector<32x128xf32>
    tpu.vector_store %arg8[%c0_20, %c0_21], %31 {strides = array<i32>} : memref<32x128xf32, #tpu.memory_space<vmem>>, vector<32x128xf32>,
    return
  }
  func.func @transform_0(%arg0: i32) -> (i32, i32, i32) {
    %c0_i32 = arith.constant 0 : i32
    %c0_i32_0 = arith.constant 0 : i32
    %c0_i32_1 = arith.constant 0 : i32
    return %arg0, %c0_i32, %c0_i32_0 : i32, i32, i32
  }
  func.func @transform_1(%arg0: i32) -> (i32, i32) {
    %c0_i32 = arith.constant 0 : i32
    %c0_i32_0 = arith.constant 0 : i32
    return %arg0, %c0_i32 : i32, i32
  }
  func.func @transform_2(%arg0: i32) -> (i32, i32) {
    %c0_i32 = arith.constant 0 : i32
    %c0_i32_0 = arith.constant 0 : i32
    %c0_i32_1 = arith.constant 0 : i32
    return %c0_i32, %c0_i32_0 : i32, i32
  }
  func.func @transform_3(%arg0: i32) -> (i32, i32) {
    %c0_i32 = arith.constant 0 : i32
    %c0_i32_0 = arith.constant 0 : i32
    %c0_i32_1 = arith.constant 0 : i32
    return %c0_i32, %c0_i32_0 : i32, i32
  }
  func.func @transform_4(%arg0: i32) -> (i32, i32) {
    %c0_i32 = arith.constant 0 : i32
    %c0_i32_0 = arith.constant 0 : i32
    %c0_i32_1 = arith.constant 0 : i32
    return %c0_i32, %c0_i32_0 : i32, i32
  }
  func.func @transform_5(%arg0: i32) -> (i32, i32) {
    %c0_i32 = arith.constant 0 : i32
    %c0_i32_0 = arith.constant 0 : i32
    %c0_i32_1 = arith.constant 0 : i32
    return %c0_i32, %c0_i32_0 : i32, i32
  }
  func.func @transform_6(%arg0: i32) -> i32 {
    %c0_i32 = arith.constant 0 : i32
    %c0_i32_0 = arith.constant 0 : i32
    return %c0_i32 : i32
  }
  func.func @transform_7(%arg0: i32) -> (i32, i32) {
    %c0_i32 = arith.constant 0 : i32
    %c0_i32_0 = arith.constant 0 : i32
    return %arg0, %c0_i32 : i32, i32
  }
}

module attributes {stable_mosaic.version = 11 : i64} {
  func.func @_meta_mil_temp_kernel(%arg0: i32, %arg1: memref<32x16x128xf32, #tpu.memory_space<vmem>>, %arg2: memref<32x8xf32, #tpu.memory_space<vmem>>, %arg3: memref<128x128xf32, #tpu.memory_space<vmem>>, %arg4: memref<128x1xf32, #tpu.memory_space<vmem>>, %arg5: memref<128x128xf32, #tpu.memory_space<vmem>>, %arg6: memref<8x128xf32, #tpu.memory_space<vmem>>, %arg7: memref<1xf32, #tpu.memory_space<smem>>, %arg8: memref<32x128xf32, #tpu.memory_space<vmem>>) attributes {dimension_semantics = [#tpu.dimension_semantics<parallel>], iteration_bounds = array<i64: 2>, scalar_prefetch = 0 : i64, scratch_operands = 0 : i64, tpu.core_type = #tpu.core_type<tc>, window_params = [{transform_indices = @transform_0, window_bounds = array<i64: 32, 16, 128>}, {transform_indices = @transform_1, window_bounds = array<i64: 32, 8>}, {pipeline_mode = #tpu.pipeline_mode<synchronous>, transform_indices = @transform_2, window_bounds = array<i64: 128, 128>}, {pipeline_mode = #tpu.pipeline_mode<synchronous>, transform_indices = @transform_3, window_bounds = array<i64: 128, 1>}, {pipeline_mode = #tpu.pipeline_mode<synchronous>, transform_indices = @transform_4, window_bounds = array<i64: 128, 128>}, {pipeline_mode = #tpu.pipeline_mode<synchronous>, transform_indices = @transform_5, window_bounds = array<i64: 8, 128>}, {transform_indices = @transform_6, window_bounds = array<i64: 1>}, {transform_indices = @transform_7, window_bounds = array<i64: 32, 128>}]} {
    %c0 = arith.constant 0 : index
    %c0_0 = arith.constant 0 : index
    %c0_1 = arith.constant 0 : index
    %0 = vector.load %arg1[%c0, %c0_0, %c0_1] : memref<32x16x128xf32, #tpu.memory_space<vmem>>, vector<32x16x128xf32>
    %1 = vector.shape_cast %0 : vector<32x16x128xf32> to vector<512x128xf32>
    %c0_2 = arith.constant 0 : index
    %c0_3 = arith.constant 0 : index
    %2 = vector.load %arg3[%c0_2, %c0_3] : memref<128x128xf32, #tpu.memory_space<vmem>>, vector<128x128xf32>
    %cst = arith.constant dense<0.000000e+00> : vector<512x128xf32>
    %3 = tpu.matmul %1, %2, %cst {dimension_numbers = #tpu.dot_dimension_numbers<[1], [0], [0], [1], [0, 0, 1, 1], [], []>} : vector<512x128xf32>, vector<128x128xf32>, vector<512x128xf32> -> vector<512x128xf32>
    %4 = math.tanh %3 : vector<512x128xf32>
    %c0_4 = arith.constant 0 : index
    %c0_5 = arith.constant 0 : index
    %5 = vector.load %arg4[%c0_4, %c0_5] : memref<128x1xf32, #tpu.memory_space<vmem>>, vector<128x1xf32>
    %cst_6 = arith.constant dense<0.000000e+00> : vector<512x1xf32>
    %6 = tpu.matmul %4, %5, %cst_6 {dimension_numbers = #tpu.dot_dimension_numbers<[1], [0], [0], [1], [0, 0, 1, 1], [], []>} : vector<512x128xf32>, vector<128x1xf32>, vector<512x1xf32> -> vector<512x1xf32>
    %7 = vector.shape_cast %6 : vector<512x1xf32> to vector<32x16x1xf32>
    %cst_7 = arith.constant dense<0xFF800000> : vector<32x1xf32>
    %8 = vector.multi_reduction <maximumf>, %7, %cst_7 [1] : vector<32x16x1xf32> to vector<32x1xf32>
    %9 = vector.shape_cast %8 : vector<32x1xf32> to vector<32x1x1xf32>
    %10 = vector.broadcast %9 : vector<32x1x1xf32> to vector<32x16x1xf32>
    %11 = arith.subf %7, %10 : vector<32x16x1xf32>
    %12 = math.exp %11 : vector<32x16x1xf32>
    %cst_8 = arith.constant dense<0.000000e+00> : vector<32x1xf32>
    %13 = vector.multi_reduction <add>, %12, %cst_8 [1] : vector<32x16x1xf32> to vector<32x1xf32>
    %14 = vector.shape_cast %13 : vector<32x1xf32> to vector<32x1x1xf32>
    %15 = tpu.reciprocal %14 : vector<32x1x1xf32> -> vector<32x1x1xf32>
    %16 = vector.broadcast %15 : vector<32x1x1xf32> to vector<32x16x1xf32>
    %17 = arith.mulf %12, %16 : vector<32x16x1xf32>
    %18 = vector.shape_cast %4 : vector<512x128xf32> to vector<32x16x128xf32>
    %19 = vector.broadcast %17 : vector<32x16x1xf32> to vector<32x16x128xf32>
    %20 = arith.mulf %19, %18 : vector<32x16x128xf32>
    %cst_9 = arith.constant dense<0.000000e+00> : vector<32x128xf32>
    %21 = vector.multi_reduction <add>, %20, %cst_9 [1] : vector<32x16x128xf32> to vector<32x128xf32>
    %c0_10 = arith.constant 0 : index
    %c0_11 = arith.constant 0 : index
    %22 = vector.load %arg5[%c0_10, %c0_11] : memref<128x128xf32, #tpu.memory_space<vmem>>, vector<128x128xf32>
    %cst_12 = arith.constant dense<0.000000e+00> : vector<32x128xf32>
    %23 = tpu.matmul %21, %22, %cst_12 {dimension_numbers = #tpu.dot_dimension_numbers<[1], [0], [0], [1], [0, 0, 1, 1], [], []>} : vector<32x128xf32>, vector<128x128xf32>, vector<32x128xf32> -> vector<32x128xf32>
    %c0_13 = arith.constant 0 : index
    %c0_14 = arith.constant 0 : index
    %24 = vector.load %arg2[%c0_13, %c0_14] : memref<32x8xf32, #tpu.memory_space<vmem>>, vector<32x8xf32>
    %c0_15 = arith.constant 0 : index
    %c0_16 = arith.constant 0 : index
    %25 = vector.load %arg6[%c0_15, %c0_16] : memref<8x128xf32, #tpu.memory_space<vmem>>, vector<8x128xf32>
    %cst_17 = arith.constant dense<0.000000e+00> : vector<32x128xf32>
    %26 = tpu.matmul %24, %25, %cst_17 {dimension_numbers = #tpu.dot_dimension_numbers<[1], [0], [0], [1], [0, 0, 1, 1], [], []>} : vector<32x8xf32>, vector<8x128xf32>, vector<32x128xf32> -> vector<32x128xf32>
    %27 = arith.addf %23, %26 : vector<32x128xf32>
    %c0_18 = arith.constant 0 : index
    %28 = memref.load %arg7[%c0_18] : memref<1xf32, #tpu.memory_space<smem>>
    %cst_19 = arith.constant 1.000000e+00 : f32
    %29 = arith.divf %cst_19, %28 : f32
    %30 = vector.broadcast %29 : f32 to vector<32x128xf32>
    %31 = arith.mulf %27, %30 : vector<32x128xf32>
    %c0_20 = arith.constant 0 : index
    %c0_21 = arith.constant 0 : index
    %32 = vector.load %arg8[%c0_20, %c0_21] : memref<32x128xf32, #tpu.memory_space<vmem>>, vector<32x128xf32>
    tpu.vector_store %arg8[%c0_20, %c0_21], %31 {strides = array<i32>} : memref<32x128xf32, #tpu.memory_space<vmem>>, vector<32x128xf32>,
    return
  }
  func.func @transform_0(%arg0: i32) -> (i32, i32, i32) {
    %c0_i32 = arith.constant 0 : i32
    %c0_i32_0 = arith.constant 0 : i32
    %c0_i32_1 = arith.constant 0 : i32
    return %arg0, %c0_i32, %c0_i32_0 : i32, i32, i32
  }
  func.func @transform_1(%arg0: i32) -> (i32, i32) {
    %c0_i32 = arith.constant 0 : i32
    %c0_i32_0 = arith.constant 0 : i32
    return %arg0, %c0_i32 : i32, i32
  }
  func.func @transform_2(%arg0: i32) -> (i32, i32) {
    %c0_i32 = arith.constant 0 : i32
    %c0_i32_0 = arith.constant 0 : i32
    %c0_i32_1 = arith.constant 0 : i32
    return %c0_i32, %c0_i32_0 : i32, i32
  }
  func.func @transform_3(%arg0: i32) -> (i32, i32) {
    %c0_i32 = arith.constant 0 : i32
    %c0_i32_0 = arith.constant 0 : i32
    %c0_i32_1 = arith.constant 0 : i32
    return %c0_i32, %c0_i32_0 : i32, i32
  }
  func.func @transform_4(%arg0: i32) -> (i32, i32) {
    %c0_i32 = arith.constant 0 : i32
    %c0_i32_0 = arith.constant 0 : i32
    %c0_i32_1 = arith.constant 0 : i32
    return %c0_i32, %c0_i32_0 : i32, i32
  }
  func.func @transform_5(%arg0: i32) -> (i32, i32) {
    %c0_i32 = arith.constant 0 : i32
    %c0_i32_0 = arith.constant 0 : i32
    %c0_i32_1 = arith.constant 0 : i32
    return %c0_i32, %c0_i32_0 : i32, i32
  }
  func.func @transform_6(%arg0: i32) -> i32 {
    %c0_i32 = arith.constant 0 : i32
    %c0_i32_0 = arith.constant 0 : i32
    return %c0_i32 : i32
  }
  func.func @transform_7(%arg0: i32) -> (i32, i32) {
    %c0_i32 = arith.constant 0 : i32
    %c0_i32_0 = arith.constant 0 : i32
    return %arg0, %c0_i32 : i32, i32
  }
}

</mosaic_0001>

<bundles_post_ra>
// kernel: tpu_custom_call.1
= control target key start
LH: loop header
LB: loop body
LE: loop exit
PB: predicated region body
PF: predicated region fallthrough
CT: control target
= control target key end

     0   :  { %s5815_s0 = inlined_call_operand.hbm [shape: f32[64,16,128], index: 0, kind: input, shape index: {}]   ;;  %s5816_s1 = inlined_call_operand.vmem [shape: f32[64,8], index: 1, kind: input, shape index: {}]   ;;  %s5817_s2 = inlined_call_operand.vmem [shape: f32[128,128], index: 2, kind: input, shape index: {}]   ;;  %s5818_s3 = inlined_call_operand.vmem [shape: f32[128,1], index: 3, kind: input, shape index: {}]   ;;  %s5819_s4 = inlined_call_operand.hbm [shape: f32[128,128], index: 4, kind: input, shape index: {}]   ;;  %s5820_s5 = inlined_call_operand.vmem [shape: f32[8,128], index: 5, kind: input, shape index: {}]   ;;  %s5821_s6 = inlined_call_operand.<no memory space> [shape: f32[1], index: 6, kind: input, shape index: {}]   ;;  %s5822_s7 = inlined_call_operand.hbm [shape: f32[64,128], index: 7, kind: output, shape index: {}]  }
   0x1   :  { %12 = sst [smem:[#allocation2]] %s5821_s6 }
   0x2   :  { %13 = vsyncpa [#allocation4], 0 }
   0x3   :  { %15 = vsyncpa [#allocation4 + $0x1], 0 }
   0x4   :  { %16 = vsyncpa [#allocation7], 0 }
   0x5   :  { %17 = vsyncpa [#allocation5], 0 }
   0x6   :  { %19 = vsyncpa [#allocation5 + $0x1], 0  ;;  %s4320_s26 = smov 0   ;;  %s4322_s27 = smov 0  }
   0x7   :  { %s4324_s28 = smov 0   ;;  %s4326_s29 = smov 0  }
   0x8 LB: > { %s4341_s6 = sadd.s32 4294967295, %s4267_s29   ;;  %s3138_s30 = sadd.s32 4294967294, %s4267_s29   ;;  %s4267_s29 = sphi %s4326_s29, %s6118_s29   ;;  %s4263_s28 = sphi %s4324_s28, %s6117_s28   ;;  %s4259_s27 = sphi %s4322_s27, %s6116_s27   ;;  %s4255_s26 = sphi %s4320_s26, %s6115_s26  }
   0x9   : > { %p45_p0 = scmp.ne.s32.totalorder %s4259_s27, %s4255_s26  ;;  %p5823_p1 = scmp.eq.s32.totalorder %s4341_s6, 0 }
   0xa   : > { %p206_p3 = scmp.eq.s32.totalorder %s3138_s30, 1  ;;  %p3139_p5 = scmp.ge.s32.totalorder %s4267_s29, 1 }
   0xb   : > { %p4350_p4 = por %p5823_p1, %p45_p0  ;;  %p213_p7 = scmp.lt.s32.totalorder %s4267_s29, 3 }
   0xc   : > { %p4355_p6 = por %p206_p3, %p45_p0  ;;  %s4269_s11 = smov [#allocation6]  }
   0xd   : > { %s5911_s8 = scalar_select %p4350_p4, 1, 0 }
   0xe   : > { %s5912_s9 = scalar_select %p4355_p6, 1, 0 }
   0xf   : > { %p4360_p8 = pnand %p3139_p5, %p213_p7  ;;  %s231_s12 = sshll.u32 %s4269_s11, 4  ;;  %s4364_s12 = int_to_ptr.vmem [resolvable:$true] %s231_s12 }
  0x10   : > { %s4376_s14 = sadd.s32 1, %s4267_s29   ;;  %s32_s15 = sadd.s32 1, %s4263_s28 }
  0x11   : > { %s5913_s10 = scalar_select %p4360_p8, 1, 0 }
  0x12   : > { %p3761_p9 = pneg %p4360_p8  ;;  %s29_s16 = ssub.s32 %s4267_s29, %s4376_s14 }
  0x13   : > { %s4139_s19 = scalar_lea.hbm %s5819_s4, 2048 }
  0x14   : > { %p4371_p11 = pnand %p3761_p9, %p5823_p1  ;;  %p4140_p12 = scmp.ne.s32.totalorder %s5819_s4, %s4139_s19 }
  0x15   : > { %p4146_p5 = scmp.lt.u32.totalorder %s4139_s19, %s5819_s4 }
  0x16   : > { %p4141_p13 = pneg %p4371_p11 }
  0x18   : > { %p4142_p0 = pnand %p4141_p13, %p4140_p12 }
  0x1a   : > { %p4143_p3 = pneg %p4142_p0 }
  0x1c   : > { %p4148_p7 = pnand %p4146_p5, %p4143_p3 }
  0x1e   : > { %4151 = shalt.err (!%p4148_p7)
}
  0x1f   : > { %s4152_s24 = scalar_lea.vmem %s4364_s12, 2048  ;;  %p4160_p2 = scmp.lt.s32.totalorder %s4364_s12, %s4364_s12 }
  0x20   : > { %p4153_p9 = scmp.ne.s32.totalorder %s4364_s12, %s4152_s24  ;;  %p4161_p6 = scmp.lt.s32.totalorder %s4152_s24, %s4152_s24 }
  0x22   : > { %p4155_p10 = pnand %p4153_p9, %p4141_p13  ;;  %p4162_p4 = por %p4161_p6, %p4160_p2 }
  0x24   : > { %p4156_p1 = pneg %p4155_p10 }
  0x26   : > { %p4163_p8 = pnand %p4162_p4, %p4156_p1 }
  0x28   : > { %4166 = shalt.err (!%p4163_p8)
}
  0x29   : > { %s4270_s25 = smov 128   ;;  %s4271_s30 = smov 8  }
  0x2a   : > { %3764 = dma.hbm_to_vmem [thread:$0]  (!%p4371_p11), %s5819_s4, 2048, %s4364_s12, [#allocation7], %s4270_s25, %s4270_s25, %s4271_s30  }
  0x2b   : > { %p30_p1 = scmp.eq.s32.totalorder %s29_s16, 0  ;;  %p39_p2 = scmp.ne.s32.totalorder %s4263_s28, %s4259_s27 }
  0x2c   : > { %p40_p4 = scmp.eq.s32.totalorder %s4267_s29, 0  ;;  %p3774_p6 = scmp.lt.s32.totalorder %s4267_s29, 2 }
  0x2d   : > { %s4410_s18 = scalar_select %p30_p1, %s4263_s28, %s32_s15  }
  0x2e   : > { %p41_p8 = por %p40_p4, %p39_p2  ;;  %p5915_p10 = scmp.eq.s32.totalorder %s4341_s6, 1 }
  0x2f   : > { %s251_s13 = sand.u32 1, %s4263_s28   ;;  %s3162_s20 = sshll.u32 %s4267_s29, 13 }
  0x30   : > { %p4414_p12 = por %p5915_p10, %p39_p2  ;;  %s3142_s21 = sshll.u32 %s251_s13, 9 }
  0x31   : > { %s4423_s24 = scalar_lea.hbm %s5815_s0, %s3162_s20  ;;  %s255_s12 = scalar_lea.vmem [#allocation3], %s3142_s21 }
  0x32   : > { %s263_s15 = sshll.u32 %s255_s12, 4  ;;  %p4425_p11 = pnand %p3774_p6, %p41_p8  ;;  %s4429_s15 = int_to_ptr.vmem [resolvable:$true] %s263_s15 }
  0x33   : > { %s4431_s11 = scalar_lea.sflag [#allocation4], %s251_s13  ;;  %s4167_s17 = scalar_lea.hbm %s4423_s24, 8192 }
  0x34   : > { %p4168_p13 = scmp.ne.s32.totalorder %s4423_s24, %s4167_s17  ;;  %p4169_p0 = pneg %p4425_p11 }
  0x35   : > { %s4172_s22 = scalar_lea.hbm %s5815_s0, 16384  ;;  %p4173_p7 = scmp.lt.u32.totalorder %s4423_s24, %s5815_s0 }
  0x36   : > { %p4170_p3 = pnand %p4169_p0, %p4168_p13  ;;  %p4174_p9 = scmp.lt.u32.totalorder %s4172_s22, %s4167_s17 }
  0x37   : > { %p4176_p2 = scmp.lt.u32.totalorder %s4167_s17, %s4423_s24 }
  0x38   : > { %p4171_p5 = pneg %p4170_p3  ;;  %p4175_p1 = por %p4174_p9, %p4173_p7 }
  0x3a   : > { %p4177_p4 = por %p4176_p2, %p4175_p1 }
  0x3c   : > { %p4178_p6 = pnand %p4177_p4, %p4171_p5 }
  0x3e   : > { %4181 = shalt.err (!%p4178_p6)
}
  0x3f   : > { %s4182_s13 = scalar_lea.vmem %s4429_s15, 8192  ;;  %s4272_s20 = smov [#allocation3]  }
  0x40   : > { %p4183_p8 = scmp.ne.s32.totalorder %s4429_s15, %s4182_s13  ;;  %s4187_s21 = sshll.u32 %s4272_s20, 4  ;;  %s4188_s21 = int_to_ptr.vmem [resolvable:$false] %s4187_s21 }
  0x41   : > { %s4189_s23 = scalar_lea.vmem %s4188_s21, 16384  ;;  %p4190_p3 = scmp.lt.s32.totalorder %s4429_s15, %s4188_s21 }
  0x42   : > { %p4185_p10 = pnand %p4183_p8, %p4169_p0  ;;  %p4191_p7 = scmp.lt.s32.totalorder %s4189_s23, %s4182_s13 }
  0x44   : > { %p4186_p13 = pneg %p4185_p10  ;;  %p4192_p9 = por %p4191_p7, %p4190_p3 }
  0x46   : > { %p4193_p1 = pnand %p4192_p9, %p4186_p13 }
  0x48   : > { %4196 = shalt.err (!%p4193_p1)
}
  0x49   : > { %3768 = dma.hbm_to_vmem [thread:$0]  (!%p4425_p11), %s4423_s24, 8192, %s4429_s15, %s4431_s11, %s4270_s25, %s4270_s25, %s4271_s30  }
  0x4a   : > { %p5918_p0 = scmp.ne.s32.totalorder %s5913_s10, 0 }
  0x4c   : > { %284 = sbr.rel (%p5918_p0) target bundleno = 1208 (0x4b8), region = 48 }
  0x53   : > { %s4465_s17 = sand.u32 1, %s4259_s27   ;;  %p5919_p5 = scmp.ne.s32.totalorder %s5911_s8, 0 }
  0x54   : > { %s3147_s22 = sshll.u32 %s4465_s17, 9  ;;  %s287_s12 = scalar_lea.sflag [#allocation4], %s4465_s17 }
  0x55   : > { %s4469_s13 = scalar_lea.vmem [#allocation3], %s3147_s22 }
  0x56   : > { %4242 = dma.done.wait (%p5919_p5), %s287_s12, 8192  }
  0x57   : > { %4244 = vsyncadd (%p5919_p5), %s287_s12, 4294959104  ;;  %p5920_p11 = scmp.eq.s32.totalorder %s4341_s6, 0 }
  0x59   : > { %4246 = dma.done.wait (%p5920_p11), [#allocation7], 2048   ;;  %p5921_p2 = pmov %p5920_p11 }
  0x5a   : > { %v402_v0 = vld [vmem:[%s5817_s2] sm:$0xff]  ;;  %v403_v1 = vld [vmem:[%s5817_s2 + $0x8] sm:$0xff]  ;;  %v404_v2 = vld [vmem:[%s5817_s2 + $0x10] sm:$0xff]  ;;  %vm1268_vm0 = vcmask 7168   ;;  %s3150_s10 = sshll.u32 %s4341_s6, 2  ;;  %vm2762_vm1 = vcmask 64512  }
  0x5b   : > { %4248 = vsyncadd (%p5921_p2), [#allocation7], 4294965248  ;;  %v3651_v3 = vpack.c.bf16 %v403_v1, %v402_v0  ;;  %v405_v4 = vld [vmem:[%s5817_s2 + $0x18] sm:$0xff]  ;;  %v406_v6 = vld [vmem:[%s5817_s2 + $0x20] sm:$0xff]  ;;  %p5591_p4 = scmp.lt.s32.totalorder %s3150_s10, 7  ;;  %vm2892_vm2 = vcmask 1041409  }
  0x5c   : > { %v3655_v5 = vpack.c.bf16 %v405_v4, %v404_v2  ;;  %v407_v7 = vld [vmem:[%s5817_s2 + $0x28] sm:$0xff]  ;;  %v338_v9 = vld [vmem:[%s4469_s13] sm:$0xff]  ;;  %v408_v10 = vld [vmem:[%s5817_s2 + $0x30] sm:$0xff]  ;;  %vm2894_vm3 = vcmask 1042434   ;;  %vm2896_vm4 = vcmask 1043459   ;;  %vm2898_vm5 = vcmask 1044484  }
  0x5d   : > { %3652 = vmatprep.subr.bf16.mxu0 %v3651_v3  ;;  %v3659_v8 = vpack.c.bf16 %v407_v7, %v406_v6  ;;  %v409_v11 = vld [vmem:[%s5817_s2 + $0x38] sm:$0xff]  ;;  %3381 = vmatprep.mubr.f32.mxu0 %v338_v9  ;;  %v410_v13 = vld [vmem:[%s5817_s2 + $0x40] sm:$0xff]  ;;  %v411_v14 = vld [vmem:[%s5817_s2 + $0x48] sm:$0xff]  ;;  %s6120_s10 = smov (!%p5591_p4, %s3150_s10), 7  ;;  %vm2900_vm6 = vcmask 1045509   ;;  %vm2902_vm7 = vcmask 1046534  }
  0x5e   : > { %3654 = vmatpush3.bf16.msra.mxu0 %v3651_v3  ;;  %v3663_v12 = vpack.c.bf16 %v409_v11, %v408_v10  ;;  %v3667_v15 = vpack.c.bf16 %v411_v14, %v410_v13  ;;  %v412_v16 = vld [vmem:[%s5817_s2 + $0x50] sm:$0xff]  ;;  %v413_v17 = vld [vmem:[%s5817_s2 + $0x58] sm:$0xff]  ;;  %v414_v19 = vld [vmem:[%s5817_s2 + $0x60] sm:$0xff]  ;;  %s3151_s30 = sshll.u32 %s6120_s10, 3  ;;  %vm2904_vm8 = vcmask 1047559   ;;  %s3016_s8 = sld [smem:[#allocation2]] }
  0x5f   : > { %3656 = vmatprep.subr.bf16.mxu0 %v3655_v5  ;;  %v3671_v18 = vpack.c.bf16 %v413_v17, %v412_v16  ;;  %v415_v20 = vld [vmem:[%s5817_s2 + $0x68] sm:$0xff]  ;;  %v416_v22 = vld [vmem:[%s5817_s2 + $0x70] sm:$0xff]  ;;  %v417_v23 = vld [vmem:[%s5817_s2 + $0x78] sm:$0xff]  ;;  %s5627_s16 = scalar_lea.vmem %s5816_s1, %s3151_s30  ;;  %s3149_s20 = sshll.u32 %s4465_s17, 5 }
  0x60   : > { %v3675_v21 = vpack.c.bf16 %v415_v20, %v414_v19  ;;  %v3679_v24 = vpack.c.bf16 %v417_v23, %v416_v22  ;;  %v867_v25 = vld [vmem:[%s5818_s3] sm:$0xff]  ;;  %v868_v26 = vld [vmem:[%s5818_s3 + $0x8] sm:$0xff]  ;;  %v869_v27 = vld [vmem:[%s5818_s3 + $0x10] sm:$0xff]  ;;  %s329_s21 = scalar_lea.vmem [#allocation8], %s3149_s20  ;;  %s3163_s22 = sshll.u32 %s4341_s6, 9 }
  0x61   : > { %v339_v28 = vld [vmem:[%s4469_s13 + $0x8] sm:$0xff]  ;;  %v3683_v29 = vpack.c.bf16 %v868_v26, %v867_v25  ;;  %v870_v30 = vld [vmem:[%s5818_s3 + $0x18] sm:$0xff]  ;;  %v340_v31 = vld [vmem:[%s4469_s13 + $0x10] sm:$0xff]  ;;  %s3043_s23 = sshll.u32 %s329_s21, 4  ;;  %s5771_s10 = scalar_lea.hbm %s5822_s7, %s3163_s22  ;;  %s5766_s23 = int_to_ptr.vmem [resolvable:$true] %s3043_s23 }
  0x62   : > { %3658 = vmatpush3.bf16.msra.mxu0 %v3655_v5  ;;  %v3687_v32 = vpack.c.bf16 %v870_v30, %v869_v27  ;;  %v871_v33 = vld [vmem:[%s5818_s3 + $0x20] sm:$0xff]  ;;  %v872_v34 = vld [vmem:[%s5818_s3 + $0x28] sm:$0xff]  ;;  %v341_v35 = vld [vmem:[%s4469_s13 + $0x18] sm:$0xff]  ;;  %s3030_s25 = scalar_lea.sflag [#allocation5], %s4465_s17  ;;  %s4197_s30 = scalar_lea.vmem %s5766_s23, 512 }
  0x63   : > { %3660 = vmatprep.subr.bf16.mxu0 %v3659_v8  ;;  %3684 = vmatprep.subr.bf16.mxu1 %v3683_v29  ;;  %v3691_v36 = vpack.c.bf16 %v872_v34, %v871_v33  ;;  %v342_v37 = vld [vmem:[%s4469_s13 + $0x20] sm:$0xff]  ;;  %v873_v38 = vld [vmem:[%s5818_s3 + $0x30] sm:$0xff]  ;;  %v874_v39 = vld [vmem:[%s5818_s3 + $0x38] sm:$0xff]  ;;  %p4198_p6 = scmp.ne.s32.totalorder %s5766_s23, %s4197_s30  ;;  %s4274_s6 = smov [#allocation8]  }
  0x64   : > { %3686 = vmatpush3.bf16.msra.mxu1 %v3683_v29  ;;  %v343_v40 = vld [vmem:[%s4469_s13 + $0x28] sm:$0xff]  ;;  %v3695_v41 = vpack.c.bf16 %v874_v39, %v873_v38  ;;  %v344_v42 = vld [vmem:[%s4469_s13 + $0x30] sm:$0xff]  ;;  %v875_v43 = vld [vmem:[%s5818_s3 + $0x40] sm:$0xff]  ;;  %s4201_s24 = sshll.u32 %s4274_s6, 4  ;;  %s4202_s24 = int_to_ptr.vmem [resolvable:$false] %s4201_s24 }
  0x65   : > { %3688 = vmatprep.subr.bf16.mxu1 %v3687_v32  ;;  %v876_v44 = vld [vmem:[%s5818_s3 + $0x48] sm:$0xff]  ;;  %v345_v45 = vld [vmem:[%s4469_s13 + $0x38] sm:$0xff]  ;;  %v346_v47 = vld [vmem:[%s4469_s13 + $0x40] sm:$0xff]  ;;  %p4199_p8 = pnand %p4198_p6, %p4414_p12  ;;  %s4203_s15 = scalar_lea.vmem %s4202_s24, 1024 }
  0x66   : > { %3662 = vmatpush3.bf16.msra.mxu0 %v3659_v8  ;;  %v3699_v46 = vpack.c.bf16 %v876_v44, %v875_v43  ;;  %v347_v48 = vld [vmem:[%s4469_s13 + $0x48] sm:$0xff]  ;;  %v348_v49 = vld [vmem:[%s4469_s13 + $0x50] sm:$0xff]  ;;  %v349_v50 = vld [vmem:[%s4469_s13 + $0x58] sm:$0xff]  ;;  %p4204_p13 = scmp.lt.s32.totalorder %s5766_s23, %s4202_s24  ;;  %p4205_p3 = scmp.lt.s32.totalorder %s4203_s15, %s4197_s30 }
  0x67   : > { %3664 = vmatprep.subr.bf16.mxu0 %v3663_v12  ;;  %v350_v51 = vld [vmem:[%s4469_s13 + $0x60] sm:$0xff]  ;;  %v351_v52 = vld [vmem:[%s4469_s13 + $0x68] sm:$0xff]  ;;  %v352_v53 = vld [vmem:[%s4469_s13 + $0x70] sm:$0xff]  ;;  %p4200_p10 = pneg %p4199_p8 }
  0x68   : > { %3690 = vmatpush3.bf16.msra.mxu1 %v3687_v32  ;;  %v353_v54 = vld [vmem:[%s4469_s13 + $0x78] sm:$0xff]  ;;  %v354_v55 = vld [vmem:[%s4469_s13 + $0x80] sm:$0xff]  ;;  %v355_v56 = vld [vmem:[%s4469_s13 + $0x88] sm:$0xff]  ;;  %p4206_p7 = por %p4205_p3, %p4204_p13 }
  0x69   : > { %3692 = vmatprep.subr.bf16.mxu1 %v3691_v36  ;;  %v356_v57 = vld [vmem:[%s4469_s13 + $0x90] sm:$0xff]  ;;  %v357_v58 = vld [vmem:[%s4469_s13 + $0x98] sm:$0xff]  ;;  %v358_v59 = vld [vmem:[%s4469_s13 + $0xa0] sm:$0xff] }
  0x6a   : > { %3666 = vmatpush3.bf16.msra.mxu0 %v3663_v12  ;;  %v359_v60 = vld [vmem:[%s4469_s13 + $0xa8] sm:$0xff]  ;;  %v360_v61 = vld [vmem:[%s4469_s13 + $0xb0] sm:$0xff]  ;;  %v361_v62 = vld [vmem:[%s4469_s13 + $0xb8] sm:$0xff]  ;;  %p4207_p9 = pnand %p4206_p7, %p4200_p10 }
  0x6b   : > { %3668 = vmatprep.subr.bf16.mxu0 %v3667_v15  ;;  %v362_v63 = vld [vmem:[%s4469_s13 + $0xc0] sm:$0xff]  ;;  %v363_v0 = vld [vmem:[%s4469_s13 + $0xc8] sm:$0xff]  ;;  %v364_v1 = vld [vmem:[%s4469_s13 + $0xd0] sm:$0xff] }
  0x6c   : > { %3694 = vmatpush3.bf16.msra.mxu1 %v3691_v36  ;;  %v365_v2 = vld [vmem:[%s4469_s13 + $0xd8] sm:$0xff]  ;;  %v366_v3 = vld [vmem:[%s4469_s13 + $0xe0] sm:$0xff]  ;;  %v367_v4 = vld [vmem:[%s4469_s13 + $0xe8] sm:$0xff] }
  0x6d   : > { %3696 = vmatprep.subr.bf16.mxu1 %v3695_v41  ;;  %v368_v5 = vld [vmem:[%s4469_s13 + $0xf0] sm:$0xff]  ;;  %v369_v6 = vld [vmem:[%s4469_s13 + $0xf8] sm:$0xff]  ;;  %v370_v7 = vld [vmem:[%s4469_s13 + $0x100] sm:$0xff] }
  0x6e   : > { %3670 = vmatpush3.bf16.msra.mxu0 %v3667_v15  ;;  %v371_v8 = vld [vmem:[%s4469_s13 + $0x108] sm:$0xff]  ;;  %v372_v9 = vld [vmem:[%s4469_s13 + $0x110] sm:$0xff]  ;;  %v373_v10 = vld [vmem:[%s4469_s13 + $0x118] sm:$0xff] }
  0x6f   : > { %3672 = vmatprep.subr.bf16.mxu0 %v3671_v18  ;;  %v374_v11 = vld [vmem:[%s4469_s13 + $0x120] sm:$0xff]  ;;  %v375_v12 = vld [vmem:[%s4469_s13 + $0x128] sm:$0xff]  ;;  %v376_v13 = vld [vmem:[%s4469_s13 + $0x130] sm:$0xff] }
  0x70   : > { %3698 = vmatpush3.bf16.msra.mxu1 %v3695_v41  ;;  %v377_v14 = vld [vmem:[%s4469_s13 + $0x138] sm:$0xff]  ;;  %v378_v15 = vld [vmem:[%s4469_s13 + $0x140] sm:$0xff]  ;;  %v379_v16 = vld [vmem:[%s4469_s13 + $0x148] sm:$0xff] }
  0x71   : > { %3700 = vmatprep.subr.bf16.mxu1 %v3699_v46  ;;  %v380_v17 = vld [vmem:[%s4469_s13 + $0x150] sm:$0xff]  ;;  %v382_v19 = vld [vmem:[%s4469_s13 + $0x160] sm:$0xff]  ;;  %v383_v23 = vld [vmem:[%s4469_s13 + $0x168] sm:$0xff] }
  0x72   : > { %3674 = vmatpush3.bf16.msra.mxu0 %v3671_v18  ;;  %v381_v18 = vld [vmem:[%s4469_s13 + $0x158] sm:$0xff]  ;;  %v877_v20 = vld [vmem:[%s5818_s3 + $0x50] sm:$0xff]  ;;  %v879_v25 = vld [vmem:[%s5818_s3 + $0x60] sm:$0xff] }
  0x73   : > { %3676 = vmatprep.subr.bf16.mxu0 %v3675_v21  ;;  %v880_v26 = vld [vmem:[%s5818_s3 + $0x68] sm:$0xff]  ;;  %v386_v29 = vld [vmem:[%s4469_s13 + $0x180] sm:$0xff]  ;;  %v881_v30 = vld [vmem:[%s5818_s3 + $0x70] sm:$0xff] }
  0x74   : > { %3702 = vmatpush3.bf16.msra.mxu1 %v3699_v46  ;;  %v3707_v27 = vpack.c.bf16 %v880_v26, %v879_v25  ;;  %v387_v33 = vld [vmem:[%s4469_s13 + $0x188] sm:$0xff]  ;;  %v388_v34 = vld [vmem:[%s4469_s13 + $0x190] sm:$0xff]  ;;  %v390_v36 = vld [vmem:[%s4469_s13 + $0x1a0] sm:$0xff] }
  0x75   : > { %v392_v38 = vld [vmem:[%s4469_s13 + $0x1b0] sm:$0xff]  ;;  %v393_v39 = vld [vmem:[%s4469_s13 + $0x1b8] sm:$0xff]  ;;  %v395_v41 = vld [vmem:[%s4469_s13 + $0x1c8] sm:$0xff] }
  0x76   : > { %3678 = vmatpush3.bf16.msra.mxu0 %v3675_v21  ;;  %v878_v21 = vld [vmem:[%s5818_s3 + $0x58] sm:$0xff]  ;;  %v398_v44 = vld [vmem:[%s4469_s13 + $0x1e0] sm:$0xff]  ;;  %v400_v46 = vld [vmem:[%s4469_s13 + $0x1f0] sm:$0xff] }
  0x77   : > { %3680 = vmatprep.subr.bf16.mxu0 %v3679_v24  ;;  %v3703_v22 = vpack.c.bf16 %v878_v21, %v877_v20  ;;  %v397_v43 = vld [vmem:[%s4469_s13 + $0x1d8] sm:$0xff] }
  0x79   : > { %3704 = vmatprep.subr.bf16.mxu1 %v3703_v22 }
  0x7a   : > { %3682 = vmatpush3.bf16.msra.mxu0 %v3679_v24  ;;  %v384_v24 = vld [vmem:[%s4469_s13 + $0x170] sm:$0xff]  ;;  %3706 = vmatpush3.bf16.msra.mxu1 %v3703_v22 }
  0x7b   : > { %3708 = vmatprep.subr.bf16.mxu1 %v3707_v27 }
  0x7d   : > { %3382 = vmatmul.mubr.f32.vlgmr.msra.gmra.mrb[0].mxu0 %v339_v28  ;;  %v385_v28 = vld [vmem:[%s4469_s13 + $0x178] sm:$0xff] }
  0x7e   : > { %3384 = vmatprep.mubr.f32.mxu0 %v340_v31  ;;  %3710 = vmatpush3.bf16.msra.mxu1 %v3707_v27  ;;  %v882_v31 = vld [vmem:[%s5818_s3 + $0x78] sm:$0xff] }
  0x7f   : > { %v3711_v32 = vpack.c.bf16 %v882_v31, %v881_v30 }
  0x81   : > { %3385 = vmatmul.mubr.f32.gmra.mrb[2].mxu0 %v341_v35  ;;  %3712 = vmatprep.subr.bf16.mxu1 %v3711_v32  ;;  %v389_v35 = vld [vmem:[%s4469_s13 + $0x198] sm:$0xff] }
  0x82   : > { %3387 = vmatprep.mubr.f32.mxu0 %v342_v37  ;;  %3714 = vmatpush3.bf16.msra.mxu1 %v3711_v32  ;;  %v391_v37 = vld [vmem:[%s4469_s13 + $0x1a8] sm:$0xff] }
  0x85   : > { %3388 = vmatmul.mubr.f32.gmra.mrb[4].mxu0 %v343_v40  ;;  %v394_v40 = vld [vmem:[%s4469_s13 + $0x1c0] sm:$0xff] }
  0x86   : > { %3390 = vmatprep.mubr.f32.mxu0 %v344_v42  ;;  %v396_v42 = vld [vmem:[%s4469_s13 + $0x1d0] sm:$0xff] }
  0x89   : > { %3391 = vmatmul.mubr.f32.gmra.mrb[6].mxu0 %v345_v45  ;;  %v399_v45 = vld [vmem:[%s4469_s13 + $0x1e8] sm:$0xff] }
  0x8a   : > { %3393 = vmatprep.mubr.f32.mxu0 %v346_v47  ;;  %v401_v47 = vld [vmem:[%s4469_s13 + $0x1f8] sm:$0xff] }
  0x8d   : > { %3394 = vmatmul.mubr.f32.gmra.mrb[8].mxu0 %v347_v48 }
  0x8e   : > { %3396 = vmatprep.mubr.f32.mxu0 %v348_v49 }
  0x91   : > { %3397 = vmatmul.mubr.f32.gmra.mrb[10].mxu0 %v349_v50 }
  0x92   : > { %3399 = vmatprep.mubr.f32.mxu0 %v350_v51 }
  0x95   : > { %3400 = vmatmul.mubr.f32.gmra.mrb[12].mxu0 %v351_v52 }
  0x96   : > { %3402 = vmatprep.mubr.f32.mxu0 %v352_v53 }
  0x99   : > { %3403 = vmatmul.mubr.f32.gmra.mrb[14].mxu0 %v353_v54 }
  0x9a   : > { %3405 = vmatprep.mubr.f32.mxu0 %v354_v55 }
  0x9d   : > { %3406 = vmatmul.mubr.f32.gmra.mrb[16].mxu0 %v355_v56 }
  0x9e   : > { %3408 = vmatprep.mubr.f32.mxu0 %v356_v57 }
  0xa1   : > { %3409 = vmatmul.mubr.f32.gmra.mrb[18].mxu0 %v357_v58 }
  0xa2   : > { %3411 = vmatprep.mubr.f32.mxu0 %v358_v59 }
  0xa5   : > { %3412 = vmatmul.mubr.f32.gmra.mrb[20].mxu0 %v359_v60 }
  0xa6   : > { %3414 = vmatprep.mubr.f32.mxu0 %v360_v61 }
  0xa9   : > { %3415 = vmatmul.mubr.f32.gmra.mrb[22].mxu0 %v361_v62 }
  0xaa   : > { %3417 = vmatprep.mubr.f32.mxu0 %v362_v63 }
  0xad   : > { %3418 = vmatmul.mubr.f32.gmra.mrb[24].mxu0 %v363_v0 }
  0xae   : > { %3420 = vmatprep.mubr.f32.mxu0 %v364_v1 }
  0xb1   : > { %3421 = vmatmul.mubr.f32.gmra.mrb[26].mxu0 %v365_v2 }
  0xb2   : > { %3423 = vmatprep.mubr.f32.mxu0 %v366_v3 }
  0xb5   : > { %3424 = vmatmul.mubr.f32.gmra.mrb[28].mxu0 %v367_v4 }
  0xb6   : > { %3426 = vmatprep.mubr.f32.mxu0 %v368_v5 }
  0xb9   : > { %3427 = vmatmul.mubr.f32.gmra.mrb[30].mxu0 %v369_v6 }
  0xba   : > { %3429 = vmatprep.mubr.f32.mxu0 %v370_v7 }
  0xbd   : > { %3430 = vmatmul.mubr.f32.gmra.mrb[32].mxu0 %v371_v8 }
  0xbe   : > { %3432 = vmatprep.mubr.f32.mxu0 %v372_v9 }
  0xc1   : > { %3433 = vmatmul.mubr.f32.gmra.mrb[34].mxu0 %v373_v10 }
  0xc2   : > { %3435 = vmatprep.mubr.f32.mxu0 %v374_v11 }
  0xc5   : > { %3436 = vmatmul.mubr.f32.gmra.mrb[36].mxu0 %v375_v12 }
  0xc6   : > { %3438 = vmatprep.mubr.f32.mxu0 %v376_v13 }
  0xc9   : > { %3439 = vmatmul.mubr.f32.gmra.mrb[38].mxu0 %v377_v14 }
  0xca   : > { %3441 = vmatprep.mubr.f32.mxu0 %v378_v15 }
  0xcd   : > { %3442 = vmatmul.mubr.f32.gmra.mrb[40].mxu0 %v379_v16 }
  0xce   : > { %3444 = vmatprep.mubr.f32.mxu0 %v380_v17 }
  0xd1   : > { %3445 = vmatmul.mubr.f32.gmra.mrb[42].mxu0 %v381_v18 }
  0xd2   : > { %3447 = vmatprep.mubr.f32.mxu0 %v382_v19 }
  0xd5   : > { %3448 = vmatmul.mubr.f32.gmra.mrb[44].mxu0 %v383_v23 }
  0xd6   : > { %3450 = vmatprep.mubr.f32.mxu0 %v384_v24 }
  0xd9   : > { %3451 = vmatmul.mubr.f32.gmra.mrb[46].mxu0 %v385_v28 }
  0xda   : > { %3453 = vmatprep.mubr.f32.mxu0 %v386_v29 }
  0xdd   : > { %3454 = vmatmul.mubr.f32.gmra.mrb[48].mxu0 %v387_v33 }
  0xde   : > { %3456 = vmatprep.mubr.f32.mxu0 %v388_v34 }
  0xe1   : > { %3457 = vmatmul.mubr.f32.gmra.mrb[50].mxu0 %v389_v35 }
  0xe2   : > { %3459 = vmatprep.mubr.f32.mxu0 %v390_v36 }
  0xe5   : > { %3460 = vmatmul.mubr.f32.gmra.mrb[52].mxu0 %v391_v37 }
  0xe6   : > { %3462 = vmatprep.mubr.f32.mxu0 %v392_v38 }
  0xe9   : > { %3463 = vmatmul.mubr.f32.gmra.mrb[54].mxu0 %v393_v39 }
  0xea   : > { %3465 = vmatprep.mubr.f32.mxu0 %v394_v40 }
  0xed   : > { %3466 = vmatmul.mubr.f32.gmra.mrb[56].mxu0 %v395_v41 }
  0xee   : > { %3468 = vmatprep.mubr.f32.mxu0 %v396_v42 }
  0xf1   : > { %3469 = vmatmul.mubr.f32.gmra.mrb[58].mxu0 %v397_v43 }
  0xf2   : > { %3471 = vmatprep.mubr.f32.mxu0 %v398_v44 }
  0xf5   : > { %3472 = vmatmul.mubr.f32.gmra.mrb[60].mxu0 %v399_v45 }
  0xf6   : > { %3474 = vmatprep.mubr.f32.mxu0 %v400_v46 }
  0xf9   : > { %3475 = vmatmul.mubr.f32.gmra.mrb[62].mxu0 %v401_v47 }
 0x150   : > { %v3383_v48 = vpop.f32.mrb[0].mxu0 }
 0x151   : > { %v484_v49 = vpop.f32.mrb[1].mxu0 }
 0x152   : > { %3817 = vtanh.f32 %v484_v49 }
 0x153   : > { %3819 = vtanh.f32 %v3383_v48 }
 0x154   : > { %v3386_v50 = vpop.f32.mrb[2].mxu0 }
 0x155   : > { %v494_v51 = vpop.f32.mrb[3].mxu0 }
 0x156   : > { %3821 = vtanh.f32 %v494_v51 }
 0x157   : > { %3823 = vtanh.f32 %v3386_v50 }
 0x158   : > { %v3389_v52 = vpop.f32.mrb[4].mxu0 }
 0x159   : > { %3825 = vtanh.f32 %v3389_v52  ;;  %v504_v53 = vpop.f32.mrb[5].mxu0 }
 0x15a   : > { %3827 = vtanh.f32 %v504_v53 }
 0x15c   : > { %v4639_v54 = vpop.eup %3817  ;;  %v3392_v55 = vpop.f32.mrb[6].mxu0 }
 0x15d   : > { %5922 = vst [vmem:[#allocation12_spill] sm:$0xff] %v4639_v54  ;;  %v4641_v56 = vpop.eup %3819  ;;  %3829 = vtanh.f32 %v3392_v55  ;;  %v514_v57 = vpop.f32.mrb[7].mxu0  ;;  %3509 = vmatprep.mubr.f32.mxu1 %v4639_v54 }
 0x15e   : > { %5923 = vst [vmem:[#allocation13_spill] sm:$0xff] %v4641_v56  ;;  %3831 = vtanh.f32 %v514_v57  ;;  %3510 = vmatmul.mubr.f32.vlgmr.msra.gmra.mrb[0].mxu1 %v4641_v56 }
 0x160   : > { %v4645_v58 = vpop.eup %3821  ;;  %v3395_v59 = vpop.f32.mrb[8].mxu0 }
 0x161   : > { %5924 = vst [vmem:[#allocation14_spill] sm:$0xff] %v4645_v58  ;;  %v4647_v60 = vpop.eup %3823  ;;  %3833 = vtanh.f32 %v3395_v59  ;;  %v524_v61 = vpop.f32.mrb[9].mxu0  ;;  %3512 = vmatprep.mubr.f32.mxu1 %v4645_v58 }
 0x162   : > { %5925 = vst [vmem:[#allocation15_spill] sm:$0xff] %v4647_v60  ;;  %3835 = vtanh.f32 %v524_v61  ;;  %3513 = vmatmul.mubr.f32.gmra.mrb[2].mxu1 %v4647_v60 }
 0x163   : > { %v4651_v62 = vpop.eup %3825 }
 0x164   : > { %5926 = vst [vmem:[#allocation16_spill] sm:$0xff] %v4651_v62  ;;  %v4653_v63 = vpop.eup %3827  ;;  %v3398_v0 = vpop.f32.mrb[10].mxu0 }
 0x165   : > { %5927 = vst [vmem:[#allocation17_spill] sm:$0xff] %v4653_v63  ;;  %3837 = vtanh.f32 %v3398_v0  ;;  %v534_v1 = vpop.f32.mrb[11].mxu0  ;;  %3515 = vmatprep.mubr.f32.mxu1 %v4653_v63 }
 0x166   : > { %3839 = vtanh.f32 %v534_v1  ;;  %3516 = vmatmul.mubr.f32.gmra.mrb[4].mxu1 %v4651_v62 }
 0x167   : > { %v4657_v2 = vpop.eup %3829 }
 0x168   : > { %5928 = vst [vmem:[#allocation18_spill] sm:$0xff] %v4657_v2  ;;  %v4659_v3 = vpop.eup %3831  ;;  %v3401_v4 = vpop.f32.mrb[12].mxu0 }
 0x169   : > { %5929 = vst [vmem:[#allocation19_spill] sm:$0xff] %v4659_v3  ;;  %3841 = vtanh.f32 %v3401_v4  ;;  %v544_v5 = vpop.f32.mrb[13].mxu0  ;;  %3518 = vmatprep.mubr.f32.mxu1 %v4659_v3 }
 0x16a   : > { %3843 = vtanh.f32 %v544_v5  ;;  %3519 = vmatmul.mubr.f32.gmra.mrb[6].mxu1 %v4657_v2 }
 0x16b   : > { %v4663_v6 = vpop.eup %3833 }
 0x16c   : > { %5930 = vst [vmem:[#allocation20_spill] sm:$0xff] %v4663_v6  ;;  %v4665_v7 = vpop.eup %3835  ;;  %v3404_v8 = vpop.f32.mrb[14].mxu0 }
 0x16d   : > { %5931 = vst [vmem:[#allocation21_spill] sm:$0xff] %v4665_v7  ;;  %3845 = vtanh.f32 %v3404_v8  ;;  %v554_v9 = vpop.f32.mrb[15].mxu0  ;;  %3521 = vmatprep.mubr.f32.mxu1 %v4665_v7 }
 0x16e   : > { %3847 = vtanh.f32 %v554_v9  ;;  %3522 = vmatmul.mubr.f32.gmra.mrb[8].mxu1 %v4663_v6 }
 0x16f   : > { %v4669_v10 = vpop.eup %3837 }
 0x170   : > { %5932 = vst [vmem:[#allocation22_spill] sm:$0xff] %v4669_v10  ;;  %v4671_v11 = vpop.eup %3839  ;;  %v3407_v12 = vpop.f32.mrb[16].mxu0 }
 0x171   : > { %5933 = vst [vmem:[#allocation23_spill] sm:$0xff] %v4671_v11  ;;  %3849 = vtanh.f32 %v3407_v12  ;;  %v564_v13 = vpop.f32.mrb[17].mxu0  ;;  %3524 = vmatprep.mubr.f32.mxu1 %v4671_v11 }
 0x172   : > { %3851 = vtanh.f32 %v564_v13  ;;  %3525 = vmatmul.mubr.f32.gmra.mrb[10].mxu1 %v4669_v10 }
 0x173   : > { %v4675_v14 = vpop.eup %3841 }
 0x174   : > { %5934 = vst [vmem:[#allocation24_spill] sm:$0xff] %v4675_v14  ;;  %v4677_v15 = vpop.eup %3843  ;;  %v3410_v16 = vpop.f32.mrb[18].mxu0 }
 0x175   : > { %5935 = vst [vmem:[#allocation25_spill] sm:$0xff] %v4677_v15  ;;  %3853 = vtanh.f32 %v3410_v16  ;;  %v574_v17 = vpop.f32.mrb[19].mxu0  ;;  %3527 = vmatprep.mubr.f32.mxu1 %v4677_v15 }
 0x176   : > { %3855 = vtanh.f32 %v574_v17  ;;  %3528 = vmatmul.mubr.f32.gmra.mrb[12].mxu1 %v4675_v14 }
 0x177   : > { %v4681_v18 = vpop.eup %3845 }
 0x178   : > { %5936 = vst [vmem:[#allocation26_spill] sm:$0xff] %v4681_v18  ;;  %v4683_v19 = vpop.eup %3847  ;;  %v3413_v20 = vpop.f32.mrb[20].mxu0 }
 0x179   : > { %5937 = vst [vmem:[#allocation27_spill] sm:$0xff] %v4683_v19  ;;  %3857 = vtanh.f32 %v3413_v20  ;;  %v584_v21 = vpop.f32.mrb[21].mxu0  ;;  %3530 = vmatprep.mubr.f32.mxu1 %v4683_v19 }
 0x17a   : > { %3859 = vtanh.f32 %v584_v21  ;;  %3531 = vmatmul.mubr.f32.gmra.mrb[14].mxu1 %v4681_v18 }
 0x17b   : > { %v4687_v22 = vpop.eup %3849 }
 0x17c   : > { %5938 = vst [vmem:[#allocation28_spill] sm:$0xff] %v4687_v22  ;;  %v4689_v23 = vpop.eup %3851  ;;  %v3416_v24 = vpop.f32.mrb[22].mxu0 }
 0x17d   : > { %5939 = vst [vmem:[#allocation29_spill] sm:$0xff] %v4689_v23  ;;  %3861 = vtanh.f32 %v3416_v24  ;;  %v594_v25 = vpop.f32.mrb[23].mxu0  ;;  %3533 = vmatprep.mubr.f32.mxu1 %v4689_v23 }
 0x17e   : > { %3863 = vtanh.f32 %v594_v25  ;;  %3534 = vmatmul.mubr.f32.gmra.mrb[16].mxu1 %v4687_v22 }
 0x17f   : > { %v4693_v26 = vpop.eup %3853 }
 0x180   : > { %5940 = vst [vmem:[#allocation30_spill] sm:$0xff] %v4693_v26  ;;  %v4695_v27 = vpop.eup %3855  ;;  %v3419_v28 = vpop.f32.mrb[24].mxu0 }
 0x181   : > { %5941 = vst [vmem:[#allocation31_spill] sm:$0xff] %v4695_v27  ;;  %3865 = vtanh.f32 %v3419_v28  ;;  %v604_v29 = vpop.f32.mrb[25].mxu0  ;;  %3536 = vmatprep.mubr.f32.mxu1 %v4695_v27 }
 0x182   : > { %3867 = vtanh.f32 %v604_v29  ;;  %3537 = vmatmul.mubr.f32.gmra.mrb[18].mxu1 %v4693_v26 }
 0x183   : > { %v4699_v30 = vpop.eup %3857 }
 0x184   : > { %5942 = vst [vmem:[#allocation32_spill] sm:$0xff] %v4699_v30  ;;  %v4701_v31 = vpop.eup %3859  ;;  %v3422_v32 = vpop.f32.mrb[26].mxu0 }
 0x185   : > { %5943 = vst [vmem:[#allocation33_spill] sm:$0xff] %v4701_v31  ;;  %3869 = vtanh.f32 %v3422_v32  ;;  %v614_v33 = vpop.f32.mrb[27].mxu0  ;;  %3539 = vmatprep.mubr.f32.mxu1 %v4701_v31 }
 0x186   : > { %3871 = vtanh.f32 %v614_v33  ;;  %3540 = vmatmul.mubr.f32.gmra.mrb[20].mxu1 %v4699_v30 }
 0x187   : > { %v4705_v34 = vpop.eup %3861 }
 0x188   : > { %5944 = vst [vmem:[#allocation34_spill] sm:$0xff] %v4705_v34  ;;  %v4707_v35 = vpop.eup %3863  ;;  %v3425_v36 = vpop.f32.mrb[28].mxu0 }
 0x189   : > { %5945 = vst [vmem:[#allocation35_spill] sm:$0xff] %v4707_v35  ;;  %3873 = vtanh.f32 %v3425_v36  ;;  %v624_v37 = vpop.f32.mrb[29].mxu0  ;;  %3542 = vmatprep.mubr.f32.mxu1 %v4707_v35 }
 0x18a   : > { %3875 = vtanh.f32 %v624_v37  ;;  %3543 = vmatmul.mubr.f32.gmra.mrb[22].mxu1 %v4705_v34 }
 0x18b   : > { %v4711_v38 = vpop.eup %3865 }
 0x18c   : > { %5946 = vst [vmem:[#allocation36_spill] sm:$0xff] %v4711_v38  ;;  %v4713_v39 = vpop.eup %3867  ;;  %v3428_v40 = vpop.f32.mrb[30].mxu0 }
 0x18d   : > { %5947 = vst [vmem:[#allocation37_spill] sm:$0xff] %v4713_v39  ;;  %3877 = vtanh.f32 %v3428_v40  ;;  %v634_v41 = vpop.f32.mrb[31].mxu0  ;;  %3545 = vmatprep.mubr.f32.mxu1 %v4713_v39 }
 0x18e   : > { %3879 = vtanh.f32 %v634_v41  ;;  %3546 = vmatmul.mubr.f32.gmra.mrb[24].mxu1 %v4711_v38 }
 0x18f   : > { %v4717_v42 = vpop.eup %3869 }
 0x190   : > { %5948 = vst [vmem:[#allocation38_spill] sm:$0xff] %v4717_v42  ;;  %v4719_v43 = vpop.eup %3871  ;;  %v3431_v44 = vpop.f32.mrb[32].mxu0 }
 0x191   : > { %5949 = vst [vmem:[#allocation39_spill] sm:$0xff] %v4719_v43  ;;  %3881 = vtanh.f32 %v3431_v44  ;;  %v644_v45 = vpop.f32.mrb[33].mxu0  ;;  %3548 = vmatprep.mubr.f32.mxu1 %v4719_v43 }
 0x192   : > { %3883 = vtanh.f32 %v644_v45  ;;  %3549 = vmatmul.mubr.f32.gmra.mrb[26].mxu1 %v4717_v42 }
 0x193   : > { %v4723_v46 = vpop.eup %3873 }
 0x194   : > { %5950 = vst [vmem:[#allocation40_spill] sm:$0xff] %v4723_v46  ;;  %v4725_v47 = vpop.eup %3875  ;;  %v3434_v48 = vpop.f32.mrb[34].mxu0 }
 0x195   : > { %5951 = vst [vmem:[#allocation41_spill] sm:$0xff] %v4725_v47  ;;  %3885 = vtanh.f32 %v3434_v48  ;;  %v654_v49 = vpop.f32.mrb[35].mxu0  ;;  %3551 = vmatprep.mubr.f32.mxu1 %v4725_v47 }
 0x196   : > { %3887 = vtanh.f32 %v654_v49  ;;  %3552 = vmatmul.mubr.f32.gmra.mrb[28].mxu1 %v4723_v46 }
 0x197   : > { %v4729_v50 = vpop.eup %3877 }
 0x198   : > { %5952 = vst [vmem:[#allocation42_spill] sm:$0xff] %v4729_v50  ;;  %v4731_v51 = vpop.eup %3879  ;;  %v3437_v52 = vpop.f32.mrb[36].mxu0 }
 0x199   : > { %5953 = vst [vmem:[#allocation43_spill] sm:$0xff] %v4731_v51  ;;  %3889 = vtanh.f32 %v3437_v52  ;;  %v664_v53 = vpop.f32.mrb[37].mxu0  ;;  %3554 = vmatprep.mubr.f32.mxu1 %v4731_v51 }
 0x19a   : > { %3891 = vtanh.f32 %v664_v53  ;;  %3555 = vmatmul.mubr.f32.gmra.mrb[30].mxu1 %v4729_v50 }
 0x19b   : > { %v4735_v55 = vpop.eup %3881 }
 0x19c   : > { %5954 = vst [vmem:[#allocation44_spill] sm:$0xff] %v4735_v55  ;;  %v4737_v57 = vpop.eup %3883  ;;  %v3440_v59 = vpop.f32.mrb[38].mxu0 }
 0x19d   : > { %5955 = vst [vmem:[#allocation45_spill] sm:$0xff] %v4737_v57  ;;  %3893 = vtanh.f32 %v3440_v59  ;;  %v674_v61 = vpop.f32.mrb[39].mxu0  ;;  %3557 = vmatprep.mubr.f32.mxu1 %v4737_v57 }
 0x19e   : > { %3895 = vtanh.f32 %v674_v61  ;;  %3558 = vmatmul.mubr.f32.gmra.mrb[32].mxu1 %v4735_v55 }
 0x19f   : > { %v4741_v0 = vpop.eup %3885 }
 0x1a0   : > { %5956 = vst [vmem:[#allocation46_spill] sm:$0xff] %v4741_v0  ;;  %v4743_v1 = vpop.eup %3887  ;;  %v3443_v4 = vpop.f32.mrb[40].mxu0 }
 0x1a1   : > { %5957 = vst [vmem:[#allocation47_spill] sm:$0xff] %v4743_v1  ;;  %3897 = vtanh.f32 %v3443_v4  ;;  %v684_v5 = vpop.f32.mrb[41].mxu0  ;;  %3560 = vmatprep.mubr.f32.mxu1 %v4743_v1 }
 0x1a2   : > { %3899 = vtanh.f32 %v684_v5  ;;  %3561 = vmatmul.mubr.f32.gmra.mrb[34].mxu1 %v4741_v0 }
 0x1a3   : > { %v4747_v8 = vpop.eup %3889 }
 0x1a4   : > { %5958 = vst [vmem:[#allocation48_spill] sm:$0xff] %v4747_v8  ;;  %v4749_v9 = vpop.eup %3891  ;;  %v3446_v12 = vpop.f32.mrb[42].mxu0 }
 0x1a5   : > { %5959 = vst [vmem:[#allocation49_spill] sm:$0xff] %v4749_v9  ;;  %3901 = vtanh.f32 %v3446_v12  ;;  %v694_v13 = vpop.f32.mrb[43].mxu0  ;;  %3563 = vmatprep.mubr.f32.mxu1 %v4749_v9 }
 0x1a6   : > { %3903 = vtanh.f32 %v694_v13  ;;  %3564 = vmatmul.mubr.f32.gmra.mrb[36].mxu1 %v4747_v8 }
 0x1a7   : > { %v4753_v16 = vpop.eup %3893 }
 0x1a8   : > { %5960 = vst [vmem:[#allocation50_spill] sm:$0xff] %v4753_v16  ;;  %v4755_v17 = vpop.eup %3895  ;;  %v3449_v20 = vpop.f32.mrb[44].mxu0 }
 0x1a9   : > { %5961 = vst [vmem:[#allocation51_spill] sm:$0xff] %v4755_v17  ;;  %3905 = vtanh.f32 %v3449_v20  ;;  %v704_v21 = vpop.f32.mrb[45].mxu0  ;;  %3566 = vmatprep.mubr.f32.mxu1 %v4755_v17 }
 0x1aa   : > { %3907 = vtanh.f32 %v704_v21  ;;  %3567 = vmatmul.mubr.f32.gmra.mrb[38].mxu1 %v4753_v16 }
 0x1ab   : > { %v4759_v24 = vpop.eup %3897 }
 0x1ac   : > { %5962 = vst [vmem:[#allocation52_spill] sm:$0xff] %v4759_v24  ;;  %v4761_v25 = vpop.eup %3899  ;;  %v3452_v28 = vpop.f32.mrb[46].mxu0 }
 0x1ad   : > { %5963 = vst [vmem:[#allocation53_spill] sm:$0xff] %v4761_v25  ;;  %3909 = vtanh.f32 %v3452_v28  ;;  %v714_v29 = vpop.f32.mrb[47].mxu0  ;;  %3569 = vmatprep.mubr.f32.mxu1 %v4761_v25 }
 0x1ae   : > { %3911 = vtanh.f32 %v714_v29  ;;  %3570 = vmatmul.mubr.f32.gmra.mrb[40].mxu1 %v4759_v24 }
 0x1af   : > { %v4765_v32 = vpop.eup %3901 }
 0x1b0   : > { %5964 = vst [vmem:[#allocation54_spill] sm:$0xff] %v4765_v32  ;;  %v4767_v33 = vpop.eup %3903  ;;  %v3455_v36 = vpop.f32.mrb[48].mxu0 }
 0x1b1   : > { %5965 = vst [vmem:[#allocation55_spill] sm:$0xff] %v4767_v33  ;;  %3913 = vtanh.f32 %v3455_v36  ;;  %v724_v37 = vpop.f32.mrb[49].mxu0  ;;  %3572 = vmatprep.mubr.f32.mxu1 %v4767_v33 }
 0x1b2   : > { %3915 = vtanh.f32 %v724_v37  ;;  %3573 = vmatmul.mubr.f32.gmra.mrb[42].mxu1 %v4765_v32 }
 0x1b3   : > { %v4771_v40 = vpop.eup %3905 }
 0x1b4   : > { %5966 = vst [vmem:[#allocation56_spill] sm:$0xff] %v4771_v40  ;;  %v4773_v41 = vpop.eup %3907  ;;  %v3458_v44 = vpop.f32.mrb[50].mxu0 }
 0x1b5   : > { %5967 = vst [vmem:[#allocation57_spill] sm:$0xff] %v4773_v41  ;;  %3917 = vtanh.f32 %v3458_v44  ;;  %v734_v45 = vpop.f32.mrb[51].mxu0  ;;  %3575 = vmatprep.mubr.f32.mxu1 %v4773_v41 }
 0x1b6   : > { %3919 = vtanh.f32 %v734_v45  ;;  %3576 = vmatmul.mubr.f32.gmra.mrb[44].mxu1 %v4771_v40 }
 0x1b7   : > { %v4777_v48 = vpop.eup %3909 }
 0x1b8   : > { %5968 = vst [vmem:[#allocation58_spill] sm:$0xff] %v4777_v48  ;;  %v4779_v49 = vpop.eup %3911  ;;  %v3461_v52 = vpop.f32.mrb[52].mxu0 }
 0x1b9   : > { %5969 = vst [vmem:[#allocation59_spill] sm:$0xff] %v4779_v49  ;;  %3921 = vtanh.f32 %v3461_v52  ;;  %v744_v53 = vpop.f32.mrb[53].mxu0  ;;  %3578 = vmatprep.mubr.f32.mxu1 %v4779_v49 }
 0x1ba   : > { %3923 = vtanh.f32 %v744_v53  ;;  %3579 = vmatmul.mubr.f32.gmra.mrb[46].mxu1 %v4777_v48 }
 0x1bb   : > { %v4783_v59 = vpop.eup %3913 }
 0x1bc   : > { %5970 = vst [vmem:[#allocation60_spill] sm:$0xff] %v4783_v59  ;;  %v4785_v61 = vpop.eup %3915  ;;  %v3464_v4 = vpop.f32.mrb[54].mxu0 }
 0x1bd   : > { %5971 = vst [vmem:[#allocation61_spill] sm:$0xff] %v4785_v61  ;;  %3925 = vtanh.f32 %v3464_v4  ;;  %v754_v5 = vpop.f32.mrb[55].mxu0  ;;  %3581 = vmatprep.mubr.f32.mxu1 %v4785_v61 }
 0x1be   : > { %3927 = vtanh.f32 %v754_v5  ;;  %3582 = vmatmul.mubr.f32.gmra.mrb[48].mxu1 %v4783_v59 }
 0x1bf   : > { %v4789_v12 = vpop.eup %3917 }
 0x1c0   : > { %5972 = vst [vmem:[#allocation62_spill] sm:$0xff] %v4789_v12  ;;  %v4791_v13 = vpop.eup %3919  ;;  %v3467_v20 = vpop.f32.mrb[56].mxu0 }
 0x1c1   : > { %5973 = vst [vmem:[#allocation63_spill] sm:$0xff] %v4791_v13  ;;  %3929 = vtanh.f32 %v3467_v20  ;;  %v764_v21 = vpop.f32.mrb[57].mxu0  ;;  %3584 = vmatprep.mubr.f32.mxu1 %v4791_v13 }
 0x1c2   : > { %3931 = vtanh.f32 %v764_v21  ;;  %3585 = vmatmul.mubr.f32.gmra.mrb[50].mxu1 %v4789_v12 }
 0x1c3   : > { %v4795_v28 = vpop.eup %3921 }
 0x1c4   : > { %5974 = vst [vmem:[#allocation64_spill] sm:$0xff] %v4795_v28  ;;  %v4797_v29 = vpop.eup %3923  ;;  %v3470_v36 = vpop.f32.mrb[58].mxu0 }
 0x1c5   : > { %5975 = vst [vmem:[#allocation65_spill] sm:$0xff] %v4797_v29  ;;  %3933 = vtanh.f32 %v3470_v36  ;;  %v774_v37 = vpop.f32.mrb[59].mxu0  ;;  %3587 = vmatprep.mubr.f32.mxu1 %v4797_v29 }
 0x1c6   : > { %3935 = vtanh.f32 %v774_v37  ;;  %3588 = vmatmul.mubr.f32.gmra.mrb[52].mxu1 %v4795_v28 }
 0x1c7   : > { %v4801_v44 = vpop.eup %3925 }
 0x1c8   : > { %5976 = vst [vmem:[#allocation66_spill] sm:$0xff] %v4801_v44  ;;  %v4803_v45 = vpop.eup %3927  ;;  %v3473_v52 = vpop.f32.mrb[60].mxu0 }
 0x1c9   : > { %5977 = vst [vmem:[#allocation67_spill] sm:$0xff] %v4803_v45  ;;  %3937 = vtanh.f32 %v3473_v52  ;;  %v784_v53 = vpop.f32.mrb[61].mxu0  ;;  %3590 = vmatprep.mubr.f32.mxu1 %v4803_v45 }
 0x1ca   : > { %3939 = vtanh.f32 %v784_v53  ;;  %3591 = vmatmul.mubr.f32.gmra.mrb[54].mxu1 %v4801_v44 }
 0x1cb   : > { %v4807_v4 = vpop.eup %3929 }
 0x1cc   : > { %5978 = vst [vmem:[#allocation68_spill] sm:$0xff] %v4807_v4  ;;  %v4809_v5 = vpop.eup %3931  ;;  %v3476_v20 = vpop.f32.mrb[62].mxu0 }
 0x1cd   : > { %5979 = vst [vmem:[#allocation69_spill] sm:$0xff] %v4809_v5  ;;  %3941 = vtanh.f32 %v3476_v20  ;;  %v794_v21 = vpop.f32.mrb[63].mxu0  ;;  %3593 = vmatprep.mubr.f32.mxu1 %v4809_v5 }
 0x1ce   : > { %3943 = vtanh.f32 %v794_v21  ;;  %3594 = vmatmul.mubr.f32.gmra.mrb[56].mxu1 %v4807_v4  ;;  %v4273_v4 = vmov 0  }
 0x1cf   : > { %v4813_v36 = vpop.eup %3933  ;;  %3815 = vset.pattern.permute.xlu0 %v4273_v4  ;;  %3816 = vset.pattern.permute.xlu1 %v4273_v4 }
 0x1d0   : > { %5980 = vst [vmem:[#allocation70_spill] sm:$0xff] %v4813_v36  ;;  %v4815_v37 = vpop.eup %3935 }
 0x1d1   : > { %5981 = vst [vmem:[#allocation71_spill] sm:$0xff] %v4815_v37  ;;  %3596 = vmatprep.mubr.f32.mxu1 %v4815_v37 }
 0x1d2   : > { %3597 = vmatmul.mubr.f32.gmra.mrb[58].mxu1 %v4813_v36 }
 0x1d3   : > { %v4819_v52 = vpop.eup %3937 }
 0x1d4   : > { %5982 = vst [vmem:[#allocation72_spill] sm:$0xff] %v4819_v52  ;;  %v4821_v53 = vpop.eup %3939 }
 0x1d5   : > { %5983 = vst [vmem:[#allocation73_spill] sm:$0xff] %v4821_v53  ;;  %3599 = vmatprep.mubr.f32.mxu1 %v4821_v53 }
 0x1d6   : > { %3600 = vmatmul.mubr.f32.gmra.mrb[60].mxu1 %v4819_v52 }
 0x1d7   : > { %v4825_v20 = vpop.eup %3941 }
 0x1d8   : > { %5984 = vst [vmem:[#allocation74_spill] sm:$0xff] %v4825_v20  ;;  %v4827_v21 = vpop.eup %3943 }
 0x1d9   : > { %5985 = vst [vmem:[#allocation75_spill] sm:$0xff] %v4827_v21  ;;  %3602 = vmatprep.mubr.f32.mxu1 %v4827_v21 }
 0x1da   : > { %3603 = vmatmul.mubr.f32.gmra.mrb[62].mxu1 %v4825_v20 }
 0x231   : > { %v3511_v36 = vpop.f32.mrb[0].mxu1 }
 0x232   : > { %v1270_v37 = vsel %vm1268_vm0, %v3511_v36, -inf  ;;  %v949_v5 = vpop.f32.mrb[1].mxu1 }
 0x233   : > { %v1269_v53 = vsel %vm1268_vm0, %v949_v5, -inf }
 0x234   : > { %v1271_v44 = vmax.f32 %v1269_v53, %v1270_v37 }
 0x235   : > { %v3514_v52 = vpop.f32.mrb[2].mxu1 }
 0x236   : > { %v1272_v45 = vrot.slane %v1271_v44, 4  ;;  %v1279_v29 = vsel %vm1268_vm0, %v3514_v52, -inf  ;;  %v959_v61 = vpop.f32.mrb[3].mxu1 }
 0x237   : > { %v1278_v21 = vsel %vm1268_vm0, %v959_v61, -inf }
 0x238   : > { %v1273_v28 = vmax.f32 %v1271_v44, %v1272_v45  ;;  %v1280_v20 = vmax.f32 %v1278_v21, %v1279_v29 }
 0x239   : > { %v4835_v13 = vpop.f32.mrb[4].mxu1 }
 0x23a   : > { %v1274_v4 = vrot.slane %v1273_v28, 2  ;;  %v1281_v59 = vrot.slane %v1280_v20, 4  ;;  %v1288_v12 = vsel %vm1268_vm0, %v4835_v13, -inf  ;;  %v969_v48 = vpop.f32.mrb[5].mxu1 }
 0x23b   : > { %v1287_v49 = vsel %vm1268_vm0, %v969_v48, -inf }
 0x23c   : > { %v1275_v37 = vmax.f32 %v1273_v28, %v1274_v4  ;;  %v1282_v53 = vmax.f32 %v1280_v20, %v1281_v59  ;;  %v1289_v40 = vmax.f32 %v1287_v49, %v1288_v12 }
 0x23d   : > { %v4840_v41 = vpop.f32.mrb[6].mxu1 }
 0x23e   : > { %v1276_v32 = vrot.slane %v1275_v37, 1  ;;  %v1283_v33 = vrot.slane %v1282_v53, 2  ;;  %v1290_v24 = vrot.slane %v1289_v40, 4  ;;  %v1297_v29 = vsel %vm1268_vm0, %v4840_v41, -inf  ;;  %v4844_v44 = vpop.f32.mrb[7].mxu1 }
 0x23f   : > { %v1296_v45 = vsel %vm1268_vm0, %v4844_v44, -inf }
 0x240   : > { %v1277_v21 = vmax.f32 %v1275_v37, %v1276_v32  ;;  %v1284_v25 = vmax.f32 %v1282_v53, %v1283_v33  ;;  %v1291_v16 = vmax.f32 %v1289_v40, %v1290_v24  ;;  %v1298_v17 = vmax.f32 %v1296_v45, %v1297_v29 }
 0x241   : > { %v4848_v28 = vpop.f32.mrb[8].mxu1 }
 0x242   : > { %v1557_v49 = vsub.f32 %v949_v5, %v1277_v21  ;;  %v1558_v59 = vsub.f32 %v3511_v36, %v1277_v21  ;;  %v1285_v12 = vrot.slane %v1284_v25, 1  ;;  %v1292_v20 = vrot.slane %v1291_v16, 2  ;;  %v4850_v4 = vpop.f32.mrb[9].mxu1 }
 0x243   : > { %v1299_v57 = vrot.slane %v1298_v17, 4  ;;  %v1306_v9 = vsel %vm1268_vm0, %v4848_v28, -inf  ;;  %v1305_v8 = vsel %vm1268_vm0, %v4850_v4, -inf }
 0x244   : > { %v1621_v1 = vmul.f32 1.442695, %v1557_v49  ;;  %v1623_v32 = vmul.f32 1.442695, %v1558_v59  ;;  %v1286_v33 = vmax.f32 %v1284_v25, %v1285_v12  ;;  %v1293_v24 = vmax.f32 %v1291_v16, %v1292_v20 }
 0x245   : > { %v1300_v40 = vmax.f32 %v1298_v17, %v1299_v57  ;;  %v1307_v37 = vmax.f32 %v1305_v8, %v1306_v9  ;;  %v4856_v53 = vpop.f32.mrb[10].mxu1 }
 0x246   : > { %3945 = vpow2.f32 %v1621_v1  ;;  %v1559_v5 = vsub.f32 %v959_v61, %v1286_v33  ;;  %v1560_v36 = vsub.f32 %v3514_v52, %v1286_v33  ;;  %v1294_v29 = vrot.slane %v1293_v24, 1  ;;  %v4858_v45 = vpop.f32.mrb[11].mxu1 }
 0x247   : > { %3947 = vpow2.f32 %v1623_v32  ;;  %v1301_v21 = vrot.slane %v1300_v40, 2  ;;  %v1308_v55 = vrot.slane %v1307_v37, 4  ;;  %v1315_v0 = vsel %vm1268_vm0, %v4856_v53, -inf }
 0x248   : > { %v1625_v49 = vmul.f32 1.442695, %v1559_v5  ;;  %v1627_v59 = vmul.f32 1.442695, %v1560_v36  ;;  %v1295_v25 = vmax.f32 %v1293_v24, %v1294_v29  ;;  %v1314_v57 = vsel %vm1268_vm0, %v4858_v45, -inf }
 0x249   : > { %v1302_v8 = vmax.f32 %v1300_v40, %v1301_v21  ;;  %v1309_v9 = vmax.f32 %v1307_v37, %v1308_v55  ;;  %v1316_v1 = vmax.f32 %v1314_v57, %v1315_v0  ;;  %v4864_v16 = vpop.f32.mrb[12].mxu1 }
 0x24a   : > { %3949 = vpow2.f32 %v1625_v49  ;;  %v1561_v17 = vsub.f32 %v969_v48, %v1295_v25  ;;  %v1562_v61 = vsub.f32 %v4835_v13, %v1295_v25  ;;  %v1324_v52 = vsel %vm1268_vm0, %v4864_v16, -inf  ;;  %v4869_v12 = vpop.f32.mrb[13].mxu1 }
 0x24b   : > { %3951 = vpow2.f32 %v1627_v59  ;;  %v1303_v20 = vrot.slane %v1302_v8, 1  ;;  %v1310_v32 = vrot.slane %v1309_v9, 2  ;;  %v1317_v33 = vrot.slane %v1316_v1, 4 }
 0x24c   : > { %v1629_v24 = vmul.f32 1.442695, %v1561_v17  ;;  %v1631_v5 = vmul.f32 1.442695, %v1562_v61  ;;  %v1323_v55 = vsel %vm1268_vm0, %v4869_v12, -inf }
 0x24d   : > { %v1304_v0 = vmax.f32 %v1302_v8, %v1303_v20  ;;  %v1311_v40 = vmax.f32 %v1309_v9, %v1310_v32  ;;  %v1318_v37 = vmax.f32 %v1316_v1, %v1317_v33  ;;  %v1325_v48 = vmax.f32 %v1323_v55, %v1324_v52  ;;  %v4873_v36 = vpop.f32.mrb[14].mxu1 }
 0x24e   : > { %3953 = vpow2.f32 %v1629_v24  ;;  %v1333_v13 = vsel %vm1268_vm0, %v4873_v36, -inf  ;;  %v4877_v29 = vpop.f32.mrb[15].mxu1 }
 0x24f   : > { %3955 = vpow2.f32 %v1631_v5  ;;  %v1563_v21 = vsub.f32 %v4844_v44, %v1304_v0  ;;  %v1564_v49 = vsub.f32 %v4840_v41, %v1304_v0  ;;  %v1312_v59 = vrot.slane %v1311_v40, 1 }
 0x250   : > { %v4881_v25 = vpop.eup %3945  ;;  %v1319_v57 = vrot.slane %v1318_v37, 2  ;;  %v1326_v8 = vrot.slane %v1325_v48, 4  ;;  %v1332_v9 = vsel %vm1268_vm0, %v4877_v29, -inf }
 0x251   : > { %v4885_v1 = vpop.eup %3947  ;;  %v1749_v17 = vsel %vm1268_vm0, %v4881_v25, 0.0  ;;  %v1633_v61 = vmul.f32 1.442695, %v1563_v21  ;;  %v1635_v52 = vmul.f32 1.442695, %v1564_v49  ;;  %v1313_v20 = vmax.f32 %v1311_v40, %v1312_v59  ;;  %v4889_v32 = vpop.f32.mrb[16].mxu1 }
 0x252   : > { %v1750_v41 = vsel %vm1268_vm0, %v4885_v1, 0.0  ;;  %v1320_v44 = vmax.f32 %v1318_v37, %v1319_v57  ;;  %v1327_v33 = vmax.f32 %v1325_v48, %v1326_v8  ;;  %v1334_v24 = vmax.f32 %v1332_v9, %v1333_v13  ;;  %v4893_v5 = vpop.f32.mrb[17].mxu1 }
 0x253   : > { %v1751_v55 = vadd.f32 %v1750_v41, %v1749_v17  ;;  %3957 = vpow2.f32 %v1633_v61  ;;  %v1565_v0 = vsub.f32 %v4850_v4, %v1313_v20  ;;  %v1566_v50 = vsub.f32 %v4848_v28, %v1313_v20 }
 0x254   : > { %v4897_v51 = vpop.eup %3949  ;;  %3959 = vpow2.f32 %v1635_v52  ;;  %v1321_v40 = vrot.slane %v1320_v44, 1  ;;  %v1328_v21 = vrot.slane %v1327_v33, 2  ;;  %v1335_v49 = vrot.slane %v1334_v24, 4 }
 0x255   : > { %v4899_v59 = vpop.eup %3951  ;;  %v1752_v46 = vrot.slane %v1751_v55, 4  ;;  %v1758_v37 = vsel %vm1268_vm0, %v4897_v51, 0.0  ;;  %v1637_v48 = vmul.f32 1.442695, %v1565_v0  ;;  %v1639_v13 = vmul.f32 1.442695, %v1566_v50 }
 0x256   : > { %v1759_v57 = vsel %vm1268_vm0, %v4899_v59, 0.0  ;;  %v1322_v4 = vmax.f32 %v1320_v44, %v1321_v40  ;;  %v1329_v8 = vmax.f32 %v1327_v33, %v1328_v21  ;;  %v1336_v28 = vmax.f32 %v1334_v24, %v1335_v49  ;;  %v4905_v9 = vpop.f32.mrb[18].mxu1 }
 0x257   : > { %v4907_v17 = vadd.f32 %v1752_v46, %v1751_v55  ;;  %v1760_v61 = vadd.f32 %v1759_v57, %v1758_v37  ;;  %3961 = vpow2.f32 %v1637_v48  ;;  %v1342_v52 = vsel %vm1268_vm0, %v4889_v32, -inf  ;;  %v4911_v20 = vpop.f32.mrb[19].mxu1 }
 0x258   : > { %v4913_v41 = vpop.eup %3953  ;;  %3963 = vpow2.f32 %v1639_v13  ;;  %v1567_v50 = vsub.f32 %v4858_v45, %v1322_v4  ;;  %v1568_v44 = vsub.f32 %v4856_v53, %v1322_v4  ;;  %v1330_v33 = vrot.slane %v1329_v8, 1 }
 0x259   : > { %v4917_v24 = vpop.eup %3955  ;;  %v1761_v0 = vrot.slane %v1760_v61, 4  ;;  %v1767_v46 = vsel %vm1268_vm0, %v4913_v41, 0.0  ;;  %v1337_v55 = vrot.slane %v1336_v28, 2  ;;  %v1341_v40 = vsel %vm1268_vm0, %v4893_v5, -inf  ;;  %v4923_v21 = vpop.f32.mrb[20].mxu1 }
 0x25a   : > { %v1768_v49 = vsel %vm1268_vm0, %v4917_v24, 0.0  ;;  %v1641_v37 = vmul.f32 1.442695, %v1567_v50  ;;  %v1643_v45 = vmul.f32 1.442695, %v1568_v44  ;;  %v1331_v48 = vmax.f32 %v1329_v8, %v1330_v33  ;;  %v4927_v53 = vpop.f32.mrb[21].mxu1 }
 0x25b   : > { %v4929_v13 = vadd.f32 %v1761_v0, %v1760_v61  ;;  %v1769_v57 = vadd.f32 %v1768_v49, %v1767_v46  ;;  %v1338_v4 = vmax.f32 %v1336_v28, %v1337_v55  ;;  %v1343_v47 = vmax.f32 %v1341_v40, %v1342_v52 }
 0x25c   : > { %3965 = vpow2.f32 %v1641_v37  ;;  %v1569_v42 = vsub.f32 %v4869_v12, %v1331_v48  ;;  %v1570_v43 = vsub.f32 %v4864_v16, %v1331_v48  ;;  %v1351_v39 = vsel %vm1268_vm0, %v4905_v9, -inf }
 0x25d   : > { %v4935_v35 = vpop.eup %3957  ;;  %v1770_v50 = vrot.slane %v1769_v57, 4  ;;  %3967 = vpow2.f32 %v1643_v45  ;;  %v1339_v8 = vrot.slane %v1338_v4, 1  ;;  %v1344_v44 = vrot.slane %v1343_v47, 4  ;;  %v4937_v33 = vpop.f32.mrb[22].mxu1 }
 0x25e   : > { %v4939_v61 = vpop.eup %3959  ;;  %v1776_v28 = vsel %vm1268_vm0, %v4935_v35, 0.0  ;;  %v1645_v52 = vmul.f32 1.442695, %v1569_v42  ;;  %v1647_v12 = vmul.f32 1.442695, %v1570_v43  ;;  %v1350_v16 = vsel %vm1268_vm0, %v4911_v20, -inf }
 0x25f   : > { %v4945_v0 = vadd.f32 %v1770_v50, %v1769_v57  ;;  %v1777_v46 = vsel %vm1268_vm0, %v4939_v61, 0.0  ;;  %v1340_v55 = vmax.f32 %v1338_v4, %v1339_v8  ;;  %v1345_v40 = vmax.f32 %v1343_v47, %v1344_v44  ;;  %v4949_v49 = vpop.f32.mrb[23].mxu1 }
 0x260   : > { %v1778_v37 = vadd.f32 %v1777_v46, %v1776_v28  ;;  %3969 = vpow2.f32 %v1645_v52  ;;  %v1352_v45 = vmax.f32 %v1350_v16, %v1351_v39  ;;  %v1360_v48 = vsel %vm1268_vm0, %v4923_v21, -inf }
 0x261   : > { %v4953_v42 = vpop.eup %3961  ;;  %3971 = vpow2.f32 %v1647_v12  ;;  %v1571_v57 = vsub.f32 %v4877_v29, %v1340_v55  ;;  %v1572_v50 = vsub.f32 %v4873_v36, %v1340_v55  ;;  %v4958_v23 = vpop.f32.mrb[24].mxu1  ;;  %v1346_v8 = vrot.slane %v1345_v40, 2 }
 0x262   : > { %v4960_v47 = vpop.eup %3963  ;;  %v1779_v4 = vrot.slane %v1778_v37, 4  ;;  %v1785_v39 = vsel %vm1268_vm0, %v4953_v42, 0.0  ;;  %v1353_v44 = vrot.slane %v1352_v45, 4  ;;  %v4964_v28 = vpop.f32.mrb[25].mxu1  ;;  %v1359_v36 = vsel %vm1268_vm0, %v4927_v53, -inf }
 0x263   : > { %v1786_v52 = vsel %vm1268_vm0, %v4960_v47, 0.0  ;;  %v1649_v12 = vmul.f32 1.442695, %v1571_v57  ;;  %v1651_v16 = vmul.f32 1.442695, %v1572_v50  ;;  %v1347_v55 = vmax.f32 %v1345_v40, %v1346_v8 }
 0x264   : > { %v4970_v29 = vadd.f32 %v1779_v4, %v1778_v37  ;;  %v1787_v46 = vadd.f32 %v1786_v52, %v1785_v39  ;;  %v1354_v43 = vmax.f32 %v1352_v45, %v1353_v44  ;;  %v1361_v38 = vmax.f32 %v1359_v36, %v1360_v48 }
 0x265   : > { %3973 = vpow2.f32 %v1649_v12  ;;  %v1369_v31 = vsel %vm1268_vm0, %v4937_v33, -inf  ;;  %v1368_v34 = vsel %vm1268_vm0, %v4949_v49, -inf  ;;  %v4976_v27 = vpop.f32.mrb[26].mxu1  ;;  %v1348_v37 = vrot.slane %v1347_v55, 1 }
 0x266   : > { %v4978_v57 = vpop.eup %3965  ;;  %v1788_v22 = vrot.slane %v1787_v46, 4  ;;  %3975 = vpow2.f32 %v1651_v16  ;;  %v4981_v4 = vpop.f32.mrb[27].mxu1  ;;  %v1355_v48 = vrot.slane %v1354_v43, 2  ;;  %v1362_v39 = vrot.slane %v1361_v38, 4 }
 0x267   : > { %v4983_v40 = vpop.eup %3967  ;;  %v1794_v45 = vsel %vm1268_vm0, %v4978_v57, 0.0  ;;  %v1370_v8 = vmax.f32 %v1368_v34, %v1369_v31  ;;  %v1349_v12 = vmax.f32 %v1347_v55, %v1348_v37  ;;  %v1378_v16 = vsel %vm1268_vm0, %v4958_v23, -inf }
 0x268   : > { %v4987_v44 = vadd.f32 %v1788_v22, %v1787_v46  ;;  %v1795_v52 = vsel %vm1268_vm0, %v4983_v40, 0.0  ;;  %v1356_v50 = vmax.f32 %v1354_v43, %v1355_v48  ;;  %v1363_v30 = vmax.f32 %v1361_v38, %v1362_v39 }
 0x269   : > { %v1796_v36 = vadd.f32 %v1795_v52, %v1794_v45  ;;  %v1371_v26 = vrot.slane %v1370_v8, 4  ;;  %v4993_v18 = vpop.f32.mrb[28].mxu1  ;;  %v1573_v22 = vsub.f32 %v4893_v5, %v1349_v12  ;;  %v1574_v31 = vsub.f32 %v4889_v32, %v1349_v12 }
 0x26a   : > { %v4995_v19 = vpop.eup %3969  ;;  %v1377_v34 = vsel %vm1268_vm0, %v4964_v28, -inf  ;;  %v5002_v46 = vpop.f32.mrb[29].mxu1  ;;  %v1357_v37 = vrot.slane %v1356_v50, 1  ;;  %v1364_v45 = vrot.slane %v1363_v30, 2  ;;  %v1387_v7 = vsel %vm1268_vm0, %v4976_v27, -inf }
 0x26b   : > { %v5004_v55 = vpop.eup %3971  ;;  %v1797_v43 = vrot.slane %v1796_v36, 4  ;;  %v1803_v38 = vsel %vm1268_vm0, %v4995_v19, 0.0  ;;  %v1653_v39 = vmul.f32 1.442695, %v1573_v22  ;;  %v1655_v5 = vmul.f32 1.442695, %v1574_v31 }
 0x26c   : > { %v1804_v48 = vsel %vm1268_vm0, %v5004_v55, 0.0  ;;  %v1372_v52 = vmax.f32 %v1370_v8, %v1371_v26  ;;  %v1358_v14 = vmax.f32 %v1356_v50, %v1357_v37  ;;  %v1365_v15 = vmax.f32 %v1363_v30, %v1364_v45 }
 0x26d   : > { %v5010_v32 = vadd.f32 %v1797_v43, %v1796_v36  ;;  %v1805_v12 = vadd.f32 %v1804_v48, %v1803_v38  ;;  %v5012_v10 = vpop.f32.mrb[30].mxu1  ;;  %3977 = vpow2.f32 %v1653_v39  ;;  %v1379_v6 = vmax.f32 %v1377_v34, %v1378_v16 }
 0x26e   : > { %v1373_v11 = vrot.slane %v1372_v52, 2  ;;  %v5016_v3 = vpop.f32.mrb[31].mxu1  ;;  %3979 = vpow2.f32 %v1655_v5  ;;  %v1575_v8 = vsub.f32 %v4911_v20, %v1358_v14  ;;  %v1576_v16 = vsub.f32 %v4905_v9, %v1358_v14 }
 0x26f   : > { %v5018_v63 = vpop.eup %3973  ;;  %v1806_v26 = vrot.slane %v1805_v12, 4  ;;  %v1366_v36 = vrot.slane %v1365_v15, 1  ;;  %v1380_v37 = vrot.slane %v1379_v6, 4 }
 0x270   : > { %v5022_v50 = vpop.eup %3975  ;;  %v1812_v30 = vsel %vm1268_vm0, %v5018_v63, 0.0  ;;  %v1374_v31 = vmax.f32 %v1372_v52, %v1373_v11  ;;  %v1657_v38 = vmul.f32 1.442695, %v1575_v8  ;;  %v1659_v20 = vmul.f32 1.442695, %v1576_v16 }
 0x271   : > { %5986 = vst [vmem:[#allocation76_spill] sm:$0xff] %v5022_v50  ;;  %v5027_v34 = vadd.f32 %v1806_v26, %v1805_v12  ;;  %v1813_v43 = vsel %vm1268_vm0, %v5022_v50, 0.0  ;;  %v5031_v45 = vpop.f32.mrb[32].mxu1  ;;  %v1367_v39 = vmax.f32 %v1365_v15, %v1366_v36  ;;  %v1381_v14 = vmax.f32 %v1379_v6, %v1380_v37 }
 0x272   : > { %v1814_v48 = vadd.f32 %v1813_v43, %v1812_v30  ;;  %v1375_v5 = vrot.slane %v1374_v31, 1  ;;  %v5033_v22 = vpop.f32.mrb[33].mxu1  ;;  %3981 = vpow2.f32 %v1657_v38  ;;  %v1386_v11 = vsel %vm1268_vm0, %v4981_v4, -inf }
 0x273   : > { %3983 = vpow2.f32 %v1659_v20  ;;  %v1577_v52 = vsub.f32 %v4927_v53, %v1367_v39  ;;  %v1578_v12 = vsub.f32 %v4923_v21, %v1367_v39  ;;  %v1382_v8 = vrot.slane %v1381_v14, 2 }
 0x274   : > { %v1815_v9 = vrot.slane %v1814_v48, 4  ;;  %v1376_v26 = vmax.f32 %v1374_v31, %v1375_v5  ;;  %v1388_v30 = vmax.f32 %v1386_v11, %v1387_v7  ;;  %v1396_v15 = vsel %vm1268_vm0, %v4993_v18, -inf }
 0x275   : > { %v5042_v16 = vpop.f32.mrb[34].mxu1  ;;  %v1661_v6 = vmul.f32 1.442695, %v1577_v52  ;;  %v1663_v43 = vmul.f32 1.442695, %v1578_v12  ;;  %v1395_v38 = vsel %vm1268_vm0, %v5002_v46, -inf  ;;  %v1383_v31 = vmax.f32 %v1381_v14, %v1382_v8 }
 0x276   : > { %v5044_v36 = vadd.f32 %v1815_v9, %v1814_v48  ;;  %v5048_v37 = vpop.f32.mrb[35].mxu1  ;;  %v1579_v53 = vsub.f32 %v4949_v49, %v1376_v26  ;;  %v1580_v21 = vsub.f32 %v4937_v33, %v1376_v26  ;;  %v1389_v7 = vrot.slane %v1388_v30, 4 }
 0x277   : > { %v5052_v20 = vpop.eup %3977  ;;  %3985 = vpow2.f32 %v1661_v6  ;;  %v1397_v48 = vmax.f32 %v1395_v38, %v1396_v15  ;;  %v1754_v5 = vrot.slane %v4907_v17, 2  ;;  %v1384_v14 = vrot.slane %v1383_v31, 1 }
 0x278   : > { %5987 = vst [vmem:[#allocation77_spill] sm:$0xff] %v5052_v20  ;;  %v5056_v11 = vpop.eup %3979  ;;  %v1821_v9 = vsel %vm1268_vm0, %v5052_v20, 0.0  ;;  %3987 = vpow2.f32 %v1663_v43  ;;  %v1665_v52 = vmul.f32 1.442695, %v1579_v53  ;;  %v1667_v49 = vmul.f32 1.442695, %v1580_v21 }
 0x279   : > { %5988 = vst [vmem:[#allocation78_spill] sm:$0xff] %v5056_v11  ;;  %v5060_v12 = vpop.f32.mrb[36].mxu1  ;;  %v1822_v33 = vsel %vm1268_vm0, %v5056_v11, 0.0  ;;  %v1390_v26 = vmax.f32 %v1388_v30, %v1389_v7  ;;  %v1398_v8 = vrot.slane %v1397_v48, 4  ;;  %v1755_v38 = vadd.f32 %v1754_v5, %v4907_v17 }
 0x27a   : > { %v5064_v6 = vpop.f32.mrb[37].mxu1  ;;  %v1823_v15 = vadd.f32 %v1822_v33, %v1821_v9  ;;  %3989 = vpow2.f32 %v1665_v52  ;;  %v1405_v39 = vsel %vm1268_vm0, %v5012_v10, -inf  ;;  %v1385_v43 = vmax.f32 %v1383_v31, %v1384_v14 }
 0x27b   : > { %3991 = vpow2.f32 %v1667_v49  ;;  %v1391_v53 = vrot.slane %v1390_v26, 2  ;;  %v1399_v21 = vmax.f32 %v1397_v48, %v1398_v8  ;;  %v1756_v58 = vrot.slane %v1755_v38, 1 }
 0x27c   : > { %v5069_v54 = vpop.eup %3981  ;;  %v1824_v2 = vrot.slane %v1823_v15, 4  ;;  %v1404_v30 = vsel %vm1268_vm0, %v5016_v3, -inf  ;;  %v1763_v7 = vrot.slane %v4929_v13, 2  ;;  %v1581_v31 = vsub.f32 %v4964_v28, %v1385_v43 }
 0x27d   : > { %5989 = vst [vmem:[#allocation79_spill] sm:$0xff] %v5069_v54  ;;  %v5074_v9 = vpop.f32.mrb[38].mxu1  ;;  %v5076_v52 = vpop.eup %3983  ;;  %v1830_v17 = vsel %vm1268_vm0, %v5069_v54, 0.0  ;;  %v1582_v48 = vsub.f32 %v4958_v23, %v1385_v43  ;;  %v1392_v5 = vmax.f32 %v1390_v26, %v1391_v53  ;;  %v1400_v8 = vrot.slane %v1399_v21, 2 }
 0x27e   : > { %5990 = vst [vmem:[#allocation80_spill] sm:$0xff] %v5076_v52  ;;  %v5082_v49 = vpop.f32.mrb[39].mxu1  ;;  %v5084_v33 = vadd.f32 %v1824_v2, %v1823_v15  ;;  %v1831_v14 = vsel %vm1268_vm0, %v5076_v52, 0.0  ;;  %v1757_v62 = vadd.f32 %v1756_v58, %v1755_v38  ;;  %v1669_v60 = vmul.f32 1.442695, %v1581_v31 }
 0x27f   : > { %v1832_v56 = vadd.f32 %v1831_v14, %v1830_v17  ;;  %v1671_v11 = vmul.f32 1.442695, %v1582_v48  ;;  %v1393_v20 = vrot.slane %v1392_v5, 1  ;;  %v1401_v50 = vmax.f32 %v1399_v21, %v1400_v8 }
 0x280   : > { %3993 = vrcp.f32 %v1757_v62  ;;  %v1406_v28 = vmax.f32 %v1404_v30, %v1405_v39  ;;  %v1764_v43 = vadd.f32 %v1763_v7, %v4929_v13 }
 0x281   : > { %v5089_v23 = vpop.f32.mrb[40].mxu1  ;;  %v5091_v26 = vpop.eup %3985  ;;  %v1833_v2 = vrot.slane %v1832_v56, 4  ;;  %3995 = vpow2.f32 %v1669_v60  ;;  %v1394_v15 = vmax.f32 %v1392_v5, %v1393_v20  ;;  %v1402_v21 = vrot.slane %v1401_v50, 1 }
 0x282   : > { %5991 = vst [vmem:[#allocation81_spill] sm:$0xff] %v5091_v26  ;;  %v5094_v53 = vpop.f32.mrb[41].mxu1  ;;  %v5096_v58 = vpop.eup %3987  ;;  %v1839_v38 = vsel %vm1268_vm0, %v5091_v26, 0.0  ;;  %3997 = vpow2.f32 %v1671_v11  ;;  %v1407_v62 = vrot.slane %v1406_v28, 4  ;;  %v1765_v48 = vrot.slane %v1764_v43, 1 }
 0x283   : > { %5992 = vst [vmem:[#allocation82_spill] sm:$0xff] %v5096_v58  ;;  %v5100_v39 = vadd.f32 %v1833_v2, %v1832_v56  ;;  %v1840_v30 = vsel %vm1268_vm0, %v5096_v58, 0.0  ;;  %v1583_v60 = vsub.f32 %v4981_v4, %v1394_v15  ;;  %v1584_v20 = vsub.f32 %v4976_v27, %v1394_v15 }
 0x284   : > { %v5106_v13 = vpop.eup %3989  ;;  %v1841_v7 = vadd.f32 %v1840_v30, %v1839_v38  ;;  %v1403_v17 = vmax.f32 %v1401_v50, %v1402_v21  ;;  %v1408_v31 = vmax.f32 %v1406_v28, %v1407_v62  ;;  %v1766_v62 = vadd.f32 %v1765_v48, %v1764_v43 }
 0x285   : > { %5993 = vst [vmem:[#allocation83_spill] sm:$0xff] %v5106_v13  ;;  %v5108_v5 = vpop.f32.mrb[42].mxu1  ;;  %v5110_v11 = vpop.eup %3991  ;;  %v1848_v14 = vsel %vm1268_vm0, %v5106_v13, 0.0  ;;  %v1673_v8 = vmul.f32 1.442695, %v1583_v60  ;;  %v1413_v43 = vsel %vm1268_vm0, %v5033_v22, -inf }
 0x286   : > { %5994 = vst [vmem:[#allocation84_spill] sm:$0xff] %v5110_v11  ;;  %v1675_v2 = vmul.f32 1.442695, %v1584_v20  ;;  %v1842_v4 = vrot.slane %v1841_v7, 4  ;;  %v1849_v27 = vsel %vm1268_vm0, %v5110_v11, 0.0  ;;  %v1585_v15 = vsub.f32 %v5002_v46, %v1403_v17  ;;  %v5119_v28 = vpop.f32.mrb[43].mxu1 }
 0x287   : > { %v1586_v50 = vsub.f32 %v4993_v18, %v1403_v17  ;;  %v1850_v38 = vadd.f32 %v1849_v27, %v1848_v14  ;;  %3999 = vpow2.f32 %v1673_v8  ;;  %v1409_v21 = vrot.slane %v1408_v31, 2 }
 0x288   : > { %v5121_v30 = vadd.f32 %v1842_v4, %v1841_v7  ;;  %4001 = vpow2.f32 %v1675_v2  ;;  %v1677_v56 = vmul.f32 1.442695, %v1585_v15  ;;  %v1414_v46 = vsel %vm1268_vm0, %v5031_v45, -inf }
 0x289   : > { %v1679_v60 = vmul.f32 1.442695, %v1586_v50  ;;  %v5123_v20 = vpop.f32.mrb[44].mxu1  ;;  %v1851_v54 = vrot.slane %v1850_v38, 4  ;;  %v1410_v13 = vmax.f32 %v1408_v31, %v1409_v21  ;;  %4003 = vrcp.f32 %v1766_v62 }
 0x28a   : > { %v5127_v18 = vpop.f32.mrb[45].mxu1  ;;  %v3994_v17 = vpop.eup %3993  ;;  %4005 = vpow2.f32 %v1677_v56  ;;  %v5995_v7 = vrot.slane %v4945_v0, 2  ;;  %v1415_v50 = vmax.f32 %v1413_v43, %v1414_v46 }
 0x28b   : > { %v5135_v8 = vpop.eup %3995  ;;  %v5137_v31 = vadd.f32 %v1851_v54, %v1850_v38  ;;  %4007 = vpow2.f32 %v1679_v60  ;;  %v2069_v2 = vmul.f32 %v3994_v17, %v4881_v25  ;;  %v1411_v4 = vrot.slane %v1410_v13, 1 }
 0x28c   : > { %v1773_v48 = vadd.f32 %v5995_v7, %v4945_v0  ;;  %5996 = vst [vmem:[#allocation85_spill] sm:$0xff] %v5135_v8  ;;  %v5140_v27 = vpop.eup %3997  ;;  %v1857_v56 = vsel %vm1268_vm0, %v5135_v8, 0.0  ;;  %v2070_v15 = vmul.f32 %v3994_v17, %v4885_v1  ;;  %v1423_v25 = vsel %vm1268_vm0, %v5042_v16, -inf }
 0x28d   : > { %5997 = vst [vmem:[#allocation86_spill] sm:$0xff] %v5140_v27  ;;  %v5145_v62 = vpop.f32.mrb[46].mxu1  ;;  %v1858_v54 = vsel %vm1268_vm0, %v5140_v27, 0.0  ;;  %2135 = vperm.xlu0 %3815, %v2069_v2   ;;  %v1412_v38 = vmax.f32 %v1410_v13, %v1411_v4  ;;  %v1416_v14 = vrot.slane %v1415_v50, 4  ;;  %v1422_v1 = vsel %vm1268_vm0, %v5048_v37, -inf }
 0x28e   : > { %v1774_v21 = vrot.slane %v1773_v48, 1  ;;  %v5152_v60 = vpop.f32.mrb[47].mxu1  ;;  %v1859_v7 = vadd.f32 %v1858_v54, %v1857_v56  ;;  %v1424_v43 = vmax.f32 %v1422_v1, %v1423_v25  ;;  %v5998_v2 = vrot.slane %v4970_v29, 2 }
 0x28f   : > { %v1587_v46 = vsub.f32 %v5016_v3, %v1412_v38  ;;  %v1588_v17 = vsub.f32 %v5012_v10, %v1412_v38  ;;  %v1417_v0 = vmax.f32 %v1415_v50, %v1416_v14  ;;  %v1432_v56 = vsel %vm1268_vm0, %v5060_v12, -inf }
 0x290   : > { %v1775_v8 = vadd.f32 %v1774_v21, %v1773_v48  ;;  %v1782_v13 = vadd.f32 %v5998_v2, %v4970_v29  ;;  %v1860_v4 = vrot.slane %v1859_v7, 4  ;;  %v1425_v3 = vrot.slane %v1424_v43, 4 }
 0x291   : > { %v5163_v54 = vpop.f32.mrb[48].mxu1  ;;  %v5165_v48 = vpop.eup %3999  ;;  %v1681_v21 = vmul.f32 1.442695, %v1587_v46  ;;  %v1683_v27 = vmul.f32 1.442695, %v1588_v17  ;;  %2140 = vperm.xlu0 %3815, %v2070_v15   ;;  %v1418_v14 = vrot.slane %v1417_v0, 2 }
 0x292   : > { %4009 = vrcp.f32 %v1775_v8  ;;  %5999 = vst [vmem:[#allocation87_spill] sm:$0xff] %v5165_v48  ;;  %v1783_v10 = vrot.slane %v1782_v13, 1  ;;  %v5167_v38 = vpop.eup %4001  ;;  %v5169_v25 = vadd.f32 %v1860_v4, %v1859_v7  ;;  %v1866_v29 = vsel %vm1268_vm0, %v5165_v48, 0.0  ;;  %v5175_v50 = vpop.f32.mrb[49].mxu1 }
 0x293   : > { %6000 = vst [vmem:[#allocation88_spill] sm:$0xff] %v5167_v38  ;;  %v1431_v8 = vsel %vm1268_vm0, %v5064_v6, -inf  ;;  %v4004_v1 = vpop.eup %4003  ;;  %v1867_v46 = vsel %vm1268_vm0, %v5167_v38, 0.0  ;;  %4011 = vpow2.f32 %v1681_v21  ;;  %v1426_v15 = vmax.f32 %v1424_v43, %v1425_v3 }
 0x294   : > { %6001 = vst [vmem:[#allocation89_spill] sm:$0xff] %v5169_v25  ;;  %v1784_v17 = vadd.f32 %v1783_v10, %v1782_v13  ;;  %v5179_v2 = vpop.eup %4005  ;;  %v1868_v4 = vadd.f32 %v1867_v46, %v1866_v29  ;;  %4013 = vpow2.f32 %v1683_v27  ;;  %v2071_v48 = vmul.f32 %v4004_v1, %v4897_v51 }
 0x295   : > { %6002 = vst [vmem:[#allocation90_spill] sm:$0xff] %v5179_v2  ;;  %v5183_v11 = vpop.f32.mrb[50].mxu1  ;;  %v5185_v58 = vpop.eup %4007  ;;  %v1875_v26 = vsel %vm1268_vm0, %v5179_v2, 0.0  ;;  %v1419_v52 = vmax.f32 %v1417_v0, %v1418_v14  ;;  %v2072_v21 = vmul.f32 %v4004_v1, %v4899_v59  ;;  %v1427_v43 = vrot.slane %v1426_v15, 2 }
 0x296   : > { %6003 = vst [vmem:[#allocation91_spill] sm:$0xff] %v5185_v58  ;;  %v5190_v13 = vpop.f32.mrb[51].mxu1  ;;  %v1869_v3 = vrot.slane %v1868_v4, 4  ;;  %v1876_v10 = vsel %vm1268_vm0, %v5185_v58, 0.0  ;;  %2145 = vperm.xlu1 %3816, %v2071_v48   ;;  %4015 = vrcp.f32 %v1784_v17  ;;  %v1433_v51 = vmax.f32 %v1431_v8, %v1432_v56 }
 0x297   : > { %v1877_v27 = vadd.f32 %v1876_v10, %v1875_v26  ;;  %v1420_v29 = vrot.slane %v1419_v52, 1  ;;  %v1428_v46 = vmax.f32 %v1426_v15, %v1427_v43  ;;  %v6004_v7 = vrot.slane %v4987_v44, 2 }
 0x298   : > { %v5197_v0 = vadd.f32 %v1869_v3, %v1868_v4  ;;  %v1434_v59 = vrot.slane %v1433_v51, 4  ;;  %v1441_v14 = vsel %vm1268_vm0, %v5074_v9, -inf  ;;  %v1440_v1 = vsel %vm1268_vm0, %v5082_v49, -inf }
 0x299   : > { %v1791_v2 = vadd.f32 %v6004_v7, %v4987_v44  ;;  %v5203_v58 = vpop.f32.mrb[52].mxu1  ;;  %v1878_v48 = vrot.slane %v1877_v27, 4  ;;  %v1421_v56 = vmax.f32 %v1419_v52, %v1420_v29  ;;  %v1429_v26 = vrot.slane %v1428_v46, 1 }
 0x29a   : > { %6005 = vst [vmem:[#allocation92_spill] sm:$0xff] %v5203_v58  ;;  %v5205_v15 = vpop.f32.mrb[53].mxu1  ;;  %2150 = vperm.xlu1 %3816, %v2072_v21   ;;  %v1435_v7 = vmax.f32 %v1433_v51, %v1434_v59  ;;  %v1442_v4 = vmax.f32 %v1440_v1, %v1441_v14  ;;  %v6007_v43 = vrot.slane %v5010_v32, 2 }
 0x29b   : > { %v1792_v8 = vrot.slane %v1791_v2, 1  ;;  %6006 = vst [vmem:[#allocation93_spill] sm:$0xff] %v5205_v15  ;;  %v5211_v10 = vadd.f32 %v1878_v48, %v1877_v27  ;;  %v1589_v38 = vsub.f32 %v5033_v22, %v1421_v56  ;;  %v1590_v52 = vsub.f32 %v5031_v45, %v1421_v56 }
 0x29c   : > { %v4010_v17 = vpop.eup %4009  ;;  %v1800_v3 = vadd.f32 %v6007_v43, %v5010_v32  ;;  %v1430_v25 = vmax.f32 %v1428_v46, %v1429_v26  ;;  %v1436_v58 = vrot.slane %v1435_v7, 2  ;;  %v1443_v14 = vrot.slane %v1442_v4, 4 }
 0x29d   : > { %v2073_v29 = vmul.f32 %v4010_v17, %v4913_v41  ;;  %v2074_v15 = vmul.f32 %v4010_v17, %v4917_v24  ;;  %v1793_v44 = vadd.f32 %v1792_v8, %v1791_v2  ;;  %v5217_v21 = vpop.f32.mrb[54].mxu1  ;;  %v5219_v51 = vpop.eup %4011  ;;  %v1685_v32 = vmul.f32 1.442695, %v1589_v38 }
 0x29e   : > { %v1687_v27 = vmul.f32 1.442695, %v1590_v52  ;;  %v5222_v22 = vpop.eup %4013  ;;  %v1884_v41 = vsel %vm1268_vm0, %v5219_v51, 0.0  ;;  %v1591_v45 = vsub.f32 %v5048_v37, %v1430_v25  ;;  %v1592_v24 = vsub.f32 %v5042_v16, %v1430_v25  ;;  %v5228_v46 = vpop.f32.mrb[55].mxu1 }
 0x29f   : > { %2155 = vperm.xlu0 %3815, %v2073_v29   ;;  %2160 = vperm.xlu1 %3816, %v2074_v15   ;;  %v1437_v2 = vmax.f32 %v1435_v7, %v1436_v58  ;;  %v1885_v1 = vsel %vm1268_vm0, %v5222_v22, 0.0  ;;  %4017 = vpow2.f32 %v1685_v32  ;;  %v1444_v38 = vmax.f32 %v1442_v4, %v1443_v14 }
 0x2a0   : > { %v1801_v48 = vrot.slane %v1800_v3, 1  ;;  %v4016_v56 = vpop.eup %4015  ;;  %v1886_v26 = vadd.f32 %v1885_v1, %v1884_v41  ;;  %4019 = vpow2.f32 %v1687_v27  ;;  %v1689_v8 = vmul.f32 1.442695, %v1591_v45 }
 0x2a1   : > { %v1691_v17 = vmul.f32 1.442695, %v1592_v24  ;;  %v5232_v43 = vpop.f32.mrb[56].mxu1  ;;  %v2075_v37 = vmul.f32 %v4016_v56, %v4935_v35  ;;  %v1438_v16 = vrot.slane %v1437_v2, 1  ;;  %v2076_v58 = vmul.f32 %v4016_v56, %v4939_v61 }
 0x2a2   : > { %4021 = vrcp.f32 %v1793_v44  ;;  %v5236_v25 = vpop.f32.mrb[57].mxu1  ;;  %v1887_v15 = vrot.slane %v1886_v26, 4  ;;  %v1445_v7 = vrot.slane %v1444_v38, 2  ;;  %v1802_v4 = vadd.f32 %v1801_v48, %v1800_v3 }
 0x2a3   : > { %4023 = vpow2.f32 %v1689_v8  ;;  %2165 = vperm.xlu0 %3815, %v2075_v37   ;;  %v1439_v52 = vmax.f32 %v1437_v2, %v1438_v16  ;;  %2170 = vperm.xlu1 %3816, %v2076_v58   ;;  %v1450_v29 = vsel %vm1268_vm0, %v5089_v23, -inf  ;;  %v1449_v35 = vsel %vm1268_vm0, %v5094_v53, -inf }
 0x2a4   : > { %4025 = vpow2.f32 %v1691_v17  ;;  %v5242_v32 = vadd.f32 %v1887_v15, %v1886_v26  ;;  %v1446_v61 = vmax.f32 %v1444_v38, %v1445_v7  ;;  %v1451_v44 = vmax.f32 %v1449_v35, %v1450_v29 }
 0x2a5   : > { %4027 = vrcp.f32 %v1802_v4  ;;  %v5244_v27 = vpop.f32.mrb[58].mxu1  ;;  %v1593_v14 = vsub.f32 %v5064_v6, %v1439_v52  ;;  %v1594_v3 = vsub.f32 %v5060_v12, %v1439_v52  ;;  %v6008_v41 = vrot.slane %v5027_v34, 2 }
 0x2a6   : > { %v1459_v24 = vsel %vm1268_vm0, %v5108_v5, -inf  ;;  %v5253_v2 = vpop.f32.mrb[59].mxu1  ;;  %v1447_v38 = vrot.slane %v1446_v61, 1  ;;  %v1452_v48 = vrot.slane %v1451_v44, 4  ;;  %v1458_v56 = vsel %vm1268_vm0, %v5119_v28, -inf }
 0x2a7   : > { %v1809_v45 = vadd.f32 %v6008_v41, %v5027_v34  ;;  %v1693_v26 = vmul.f32 1.442695, %v1593_v14  ;;  %v1695_v6 = vmul.f32 1.442695, %v1594_v3  ;;  %v1460_v12 = vmax.f32 %v1458_v56, %v1459_v24 }
 0x2a8   : > { %v1448_v17 = vmax.f32 %v1446_v61, %v1447_v38  ;;  %v1453_v37 = vmax.f32 %v1451_v44, %v1452_v48  ;;  %v6009_v34 = vrot.slane %v5044_v36, 2  ;;  %v1468_v58 = vsel %vm1268_vm0, %v5123_v20, -inf }
 0x2a9   : > { %v1810_v8 = vrot.slane %v1809_v45, 1  ;;  %v5263_v15 = vpop.f32.mrb[60].mxu1  ;;  %v5265_v7 = vpop.eup %4017  ;;  %4029 = vpow2.f32 %v1693_v26  ;;  %v1461_v52 = vrot.slane %v1460_v12, 4  ;;  %v1467_v29 = vsel %vm1268_vm0, %v5127_v18, -inf }
 0x2aa   : > { %v1818_v16 = vadd.f32 %v6009_v34, %v5044_v36  ;;  %v5269_v35 = vpop.f32.mrb[61].mxu1  ;;  %v5271_v61 = vpop.eup %4019  ;;  %v1893_v36 = vsel %vm1268_vm0, %v5265_v7, 0.0  ;;  %4031 = vpow2.f32 %v1695_v6  ;;  %v1595_v44 = vsub.f32 %v5082_v49, %v1448_v17 }
 0x2ab   : > { %v1811_v4 = vadd.f32 %v1810_v8, %v1809_v45  ;;  %6010 = vst [vmem:[#allocation94_spill] sm:$0xff] %v5271_v61  ;;  %v1596_v14 = vsub.f32 %v5074_v9, %v1448_v17  ;;  %v1894_v41 = vsel %vm1268_vm0, %v5271_v61, 0.0  ;;  %v1454_v45 = vrot.slane %v1453_v37, 2 }
 0x2ac   : > { %v4022_v3 = vpop.eup %4021  ;;  %v1462_v24 = vmax.f32 %v1460_v12, %v1461_v52  ;;  %v1895_v48 = vadd.f32 %v1894_v41, %v1893_v36  ;;  %v1697_v26 = vmul.f32 1.442695, %v1595_v44  ;;  %v1819_v36 = vrot.slane %v1818_v16, 1 }
 0x2ad   : > { %4033 = vrcp.f32 %v1811_v4  ;;  %v5279_v38 = vpop.eup %4023  ;;  %v2077_v56 = vmul.f32 %v4022_v3, %v4953_v42  ;;  %v1699_v8 = vmul.f32 1.442695, %v1596_v14  ;;  %v5282_v34 = vpop.f32.mrb[62].mxu1  ;;  %v2078_v49 = vmul.f32 %v4022_v3, %v4960_v47 }
 0x2ae   : > { %6011 = vst [vmem:[#allocation95_spill] sm:$0xff] %v5279_v38  ;;  %v5284_v6 = vpop.eup %4025  ;;  %v1902_v9 = vsel %vm1268_vm0, %v5279_v38, 0.0  ;;  %v1455_v17 = vmax.f32 %v1453_v37, %v1454_v45  ;;  %v1463_v1 = vrot.slane %v1462_v24, 2  ;;  %v5289_v4 = vpop.f32.mrb[63].mxu1  ;;  %v1896_v52 = vrot.slane %v1895_v48, 4 }
 0x2af   : > { %v4028_v12 = vpop.eup %4027  ;;  %v1903_v42 = vsel %vm1268_vm0, %v5284_v6, 0.0  ;;  %2175 = vperm.xlu0 %3815, %v2077_v56   ;;  %4035 = vpow2.f32 %v1697_v26  ;;  %2180 = vperm.xlu1 %3816, %v2078_v49   ;;  %v1820_v3 = vadd.f32 %v1819_v36, %v1818_v16  ;;  %v1469_v61 = vmax.f32 %v1467_v29, %v1468_v58 }
 0x2b0   : > { %v1904_v44 = vadd.f32 %v1903_v42, %v1902_v9  ;;  %4037 = vpow2.f32 %v1699_v8  ;;  %v2079_v14 = vmul.f32 %v4028_v12, %v4978_v57  ;;  %v1456_v41 = vrot.slane %v1455_v17, 1 }
 0x2b1   : > { %v5294_v59 = vadd.f32 %v1896_v52, %v1895_v48  ;;  %v2080_v47 = vmul.f32 %v4028_v12, %v4983_v40  ;;  %v1464_v37 = vmax.f32 %v1462_v24, %v1463_v1  ;;  %v6012_v56 = vrot.slane %v5084_v33, 2 }
 0x2b2   : > { %v1905_v45 = vrot.slane %v1904_v44, 4  ;;  %v1457_v38 = vmax.f32 %v1455_v17, %v1456_v41  ;;  %4039 = vrcp.f32 %v1820_v3  ;;  %v1477_v57 = vsel %vm1268_vm0, %v5145_v62, -inf }
 0x2b3   : > { %v1827_v26 = vadd.f32 %v6012_v56, %v5084_v33  ;;  %2185 = vperm.xlu0 %3815, %v2079_v14   ;;  %v1465_v8 = vrot.slane %v1464_v37, 1  ;;  %v5303_v48 = vpop.eup %4029  ;;  %2190 = vperm.xlu1 %3816, %v2080_v47   ;;  %v1470_v58 = vrot.slane %v1469_v61, 4  ;;  %v1476_v17 = vsel %vm1268_vm0, %v5152_v60, -inf }
 0x2b4   : > { %v5305_v40 = vadd.f32 %v1905_v45, %v1904_v44  ;;  %v1597_v1 = vsub.f32 %v5094_v53, %v1457_v38  ;;  %v1598_v16 = vsub.f32 %v5089_v23, %v1457_v38  ;;  %v5309_v29 = vpop.eup %4031  ;;  %v1911_v33 = vsel %vm1268_vm0, %v5303_v48, 0.0 }
 0x2b5   : > { %v1466_v24 = vmax.f32 %v1464_v37, %v1465_v8  ;;  %v1828_v49 = vrot.slane %v1827_v26, 1  ;;  %v1912_v53 = vsel %vm1268_vm0, %v5309_v29, 0.0  ;;  %v1471_v47 = vmax.f32 %v1469_v61, %v1470_v58 }
 0x2b6   : > { %v1701_v42 = vmul.f32 1.442695, %v1597_v1  ;;  %v1703_v23 = vmul.f32 1.442695, %v1598_v16  ;;  %v1913_v38 = vadd.f32 %v1912_v53, %v1911_v33  ;;  %v6013_v61 = vrot.slane %v5100_v39, 2 }
 0x2b7   : > { %v4034_v12 = vpop.eup %4033  ;;  %v1599_v44 = vsub.f32 %v5119_v28, %v1466_v24  ;;  %v1600_v14 = vsub.f32 %v5108_v5, %v1466_v24  ;;  %v1829_v37 = vadd.f32 %v1828_v49, %v1827_v26  ;;  %v1472_v28 = vrot.slane %v1471_v47, 2 }
 0x2b8   : > { %v2081_v36 = vmul.f32 %v4034_v12, %v4995_v19  ;;  %4041 = vpow2.f32 %v1701_v42  ;;  %v2082_v41 = vmul.f32 %v4034_v12, %v5004_v55  ;;  %v1914_v45 = vrot.slane %v1913_v38, 4  ;;  %v2761_v42 = vld [vmem:[%s5820_s5] sm:$0xff] }
 0x2b9   : > { %v5322_v3 = vpop.eup %4035  ;;  %4043 = vpow2.f32 %v1703_v23  ;;  %v1705_v56 = vmul.f32 1.442695, %v1599_v44  ;;  %v1707_v8 = vmul.f32 1.442695, %v1600_v14  ;;  %v1478_v5 = vmax.f32 %v1476_v17, %v1477_v57  ;;  %3605 = vmatprep.subr.mxu1 %v2761_v42 }
 0x2ba   : > { %2195 = vperm.xlu0 %3815, %v2081_v36   ;;  %v5324_v1 = vpop.eup %4037  ;;  %v1920_v19 = vsel %vm1268_vm0, %v5322_v3, 0.0  ;;  %2200 = vperm.xlu1 %3816, %v2082_v41   ;;  %4045 = vrcp.f32 %v1829_v37  ;;  %v5328_v16 = vadd.f32 %v1914_v45, %v1913_v38  ;;  %v1836_v26 = vadd.f32 %v6013_v61, %v5100_v39  ;;  %v6014_v36 = vld [vmem:[#allocation76_spill] sm:$0xff] }
 0x2bb   : > { %v1921_v55 = vsel %vm1268_vm0, %v5324_v1, 0.0  ;;  %4047 = vpow2.f32 %v1705_v56  ;;  %v1473_v33 = vmax.f32 %v1471_v47, %v1472_v28  ;;  %v1479_v24 = vrot.slane %v1478_v5, 4  ;;  %3606 = vmatpush3.msra.mxu1 %v2761_v42 }
 0x2bc   : > { %v1922_v58 = vadd.f32 %v1921_v55, %v1920_v19  ;;  %4049 = vpow2.f32 %v1707_v8  ;;  %v4040_v49 = vpop.eup %4039  ;;  %v1837_v53 = vrot.slane %v1836_v26, 1  ;;  %v1486_v57 = vsel %vm1268_vm0, %v5163_v54, -inf }
 0x2bd   : > { %v1485_v17 = vsel %vm1268_vm0, %v5175_v50, -inf  ;;  %v2083_v39 = vmul.f32 %v4040_v49, %v5018_v63  ;;  %v1474_v38 = vrot.slane %v1473_v33, 1  ;;  %v2084_v44 = vmul.f32 %v4040_v49, %v6014_v36 }
 0x2be   : > { %v1923_v23 = vrot.slane %v1922_v58, 4  ;;  %v1480_v14 = vmax.f32 %v1478_v5, %v1479_v24  ;;  %v1838_v41 = vadd.f32 %v1837_v53, %v1836_v26  ;;  %v1487_v47 = vmax.f32 %v1485_v17, %v1486_v57 }
 0x2bf   : > { %v6015_v37 = vrot.slane %v5121_v30, 2  ;;  %2205 = vperm.xlu0 %3815, %v2083_v39   ;;  %v1475_v8 = vmax.f32 %v1473_v33, %v1474_v38  ;;  %2210 = vperm.xlu1 %3816, %v2084_v44   ;;  %v1495_v63 = vsel %vm1268_vm0, %v5183_v11, -inf  ;;  %v1494_v19 = vsel %vm1268_vm0, %v5190_v13, -inf }
 0x2c0   : > { %v5348_v56 = vadd.f32 %v1923_v23, %v1922_v58  ;;  %v1481_v28 = vrot.slane %v1480_v14, 2  ;;  %4051 = vrcp.f32 %v1838_v41  ;;  %v1488_v5 = vrot.slane %v1487_v47, 4 }
 0x2c1   : > { %v1845_v45 = vadd.f32 %v6015_v37, %v5121_v30  ;;  %v1601_v26 = vsub.f32 %v5127_v18, %v1475_v8  ;;  %v1602_v58 = vsub.f32 %v5123_v20, %v1475_v8  ;;  %v1496_v33 = vmax.f32 %v1494_v19, %v1495_v63  ;;  %v6016_v20 = vld [vmem:[#allocation77_spill] sm:$0xff]  ;;  %v6017_v8 = vld [vmem:[#allocation78_spill] sm:$0xff] }
 0x2c2   : > { %v5354_v61 = vpop.eup %4041  ;;  %v1482_v53 = vmax.f32 %v1480_v14, %v1481_v28  ;;  %v1489_v57 = vmax.f32 %v1487_v47, %v1488_v5 }
 0x2c3   : > { %v1846_v55 = vrot.slane %v1845_v45, 1  ;;  %v5359_v24 = vpop.eup %4043  ;;  %v1929_v49 = vsel %vm1268_vm0, %v5354_v61, 0.0  ;;  %v1709_v39 = vmul.f32 1.442695, %v1601_v26  ;;  %v1711_v38 = vmul.f32 1.442695, %v1602_v58 }
 0x2c4   : > { %v4046_v42 = vpop.eup %4045  ;;  %v1930_v23 = vsel %vm1268_vm0, %v5359_v24, 0.0  ;;  %v1497_v36 = vrot.slane %v1496_v33, 4  ;;  %v1483_v37 = vrot.slane %v1482_v53, 1  ;;  %v1490_v47 = vrot.slane %v1489_v57, 2 }
 0x2c5   : > { %v1847_v17 = vadd.f32 %v1846_v55, %v1845_v45  ;;  %v5365_v44 = vpop.eup %4047  ;;  %v1931_v18 = vadd.f32 %v1930_v23, %v1929_v49  ;;  %v2085_v41 = vmul.f32 %v4046_v42, %v6016_v20  ;;  %v2086_v63 = vmul.f32 %v4046_v42, %v6017_v8 }
 0x2c6   : > { %v5369_v19 = vpop.eup %4049  ;;  %v1938_v14 = vsel %vm1268_vm0, %v5365_v44, 0.0  ;;  %4053 = vpow2.f32 %v1709_v39  ;;  %v1498_v45 = vmax.f32 %v1496_v33, %v1497_v36  ;;  %v1484_v55 = vmax.f32 %v1482_v53, %v1483_v37 }
 0x2c7   : > { %v1932_v28 = vrot.slane %v1931_v18, 4  ;;  %v1939_v5 = vsel %vm1268_vm0, %v5369_v19, 0.0  ;;  %4055 = vpow2.f32 %v1711_v38  ;;  %2215 = vperm.xlu0 %3815, %v2085_v41   ;;  %2220 = vperm.xlu1 %3816, %v2086_v63   ;;  %v1491_v58 = vmax.f32 %v1489_v57, %v1490_v47  ;;  %v6019_v41 = vld [vmem:[#allocation92_spill] sm:$0xff] }
 0x2c8   : > { %v1940_v26 = vadd.f32 %v1939_v5, %v1938_v14  ;;  %4057 = vrcp.f32 %v1847_v17  ;;  %v1499_v49 = vrot.slane %v1498_v45, 2  ;;  %v1603_v23 = vsub.f32 %v5152_v60, %v1484_v55  ;;  %v6020_v60 = vld [vmem:[#allocation79_spill] sm:$0xff] }
 0x2c9   : > { %v5375_v42 = vadd.f32 %v1932_v28, %v1931_v18  ;;  %v1604_v39 = vsub.f32 %v5145_v62, %v1484_v55  ;;  %v6018_v33 = vrot.slane %v5137_v31, 2  ;;  %v1492_v8 = vrot.slane %v1491_v58, 1  ;;  %v6021_v28 = vld [vmem:[#allocation80_spill] sm:$0xff] }
 0x2ca   : > { %v1941_v20 = vrot.slane %v1940_v26, 4  ;;  %v1500_v38 = vmax.f32 %v1498_v45, %v1499_v49  ;;  %v1504_v53 = vsel %vm1268_vm0, %v6019_v41, -inf  ;;  %v4052_v37 = vpop.eup %4051  ;;  %v1713_v17 = vmul.f32 1.442695, %v1603_v23  ;;  %v6022_v45 = vld [vmem:[#allocation93_spill] sm:$0xff] }
 0x2cb   : > { %v1854_v36 = vadd.f32 %v6018_v33, %v5137_v31  ;;  %v1715_v18 = vmul.f32 1.442695, %v1604_v39  ;;  %v2087_v62 = vmul.f32 %v4052_v37, %v6020_v60  ;;  %v1493_v47 = vmax.f32 %v1491_v58, %v1492_v8 }
 0x2cc   : > { %v5385_v14 = vadd.f32 %v1941_v20, %v1940_v26  ;;  %v2088_v5 = vmul.f32 %v4052_v37, %v6021_v28  ;;  %4059 = vpow2.f32 %v1713_v17  ;;  %v1501_v31 = vrot.slane %v1500_v38, 1  ;;  %v6023_v20 = vld [vmem:[#allocation89_spill] sm:$0xff] }
 0x2cd   : > { %v1855_v63 = vrot.slane %v1854_v36, 1  ;;  %v1503_v49 = vsel %vm1268_vm0, %v6022_v45, -inf  ;;  %4061 = vpow2.f32 %v1715_v18  ;;  %2225 = vperm.xlu0 %3815, %v2087_v62   ;;  %v1605_v23 = vsub.f32 %v5175_v50, %v1493_v47 }
 0x2ce   : > { %v1606_v26 = vsub.f32 %v5163_v54, %v1493_v47  ;;  %2230 = vperm.xlu1 %3816, %v2088_v5   ;;  %v1502_v39 = vmax.f32 %v1500_v38, %v1501_v31  ;;  %v1505_v58 = vmax.f32 %v1503_v49, %v1504_v53  ;;  %v6024_v8 = vrot.slane %v6023_v20, 2  ;;  %v6025_v49 = vld [vmem:[#allocation81_spill] sm:$0xff] }
 0x2cf   : > { %v1856_v55 = vadd.f32 %v1855_v63, %v1854_v36  ;;  %v1717_v17 = vmul.f32 1.442695, %v1605_v23  ;;  %v1513_v18 = vsel %vm1268_vm0, %v5217_v21, -inf  ;;  %v1512_v50 = vsel %vm1268_vm0, %v5228_v46, -inf }
 0x2d0   : > { %v1863_v37 = vadd.f32 %v6024_v8, %v6023_v20  ;;  %v5397_v36 = vpop.eup %4053  ;;  %v1719_v63 = vmul.f32 1.442695, %v1606_v26  ;;  %v1607_v38 = vsub.f32 %v5190_v13, %v1502_v39  ;;  %v1608_v53 = vsub.f32 %v5183_v11, %v1502_v39  ;;  %v6026_v8 = vld [vmem:[#allocation82_spill] sm:$0xff] }
 0x2d1   : > { %4063 = vrcp.f32 %v1856_v55  ;;  %v5403_v60 = vpop.eup %4055  ;;  %v1947_v54 = vsel %vm1268_vm0, %v5397_v36, 0.0  ;;  %v1506_v62 = vrot.slane %v1505_v58, 4  ;;  %v1514_v31 = vmax.f32 %v1512_v50, %v1513_v18 }
 0x2d2   : > { %v4058_v47 = vpop.eup %4057  ;;  %v1948_v28 = vsel %vm1268_vm0, %v5403_v60, 0.0  ;;  %4065 = vpow2.f32 %v1717_v17  ;;  %v1864_v5 = vrot.slane %v1863_v37, 1  ;;  %v1721_v26 = vmul.f32 1.442695, %v1607_v38 }
 0x2d3   : > { %v1949_v55 = vadd.f32 %v1948_v28, %v1947_v54  ;;  %4067 = vpow2.f32 %v1719_v63  ;;  %v2089_v23 = vmul.f32 %v4058_v47, %v6025_v49  ;;  %v1723_v20 = vmul.f32 1.442695, %v1608_v53 }
 0x2d4   : > { %v2090_v33 = vmul.f32 %v4058_v47, %v6026_v8  ;;  %v1507_v57 = vmax.f32 %v1505_v58, %v1506_v62  ;;  %v1865_v13 = vadd.f32 %v1864_v5, %v1863_v37  ;;  %4069 = vpow2.f32 %v1721_v26  ;;  %v6029_v26 = vld [vmem:[#allocation83_spill] sm:$0xff] }
 0x2d5   : > { %v1950_v30 = vrot.slane %v1949_v55, 4  ;;  %2235 = vperm.xlu0 %3815, %v2089_v23   ;;  %v1515_v11 = vrot.slane %v1514_v31, 4  ;;  %v6027_v39 = vrot.slane %v5197_v0, 2  ;;  %4071 = vpow2.f32 %v1723_v20 }
 0x2d6   : > { %2240 = vperm.xlu1 %3816, %v2090_v33   ;;  %v1508_v18 = vrot.slane %v1507_v57, 2  ;;  %v1522_v63 = vsel %vm1268_vm0, %v5232_v43, -inf  ;;  %v1521_v50 = vsel %vm1268_vm0, %v5236_v25, -inf  ;;  %v5420_v54 = vpop.eup %4059  ;;  %4073 = vrcp.f32 %v1865_v13  ;;  %v6030_v13 = vld [vmem:[#allocation84_spill] sm:$0xff] }
 0x2d7   : > { %v1872_v17 = vadd.f32 %v6027_v39, %v5197_v0  ;;  %v5422_v58 = vadd.f32 %v1950_v30, %v1949_v55  ;;  %v1516_v37 = vmax.f32 %v1514_v31, %v1515_v11  ;;  %v5424_v53 = vpop.eup %4061  ;;  %v1956_v0 = vsel %vm1268_vm0, %v5420_v54, 0.0 }
 0x2d8   : > { %v1509_v33 = vmax.f32 %v1507_v57, %v1508_v18  ;;  %v1523_v62 = vmax.f32 %v1521_v50, %v1522_v63  ;;  %v6028_v47 = vrot.slane %v5211_v10, 2  ;;  %v1957_v30 = vsel %vm1268_vm0, %v5424_v53, 0.0 }
 0x2d9   : > { %v1873_v38 = vrot.slane %v1872_v17, 1  ;;  %v1517_v55 = vrot.slane %v1516_v37, 2  ;;  %v1958_v23 = vadd.f32 %v1957_v30, %v1956_v0 }
 0x2da   : > { %v1881_v28 = vadd.f32 %v6028_v47, %v5211_v10  ;;  %v1510_v8 = vrot.slane %v1509_v33, 1  ;;  %v1524_v39 = vrot.slane %v1523_v62, 4  ;;  %v1531_v47 = vsel %vm1268_vm0, %v5244_v27, -inf }
 0x2db   : > { %v4064_v5 = vpop.eup %4063  ;;  %v1874_v31 = vadd.f32 %v1873_v38, %v1872_v17  ;;  %v1518_v57 = vmax.f32 %v1516_v37, %v1517_v55  ;;  %v1959_v10 = vrot.slane %v1958_v23, 4  ;;  %v1530_v17 = vsel %vm1268_vm0, %v5253_v2, -inf }
 0x2dc   : > { %v2091_v20 = vmul.f32 %v4064_v5, %v6029_v26  ;;  %v2092_v11 = vmul.f32 %v4064_v5, %v6030_v13  ;;  %v1882_v18 = vrot.slane %v1881_v28, 1  ;;  %v5436_v63 = vpop.eup %4065  ;;  %v1511_v50 = vmax.f32 %v1509_v33, %v1510_v8 }
 0x2dd   : > { %4075 = vrcp.f32 %v1874_v31  ;;  %v5442_v38 = vpop.eup %4067  ;;  %v1965_v37 = vsel %vm1268_vm0, %v5436_v63, 0.0  ;;  %v1519_v0 = vrot.slane %v1518_v57, 1  ;;  %v1525_v5 = vmax.f32 %v1523_v62, %v1524_v39 }
 0x2de   : > { %2245 = vperm.xlu0 %3815, %v2091_v20   ;;  %2250 = vperm.xlu1 %3816, %v2092_v11   ;;  %v1883_v30 = vadd.f32 %v1882_v18, %v1881_v28  ;;  %v5446_v55 = vadd.f32 %v1959_v10, %v1958_v23  ;;  %v1966_v33 = vsel %vm1268_vm0, %v5442_v38, 0.0  ;;  %v1609_v31 = vsub.f32 %v6022_v45, %v1511_v50  ;;  %v5452_v20 = vpop.eup %4069 }
 0x2df   : > { %v1610_v26 = vsub.f32 %v6019_v41, %v1511_v50  ;;  %v1967_v8 = vadd.f32 %v1966_v33, %v1965_v37  ;;  %v1520_v13 = vmax.f32 %v1518_v57, %v1519_v0  ;;  %v1526_v11 = vrot.slane %v1525_v5, 2  ;;  %v5454_v49 = vpop.eup %4071  ;;  %v6031_v37 = vld [vmem:[#allocation85_spill] sm:$0xff] }
 0x2e0   : > { %4077 = vrcp.f32 %v1883_v30  ;;  %v1974_v28 = vsel %vm1268_vm0, %v5452_v20, 0.0  ;;  %v1725_v23 = vmul.f32 1.442695, %v1609_v31  ;;  %v4074_v18 = vpop.eup %4073  ;;  %v1975_v41 = vsel %vm1268_vm0, %v5454_v49, 0.0  ;;  %v6032_v30 = vld [vmem:[#allocation86_spill] sm:$0xff] }
 0x2e1   : > { %v1727_v39 = vmul.f32 1.442695, %v1610_v26  ;;  %v1968_v10 = vrot.slane %v1967_v8, 4  ;;  %v1611_v45 = vsub.f32 %v5228_v46, %v1520_v13  ;;  %v1612_v57 = vsub.f32 %v5217_v21, %v1520_v13 }
 0x2e2   : > { %v1976_v50 = vadd.f32 %v1975_v41, %v1974_v28  ;;  %4079 = vpow2.f32 %v1725_v23  ;;  %v2093_v0 = vmul.f32 %v4074_v18, %v6031_v37  ;;  %v2094_v33 = vmul.f32 %v4074_v18, %v6032_v30  ;;  %v6034_v18 = vld [vmem:[#allocation87_spill] sm:$0xff] }
 0x2e3   : > { %v5465_v62 = vadd.f32 %v1968_v10, %v1967_v8  ;;  %4081 = vpow2.f32 %v1727_v39  ;;  %v1729_v31 = vmul.f32 1.442695, %v1611_v45  ;;  %v1731_v26 = vmul.f32 1.442695, %v1612_v57 }
 0x2e4   : > { %v1977_v12 = vrot.slane %v1976_v50, 4  ;;  %2255 = vperm.xlu0 %3815, %v2093_v0   ;;  %2260 = vperm.xlu1 %3816, %v2094_v33   ;;  %v1527_v52 = vmax.f32 %v1525_v5, %v1526_v11  ;;  %v1532_v9 = vmax.f32 %v1530_v17, %v1531_v47  ;;  %v6033_v46 = vrot.slane %v5242_v32, 2  ;;  %v6035_v17 = vld [vmem:[#allocation88_spill] sm:$0xff] }
 0x2e5   : > { %v1970_v28 = vrot.slane %v5465_v62, 2  ;;  %4083 = vpow2.f32 %v1729_v31  ;;  %v1540_v8 = vsel %vm1268_vm0, %v5263_v15, -inf  ;;  %v1539_v23 = vsel %vm1268_vm0, %v5269_v35, -inf }
 0x2e6   : > { %v1890_v21 = vadd.f32 %v6033_v46, %v5242_v32  ;;  %v5475_v39 = vadd.f32 %v1977_v12, %v1976_v50  ;;  %4085 = vpow2.f32 %v1731_v26  ;;  %v1528_v47 = vrot.slane %v1527_v52, 1 }
 0x2e7   : > { %v4076_v13 = vpop.eup %4075  ;;  %v1533_v10 = vrot.slane %v1532_v9, 4  ;;  %v1541_v41 = vmax.f32 %v1539_v23, %v1540_v8  ;;  %v6036_v37 = vrot.slane %v5294_v59, 2  ;;  %v1549_v12 = vsel %vm1268_vm0, %v5282_v34, -inf  ;;  %v6038_v23 = vld [vmem:[#allocation91_spill] sm:$0xff] }
 0x2e8   : > { %v2095_v5 = vmul.f32 %v4076_v13, %v6034_v18  ;;  %v2096_v11 = vmul.f32 %v4076_v13, %v6035_v17  ;;  %v1891_v32 = vrot.slane %v1890_v21, 1  ;;  %v1979_v45 = vrot.slane %v5475_v39, 2 }
 0x2e9   : > { %v1529_v57 = vmax.f32 %v1527_v52, %v1528_v47  ;;  %v1899_v0 = vadd.f32 %v6036_v37, %v5294_v59  ;;  %v1534_v30 = vmax.f32 %v1532_v9, %v1533_v10  ;;  %v1542_v31 = vrot.slane %v1541_v41, 4  ;;  %v6037_v52 = vld [vmem:[#allocation90_spill] sm:$0xff] }
 0x2ea   : > { %2265 = vperm.xlu0 %3815, %v2095_v5   ;;  %v4078_v50 = vpop.eup %4077  ;;  %2270 = vperm.xlu1 %3816, %v2096_v11   ;;  %v1892_v33 = vadd.f32 %v1891_v32, %v1890_v21  ;;  %v1548_v26 = vsel %vm1268_vm0, %v5289_v4, -inf  ;;  %v6039_v10 = vrot.slane %v5305_v40, 2 }
 0x2eb   : > { %v1613_v46 = vsub.f32 %v5236_v25, %v1529_v57  ;;  %v1614_v13 = vsub.f32 %v5232_v43, %v1529_v57  ;;  %v2097_v8 = vmul.f32 %v4078_v50, %v6037_v52  ;;  %v2098_v18 = vmul.f32 %v4078_v50, %v6038_v23 }
 0x2ec   : > { %v1535_v59 = vrot.slane %v1534_v30, 2  ;;  %4087 = vrcp.f32 %v1892_v33  ;;  %v1543_v5 = vmax.f32 %v1541_v41, %v1542_v31  ;;  %v1900_v47 = vrot.slane %v1899_v0, 1  ;;  %v5491_v17 = vpop.eup %4079 }
 0x2ed   : > { %v1733_v9 = vmul.f32 1.442695, %v1613_v46  ;;  %v1735_v21 = vmul.f32 1.442695, %v1614_v13  ;;  %v1550_v11 = vmax.f32 %v1548_v26, %v1549_v12  ;;  %v1908_v25 = vadd.f32 %v6039_v10, %v5305_v40  ;;  %v5496_v32 = vpop.eup %4081 }
 0x2ee   : > { %2275 = vperm.xlu0 %3815, %v2097_v8   ;;  %v1983_v43 = vsel %vm1268_vm0, %v5491_v17, 0.0  ;;  %v1536_v57 = vmax.f32 %v1534_v30, %v1535_v59  ;;  %2280 = vperm.xlu1 %3816, %v2098_v18   ;;  %v1544_v37 = vrot.slane %v1543_v5, 2  ;;  %v1901_v41 = vadd.f32 %v1900_v47, %v1899_v0 }
 0x2ef   : > { %v1984_v50 = vsel %vm1268_vm0, %v5496_v32, 0.0  ;;  %4089 = vpow2.f32 %v1733_v9  ;;  %v1551_v33 = vrot.slane %v1550_v11, 4  ;;  %v1909_v31 = vrot.slane %v1908_v25, 1  ;;  %v5502_v12 = vpop.eup %4083 }
 0x2f0   : > { %v1985_v26 = vadd.f32 %v1984_v50, %v1983_v43  ;;  %4091 = vpow2.f32 %v1735_v21  ;;  %v1537_v40 = vrot.slane %v1536_v57, 1  ;;  %v1545_v46 = vmax.f32 %v1543_v5, %v1544_v37  ;;  %v5504_v13 = vpop.eup %4085 }
 0x2f1   : > { %v1992_v30 = vsel %vm1268_vm0, %v5502_v12, 0.0  ;;  %4093 = vrcp.f32 %v1901_v41  ;;  %v1552_v52 = vmax.f32 %v1550_v11, %v1551_v33  ;;  %v1910_v0 = vadd.f32 %v1909_v31, %v1908_v25 }
 0x2f2   : > { %v1986_v8 = vrot.slane %v1985_v26, 4  ;;  %v1993_v23 = vsel %vm1268_vm0, %v5504_v13, 0.0  ;;  %v1538_v18 = vmax.f32 %v1536_v57, %v1537_v40  ;;  %v1546_v59 = vrot.slane %v1545_v46, 1 }
 0x2f3   : > { %v1994_v47 = vadd.f32 %v1993_v23, %v1992_v30  ;;  %v1553_v9 = vrot.slane %v1552_v52, 2  ;;  %4095 = vrcp.f32 %v1910_v0  ;;  %v6040_v5 = vrot.slane %v5328_v16, 2 }
 0x2f4   : > { %v5513_v10 = vadd.f32 %v1986_v8, %v1985_v26  ;;  %v1615_v43 = vsub.f32 %v5253_v2, %v1538_v18  ;;  %v1616_v11 = vsub.f32 %v5244_v27, %v1538_v18  ;;  %v1547_v25 = vmax.f32 %v1545_v46, %v1546_v59 }
 0x2f5   : > { %v1917_v21 = vadd.f32 %v6040_v5, %v5328_v16  ;;  %v1995_v37 = vrot.slane %v1994_v47, 4  ;;  %v1554_v41 = vmax.f32 %v1552_v52, %v1553_v9  ;;  %v6041_v57 = vrot.slane %v5348_v56, 2 }
 0x2f6   : > { %v4088_v31 = vpop.eup %4087  ;;  %v1988_v40 = vrot.slane %v5513_v10, 2  ;;  %v1737_v30 = vmul.f32 1.442695, %v1615_v43  ;;  %v1739_v0 = vmul.f32 1.442695, %v1616_v11  ;;  %v1617_v16 = vsub.f32 %v5269_v35, %v1547_v25 }
 0x2f7   : > { %v1918_v50 = vrot.slane %v1917_v21, 1  ;;  %v1926_v33 = vadd.f32 %v6041_v57, %v5348_v56  ;;  %v5522_v26 = vadd.f32 %v1995_v37, %v1994_v47  ;;  %v2099_v2 = vmul.f32 %v4088_v31, %v5219_v51 }
 0x2f8   : > { %v1618_v27 = vsub.f32 %v5263_v15, %v1547_v25  ;;  %v2100_v46 = vmul.f32 %v4088_v31, %v5222_v22  ;;  %4097 = vpow2.f32 %v1737_v30  ;;  %v1741_v52 = vmul.f32 1.442695, %v1617_v16  ;;  %v6044_v30 = vld [vmem:[#allocation94_spill] sm:$0xff] }
 0x2f9   : > { %v1555_v8 = vrot.slane %v1554_v41, 1  ;;  %v1919_v23 = vadd.f32 %v1918_v50, %v1917_v21  ;;  %v5527_v56 = vpop.eup %4089  ;;  %v1997_v18 = vrot.slane %v5522_v26, 2  ;;  %4099 = vpow2.f32 %v1739_v0  ;;  %2285 = vperm.xlu0 %3815, %v2099_v2  }
 0x2fa   : > { %v1743_v59 = vmul.f32 1.442695, %v1618_v27  ;;  %2290 = vperm.xlu1 %3816, %v2100_v46   ;;  %v1927_v35 = vrot.slane %v1926_v33, 1  ;;  %v5530_v47 = vpop.eup %4091  ;;  %v2001_v51 = vsel %vm1268_vm0, %v5527_v56, 0.0  ;;  %4101 = vpow2.f32 %v1741_v52  ;;  %v6045_v46 = vld [vmem:[#allocation95_spill] sm:$0xff] }
 0x2fb   : > { %v1556_v22 = vmax.f32 %v1554_v41, %v1555_v8  ;;  %v6042_v15 = vrot.slane %v5375_v42, 2  ;;  %v4094_v5 = vpop.eup %4093  ;;  %v2002_v21 = vsel %vm1268_vm0, %v5530_v47, 0.0  ;;  %v6043_v11 = vrot.slane %v5385_v14, 2 }
 0x2fc   : > { %4103 = vpow2.f32 %v1743_v59  ;;  %v1928_v43 = vadd.f32 %v1927_v35, %v1926_v33  ;;  %v2003_v37 = vadd.f32 %v2002_v21, %v2001_v51  ;;  %v2101_v50 = vmul.f32 %v4094_v5, %v5265_v7 }
 0x2fd   : > { %v1935_v9 = vadd.f32 %v6042_v15, %v5375_v42  ;;  %v1944_v25 = vadd.f32 %v6043_v11, %v5385_v14  ;;  %v1619_v57 = vsub.f32 %v5289_v4, %v1556_v22  ;;  %v1620_v41 = vsub.f32 %v5282_v34, %v1556_v22  ;;  %v4096_v31 = vpop.eup %4095 }
 0x2fe   : > { %v2102_v42 = vmul.f32 %v4094_v5, %v6044_v30  ;;  %4105 = vrcp.f32 %v1919_v23  ;;  %v2004_v2 = vrot.slane %v2003_v37, 4  ;;  %2295 = vperm.xlu0 %3815, %v2101_v50   ;;  %v2103_v52 = vmul.f32 %v4096_v31, %v6045_v46 }
 0x2ff   : > { %v1936_v0 = vrot.slane %v1935_v9, 1  ;;  %v1945_v16 = vrot.slane %v1944_v25, 1  ;;  %v1745_v33 = vmul.f32 1.442695, %v1619_v57  ;;  %v1747_v27 = vmul.f32 1.442695, %v1620_v41 }
 0x300   : > { %2300 = vperm.xlu1 %3816, %v2102_v42   ;;  %v2104_v14 = vmul.f32 %v4096_v31, %v5284_v6  ;;  %4107 = vrcp.f32 %v1928_v43  ;;  %v2005_v8 = vadd.f32 %v2004_v2, %v2003_v37  ;;  %v6046_v34 = vrot.slane %v5422_v58, 2 }
 0x301   : > { %v1937_v7 = vadd.f32 %v1936_v0, %v1935_v9  ;;  %v1946_v4 = vadd.f32 %v1945_v16, %v1944_v25  ;;  %4109 = vpow2.f32 %v1745_v33  ;;  %v6047_v59 = vrot.slane %v5446_v55, 2 }
 0x302   : > { %v1953_v23 = vadd.f32 %v6046_v34, %v5422_v58  ;;  %4111 = vpow2.f32 %v1747_v27  ;;  %v1971_v51 = vadd.f32 %v1970_v28, %v5465_v62  ;;  %v1980_v6 = vadd.f32 %v1979_v45, %v5475_v39  ;;  %v5561_v15 = vpop.eup %4097  ;;  %2305 = vperm.xlu0 %3815, %v2103_v52   ;;  %v2741_v34 = vld [vmem:[#allocation6] sm:$0xff] }
 0x303   : > { %v1962_v35 = vadd.f32 %v6047_v59, %v5446_v55  ;;  %v1989_v22 = vadd.f32 %v1988_v40, %v5513_v10  ;;  %v2006_v9 = vrot.slane %v2005_v8, 2  ;;  %4113 = vrcp.f32 %v1937_v7  ;;  %v5563_v21 = vpop.eup %4099 }
 0x304   : > { %v1954_v58 = vrot.slane %v1953_v23, 1  ;;  %v2010_v55 = vsel %vm1268_vm0, %v5561_v15, 0.0  ;;  %2310 = vperm.xlu1 %3816, %v2104_v14   ;;  %4115 = vrcp.f32 %v1946_v4  ;;  %v1972_v62 = vrot.slane %v1971_v51, 1  ;;  %v5567_v43 = vpop.eup %4101 }
 0x305   : > { %v1963_v5 = vrot.slane %v1962_v35, 1  ;;  %v1981_v28 = vrot.slane %v1980_v6, 1  ;;  %v2011_v39 = vsel %vm1268_vm0, %v5563_v21, 0.0  ;;  %v1990_v40 = vrot.slane %v1989_v22, 1 }
 0x306   : > { %v1955_v45 = vadd.f32 %v1954_v58, %v1953_v23  ;;  %v5571_v11 = vpop.eup %4103  ;;  %v2012_v25 = vadd.f32 %v2011_v39, %v2010_v55  ;;  %v2019_v37 = vsel %vm1268_vm0, %v5567_v43, 0.0  ;;  %v1973_v50 = vadd.f32 %v1972_v62, %v1971_v51  ;;  %v2742_v23 = vld [vmem:[#allocation6 + $0x8] sm:$0xff]  ;;  %v2744_v58 = vld [vmem:[#allocation6 + $0x18] sm:$0xff] }
 0x307   : > { %v1964_v10 = vadd.f32 %v1963_v5, %v1962_v35  ;;  %v1982_v57 = vadd.f32 %v1981_v28, %v1980_v6  ;;  %v2020_v41 = vsel %vm1268_vm0, %v5571_v11, 0.0  ;;  %v1991_v31 = vadd.f32 %v1990_v40, %v1989_v22 }
 0x308   : > { %4117 = vrcp.f32 %v1955_v45  ;;  %v1998_v30 = vadd.f32 %v1997_v18, %v5522_v26  ;;  %v4106_v42 = vpop.eup %4105  ;;  %v2013_v0 = vrot.slane %v2012_v25, 4  ;;  %v2021_v16 = vadd.f32 %v2020_v41, %v2019_v37  ;;  %v2745_v45 = vld [vmem:[#allocation6 + $0x20] sm:$0xff] }
 0x309   : > { %4119 = vrcp.f32 %v1964_v10  ;;  %v2007_v2 = vadd.f32 %v2006_v9, %v2005_v8  ;;  %v2105_v33 = vmul.f32 %v4106_v42, %v5303_v48  ;;  %v2106_v27 = vmul.f32 %v4106_v42, %v5309_v29  ;;  %v2743_v9 = vld [vmem:[#allocation6 + $0x10] sm:$0xff]  ;;  %v2746_v10 = vld [vmem:[#allocation6 + $0x28] sm:$0xff] }
 0x30a   : > { %4121 = vrcp.f32 %v1973_v50  ;;  %v1999_v46 = vrot.slane %v1998_v30, 1  ;;  %v4108_v52 = vpop.eup %4107  ;;  %v2014_v14 = vadd.f32 %v2013_v0, %v2012_v25  ;;  %v2022_v7 = vrot.slane %v2021_v16, 4 }
 0x30b   : > { %4123 = vrcp.f32 %v1982_v57  ;;  %v2008_v4 = vrot.slane %v2007_v2, 1  ;;  %v5582_v26 = vpop.eup %4109  ;;  %2315 = vperm.xlu0 %3815, %v2105_v33   ;;  %2320 = vperm.xlu1 %3816, %v2106_v27   ;;  %v2107_v18 = vmul.f32 %v4108_v52, %v5322_v3  ;;  %v2108_v48 = vmul.f32 %v4108_v52, %v5324_v1 }
 0x30c   : > { %4125 = vrcp.f32 %v1991_v31  ;;  %v2000_v29 = vadd.f32 %v1999_v46, %v1998_v30  ;;  %v5587_v8 = vpop.eup %4111  ;;  %v2015_v59 = vrot.slane %v2014_v14, 2  ;;  %v2023_v35 = vadd.f32 %v2022_v7, %v2021_v16 }
 0x30d   : > { %v2028_v51 = vsel %vm1268_vm0, %v5582_v26, 0.0  ;;  %v2009_v6 = vadd.f32 %v2008_v4, %v2007_v2  ;;  %v4114_v22 = vpop.eup %4113  ;;  %v2029_v3 = vsel %vm1268_vm0, %v5587_v8, 0.0  ;;  %v3715_v1 = vpack.c.bf16 %v2742_v23, %v2741_v34 }
 0x30e   : > { %4127 = vrcp.f32 %v2000_v29  ;;  %v4116_v5 = vpop.eup %4115  ;;  %v2024_v55 = vrot.slane %v2023_v35, 2  ;;  %v2030_v62 = vadd.f32 %v2029_v3, %v2028_v51  ;;  %v2109_v28 = vmul.f32 %v4114_v22, %v5354_v61  ;;  %v5635_v29 = vpop.permute.xlu0 %2135 }
 0x30f   : > { %v2110_v39 = vmul.f32 %v4114_v22, %v5359_v24  ;;  %2325 = vperm.xlu0 %3815, %v2107_v18   ;;  %2330 = vperm.xlu1 %3816, %v2108_v48   ;;  %v2111_v40 = vmul.f32 %v4116_v5, %v5365_v44  ;;  %v2112_v25 = vmul.f32 %v4116_v5, %v5369_v19  ;;  %4129 = vrcp.f32 %v2009_v6  ;;  %v2757_v6 = vld [vmem:[%s5627_s16] sm:$0xff] }
 0x310   : > { %v2016_v37 = vadd.f32 %v2015_v59, %v2014_v14  ;;  %v2031_v50 = vrot.slane %v2030_v62, 4  ;;  %v2025_v57 = vadd.f32 %v2024_v55, %v2023_v35  ;;  %3716 = vmatprep.subr.bf16.mxu0 %v3715_v1  ;;  %v3719_v41 = vpack.c.bf16 %v2744_v58, %v2743_v9  ;;  %v2758_v9 = vld [vmem:[%s5627_s16 + $0x8] sm:$0xff]  ;;  %v2752_v58 = vld [vmem:[#allocation6 + $0x58] sm:$0xff]  ;;  %3607 = vmatprep.mubr.msk.f32.mxu1 %vm2762_vm1, %v2757_v6 }
 0x311   : > { %3718 = vmatpush3.bf16.msra.mxu0 %v3715_v1  ;;  %v3723_v31 = vpack.c.bf16 %v2746_v10, %v2745_v45  ;;  %3608 = vmatmul.mubr.msk.f32.vlgmr.msra.gmra.mrb[64].mxu1 %vm2762_vm1, %v2758_v9 }
 0x312   : > { %v4118_v61 = vpop.eup %4117  ;;  %v2017_v24 = vrot.slane %v2016_v37, 1  ;;  %v2032_v42 = vadd.f32 %v2031_v50, %v2030_v62  ;;  %v2026_v0 = vrot.slane %v2025_v57, 1  ;;  %3720 = vmatprep.subr.bf16.mxu0 %v3719_v41  ;;  %v2753_v62 = vld [vmem:[#allocation6 + $0x60] sm:$0xff]  ;;  %v2755_v50 = vld [vmem:[#allocation6 + $0x70] sm:$0xff] }
 0x313   : > { %v4120_v30 = vpop.eup %4119  ;;  %v2113_v44 = vmul.f32 %v4118_v61, %v5397_v36  ;;  %v2114_v19 = vmul.f32 %v4118_v61, %v5403_v60  ;;  %2335 = vperm.xlu0 %3815, %v2109_v28   ;;  %2340 = vperm.xlu1 %3816, %v2110_v39   ;;  %v2754_v28 = vld [vmem:[#allocation6 + $0x68] sm:$0xff] }
 0x314   : > { %v4122_v16 = vpop.eup %4121  ;;  %v2115_v2 = vmul.f32 %v4120_v30, %v5420_v54  ;;  %v2116_v33 = vmul.f32 %v4120_v30, %v5424_v53  ;;  %v2018_v27 = vadd.f32 %v2017_v24, %v2016_v37  ;;  %v2033_v52 = vrot.slane %v2032_v42, 2  ;;  %v2747_v54 = vld [vmem:[#allocation6 + $0x30] sm:$0xff]  ;;  %v2748_v53 = vld [vmem:[#allocation6 + $0x38] sm:$0xff] }
 0x315   : > { %v4124_v46 = vpop.eup %4123  ;;  %v2117_v14 = vmul.f32 %v4122_v16, %v5436_v63  ;;  %v2118_v7 = vmul.f32 %v4122_v16, %v5442_v38  ;;  %v2027_v36 = vadd.f32 %v2026_v0, %v2025_v57  ;;  %3722 = vmatpush3.bf16.msra.mxu0 %v3719_v41  ;;  %v2749_v38 = vld [vmem:[#allocation6 + $0x40] sm:$0xff]  ;;  %v3727_v59 = vpack.c.bf16 %v2748_v53, %v2747_v54  ;;  %v2146_v51 = vpop.permute.xlu1 %2145  ;;  %v2756_v57 = vld [vmem:[#allocation6 + $0x78] sm:$0xff] }
 0x316   : > { %v4126_v4 = vpop.eup %4125  ;;  %v5613_v60 = vmul.f32 %v4124_v46, %v5452_v20  ;;  %v5616_v34 = vmul.f32 %v4124_v46, %v5454_v49  ;;  %4131 = vrcp.f32 %v2018_v27  ;;  %v2034_v63 = vadd.f32 %v2033_v52, %v2032_v42  ;;  %3724 = vmatprep.subr.bf16.mxu0 %v3723_v31  ;;  %v2750_v20 = vld [vmem:[#allocation6 + $0x48] sm:$0xff]  ;;  %v6049_v30 = vld [vmem:[#allocation15_spill] sm:$0xff]  ;;  %v6051_v0 = vld [vmem:[#allocation16_spill] sm:$0xff] }
 0x317   : > { %v5619_v23 = vmul.f32 %v4126_v4, %v5491_v17  ;;  %v5622_v18 = vmul.f32 %v4126_v4, %v5496_v32  ;;  %4133 = vrcp.f32 %v2027_v36  ;;  %2345 = vperm.xlu0 %3815, %v2111_v40   ;;  %2350 = vperm.xlu1 %3816, %v2112_v25   ;;  %v3739_v37 = vpack.c.bf16 %v2754_v28, %v2753_v62  ;;  %v6055_v52 = vld [vmem:[#allocation17_spill] sm:$0xff]  ;;  %v6056_v36 = vld [vmem:[#allocation19_spill] sm:$0xff] }
 0x318   : > { %v4128_v49 = vpop.eup %4127  ;;  %v2035_v48 = vrot.slane %v2034_v63, 1 }
 0x319   : > { %v5630_v17 = vmul.f32 %v4128_v49, %v5502_v12  ;;  %v5633_v32 = vmul.f32 %v4128_v49, %v5504_v13  ;;  %v4130_v35 = vpop.eup %4129  ;;  %3726 = vmatpush3.bf16.msra.mxu0 %v3723_v31  ;;  %v3731_v12 = vpack.c.bf16 %v2750_v20, %v2749_v38  ;;  %v2751_v13 = vld [vmem:[#allocation6 + $0x50] sm:$0xff]  ;;  %v2151_v55 = vpop.permute.xlu1 %2150  ;;  %v6058_v49 = vld [vmem:[#allocation20_spill] sm:$0xff] }
 0x31a   : > { %v5639_v22 = vmul.f32 %v4130_v35, %v5527_v56  ;;  %v5642_v3 = vmul.f32 %v4130_v35, %v5530_v47  ;;  %v2036_v1 = vadd.f32 %v2035_v48, %v2034_v63  ;;  %3728 = vmatprep.subr.bf16.mxu0 %v3727_v59  ;;  %v2141_v56 = vpop.permute.xlu0 %2140  ;;  %v3735_v5 = vpack.c.bf16 %v2752_v58, %v2751_v13 }
 0x31b   : > { %2355 = vperm.xlu0 %3815, %v2113_v44   ;;  %2360 = vperm.xlu1 %3816, %v2114_v19   ;;  %v2456_v42 = vmul.f32 %v6049_v30, %v2151_v55  ;;  %v6050_v44 = vld [vmem:[#allocation13_spill] sm:$0xff] }
 0x31c   : > { %4135 = vrcp.f32 %v2036_v1  ;;  %v2454_v19 = vmul.f32 %v6050_v44, %v2141_v56  ;;  %v6060_v1 = vld [vmem:[#allocation22_spill] sm:$0xff] }
 0x31d   : > { %3730 = vmatpush3.bf16.msra.mxu0 %v3727_v59 }
 0x31e   : > { %3732 = vmatprep.subr.bf16.mxu0 %v3731_v12  ;;  %v2156_v41 = vpop.permute.xlu0 %2155  ;;  %v2161_v61 = vpop.permute.xlu1 %2160 }
 0x31f   : > { %2365 = vperm.xlu0 %3815, %v2115_v2   ;;  %2370 = vperm.xlu1 %3816, %v2116_v33   ;;  %v2458_v16 = vmul.f32 %v6051_v0, %v2161_v61  ;;  %v6052_v2 = vld [vmem:[#allocation14_spill] sm:$0xff] }
 0x320   : > { %v4132_v47 = vpop.eup %4131  ;;  %v2455_v33 = vmul.f32 %v6052_v2, %v2146_v51  ;;  %v6059_v51 = vld [vmem:[#allocation23_spill] sm:$0xff] }
 0x321   : > { %v4134_v39 = vpop.eup %4133  ;;  %v2127_v45 = vmul.f32 %v4132_v47, %v5561_v15  ;;  %v2128_v10 = vmul.f32 %v4132_v47, %v5563_v21  ;;  %3734 = vmatpush3.bf16.msra.mxu0 %v3731_v12  ;;  %v3743_v15 = vpack.c.bf16 %v2756_v57, %v2755_v50 }
 0x322   : > { %v5650_v40 = vmul.f32 %v4134_v39, %v5567_v43  ;;  %v5653_v25 = vmul.f32 %v4134_v39, %v5571_v11  ;;  %3736 = vmatprep.subr.bf16.mxu0 %v3735_v5  ;;  %v2166_v11 = vpop.permute.xlu0 %2165  ;;  %v2171_v31 = vpop.permute.xlu1 %2170 }
 0x323   : > { %2375 = vperm.xlu0 %3815, %v2117_v14   ;;  %2380 = vperm.xlu1 %3816, %v2118_v7   ;;  %v2457_v14 = vmul.f32 %v6055_v52, %v2156_v41  ;;  %v2524_v7 = vadd.f32 %v2456_v42, %v2455_v33  ;;  %v2459_v4 = vmul.f32 %v6056_v36, %v2166_v11  ;;  %v6064_v33 = vld [vmem:[#allocation26_spill] sm:$0xff] }
 0x325   : > { %3738 = vmatpush3.bf16.msra.mxu0 %v3735_v5  ;;  %v2531_v54 = vadd.f32 %v2458_v16, %v2457_v14  ;;  %v2525_v20 = vrot.slane %v2524_v7, 4  ;;  %v6063_v16 = vld [vmem:[#allocation27_spill] sm:$0xff] }
 0x326   : > { %v4136_v24 = vpop.eup %4135  ;;  %3740 = vmatprep.subr.bf16.mxu0 %v3739_v37 }
 0x327   : > { %2385 = vperm.xlu0 %3815, %v5613_v60   ;;  %2390 = vperm.xlu1 %3816, %v5616_v34   ;;  %v2131_v21 = vmul.f32 %v4136_v24, %v5582_v26  ;;  %v2132_v43 = vmul.f32 %v4136_v24, %v5587_v8  ;;  %v6053_v26 = vld [vmem:[#allocation18_spill] sm:$0xff]  ;;  %v6054_v8 = vld [vmem:[#allocation12_spill] sm:$0xff]  ;;  %v2526_v13 = vadd.f32 %v2525_v20, %v2524_v7 }
 0x328   : > { %v2460_v27 = vmul.f32 %v6053_v26, %v2171_v31  ;;  %v2453_v46 = vmul.f32 %v6054_v8, %v5635_v29  ;;  %v2532_v29 = vrot.slane %v2531_v54, 4 }
 0x329   : > { %3742 = vmatpush3.bf16.msra.mxu0 %v3739_v37  ;;  %v2527_v28 = vrot.slane %v2526_v13, 2  ;;  %v6061_v37 = vld [vmem:[#allocation25_spill] sm:$0xff] }
 0x32a   : > { %3744 = vmatprep.subr.bf16.mxu0 %v3743_v15  ;;  %v2517_v34 = vadd.f32 %v2454_v19, %v2453_v46 }
 0x32b   : > { %2395 = vperm.xlu0 %3815, %v5619_v23   ;;  %2400 = vperm.xlu1 %3816, %v5622_v18   ;;  %v2538_v23 = vadd.f32 %v2460_v27, %v2459_v4  ;;  %v6057_v18 = vld [vmem:[#allocation21_spill] sm:$0xff]  ;;  %v2528_v11 = vadd.f32 %v2527_v28, %v2526_v13 }
 0x32c   : > { %v2518_v48 = vrot.slane %v2517_v34, 4 }
 0x32d   : > { %3746 = vmatpush3.bf16.msra.mxu0 %v3743_v15  ;;  %v2539_v35 = vrot.slane %v2538_v23, 4  ;;  %v2529_v8 = vrot.slane %v2528_v11, 1 }
 0x32e   : > { %v2176_v60 = vpop.permute.xlu0 %2175  ;;  %v2181_v53 = vpop.permute.xlu1 %2180  ;;  %v2519_v56 = vadd.f32 %v2518_v48, %v2517_v34 }
 0x32f   : > { %2405 = vperm.xlu0 %3815, %v5630_v17   ;;  %2410 = vperm.xlu1 %3816, %v5633_v32   ;;  %v2461_v63 = vmul.f32 %v6057_v18, %v2176_v60  ;;  %v2462_v38 = vmul.f32 %v6058_v49, %v2181_v53  ;;  %v2540_v5 = vadd.f32 %v2539_v35, %v2538_v23  ;;  %v2760_v49 = vld [vmem:[%s5627_s16 + $0x18] sm:$0xff] }
 0x330   : > { %v2520_v57 = vrot.slane %v2519_v56, 2  ;;  %v2530_v34 = vadd.f32 %v2529_v8, %v2528_v11 }
 0x331   : > { %v2545_v17 = vadd.f32 %v2462_v38, %v2461_v63  ;;  %v2541_v61 = vrot.slane %v2540_v5, 2  ;;  %v2759_v63 = vld [vmem:[%s5627_s16 + $0x10] sm:$0xff] }
 0x332   : > { %v2186_v32 = vpop.permute.xlu0 %2185  ;;  %v2191_v59 = vpop.permute.xlu1 %2190  ;;  %v2521_v30 = vadd.f32 %v2520_v57, %v2519_v56  ;;  %3610 = vmatprep.mubr.msk.f32.mxu1 %vm2762_vm1, %v2759_v63  ;;  %v6066_v57 = vld [vmem:[#allocation32_spill] sm:$0xff] }
 0x333   : > { %2415 = vperm.xlu0 %3815, %v5639_v22   ;;  %2420 = vperm.xlu1 %3816, %v5642_v3   ;;  %v2463_v6 = vmul.f32 %v6059_v51, %v2186_v32  ;;  %v2464_v12 = vmul.f32 %v6060_v1, %v2191_v59  ;;  %v2546_v9 = vrot.slane %v2545_v17, 4  ;;  %v2533_v22 = vadd.f32 %v2532_v29, %v2531_v54 }
 0x334   : > { %v2542_v19 = vadd.f32 %v2541_v61, %v2540_v5  ;;  %v2522_v14 = vrot.slane %v2521_v30, 1  ;;  %3611 = vmatmul.mubr.msk.f32.gmra.mrb[66].mxu1 %vm2762_vm1, %v2760_v49 }
 0x335   : > { %v2552_v58 = vadd.f32 %v2464_v12, %v2463_v6  ;;  %v2547_v55 = vadd.f32 %v2546_v9, %v2545_v17  ;;  %v2534_v41 = vrot.slane %v2533_v22, 2 }
 0x336   : > { %v2543_v7 = vrot.slane %v2542_v19, 1  ;;  %v2523_v38 = vadd.f32 %v2522_v14, %v2521_v30  ;;  %v6069_v30 = vld [vmem:[#allocation34_spill] sm:$0xff] }
 0x337   : > { %2425 = vperm.xlu0 %3815, %v2127_v45   ;;  %2430 = vperm.xlu1 %3816, %v2128_v10   ;;  %v2553_v3 = vrot.slane %v2552_v58, 4  ;;  %v6062_v45 = vld [vmem:[#allocation24_spill] sm:$0xff]  ;;  %v2548_v15 = vrot.slane %v2547_v55, 2 }
 0x338   : > { %v2544_v20 = vadd.f32 %v2543_v7, %v2542_v19  ;;  %v2893_v48 = vsel %vm2892_vm2, %v2530_v34, %v2523_v38  ;;  %v6071_v19 = vld [vmem:[#allocation36_spill] sm:$0xff]  ;;  %v6076_v34 = vld [vmem:[#allocation38_spill] sm:$0xff] }
 0x339   : > { %v2196_v47 = vpop.permute.xlu0 %2195  ;;  %v2201_v62 = vpop.permute.xlu1 %2200  ;;  %v2554_v39 = vadd.f32 %v2553_v3, %v2552_v58  ;;  %v2549_v27 = vadd.f32 %v2548_v15, %v2547_v55  ;;  %v3017_v55 = vstv %s3016_s8  ;;  %v6067_v15 = vld [vmem:[#allocation28_spill] sm:$0xff] }
 0x33a   : > { %v2465_v50 = vmul.f32 %v6061_v37, %v2196_v47  ;;  %v2466_v10 = vmul.f32 %v6062_v45, %v2201_v62  ;;  %4137 = vrcp.f32 %v3017_v55  ;;  %v6065_v45 = vld [vmem:[#allocation30_spill] sm:$0xff] }
 0x33b   : > { %2435 = vperm.xlu0 %3815, %v5650_v40   ;;  %2440 = vperm.xlu1 %3816, %v5653_v25   ;;  %v2555_v31 = vrot.slane %v2554_v39, 2  ;;  %v2535_v25 = vadd.f32 %v2534_v41, %v2533_v22  ;;  %v2550_v60 = vrot.slane %v2549_v27, 1 }
 0x33c   : > { %v2559_v24 = vadd.f32 %v2466_v10, %v2465_v50 }
 0x33d   : > { %v2556_v46 = vadd.f32 %v2555_v31, %v2554_v39  ;;  %v2536_v52 = vrot.slane %v2535_v25, 1  ;;  %v2551_v32 = vadd.f32 %v2550_v60, %v2549_v27  ;;  %v6068_v31 = vld [vmem:[#allocation31_spill] sm:$0xff] }
 0x33e   : > { %v2560_v40 = vrot.slane %v2559_v24, 4  ;;  %v2206_v42 = vpop.permute.xlu0 %2205  ;;  %v2211_v44 = vpop.permute.xlu1 %2210 }
 0x33f   : > { %2445 = vperm.xlu0 %3815, %v2131_v21   ;;  %2450 = vperm.xlu1 %3816, %v2132_v43   ;;  %v2467_v2 = vmul.f32 %v6063_v16, %v2206_v42  ;;  %v2468_v26 = vmul.f32 %v6064_v33, %v2211_v44  ;;  %v2557_v54 = vrot.slane %v2556_v46, 1  ;;  %v2537_v23 = vadd.f32 %v2536_v52, %v2535_v25  ;;  %v6070_v42 = vld [vmem:[#allocation33_spill] sm:$0xff] }
 0x340   : > { %v2561_v0 = vadd.f32 %v2560_v40, %v2559_v24  ;;  %v6072_v16 = vld [vmem:[#allocation29_spill] sm:$0xff] }
 0x341   : > { %v2566_v43 = vadd.f32 %v2468_v26, %v2467_v2  ;;  %v2558_v29 = vadd.f32 %v2557_v54, %v2556_v46  ;;  %v2895_v1 = vsel %vm2894_vm3, %v2537_v23, %v2893_v48  ;;  %v6073_v26 = vld [vmem:[#allocation35_spill] sm:$0xff]  ;;  %v6074_v46 = vld [vmem:[#allocation37_spill] sm:$0xff] }
 0x342   : > { %v2562_v21 = vrot.slane %v2561_v0, 2  ;;  %v2897_v9 = vsel %vm2896_vm4, %v2544_v20, %v2895_v1 }
 0x343   : > { %v2567_v4 = vrot.slane %v2566_v43, 4  ;;  %v2899_v13 = vsel %vm2898_vm5, %v2551_v32, %v2897_v9  ;;  %v6077_v32 = vld [vmem:[#allocation41_spill] sm:$0xff] }
 0x344   : > { %v2563_v36 = vadd.f32 %v2562_v21, %v2561_v0  ;;  %v2901_v56 = vsel %vm2900_vm6, %v2558_v29, %v2899_v13  ;;  %v4138_v50 = vpop.eup %4137  ;;  %v6078_v29 = vld [vmem:[#allocation40_spill] sm:$0xff] }
 0x345   : > { %v2568_v53 = vadd.f32 %v2567_v4, %v2566_v43  ;;  %3751 = vpush %v4138_v50  ;;  %v6075_v4 = vld [vmem:[#allocation39_spill] sm:$0xff] }
 0x346   : > { %v2564_v18 = vrot.slane %v2563_v36, 1  ;;  %v2216_v35 = vpop.permute.xlu0 %2215  ;;  %v2221_v51 = vpop.permute.xlu1 %2220 }
 0x347   : > { %v2569_v17 = vrot.slane %v2568_v53, 2  ;;  %v2470_v11 = vmul.f32 %v6067_v15, %v2221_v51  ;;  %v2469_v2 = vmul.f32 %v6072_v16, %v2216_v35  ;;  %v6080_v15 = vld [vmem:[#allocation42_spill] sm:$0xff] }
 0x348   : > { %v2565_v6 = vadd.f32 %v2564_v18, %v2563_v36 }
 0x349   : > { %v2570_v59 = vadd.f32 %v2569_v17, %v2568_v53  ;;  %v2573_v52 = vadd.f32 %v2470_v11, %v2469_v2 }
 0x34a   : > { %v2903_v22 = vsel %vm2902_vm7, %v2565_v6, %v2901_v56 }
 0x34b   : > { %v2571_v12 = vrot.slane %v2570_v59, 1  ;;  %v2574_v49 = vrot.slane %v2573_v52, 4 }
 0x34c   : > { %v2226_v3 = vpop.permute.xlu0 %2225 }
 0x34d   : > { %v2572_v58 = vadd.f32 %v2571_v12, %v2570_v59  ;;  %v2231_v47 = vpop.permute.xlu1 %2230  ;;  %v2471_v40 = vmul.f32 %v6068_v31, %v2226_v3  ;;  %v2575_v12 = vadd.f32 %v2574_v49, %v2573_v52 }
 0x34e   : > { %v2472_v10 = vmul.f32 %v6065_v45, %v2231_v47 }
 0x34f   : > { %v2905_v5 = vsel %vm2904_vm8, %v2572_v58, %v2903_v22  ;;  %v2576_v47 = vrot.slane %v2575_v12, 2 }
 0x350   : > { %3645 = vmatprep.mubr.f32.mxu0 %v2905_v5  ;;  %v2580_v33 = vadd.f32 %v2472_v10, %v2471_v40 }
 0x352   : > { %v2581_v53 = vrot.slane %v2580_v33, 4 }
 0x354   : > { %v2236_v62 = vpop.permute.xlu0 %2235  ;;  %v2582_v35 = vadd.f32 %v2581_v53, %v2580_v33 }
 0x355   : > { %v2241_v28 = vpop.permute.xlu1 %2240  ;;  %v2473_v44 = vmul.f32 %v6070_v42, %v2236_v62 }
 0x356   : > { %v2474_v41 = vmul.f32 %v6066_v57, %v2241_v28  ;;  %v2583_v56 = vrot.slane %v2582_v35, 2  ;;  %v2577_v57 = vadd.f32 %v2576_v47, %v2575_v12  ;;  %v6083_v12 = vld [vmem:[#allocation47_spill] sm:$0xff] }
 0x358   : > { %v2587_v8 = vadd.f32 %v2474_v41, %v2473_v44  ;;  %v2584_v28 = vadd.f32 %v2583_v56, %v2582_v35  ;;  %v6085_v56 = vld [vmem:[#allocation49_spill] sm:$0xff] }
 0x35a   : > { %v2588_v23 = vrot.slane %v2587_v8, 4  ;;  %v2585_v40 = vrot.slane %v2584_v28, 1 }
 0x35c   : > { %v2589_v6 = vadd.f32 %v2588_v23, %v2587_v8 }
 0x35d   : > { %v2246_v39 = vpop.permute.xlu0 %2245  ;;  %v2251_v37 = vpop.permute.xlu1 %2250 }
 0x35e   : > { %v2476_v25 = vmul.f32 %v6069_v30, %v2251_v37  ;;  %v2475_v27 = vmul.f32 %v6073_v26, %v2246_v39  ;;  %v2590_v5 = vrot.slane %v2589_v6, 2 }
 0x360   : > { %v2594_v14 = vadd.f32 %v2476_v25, %v2475_v27  ;;  %v2591_v37 = vadd.f32 %v2590_v5, %v2589_v6  ;;  %v2586_v27 = vadd.f32 %v2585_v40, %v2584_v28  ;;  %v6082_v6 = vld [vmem:[#allocation44_spill] sm:$0xff]  ;;  %v6086_v5 = vld [vmem:[#allocation45_spill] sm:$0xff] }
 0x362   : > { %v2595_v38 = vrot.slane %v2594_v14, 4  ;;  %v2592_v42 = vrot.slane %v2591_v37, 1 }
 0x363   : > { %v2256_v61 = vpop.permute.xlu0 %2255  ;;  %v2261_v24 = vpop.permute.xlu1 %2260 }
 0x364   : > { %v2478_v0 = vmul.f32 %v6071_v19, %v2261_v24  ;;  %v2477_v21 = vmul.f32 %v6074_v46, %v2256_v61  ;;  %v2596_v9 = vadd.f32 %v2595_v38, %v2594_v14  ;;  %v6079_v61 = vld [vmem:[#allocation43_spill] sm:$0xff]  ;;  %v2578_v19 = vrot.slane %v2577_v57, 1 }
 0x366   : > { %v2601_v36 = vadd.f32 %v2478_v0, %v2477_v21  ;;  %v2597_v55 = vrot.slane %v2596_v9, 2  ;;  %v2593_v21 = vadd.f32 %v2592_v42, %v2591_v37  ;;  %v2579_v52 = vadd.f32 %v2578_v19, %v2577_v57  ;;  %v6087_v37 = vld [vmem:[#allocation51_spill] sm:$0xff] }
 0x368   : > { %v2602_v17 = vrot.slane %v2601_v36, 4  ;;  %v2598_v41 = vadd.f32 %v2597_v55, %v2596_v9 }
 0x369   : > { %v2266_v43 = vpop.permute.xlu0 %2265  ;;  %v2271_v7 = vpop.permute.xlu1 %2270 }
 0x36a   : > { %v2479_v60 = vmul.f32 %v6075_v4, %v2266_v43  ;;  %v2480_v54 = vmul.f32 %v6076_v34, %v2271_v7  ;;  %v2603_v13 = vadd.f32 %v2602_v17, %v2601_v36  ;;  %v2599_v0 = vrot.slane %v2598_v41, 1 }
 0x36b   : > { %v2906_v4 = vsel %vm2892_vm2, %v2586_v27, %v2579_v52 }
 0x36c   : > { %v2608_v18 = vadd.f32 %v2480_v54, %v2479_v60  ;;  %v2604_v62 = vrot.slane %v2603_v13, 2  ;;  %v2600_v14 = vadd.f32 %v2599_v0, %v2598_v41  ;;  %v2907_v23 = vsel %vm2894_vm3, %v2593_v21, %v2906_v4  ;;  %v6092_v21 = vld [vmem:[#allocation54_spill] sm:$0xff] }
 0x36d   : > { %v2276_v63 = vpop.permute.xlu0 %2275  ;;  %v2281_v20 = vpop.permute.xlu1 %2280 }
 0x36e   : > { %v2481_v48 = vmul.f32 %v6077_v32, %v2276_v63  ;;  %v2482_v59 = vmul.f32 %v6078_v29, %v2281_v20  ;;  %v2609_v51 = vrot.slane %v2608_v18, 4  ;;  %v2605_v31 = vadd.f32 %v2604_v62, %v2603_v13  ;;  %v6081_v32 = vld [vmem:[#allocation46_spill] sm:$0xff]  ;;  %v6084_v13 = vld [vmem:[#allocation48_spill] sm:$0xff] }
 0x36f   : > { %v2908_v63 = vsel %vm2896_vm4, %v2600_v14, %v2907_v23  ;;  %v6094_v23 = vld [vmem:[#allocation56_spill] sm:$0xff] }
 0x370   : > { %v2615_v1 = vadd.f32 %v2482_v59, %v2481_v48  ;;  %v2610_v22 = vadd.f32 %v2609_v51, %v2608_v18  ;;  %v2606_v33 = vrot.slane %v2605_v31, 1 }
 0x372   : > { %v2616_v58 = vrot.slane %v2615_v1, 4  ;;  %v2611_v39 = vrot.slane %v2610_v22, 2  ;;  %v2607_v36 = vadd.f32 %v2606_v33, %v2605_v31  ;;  %v6089_v31 = vld [vmem:[#allocation53_spill] sm:$0xff] }
 0x374   : > { %v2617_v3 = vadd.f32 %v2616_v58, %v2615_v1  ;;  %v2612_v30 = vadd.f32 %v2611_v39, %v2610_v22  ;;  %v2909_v38 = vsel %vm2898_vm5, %v2607_v36, %v2908_v63 }
 0x376   : > { %v2618_v50 = vrot.slane %v2617_v3, 2  ;;  %v2613_v8 = vrot.slane %v2612_v30, 1  ;;  %s3752_s11 = spop %3751 }
 0x378   : > { %v2286_v45 = vpop.permute.xlu0 %2285  ;;  %v2619_v44 = vadd.f32 %v2618_v50, %v2617_v3  ;;  %v2614_v60 = vadd.f32 %v2613_v8, %v2612_v30  ;;  %v6090_v30 = vld [vmem:[#allocation52_spill] sm:$0xff]  ;;  %v6091_v8 = vld [vmem:[#allocation55_spill] sm:$0xff] }
 0x379   : > { %v2291_v10 = vpop.permute.xlu1 %2290  ;;  %v2483_v24 = vmul.f32 %v6079_v61, %v2286_v45  ;;  %v6088_v45 = vld [vmem:[#allocation50_spill] sm:$0xff] }
 0x37a   : > { %v2484_v11 = vmul.f32 %v6080_v15, %v2291_v10  ;;  %v2620_v43 = vrot.slane %v2619_v44, 1  ;;  %v2910_v17 = vsel %vm2900_vm6, %v2614_v60, %v2909_v38 }
 0x37c   : > { %v2622_v25 = vadd.f32 %v2484_v11, %v2483_v24  ;;  %v2621_v18 = vadd.f32 %v2620_v43, %v2619_v44 }
 0x37d   : > { %v2296_v2 = vpop.permute.xlu0 %2295 }
 0x37e   : > { %v2623_v16 = vrot.slane %v2622_v25, 4  ;;  %v2911_v29 = vsel %vm2902_vm7, %v2621_v18, %v2910_v17  ;;  %v2485_v3 = vmul.f32 %v6086_v5, %v2296_v2 }
 0x37f   : > { %v2301_v26 = vpop.permute.xlu1 %2300 }
 0x380   : > { %v2624_v46 = vadd.f32 %v2623_v16, %v2622_v25  ;;  %v2486_v1 = vmul.f32 %v6082_v6, %v2301_v26  ;;  %v6095_v6 = vld [vmem:[#allocation59_spill] sm:$0xff] }
 0x381   : > { %v2306_v54 = vpop.permute.xlu0 %2305 }
 0x382   : > { %v2625_v7 = vrot.slane %v2624_v46, 2  ;;  %v2487_v9 = vmul.f32 %v6083_v12, %v2306_v54  ;;  %v2629_v39 = vadd.f32 %v2486_v1, %v2485_v3  ;;  %v6093_v54 = vld [vmem:[#allocation57_spill] sm:$0xff]  ;;  %v6096_v12 = vld [vmem:[#allocation58_spill] sm:$0xff] }
 0x383   : > { %v2311_v53 = vpop.permute.xlu1 %2310 }
 0x384   : > { %v2626_v34 = vadd.f32 %v2625_v7, %v2624_v46  ;;  %v2488_v48 = vmul.f32 %v6081_v32, %v2311_v53  ;;  %v2630_v11 = vrot.slane %v2629_v39, 4 }
 0x386   : > { %v2627_v49 = vrot.slane %v2626_v34, 1  ;;  %v2636_v47 = vadd.f32 %v2488_v48, %v2487_v9  ;;  %v2631_v33 = vadd.f32 %v2630_v11, %v2629_v39 }
 0x388   : > { %v2628_v20 = vadd.f32 %v2627_v49, %v2626_v34  ;;  %v2637_v57 = vrot.slane %v2636_v47, 4  ;;  %v2632_v34 = vrot.slane %v2631_v33, 2 }
 0x38a   : > { %v2316_v59 = vpop.permute.xlu0 %2315  ;;  %v2321_v35 = vpop.permute.xlu1 %2320  ;;  %v2912_v51 = vsel %vm2904_vm8, %v2628_v20, %v2911_v29  ;;  %v2638_v44 = vadd.f32 %v2637_v57, %v2636_v47 }
 0x38b   : > { %v2490_v58 = vmul.f32 %v6084_v13, %v2321_v35  ;;  %3646 = vmatmul.mubr.f32.vlgmr.msra.gmra.mrb[64].mxu0 %v2912_v51  ;;  %v2489_v22 = vmul.f32 %v6085_v56, %v2316_v59  ;;  %v2633_v35 = vadd.f32 %v2632_v34, %v2631_v33 }
 0x38c   : > { %v2639_v52 = vrot.slane %v2638_v44, 2 }
 0x38d   : > { %v2643_v55 = vadd.f32 %v2490_v58, %v2489_v22  ;;  %v2634_v39 = vrot.slane %v2633_v35, 1 }
 0x38e   : > { %v2326_v62 = vpop.permute.xlu0 %2325  ;;  %v2331_v28 = vpop.permute.xlu1 %2330  ;;  %v2640_v38 = vadd.f32 %v2639_v52, %v2638_v44 }
 0x38f   : > { %v2491_v50 = vmul.f32 %v6087_v37, %v2326_v62  ;;  %v2492_v10 = vmul.f32 %v6088_v45, %v2331_v28  ;;  %v2644_v61 = vrot.slane %v2643_v55, 4 }
 0x390   : > { %v2641_v56 = vrot.slane %v2640_v38, 1 }
 0x391   : > { %v2650_v41 = vadd.f32 %v2492_v10, %v2491_v50  ;;  %v2645_v0 = vadd.f32 %v2644_v61, %v2643_v55 }
 0x392   : > { %v2336_v24 = vpop.permute.xlu0 %2335  ;;  %v2341_v15 = vpop.permute.xlu1 %2340  ;;  %v2642_v10 = vadd.f32 %v2641_v56, %v2640_v38 }
 0x393   : > { %v2493_v40 = vmul.f32 %v6089_v31, %v2336_v24  ;;  %v2494_v25 = vmul.f32 %v6090_v30, %v2341_v15  ;;  %v2651_v42 = vrot.slane %v2650_v41, 4  ;;  %v2646_v7 = vrot.slane %v2645_v0, 2 }
 0x395   : > { %v2657_v19 = vadd.f32 %v2494_v25, %v2493_v40  ;;  %v2652_v27 = vadd.f32 %v2651_v42, %v2650_v41  ;;  %v2647_v32 = vadd.f32 %v2646_v7, %v2645_v0  ;;  %v2635_v40 = vadd.f32 %v2634_v39, %v2633_v35  ;;  %v6104_v35 = vld [vmem:[#allocation66_spill] sm:$0xff] }
 0x396   : > { %v2346_v16 = vpop.permute.xlu0 %2345  ;;  %v2351_v2 = vpop.permute.xlu1 %2350 }
 0x397   : > { %v2658_v26 = vrot.slane %v2657_v19, 4  ;;  %v2495_v46 = vmul.f32 %v6091_v8, %v2346_v16  ;;  %v2496_v43 = vmul.f32 %v6092_v21, %v2351_v2  ;;  %v2653_v63 = vrot.slane %v2652_v27, 2  ;;  %v6097_v16 = vld [vmem:[#allocation62_spill] sm:$0xff] }
 0x398   : > { %v2648_v47 = vrot.slane %v2647_v32, 1  ;;  %v2913_v44 = vsel %vm2892_vm2, %v2642_v10, %v2635_v40 }
 0x399   : > { %v2659_v14 = vadd.f32 %v2658_v26, %v2657_v19  ;;  %v2664_v36 = vadd.f32 %v2496_v43, %v2495_v46  ;;  %v2654_v13 = vadd.f32 %v2653_v63, %v2652_v27  ;;  %v6098_v26 = vld [vmem:[#allocation60_spill] sm:$0xff]  ;;  %v6099_v43 = vld [vmem:[#allocation63_spill] sm:$0xff] }
 0x39a   : > { %v2356_v4 = vpop.permute.xlu0 %2355  ;;  %v2361_v60 = vpop.permute.xlu1 %2360  ;;  %v2649_v24 = vadd.f32 %v2648_v47, %v2647_v32 }
 0x39b   : > { %v2497_v53 = vmul.f32 %v6093_v54, %v2356_v4  ;;  %v2498_v18 = vmul.f32 %v6094_v23, %v2361_v60  ;;  %v2665_v49 = vrot.slane %v2664_v36, 4  ;;  %v2660_v20 = vrot.slane %v2659_v14, 2  ;;  %v6101_v60 = vld [vmem:[#allocation61_spill] sm:$0xff] }
 0x39c   : > { %v2655_v45 = vrot.slane %v2654_v13, 1  ;;  %v2914_v21 = vsel %vm2894_vm3, %v2649_v24, %v2913_v44  ;;  %v6102_v54 = vld [vmem:[#allocation65_spill] sm:$0xff] }
 0x39d   : > { %v2671_v17 = vadd.f32 %v2498_v18, %v2497_v53  ;;  %v2666_v48 = vadd.f32 %v2665_v49, %v2664_v36  ;;  %v2661_v22 = vadd.f32 %v2660_v20, %v2659_v14  ;;  %v6100_v14 = vld [vmem:[#allocation64_spill] sm:$0xff] }
 0x39e   : > { %v2366_v29 = vpop.permute.xlu0 %2365  ;;  %v2371_v59 = vpop.permute.xlu1 %2370  ;;  %v2656_v42 = vadd.f32 %v2655_v45, %v2654_v13 }
 0x39f   : > { %v2672_v51 = vrot.slane %v2671_v17, 4  ;;  %v2499_v1 = vmul.f32 %v6095_v6, %v2366_v29  ;;  %v2500_v9 = vmul.f32 %v6096_v12, %v2371_v59  ;;  %v2667_v58 = vrot.slane %v2666_v48, 2  ;;  %v6103_v29 = vld [vmem:[#allocation67_spill] sm:$0xff] }
 0x3a0   : > { %v2662_v57 = vrot.slane %v2661_v22, 1  ;;  %v2915_v23 = vsel %vm2896_vm4, %v2656_v42, %v2914_v21 }
 0x3a1   : > { %v2673_v5 = vadd.f32 %v2672_v51, %v2671_v17  ;;  %v2678_v3 = vadd.f32 %v2500_v9, %v2499_v1  ;;  %v2668_v55 = vadd.f32 %v2667_v58, %v2666_v48 }
 0x3a2   : > { %v2376_v62 = vpop.permute.xlu0 %2375  ;;  %v2381_v28 = vpop.permute.xlu1 %2380  ;;  %v2663_v19 = vadd.f32 %v2662_v57, %v2661_v22 }
 0x3a3   : > { %v2674_v37 = vrot.slane %v2673_v5, 2  ;;  %v2679_v50 = vrot.slane %v2678_v3, 4  ;;  %v2669_v15 = vrot.slane %v2668_v55, 1  ;;  %v2502_v27 = vmul.f32 %v6098_v26, %v2381_v28 }
 0x3a4   : > { %v2501_v34 = vmul.f32 %v6101_v60, %v2376_v62  ;;  %v2916_v49 = vsel %vm2898_vm5, %v2663_v19, %v2915_v23 }
 0x3a5   : > { %v2675_v41 = vadd.f32 %v2674_v37, %v2673_v5  ;;  %v2680_v61 = vadd.f32 %v2679_v50, %v2678_v3  ;;  %v2670_v33 = vadd.f32 %v2669_v15, %v2668_v55  ;;  %v6105_v3 = vld [vmem:[#allocation69_spill] sm:$0xff]  ;;  %v6106_v55 = vld [vmem:[#allocation68_spill] sm:$0xff]  ;;  %v6108_v15 = vld [vmem:[#allocation70_spill] sm:$0xff] }
 0x3a6   : > { %v2386_v11 = vpop.permute.xlu0 %2385  ;;  %v2391_v31 = vpop.permute.xlu1 %2390  ;;  %v2685_v38 = vadd.f32 %v2502_v27, %v2501_v34  ;;  %v6111_v34 = vld [vmem:[#allocation75_spill] sm:$0xff] }
 0x3a7   : > { %v2676_v30 = vrot.slane %v2675_v41, 1  ;;  %v2681_v25 = vrot.slane %v2680_v61, 2  ;;  %v2504_v2 = vmul.f32 %v6097_v16, %v2391_v31  ;;  %v2503_v52 = vmul.f32 %v6099_v43, %v2386_v11  ;;  %v6109_v16 = vld [vmem:[#allocation73_spill] sm:$0xff] }
 0x3a8   : > { %v2917_v48 = vsel %vm2900_vm6, %v2670_v33, %v2916_v49  ;;  %v2686_v13 = vrot.slane %v2685_v38, 4  ;;  %v6110_v33 = vld [vmem:[#allocation72_spill] sm:$0xff] }
 0x3a9   : > { %v2682_v0 = vadd.f32 %v2681_v25, %v2680_v61  ;;  %v2677_v36 = vadd.f32 %v2676_v30, %v2675_v41  ;;  %v2692_v18 = vadd.f32 %v2504_v2, %v2503_v52  ;;  %v6107_v61 = vld [vmem:[#allocation71_spill] sm:$0xff] }
 0x3aa   : > { %v2396_v8 = vpop.permute.xlu0 %2395  ;;  %v2401_v46 = vpop.permute.xlu1 %2400  ;;  %v2687_v37 = vadd.f32 %v2686_v13, %v2685_v38 }
 0x3ab   : > { %v2506_v7 = vmul.f32 %v6100_v14, %v2401_v46  ;;  %v2683_v4 = vrot.slane %v2682_v0, 1  ;;  %v2505_v53 = vmul.f32 %v6102_v54, %v2396_v8  ;;  %v2918_v6 = vsel %vm2902_vm7, %v2677_v36, %v2917_v48 }
 0x3ac   : > { %v2693_v12 = vrot.slane %v2692_v18, 4  ;;  %v2688_v30 = vrot.slane %v2687_v37, 2 }
 0x3ad   : > { %v2684_v63 = vadd.f32 %v2683_v4, %v2682_v0  ;;  %v2699_v20 = vadd.f32 %v2506_v7, %v2505_v53  ;;  %v6112_v53 = vld [vmem:[#allocation74_spill] sm:$0xff] }
 0x3ae   : > { %v2406_v17 = vpop.permute.xlu0 %2405  ;;  %v2411_v32 = vpop.permute.xlu1 %2410  ;;  %v2694_v28 = vadd.f32 %v2693_v12, %v2692_v18  ;;  %v2689_v43 = vadd.f32 %v2688_v30, %v2687_v37  ;;  %v3020_v30 = vstv %s3752_s11 }
 0x3af   : > { %v2507_v59 = vmul.f32 %v6103_v29, %v2406_v17  ;;  %v2508_v51 = vmul.f32 %v6104_v35, %v2411_v32  ;;  %v2919_v1 = vsel %vm2904_vm8, %v2684_v63, %v2918_v6  ;;  %v2700_v58 = vrot.slane %v2699_v20, 4 }
 0x3b0   : > { %3648 = vmatprep.mubr.f32.mxu0 %v2919_v1  ;;  %v2695_v31 = vrot.slane %v2694_v28, 2  ;;  %v2690_v48 = vrot.slane %v2689_v43, 1 }
 0x3b1   : > { %v2706_v9 = vadd.f32 %v2508_v51, %v2507_v59  ;;  %v2701_v50 = vadd.f32 %v2700_v58, %v2699_v20 }
 0x3b2   : > { %v2416_v56 = vpop.permute.xlu0 %2415  ;;  %v2421_v22 = vpop.permute.xlu1 %2420  ;;  %v2696_v46 = vadd.f32 %v2695_v31, %v2694_v28  ;;  %v2691_v58 = vadd.f32 %v2690_v48, %v2689_v43 }
 0x3b3   : > { %v2707_v5 = vrot.slane %v2706_v9, 4  ;;  %v2509_v47 = vmul.f32 %v6105_v3, %v2416_v56  ;;  %v2510_v62 = vmul.f32 %v6106_v55, %v2421_v22  ;;  %v2702_v25 = vrot.slane %v2701_v50, 2 }
 0x3b4   : > { %v2697_v49 = vrot.slane %v2696_v46, 1 }
 0x3b5   : > { %v2713_v39 = vadd.f32 %v2510_v62, %v2509_v47  ;;  %v2708_v57 = vadd.f32 %v2707_v5, %v2706_v9  ;;  %v2703_v52 = vadd.f32 %v2702_v25, %v2701_v50 }
 0x3b6   : > { %v2426_v45 = vpop.permute.xlu0 %2425  ;;  %v2431_v10 = vpop.permute.xlu1 %2430  ;;  %v2698_v6 = vadd.f32 %v2697_v49, %v2696_v46 }
 0x3b7   : > { %v2714_v41 = vrot.slane %v2713_v39, 4  ;;  %v2511_v24 = vmul.f32 %v6107_v61, %v2426_v45  ;;  %v2512_v11 = vmul.f32 %v6108_v15, %v2431_v10  ;;  %v2709_v0 = vrot.slane %v2708_v57, 2 }
 0x3b8   : > { %v2704_v17 = vrot.slane %v2703_v52, 1  ;;  %v2920_v47 = vsel %vm2892_vm2, %v2698_v6, %v2691_v58 }
 0x3b9   : > { %v2715_v40 = vadd.f32 %v2714_v41, %v2713_v39  ;;  %v2720_v42 = vadd.f32 %v2512_v11, %v2511_v24  ;;  %v2710_v4 = vadd.f32 %v2709_v0, %v2708_v57 }
 0x3ba   : > { %v2436_v44 = vpop.permute.xlu0 %2435  ;;  %v2441_v19 = vpop.permute.xlu1 %2440  ;;  %v2705_v13 = vadd.f32 %v2704_v17, %v2703_v52 }
 0x3bb   : > { %v2513_v2 = vmul.f32 %v6109_v16, %v2436_v44  ;;  %v2514_v26 = vmul.f32 %v6110_v33, %v2441_v19  ;;  %v2716_v27 = vrot.slane %v2715_v40, 2  ;;  %v2721_v8 = vrot.slane %v2720_v42, 4 }
 0x3bc   : > { %v2711_v29 = vrot.slane %v2710_v4, 1  ;;  %v2921_v39 = vsel %vm2894_vm3, %v2705_v13, %v2920_v47 }
 0x3bd   : > { %v2727_v21 = vadd.f32 %v2514_v26, %v2513_v2  ;;  %v2722_v14 = vadd.f32 %v2721_v8, %v2720_v42  ;;  %v2717_v18 = vadd.f32 %v2716_v27, %v2715_v40 }
 0x3be   : > { %v2446_v7 = vpop.permute.xlu0 %2445  ;;  %v2451_v36 = vpop.permute.xlu1 %2450  ;;  %v2712_v56 = vadd.f32 %v2711_v29, %v2710_v4 }
 0x3bf   : > { %v2728_v60 = vrot.slane %v2727_v21, 4  ;;  %v2515_v54 = vmul.f32 %v6111_v34, %v2446_v7  ;;  %v2516_v23 = vmul.f32 %v6112_v53, %v2451_v36  ;;  %v2723_v63 = vrot.slane %v2722_v14, 2 }
 0x3c0   : > { %v2718_v51 = vrot.slane %v2717_v18, 1  ;;  %v2922_v50 = vsel %vm2896_vm4, %v2712_v56, %v2921_v39 }
 0x3c1   : > { %v2729_v38 = vadd.f32 %v2728_v60, %v2727_v21  ;;  %v2734_v20 = vadd.f32 %v2516_v23, %v2515_v54  ;;  %v2724_v32 = vadd.f32 %v2723_v63, %v2722_v14 }
 0x3c2   : > { %v2719_v3 = vadd.f32 %v2718_v51, %v2717_v18 }
 0x3c3   : > { %v2730_v59 = vrot.slane %v2729_v38, 2  ;;  %v2735_v35 = vrot.slane %v2734_v20, 4  ;;  %v2725_v1 = vrot.slane %v2724_v32, 1 }
 0x3c4   : > { %v2923_v45 = vsel %vm2898_vm5, %v2719_v3, %v2922_v50 }
 0x3c5   : > { %v2731_v12 = vadd.f32 %v2730_v59, %v2729_v38  ;;  %v2736_v9 = vadd.f32 %v2735_v35, %v2734_v20  ;;  %v2726_v55 = vadd.f32 %v2725_v1, %v2724_v32 }
 0x3c7   : > { %v2732_v22 = vrot.slane %v2731_v12, 1  ;;  %v2737_v5 = vrot.slane %v2736_v9, 2  ;;  %v2924_v57 = vsel %vm2900_vm6, %v2726_v55, %v2923_v45 }
 0x3c9   : > { %v2738_v62 = vadd.f32 %v2737_v5, %v2736_v9  ;;  %v2733_v28 = vadd.f32 %v2732_v22, %v2731_v12 }
 0x3cb   : > { %v2739_v37 = vrot.slane %v2738_v62, 1  ;;  %v2925_v41 = vsel %vm2902_vm7, %v2733_v28, %v2924_v57 }
 0x3cd   : > { %v2740_v10 = vadd.f32 %v2739_v37, %v2738_v62 }
 0x3cf   : > { %v2926_v61 = vsel %vm2904_vm8, %v2740_v10, %v2925_v41 }
 0x3d0   : > { %3649 = vmatmul.mubr.f32.gmra.mrb[66].mxu0 %v2926_v61 }
 0x3e4   : > { %v3609_v24 = vpop.f32.mrb[64].mxu1 }
 0x3e5   : > { %v2841_v15 = vpop.f32.mrb[65].mxu1 }
 0x407   : > { %v3612_v11 = vpop.f32.mrb[66].mxu1 }
 0x408   : > { %v2851_v31 = vpop.f32.mrb[67].mxu1 }
 0x45e   : > { %v3647_v40 = vpop.f32.mrb[64].mxu0 }
 0x45f   : > { %v3003_v25 = vadd.f32 %v3647_v40, %v3609_v24  ;;  %v2997_v42 = vpop.f32.mrb[65].mxu0 }
 0x460   : > { %v2998_v44 = vadd.f32 %v2997_v42, %v2841_v15 }
 0x461   : > { %v3022_v19 = vmul.f32 %v3020_v30, %v3003_v25 }
 0x462   : > { %v3021_v0 = vmul.f32 %v3020_v30, %v2998_v44 }
 0x463   : > { %3026 = vst [vmem:[%s329_s21 + $0x8] sm:$0xff] %v3022_v19 }
 0x464   : > { %3025 = vst [vmem:[%s329_s21] sm:$0xff] %v3021_v0 }
 0x4a3   : > { %v3650_v16 = vpop.f32.mrb[66].mxu0 }
 0x4a4   : > { %v3013_v2 = vadd.f32 %v3650_v16, %v3612_v11  ;;  %v3007_v33 = vpop.f32.mrb[67].mxu0 }
 0x4a5   : > { %v3008_v26 = vadd.f32 %v3007_v33, %v2851_v31 }
 0x4a6   : > { %v3024_v27 = vmul.f32 %v3020_v30, %v3013_v2 }
 0x4a7   : > { %v3023_v8 = vmul.f32 %v3020_v30, %v3008_v26 }
 0x4a8   : > { %3028 = vst [vmem:[%s329_s21 + $0x18] sm:$0xff] %v3024_v27 }
 0x4a9   : > { %3027 = vst [vmem:[%s329_s21 + $0x10] sm:$0xff] %v3023_v8 }
 0x4aa   : > { %4210 = shalt.err (!%p4207_p9)
}
 0x4ab   : > { %s4211_s16 = scalar_lea.hbm %s5771_s10, 512  ;;  %s4215_s20 = scalar_lea.hbm %s5822_s7, 1024 }
 0x4ac   : > { %p4212_p1 = scmp.ne.s32.totalorder %s5771_s10, %s4211_s16  ;;  %p4216_p11 = scmp.lt.u32.totalorder %s5771_s10, %s5822_s7 }
 0x4ad   : > { %p4217_p2 = scmp.lt.u32.totalorder %s4215_s20, %s4211_s16  ;;  %p4219_p6 = scmp.lt.u32.totalorder %s4211_s16, %s5771_s10 }
 0x4ae   : > { %p4213_p0 = pnand %p4212_p1, %p4414_p12 }
 0x4af   : > { %p4218_p4 = por %p4217_p2, %p4216_p11 }
 0x4b0   : > { %p4214_p5 = pneg %p4213_p0 }
 0x4b1   : > { %p4220_p8 = por %p4219_p6, %p4218_p4 }
 0x4b3   : > { %p4221_p10 = pnand %p4220_p8, %p4214_p5 }
 0x4b5   : > { %4224 = shalt.err (!%p4221_p10)
}
 0x4b6   : > { %s4275_s13 = smov 128   ;;  %s4276_s12 = smov 8  }
 0x4b7   : > { %3759 = dma.vmem_to_hbm [thread:$0]  (%p4414_p12), %s5766_s23, 512, %s5771_s10, %s3030_s25, %s4275_s13, %s4275_s13, %s4276_s12  }
 0x4b8 PF: > { %s3058_s30 = sand.u32 1, %s4255_s26   ;;  %p6113_p13 = scmp.ne.s32.totalorder %s5912_s9, 0 }
 0x4b9   : > { %p6114_p3 = scmp.ge.s32.totalorder %s4267_s29, 2  ;;  %s3059_s6 = scalar_lea.sflag [#allocation5], %s3058_s30 }
 0x4bb   : > { %p3770_p7 = pnand %p6114_p3, %p6113_p13 }
 0x4bd   : > { %4250 = dma.done.wait (!%p3770_p7), %s3059_s6, 512  }
 0x4be   : > { %4252 = vsyncadd (!%p3770_p7), %s3059_s6, 4294966784  ;;  %p22_p9 = scmp.ge.s32.totalorder %s4376_s14, 4   ;;  %s6115_s26 = smov %s4259_s27 }
 0x4bf   : > { %s6116_s27 = smov %s4263_s28  ;;  %s6117_s28 = smov %s4410_s18 }
 0x4c0   : > { %s6118_s29 = smov %s4376_s14  ;;  %24 = sbr.rel (!%p22_p9) target bundleno = 8 (0x8), region = 100 }
 0x4c7   :  { %3064 = vsyncpa [#allocation4], 1 }
 0x4c8   :  { %3066 = vsyncpa [#allocation4 + $0x1], 1 }
 0x4c9   :  { %3067 = vsyncpa [#allocation7], 1 }
 0x4ca   :  { %3068 = vsyncpa [#allocation5], 1 }
 0x4cb   :  { %3070 = vsyncpa [#allocation5 + $0x1], 1 }

// kernel: tpu_custom_call.1
= control target key start
LH: loop header
LB: loop body
LE: loop exit
PB: predicated region body
PF: predicated region fallthrough
CT: control target
= control target key end

     0   :  { %s5815_s0 = inlined_call_operand.hbm [shape: f32[64,16,128], index: 0, kind: input, shape index: {}]   ;;  %s5816_s1 = inlined_call_operand.vmem [shape: f32[64,8], index: 1, kind: input, shape index: {}]   ;;  %s5817_s2 = inlined_call_operand.vmem [shape: f32[128,128], index: 2, kind: input, shape index: {}]   ;;  %s5818_s3 = inlined_call_operand.vmem [shape: f32[128,1], index: 3, kind: input, shape index: {}]   ;;  %s5819_s4 = inlined_call_operand.hbm [shape: f32[128,128], index: 4, kind: input, shape index: {}]   ;;  %s5820_s5 = inlined_call_operand.vmem [shape: f32[8,128], index: 5, kind: input, shape index: {}]   ;;  %s5821_s6 = inlined_call_operand.<no memory space> [shape: f32[1], index: 6, kind: input, shape index: {}]   ;;  %s5822_s7 = inlined_call_operand.hbm [shape: f32[64,128], index: 7, kind: output, shape index: {}]  }
   0x1   :  { %12 = sst [smem:[#allocation2]] %s5821_s6 }
   0x2   :  { %13 = vsyncpa [#allocation4], 0 }
   0x3   :  { %15 = vsyncpa [#allocation4 + $0x1], 0 }
   0x4   :  { %16 = vsyncpa [#allocation7], 0 }
   0x5   :  { %17 = vsyncpa [#allocation5], 0 }
   0x6   :  { %19 = vsyncpa [#allocation5 + $0x1], 0  ;;  %s4320_s26 = smov 0   ;;  %s4322_s27 = smov 0  }
   0x7   :  { %s4324_s28 = smov 0   ;;  %s4326_s29 = smov 0  }
   0x8 LB: > { %s4341_s6 = sadd.s32 4294967295, %s4267_s29   ;;  %s3138_s30 = sadd.s32 4294967294, %s4267_s29   ;;  %s4267_s29 = sphi %s4326_s29, %s6118_s29   ;;  %s4263_s28 = sphi %s4324_s28, %s6117_s28   ;;  %s4259_s27 = sphi %s4322_s27, %s6116_s27   ;;  %s4255_s26 = sphi %s4320_s26, %s6115_s26  }
   0x9   : > { %p45_p0 = scmp.ne.s32.totalorder %s4259_s27, %s4255_s26  ;;  %p5823_p1 = scmp.eq.s32.totalorder %s4341_s6, 0 }
   0xa   : > { %p206_p3 = scmp.eq.s32.totalorder %s3138_s30, 1  ;;  %p3139_p5 = scmp.ge.s32.totalorder %s4267_s29, 1 }
   0xb   : > { %p4350_p4 = por %p5823_p1, %p45_p0  ;;  %p213_p7 = scmp.lt.s32.totalorder %s4267_s29, 3 }
   0xc   : > { %p4355_p6 = por %p206_p3, %p45_p0  ;;  %s4269_s11 = smov [#allocation6]  }
   0xd   : > { %s5911_s8 = scalar_select %p4350_p4, 1, 0 }
   0xe   : > { %s5912_s9 = scalar_select %p4355_p6, 1, 0 }
   0xf   : > { %p4360_p8 = pnand %p3139_p5, %p213_p7  ;;  %s231_s12 = sshll.u32 %s4269_s11, 4  ;;  %s4364_s12 = int_to_ptr.vmem [resolvable:$true] %s231_s12 }
  0x10   : > { %s4376_s14 = sadd.s32 1, %s4267_s29   ;;  %s32_s15 = sadd.s32 1, %s4263_s28 }
  0x11   : > { %s5913_s10 = scalar_select %p4360_p8, 1, 0 }
  0x12   : > { %p3761_p9 = pneg %p4360_p8  ;;  %s29_s16 = ssub.s32 %s4267_s29, %s4376_s14 }
  0x13   : > { %s4139_s19 = scalar_lea.hbm %s5819_s4, 2048 }
  0x14   : > { %p4371_p11 = pnand %p3761_p9, %p5823_p1  ;;  %p4140_p12 = scmp.ne.s32.totalorder %s5819_s4, %s4139_s19 }
  0x15   : > { %p4146_p5 = scmp.lt.u32.totalorder %s4139_s19, %s5819_s4 }
  0x16   : > { %p4141_p13 = pneg %p4371_p11 }
  0x18   : > { %p4142_p0 = pnand %p4141_p13, %p4140_p12 }
  0x1a   : > { %p4143_p3 = pneg %p4142_p0 }
  0x1c   : > { %p4148_p7 = pnand %p4146_p5, %p4143_p3 }
  0x1e   : > { %4151 = shalt.err (!%p4148_p7)
}
  0x1f   : > { %s4152_s24 = scalar_lea.vmem %s4364_s12, 2048  ;;  %p4160_p2 = scmp.lt.s32.totalorder %s4364_s12, %s4364_s12 }
  0x20   : > { %p4153_p9 = scmp.ne.s32.totalorder %s4364_s12, %s4152_s24  ;;  %p4161_p6 = scmp.lt.s32.totalorder %s4152_s24, %s4152_s24 }
  0x22   : > { %p4155_p10 = pnand %p4153_p9, %p4141_p13  ;;  %p4162_p4 = por %p4161_p6, %p4160_p2 }
  0x24   : > { %p4156_p1 = pneg %p4155_p10 }
  0x26   : > { %p4163_p8 = pnand %p4162_p4, %p4156_p1 }
  0x28   : > { %4166 = shalt.err (!%p4163_p8)
}
  0x29   : > { %s4270_s25 = smov 128   ;;  %s4271_s30 = smov 8  }
  0x2a   : > { %3764 = dma.hbm_to_vmem [thread:$0]  (!%p4371_p11), %s5819_s4, 2048, %s4364_s12, [#allocation7], %s4270_s25, %s4270_s25, %s4271_s30  }
  0x2b   : > { %p30_p1 = scmp.eq.s32.totalorder %s29_s16, 0  ;;  %p39_p2 = scmp.ne.s32.totalorder %s4263_s28, %s4259_s27 }
  0x2c   : > { %p40_p4 = scmp.eq.s32.totalorder %s4267_s29, 0  ;;  %p3774_p6 = scmp.lt.s32.totalorder %s4267_s29, 2 }
  0x2d   : > { %s4410_s18 = scalar_select %p30_p1, %s4263_s28, %s32_s15  }
  0x2e   : > { %p41_p8 = por %p40_p4, %p39_p2  ;;  %p5915_p10 = scmp.eq.s32.totalorder %s4341_s6, 1 }
  0x2f   : > { %s251_s13 = sand.u32 1, %s4263_s28   ;;  %s3162_s20 = sshll.u32 %s4267_s29, 13 }
  0x30   : > { %p4414_p12 = por %p5915_p10, %p39_p2  ;;  %s3142_s21 = sshll.u32 %s251_s13, 9 }
  0x31   : > { %s4423_s24 = scalar_lea.hbm %s5815_s0, %s3162_s20  ;;  %s255_s12 = scalar_lea.vmem [#allocation3], %s3142_s21 }
  0x32   : > { %s263_s15 = sshll.u32 %s255_s12, 4  ;;  %p4425_p11 = pnand %p3774_p6, %p41_p8  ;;  %s4429_s15 = int_to_ptr.vmem [resolvable:$true] %s263_s15 }
  0x33   : > { %s4431_s11 = scalar_lea.sflag [#allocation4], %s251_s13  ;;  %s4167_s17 = scalar_lea.hbm %s4423_s24, 8192 }
  0x34   : > { %p4168_p13 = scmp.ne.s32.totalorder %s4423_s24, %s4167_s17  ;;  %p4169_p0 = pneg %p4425_p11 }
  0x35   : > { %s4172_s22 = scalar_lea.hbm %s5815_s0, 16384  ;;  %p4173_p7 = scmp.lt.u32.totalorder %s4423_s24, %s5815_s0 }
  0x36   : > { %p4170_p3 = pnand %p4169_p0, %p4168_p13  ;;  %p4174_p9 = scmp.lt.u32.totalorder %s4172_s22, %s4167_s17 }
  0x37   : > { %p4176_p2 = scmp.lt.u32.totalorder %s4167_s17, %s4423_s24 }
  0x38   : > { %p4171_p5 = pneg %p4170_p3  ;;  %p4175_p1 = por %p4174_p9, %p4173_p7 }
  0x3a   : > { %p4177_p4 = por %p4176_p2, %p4175_p1 }
  0x3c   : > { %p4178_p6 = pnand %p4177_p4, %p4171_p5 }
  0x3e   : > { %4181 = shalt.err (!%p4178_p6)
}
  0x3f   : > { %s4182_s13 = scalar_lea.vmem %s4429_s15, 8192  ;;  %s4272_s20 = smov [#allocation3]  }
  0x40   : > { %p4183_p8 = scmp.ne.s32.totalorder %s4429_s15, %s4182_s13  ;;  %s4187_s21 = sshll.u32 %s4272_s20, 4  ;;  %s4188_s21 = int_to_ptr.vmem [resolvable:$false] %s4187_s21 }
  0x41   : > { %s4189_s23 = scalar_lea.vmem %s4188_s21, 16384  ;;  %p4190_p3 = scmp.lt.s32.totalorder %s4429_s15, %s4188_s21 }
  0x42   : > { %p4185_p10 = pnand %p4183_p8, %p4169_p0  ;;  %p4191_p7 = scmp.lt.s32.totalorder %s4189_s23, %s4182_s13 }
  0x44   : > { %p4186_p13 = pneg %p4185_p10  ;;  %p4192_p9 = por %p4191_p7, %p4190_p3 }
  0x46   : > { %p4193_p1 = pnand %p4192_p9, %p4186_p13 }
  0x48   : > { %4196 = shalt.err (!%p4193_p1)
}
  0x49   : > { %3768 = dma.hbm_to_vmem [thread:$0]  (!%p4425_p11), %s4423_s24, 8192, %s4429_s15, %s4431_s11, %s4270_s25, %s4270_s25, %s4271_s30  }
  0x4a   : > { %p5918_p0 = scmp.ne.s32.totalorder %s5913_s10, 0 }
  0x4c   : > { %284 = sbr.rel (%p5918_p0) target bundleno = 1208 (0x4b8), region = 48 }
  0x53   : > { %s4465_s17 = sand.u32 1, %s4259_s27   ;;  %p5919_p5 = scmp.ne.s32.totalorder %s5911_s8, 0 }
  0x54   : > { %s3147_s22 = sshll.u32 %s4465_s17, 9  ;;  %s287_s12 = scalar_lea.sflag [#allocation4], %s4465_s17 }
  0x55   : > { %s4469_s13 = scalar_lea.vmem [#allocation3], %s3147_s22 }
  0x56   : > { %4242 = dma.done.wait (%p5919_p5), %s287_s12, 8192  }
  0x57   : > { %4244 = vsyncadd (%p5919_p5), %s287_s12, 4294959104  ;;  %p5920_p11 = scmp.eq.s32.totalorder %s4341_s6, 0 }
  0x59   : > { %4246 = dma.done.wait (%p5920_p11), [#allocation7], 2048   ;;  %p5921_p2 = pmov %p5920_p11 }
  0x5a   : > { %v402_v0 = vld [vmem:[%s5817_s2] sm:$0xff]  ;;  %v403_v1 = vld [vmem:[%s5817_s2 + $0x8] sm:$0xff]  ;;  %v404_v2 = vld [vmem:[%s5817_s2 + $0x10] sm:$0xff]  ;;  %vm1268_vm0 = vcmask 7168   ;;  %s3150_s10 = sshll.u32 %s4341_s6, 2  ;;  %vm2762_vm1 = vcmask 64512  }
  0x5b   : > { %4248 = vsyncadd (%p5921_p2), [#allocation7], 4294965248  ;;  %v3651_v3 = vpack.c.bf16 %v403_v1, %v402_v0  ;;  %v405_v4 = vld [vmem:[%s5817_s2 + $0x18] sm:$0xff]  ;;  %v406_v6 = vld [vmem:[%s5817_s2 + $0x20] sm:$0xff]  ;;  %p5591_p4 = scmp.lt.s32.totalorder %s3150_s10, 7  ;;  %vm2892_vm2 = vcmask 1041409  }
  0x5c   : > { %v3655_v5 = vpack.c.bf16 %v405_v4, %v404_v2  ;;  %v407_v7 = vld [vmem:[%s5817_s2 + $0x28] sm:$0xff]  ;;  %v338_v9 = vld [vmem:[%s4469_s13] sm:$0xff]  ;;  %v408_v10 = vld [vmem:[%s5817_s2 + $0x30] sm:$0xff]  ;;  %vm2894_vm3 = vcmask 1042434   ;;  %vm2896_vm4 = vcmask 1043459   ;;  %vm2898_vm5 = vcmask 1044484  }
  0x5d   : > { %3652 = vmatprep.subr.bf16.mxu0 %v3651_v3  ;;  %v3659_v8 = vpack.c.bf16 %v407_v7, %v406_v6  ;;  %v409_v11 = vld [vmem:[%s5817_s2 + $0x38] sm:$0xff]  ;;  %3381 = vmatprep.mubr.f32.mxu0 %v338_v9  ;;  %v410_v13 = vld [vmem:[%s5817_s2 + $0x40] sm:$0xff]  ;;  %v411_v14 = vld [vmem:[%s5817_s2 + $0x48] sm:$0xff]  ;;  %s6120_s10 = smov (!%p5591_p4, %s3150_s10), 7  ;;  %vm2900_vm6 = vcmask 1045509   ;;  %vm2902_vm7 = vcmask 1046534  }
  0x5e   : > { %3654 = vmatpush3.bf16.msra.mxu0 %v3651_v3  ;;  %v3663_v12 = vpack.c.bf16 %v409_v11, %v408_v10  ;;  %v3667_v15 = vpack.c.bf16 %v411_v14, %v410_v13  ;;  %v412_v16 = vld [vmem:[%s5817_s2 + $0x50] sm:$0xff]  ;;  %v413_v17 = vld [vmem:[%s5817_s2 + $0x58] sm:$0xff]  ;;  %v414_v19 = vld [vmem:[%s5817_s2 + $0x60] sm:$0xff]  ;;  %s3151_s30 = sshll.u32 %s6120_s10, 3  ;;  %vm2904_vm8 = vcmask 1047559   ;;  %s3016_s8 = sld [smem:[#allocation2]] }
  0x5f   : > { %3656 = vmatprep.subr.bf16.mxu0 %v3655_v5  ;;  %v3671_v18 = vpack.c.bf16 %v413_v17, %v412_v16  ;;  %v415_v20 = vld [vmem:[%s5817_s2 + $0x68] sm:$0xff]  ;;  %v416_v22 = vld [vmem:[%s5817_s2 + $0x70] sm:$0xff]  ;;  %v417_v23 = vld [vmem:[%s5817_s2 + $0x78] sm:$0xff]  ;;  %s5627_s16 = scalar_lea.vmem %s5816_s1, %s3151_s30  ;;  %s3149_s20 = sshll.u32 %s4465_s17, 5 }
  0x60   : > { %v3675_v21 = vpack.c.bf16 %v415_v20, %v414_v19  ;;  %v3679_v24 = vpack.c.bf16 %v417_v23, %v416_v22  ;;  %v867_v25 = vld [vmem:[%s5818_s3] sm:$0xff]  ;;  %v868_v26 = vld [vmem:[%s5818_s3 + $0x8] sm:$0xff]  ;;  %v869_v27 = vld [vmem:[%s5818_s3 + $0x10] sm:$0xff]  ;;  %s329_s21 = scalar_lea.vmem [#allocation8], %s3149_s20  ;;  %s3163_s22 = sshll.u32 %s4341_s6, 9 }
  0x61   : > { %v339_v28 = vld [vmem:[%s4469_s13 + $0x8] sm:$0xff]  ;;  %v3683_v29 = vpack.c.bf16 %v868_v26, %v867_v25  ;;  %v870_v30 = vld [vmem:[%s5818_s3 + $0x18] sm:$0xff]  ;;  %v340_v31 = vld [vmem:[%s4469_s13 + $0x10] sm:$0xff]  ;;  %s3043_s23 = sshll.u32 %s329_s21, 4  ;;  %s5771_s10 = scalar_lea.hbm %s5822_s7, %s3163_s22  ;;  %s5766_s23 = int_to_ptr.vmem [resolvable:$true] %s3043_s23 }
  0x62   : > { %3658 = vmatpush3.bf16.msra.mxu0 %v3655_v5  ;;  %v3687_v32 = vpack.c.bf16 %v870_v30, %v869_v27  ;;  %v871_v33 = vld [vmem:[%s5818_s3 + $0x20] sm:$0xff]  ;;  %v872_v34 = vld [vmem:[%s5818_s3 + $0x28] sm:$0xff]  ;;  %v341_v35 = vld [vmem:[%s4469_s13 + $0x18] sm:$0xff]  ;;  %s3030_s25 = scalar_lea.sflag [#allocation5], %s4465_s17  ;;  %s4197_s30 = scalar_lea.vmem %s5766_s23, 512 }
  0x63   : > { %3660 = vmatprep.subr.bf16.mxu0 %v3659_v8  ;;  %3684 = vmatprep.subr.bf16.mxu1 %v3683_v29  ;;  %v3691_v36 = vpack.c.bf16 %v872_v34, %v871_v33  ;;  %v342_v37 = vld [vmem:[%s4469_s13 + $0x20] sm:$0xff]  ;;  %v873_v38 = vld [vmem:[%s5818_s3 + $0x30] sm:$0xff]  ;;  %v874_v39 = vld [vmem:[%s5818_s3 + $0x38] sm:$0xff]  ;;  %p4198_p6 = scmp.ne.s32.totalorder %s5766_s23, %s4197_s30  ;;  %s4274_s6 = smov [#allocation8]  }
  0x64   : > { %3686 = vmatpush3.bf16.msra.mxu1 %v3683_v29  ;;  %v343_v40 = vld [vmem:[%s4469_s13 + $0x28] sm:$0xff]  ;;  %v3695_v41 = vpack.c.bf16 %v874_v39, %v873_v38  ;;  %v344_v42 = vld [vmem:[%s4469_s13 + $0x30] sm:$0xff]  ;;  %v875_v43 = vld [vmem:[%s5818_s3 + $0x40] sm:$0xff]  ;;  %s4201_s24 = sshll.u32 %s4274_s6, 4  ;;  %s4202_s24 = int_to_ptr.vmem [resolvable:$false] %s4201_s24 }
  0x65   : > { %3688 = vmatprep.subr.bf16.mxu1 %v3687_v32  ;;  %v876_v44 = vld [vmem:[%s5818_s3 + $0x48] sm:$0xff]  ;;  %v345_v45 = vld [vmem:[%s4469_s13 + $0x38] sm:$0xff]  ;;  %v346_v47 = vld [vmem:[%s4469_s13 + $0x40] sm:$0xff]  ;;  %p4199_p8 = pnand %p4198_p6, %p4414_p12  ;;  %s4203_s15 = scalar_lea.vmem %s4202_s24, 1024 }
  0x66   : > { %3662 = vmatpush3.bf16.msra.mxu0 %v3659_v8  ;;  %v3699_v46 = vpack.c.bf16 %v876_v44, %v875_v43  ;;  %v347_v48 = vld [vmem:[%s4469_s13 + $0x48] sm:$0xff]  ;;  %v348_v49 = vld [vmem:[%s4469_s13 + $0x50] sm:$0xff]  ;;  %v349_v50 = vld [vmem:[%s4469_s13 + $0x58] sm:$0xff]  ;;  %p4204_p13 = scmp.lt.s32.totalorder %s5766_s23, %s4202_s24  ;;  %p4205_p3 = scmp.lt.s32.totalorder %s4203_s15, %s4197_s30 }
  0x67   : > { %3664 = vmatprep.subr.bf16.mxu0 %v3663_v12  ;;  %v350_v51 = vld [vmem:[%s4469_s13 + $0x60] sm:$0xff]  ;;  %v351_v52 = vld [vmem:[%s4469_s13 + $0x68] sm:$0xff]  ;;  %v352_v53 = vld [vmem:[%s4469_s13 + $0x70] sm:$0xff]  ;;  %p4200_p10 = pneg %p4199_p8 }
  0x68   : > { %3690 = vmatpush3.bf16.msra.mxu1 %v3687_v32  ;;  %v353_v54 = vld [vmem:[%s4469_s13 + $0x78] sm:$0xff]  ;;  %v354_v55 = vld [vmem:[%s4469_s13 + $0x80] sm:$0xff]  ;;  %v355_v56 = vld [vmem:[%s4469_s13 + $0x88] sm:$0xff]  ;;  %p4206_p7 = por %p4205_p3, %p4204_p13 }
  0x69   : > { %3692 = vmatprep.subr.bf16.mxu1 %v3691_v36  ;;  %v356_v57 = vld [vmem:[%s4469_s13 + $0x90] sm:$0xff]  ;;  %v357_v58 = vld [vmem:[%s4469_s13 + $0x98] sm:$0xff]  ;;  %v358_v59 = vld [vmem:[%s4469_s13 + $0xa0] sm:$0xff] }
  0x6a   : > { %3666 = vmatpush3.bf16.msra.mxu0 %v3663_v12  ;;  %v359_v60 = vld [vmem:[%s4469_s13 + $0xa8] sm:$0xff]  ;;  %v360_v61 = vld [vmem:[%s4469_s13 + $0xb0] sm:$0xff]  ;;  %v361_v62 = vld [vmem:[%s4469_s13 + $0xb8] sm:$0xff]  ;;  %p4207_p9 = pnand %p4206_p7, %p4200_p10 }
  0x6b   : > { %3668 = vmatprep.subr.bf16.mxu0 %v3667_v15  ;;  %v362_v63 = vld [vmem:[%s4469_s13 + $0xc0] sm:$0xff]  ;;  %v363_v0 = vld [vmem:[%s4469_s13 + $0xc8] sm:$0xff]  ;;  %v364_v1 = vld [vmem:[%s4469_s13 + $0xd0] sm:$0xff] }
  0x6c   : > { %3694 = vmatpush3.bf16.msra.mxu1 %v3691_v36  ;;  %v365_v2 = vld [vmem:[%s4469_s13 + $0xd8] sm:$0xff]  ;;  %v366_v3 = vld [vmem:[%s4469_s13 + $0xe0] sm:$0xff]  ;;  %v367_v4 = vld [vmem:[%s4469_s13 + $0xe8] sm:$0xff] }
  0x6d   : > { %3696 = vmatprep.subr.bf16.mxu1 %v3695_v41  ;;  %v368_v5 = vld [vmem:[%s4469_s13 + $0xf0] sm:$0xff]  ;;  %v369_v6 = vld [vmem:[%s4469_s13 + $0xf8] sm:$0xff]  ;;  %v370_v7 = vld [vmem:[%s4469_s13 + $0x100] sm:$0xff] }
  0x6e   : > { %3670 = vmatpush3.bf16.msra.mxu0 %v3667_v15  ;;  %v371_v8 = vld [vmem:[%s4469_s13 + $0x108] sm:$0xff]  ;;  %v372_v9 = vld [vmem:[%s4469_s13 + $0x110] sm:$0xff]  ;;  %v373_v10 = vld [vmem:[%s4469_s13 + $0x118] sm:$0xff] }
  0x6f   : > { %3672 = vmatprep.subr.bf16.mxu0 %v3671_v18  ;;  %v374_v11 = vld [vmem:[%s4469_s13 + $0x120] sm:$0xff]  ;;  %v375_v12 = vld [vmem:[%s4469_s13 + $0x128] sm:$0xff]  ;;  %v376_v13 = vld [vmem:[%s4469_s13 + $0x130] sm:$0xff] }
  0x70   : > { %3698 = vmatpush3.bf16.msra.mxu1 %v3695_v41  ;;  %v377_v14 = vld [vmem:[%s4469_s13 + $0x138] sm:$0xff]  ;;  %v378_v15 = vld [vmem:[%s4469_s13 + $0x140] sm:$0xff]  ;;  %v379_v16 = vld [vmem:[%s4469_s13 + $0x148] sm:$0xff] }
  0x71   : > { %3700 = vmatprep.subr.bf16.mxu1 %v3699_v46  ;;  %v380_v17 = vld [vmem:[%s4469_s13 + $0x150] sm:$0xff]  ;;  %v382_v19 = vld [vmem:[%s4469_s13 + $0x160] sm:$0xff]  ;;  %v383_v23 = vld [vmem:[%s4469_s13 + $0x168] sm:$0xff] }
  0x72   : > { %3674 = vmatpush3.bf16.msra.mxu0 %v3671_v18  ;;  %v381_v18 = vld [vmem:[%s4469_s13 + $0x158] sm:$0xff]  ;;  %v877_v20 = vld [vmem:[%s5818_s3 + $0x50] sm:$0xff]  ;;  %v879_v25 = vld [vmem:[%s5818_s3 + $0x60] sm:$0xff] }
  0x73   : > { %3676 = vmatprep.subr.bf16.mxu0 %v3675_v21  ;;  %v880_v26 = vld [vmem:[%s5818_s3 + $0x68] sm:$0xff]  ;;  %v386_v29 = vld [vmem:[%s4469_s13 + $0x180] sm:$0xff]  ;;  %v881_v30 = vld [vmem:[%s5818_s3 + $0x70] sm:$0xff] }
  0x74   : > { %3702 = vmatpush3.bf16.msra.mxu1 %v3699_v46  ;;  %v3707_v27 = vpack.c.bf16 %v880_v26, %v879_v25  ;;  %v387_v33 = vld [vmem:[%s4469_s13 + $0x188] sm:$0xff]  ;;  %v388_v34 = vld [vmem:[%s4469_s13 + $0x190] sm:$0xff]  ;;  %v390_v36 = vld [vmem:[%s4469_s13 + $0x1a0] sm:$0xff] }
  0x75   : > { %v392_v38 = vld [vmem:[%s4469_s13 + $0x1b0] sm:$0xff]  ;;  %v393_v39 = vld [vmem:[%s4469_s13 + $0x1b8] sm:$0xff]  ;;  %v395_v41 = vld [vmem:[%s4469_s13 + $0x1c8] sm:$0xff] }
  0x76   : > { %3678 = vmatpush3.bf16.msra.mxu0 %v3675_v21  ;;  %v878_v21 = vld [vmem:[%s5818_s3 + $0x58] sm:$0xff]  ;;  %v398_v44 = vld [vmem:[%s4469_s13 + $0x1e0] sm:$0xff]  ;;  %v400_v46 = vld [vmem:[%s4469_s13 + $0x1f0] sm:$0xff] }
  0x77   : > { %3680 = vmatprep.subr.bf16.mxu0 %v3679_v24  ;;  %v3703_v22 = vpack.c.bf16 %v878_v21, %v877_v20  ;;  %v397_v43 = vld [vmem:[%s4469_s13 + $0x1d8] sm:$0xff] }
  0x79   : > { %3704 = vmatprep.subr.bf16.mxu1 %v3703_v22 }
  0x7a   : > { %3682 = vmatpush3.bf16.msra.mxu0 %v3679_v24  ;;  %v384_v24 = vld [vmem:[%s4469_s13 + $0x170] sm:$0xff]  ;;  %3706 = vmatpush3.bf16.msra.mxu1 %v3703_v22 }
  0x7b   : > { %3708 = vmatprep.subr.bf16.mxu1 %v3707_v27 }
  0x7d   : > { %3382 = vmatmul.mubr.f32.vlgmr.msra.gmra.mrb[0].mxu0 %v339_v28  ;;  %v385_v28 = vld [vmem:[%s4469_s13 + $0x178] sm:$0xff] }
  0x7e   : > { %3384 = vmatprep.mubr.f32.mxu0 %v340_v31  ;;  %3710 = vmatpush3.bf16.msra.mxu1 %v3707_v27  ;;  %v882_v31 = vld [vmem:[%s5818_s3 + $0x78] sm:$0xff] }
  0x7f   : > { %v3711_v32 = vpack.c.bf16 %v882_v31, %v881_v30 }
  0x81   : > { %3385 = vmatmul.mubr.f32.gmra.mrb[2].mxu0 %v341_v35  ;;  %3712 = vmatprep.subr.bf16.mxu1 %v3711_v32  ;;  %v389_v35 = vld [vmem:[%s4469_s13 + $0x198] sm:$0xff] }
  0x82   : > { %3387 = vmatprep.mubr.f32.mxu0 %v342_v37  ;;  %3714 = vmatpush3.bf16.msra.mxu1 %v3711_v32  ;;  %v391_v37 = vld [vmem:[%s4469_s13 + $0x1a8] sm:$0xff] }
  0x85   : > { %3388 = vmatmul.mubr.f32.gmra.mrb[4].mxu0 %v343_v40  ;;  %v394_v40 = vld [vmem:[%s4469_s13 + $0x1c0] sm:$0xff] }
  0x86   : > { %3390 = vmatprep.mubr.f32.mxu0 %v344_v42  ;;  %v396_v42 = vld [vmem:[%s4469_s13 + $0x1d0] sm:$0xff] }
  0x89   : > { %3391 = vmatmul.mubr.f32.gmra.mrb[6].mxu0 %v345_v45  ;;  %v399_v45 = vld [vmem:[%s4469_s13 + $0x1e8] sm:$0xff] }
  0x8a   : > { %3393 = vmatprep.mubr.f32.mxu0 %v346_v47  ;;  %v401_v47 = vld [vmem:[%s4469_s13 + $0x1f8] sm:$0xff] }
  0x8d   : > { %3394 = vmatmul.mubr.f32.gmra.mrb[8].mxu0 %v347_v48 }
  0x8e   : > { %3396 = vmatprep.mubr.f32.mxu0 %v348_v49 }
  0x91   : > { %3397 = vmatmul.mubr.f32.gmra.mrb[10].mxu0 %v349_v50 }
  0x92   : > { %3399 = vmatprep.mubr.f32.mxu0 %v350_v51 }
  0x95   : > { %3400 = vmatmul.mubr.f32.gmra.mrb[12].mxu0 %v351_v52 }
  0x96   : > { %3402 = vmatprep.mubr.f32.mxu0 %v352_v53 }
  0x99   : > { %3403 = vmatmul.mubr.f32.gmra.mrb[14].mxu0 %v353_v54 }
  0x9a   : > { %3405 = vmatprep.mubr.f32.mxu0 %v354_v55 }
  0x9d   : > { %3406 = vmatmul.mubr.f32.gmra.mrb[16].mxu0 %v355_v56 }
  0x9e   : > { %3408 = vmatprep.mubr.f32.mxu0 %v356_v57 }
  0xa1   : > { %3409 = vmatmul.mubr.f32.gmra.mrb[18].mxu0 %v357_v58 }
  0xa2   : > { %3411 = vmatprep.mubr.f32.mxu0 %v358_v59 }
  0xa5   : > { %3412 = vmatmul.mubr.f32.gmra.mrb[20].mxu0 %v359_v60 }
  0xa6   : > { %3414 = vmatprep.mubr.f32.mxu0 %v360_v61 }
  0xa9   : > { %3415 = vmatmul.mubr.f32.gmra.mrb[22].mxu0 %v361_v62 }
  0xaa   : > { %3417 = vmatprep.mubr.f32.mxu0 %v362_v63 }
  0xad   : > { %3418 = vmatmul.mubr.f32.gmra.mrb[24].mxu0 %v363_v0 }
  0xae   : > { %3420 = vmatprep.mubr.f32.mxu0 %v364_v1 }
  0xb1   : > { %3421 = vmatmul.mubr.f32.gmra.mrb[26].mxu0 %v365_v2 }
  0xb2   : > { %3423 = vmatprep.mubr.f32.mxu0 %v366_v3 }
  0xb5   : > { %3424 = vmatmul.mubr.f32.gmra.mrb[28].mxu0 %v367_v4 }
  0xb6   : > { %3426 = vmatprep.mubr.f32.mxu0 %v368_v5 }
  0xb9   : > { %3427 = vmatmul.mubr.f32.gmra.mrb[30].mxu0 %v369_v6 }
  0xba   : > { %3429 = vmatprep.mubr.f32.mxu0 %v370_v7 }
  0xbd   : > { %3430 = vmatmul.mubr.f32.gmra.mrb[32].mxu0 %v371_v8 }
  0xbe   : > { %3432 = vmatprep.mubr.f32.mxu0 %v372_v9 }
  0xc1   : > { %3433 = vmatmul.mubr.f32.gmra.mrb[34].mxu0 %v373_v10 }
  0xc2   : > { %3435 = vmatprep.mubr.f32.mxu0 %v374_v11 }
  0xc5   : > { %3436 = vmatmul.mubr.f32.gmra.mrb[36].mxu0 %v375_v12 }
  0xc6   : > { %3438 = vmatprep.mubr.f32.mxu0 %v376_v13 }
  0xc9   : > { %3439 = vmatmul.mubr.f32.gmra.mrb[38].mxu0 %v377_v14 }
  0xca   : > { %3441 = vmatprep.mubr.f32.mxu0 %v378_v15 }
  0xcd   : > { %3442 = vmatmul.mubr.f32.gmra.mrb[40].mxu0 %v379_v16 }
  0xce   : > { %3444 = vmatprep.mubr.f32.mxu0 %v380_v17 }
  0xd1   : > { %3445 = vmatmul.mubr.f32.gmra.mrb[42].mxu0 %v381_v18 }
  0xd2   : > { %3447 = vmatprep.mubr.f32.mxu0 %v382_v19 }
  0xd5   : > { %3448 = vmatmul.mubr.f32.gmra.mrb[44].mxu0 %v383_v23 }
  0xd6   : > { %3450 = vmatprep.mubr.f32.mxu0 %v384_v24 }
  0xd9   : > { %3451 = vmatmul.mubr.f32.gmra.mrb[46].mxu0 %v385_v28 }
  0xda   : > { %3453 = vmatprep.mubr.f32.mxu0 %v386_v29 }
  0xdd   : > { %3454 = vmatmul.mubr.f32.gmra.mrb[48].mxu0 %v387_v33 }
  0xde   : > { %3456 = vmatprep.mubr.f32.mxu0 %v388_v34 }
  0xe1   : > { %3457 = vmatmul.mubr.f32.gmra.mrb[50].mxu0 %v389_v35 }
  0xe2   : > { %3459 = vmatprep.mubr.f32.mxu0 %v390_v36 }
  0xe5   : > { %3460 = vmatmul.mubr.f32.gmra.mrb[52].mxu0 %v391_v37 }
  0xe6   : > { %3462 = vmatprep.mubr.f32.mxu0 %v392_v38 }
  0xe9   : > { %3463 = vmatmul.mubr.f32.gmra.mrb[54].mxu0 %v393_v39 }
  0xea   : > { %3465 = vmatprep.mubr.f32.mxu0 %v394_v40 }
  0xed   : > { %3466 = vmatmul.mubr.f32.gmra.mrb[56].mxu0 %v395_v41 }
  0xee   : > { %3468 = vmatprep.mubr.f32.mxu0 %v396_v42 }
  0xf1   : > { %3469 = vmatmul.mubr.f32.gmra.mrb[58].mxu0 %v397_v43 }
  0xf2   : > { %3471 = vmatprep.mubr.f32.mxu0 %v398_v44 }
  0xf5   : > { %3472 = vmatmul.mubr.f32.gmra.mrb[60].mxu0 %v399_v45 }
  0xf6   : > { %3474 = vmatprep.mubr.f32.mxu0 %v400_v46 }
  0xf9   : > { %3475 = vmatmul.mubr.f32.gmra.mrb[62].mxu0 %v401_v47 }
 0x150   : > { %v3383_v48 = vpop.f32.mrb[0].mxu0 }
 0x151   : > { %v484_v49 = vpop.f32.mrb[1].mxu0 }
 0x152   : > { %3817 = vtanh.f32 %v484_v49 }
 0x153   : > { %3819 = vtanh.f32 %v3383_v48 }
 0x154   : > { %v3386_v50 = vpop.f32.mrb[2].mxu0 }
 0x155   : > { %v494_v51 = vpop.f32.mrb[3].mxu0 }
 0x156   : > { %3821 = vtanh.f32 %v494_v51 }
 0x157   : > { %3823 = vtanh.f32 %v3386_v50 }
 0x158   : > { %v3389_v52 = vpop.f32.mrb[4].mxu0 }
 0x159   : > { %3825 = vtanh.f32 %v3389_v52  ;;  %v504_v53 = vpop.f32.mrb[5].mxu0 }
 0x15a   : > { %3827 = vtanh.f32 %v504_v53 }
 0x15c   : > { %v4639_v54 = vpop.eup %3817  ;;  %v3392_v55 = vpop.f32.mrb[6].mxu0 }
 0x15d   : > { %5922 = vst [vmem:[#allocation12_spill] sm:$0xff] %v4639_v54  ;;  %v4641_v56 = vpop.eup %3819  ;;  %3829 = vtanh.f32 %v3392_v55  ;;  %v514_v57 = vpop.f32.mrb[7].mxu0  ;;  %3509 = vmatprep.mubr.f32.mxu1 %v4639_v54 }
 0x15e   : > { %5923 = vst [vmem:[#allocation13_spill] sm:$0xff] %v4641_v56  ;;  %3831 = vtanh.f32 %v514_v57  ;;  %3510 = vmatmul.mubr.f32.vlgmr.msra.gmra.mrb[0].mxu1 %v4641_v56 }
 0x160   : > { %v4645_v58 = vpop.eup %3821  ;;  %v3395_v59 = vpop.f32.mrb[8].mxu0 }
 0x161   : > { %5924 = vst [vmem:[#allocation14_spill] sm:$0xff] %v4645_v58  ;;  %v4647_v60 = vpop.eup %3823  ;;  %3833 = vtanh.f32 %v3395_v59  ;;  %v524_v61 = vpop.f32.mrb[9].mxu0  ;;  %3512 = vmatprep.mubr.f32.mxu1 %v4645_v58 }
 0x162   : > { %5925 = vst [vmem:[#allocation15_spill] sm:$0xff] %v4647_v60  ;;  %3835 = vtanh.f32 %v524_v61  ;;  %3513 = vmatmul.mubr.f32.gmra.mrb[2].mxu1 %v4647_v60 }
 0x163   : > { %v4651_v62 = vpop.eup %3825 }
 0x164   : > { %5926 = vst [vmem:[#allocation16_spill] sm:$0xff] %v4651_v62  ;;  %v4653_v63 = vpop.eup %3827  ;;  %v3398_v0 = vpop.f32.mrb[10].mxu0 }
 0x165   : > { %5927 = vst [vmem:[#allocation17_spill] sm:$0xff] %v4653_v63  ;;  %3837 = vtanh.f32 %v3398_v0  ;;  %v534_v1 = vpop.f32.mrb[11].mxu0  ;;  %3515 = vmatprep.mubr.f32.mxu1 %v4653_v63 }
 0x166   : > { %3839 = vtanh.f32 %v534_v1  ;;  %3516 = vmatmul.mubr.f32.gmra.mrb[4].mxu1 %v4651_v62 }
 0x167   : > { %v4657_v2 = vpop.eup %3829 }
 0x168   : > { %5928 = vst [vmem:[#allocation18_spill] sm:$0xff] %v4657_v2  ;;  %v4659_v3 = vpop.eup %3831  ;;  %v3401_v4 = vpop.f32.mrb[12].mxu0 }
 0x169   : > { %5929 = vst [vmem:[#allocation19_spill] sm:$0xff] %v4659_v3  ;;  %3841 = vtanh.f32 %v3401_v4  ;;  %v544_v5 = vpop.f32.mrb[13].mxu0  ;;  %3518 = vmatprep.mubr.f32.mxu1 %v4659_v3 }
 0x16a   : > { %3843 = vtanh.f32 %v544_v5  ;;  %3519 = vmatmul.mubr.f32.gmra.mrb[6].mxu1 %v4657_v2 }
 0x16b   : > { %v4663_v6 = vpop.eup %3833 }
 0x16c   : > { %5930 = vst [vmem:[#allocation20_spill] sm:$0xff] %v4663_v6  ;;  %v4665_v7 = vpop.eup %3835  ;;  %v3404_v8 = vpop.f32.mrb[14].mxu0 }
 0x16d   : > { %5931 = vst [vmem:[#allocation21_spill] sm:$0xff] %v4665_v7  ;;  %3845 = vtanh.f32 %v3404_v8  ;;  %v554_v9 = vpop.f32.mrb[15].mxu0  ;;  %3521 = vmatprep.mubr.f32.mxu1 %v4665_v7 }
 0x16e   : > { %3847 = vtanh.f32 %v554_v9  ;;  %3522 = vmatmul.mubr.f32.gmra.mrb[8].mxu1 %v4663_v6 }
 0x16f   : > { %v4669_v10 = vpop.eup %3837 }
 0x170   : > { %5932 = vst [vmem:[#allocation22_spill] sm:$0xff] %v4669_v10  ;;  %v4671_v11 = vpop.eup %3839  ;;  %v3407_v12 = vpop.f32.mrb[16].mxu0 }
 0x171   : > { %5933 = vst [vmem:[#allocation23_spill] sm:$0xff] %v4671_v11  ;;  %3849 = vtanh.f32 %v3407_v12  ;;  %v564_v13 = vpop.f32.mrb[17].mxu0  ;;  %3524 = vmatprep.mubr.f32.mxu1 %v4671_v11 }
 0x172   : > { %3851 = vtanh.f32 %v564_v13  ;;  %3525 = vmatmul.mubr.f32.gmra.mrb[10].mxu1 %v4669_v10 }
 0x173   : > { %v4675_v14 = vpop.eup %3841 }
 0x174   : > { %5934 = vst [vmem:[#allocation24_spill] sm:$0xff] %v4675_v14  ;;  %v4677_v15 = vpop.eup %3843  ;;  %v3410_v16 = vpop.f32.mrb[18].mxu0 }
 0x175   : > { %5935 = vst [vmem:[#allocation25_spill] sm:$0xff] %v4677_v15  ;;  %3853 = vtanh.f32 %v3410_v16  ;;  %v574_v17 = vpop.f32.mrb[19].mxu0  ;;  %3527 = vmatprep.mubr.f32.mxu1 %v4677_v15 }
 0x176   : > { %3855 = vtanh.f32 %v574_v17  ;;  %3528 = vmatmul.mubr.f32.gmra.mrb[12].mxu1 %v4675_v14 }
 0x177   : > { %v4681_v18 = vpop.eup %3845 }
 0x178   : > { %5936 = vst [vmem:[#allocation26_spill] sm:$0xff] %v4681_v18  ;;  %v4683_v19 = vpop.eup %3847  ;;  %v3413_v20 = vpop.f32.mrb[20].mxu0 }
 0x179   : > { %5937 = vst [vmem:[#allocation27_spill] sm:$0xff] %v4683_v19  ;;  %3857 = vtanh.f32 %v3413_v20  ;;  %v584_v21 = vpop.f32.mrb[21].mxu0  ;;  %3530 = vmatprep.mubr.f32.mxu1 %v4683_v19 }
 0x17a   : > { %3859 = vtanh.f32 %v584_v21  ;;  %3531 = vmatmul.mubr.f32.gmra.mrb[14].mxu1 %v4681_v18 }
 0x17b   : > { %v4687_v22 = vpop.eup %3849 }
 0x17c   : > { %5938 = vst [vmem:[#allocation28_spill] sm:$0xff] %v4687_v22  ;;  %v4689_v23 = vpop.eup %3851  ;;  %v3416_v24 = vpop.f32.mrb[22].mxu0 }
 0x17d   : > { %5939 = vst [vmem:[#allocation29_spill] sm:$0xff] %v4689_v23  ;;  %3861 = vtanh.f32 %v3416_v24  ;;  %v594_v25 = vpop.f32.mrb[23].mxu0  ;;  %3533 = vmatprep.mubr.f32.mxu1 %v4689_v23 }
 0x17e   : > { %3863 = vtanh.f32 %v594_v25  ;;  %3534 = vmatmul.mubr.f32.gmra.mrb[16].mxu1 %v4687_v22 }
 0x17f   : > { %v4693_v26 = vpop.eup %3853 }
 0x180   : > { %5940 = vst [vmem:[#allocation30_spill] sm:$0xff] %v4693_v26  ;;  %v4695_v27 = vpop.eup %3855  ;;  %v3419_v28 = vpop.f32.mrb[24].mxu0 }
 0x181   : > { %5941 = vst [vmem:[#allocation31_spill] sm:$0xff] %v4695_v27  ;;  %3865 = vtanh.f32 %v3419_v28  ;;  %v604_v29 = vpop.f32.mrb[25].mxu0  ;;  %3536 = vmatprep.mubr.f32.mxu1 %v4695_v27 }
 0x182   : > { %3867 = vtanh.f32 %v604_v29  ;;  %3537 = vmatmul.mubr.f32.gmra.mrb[18].mxu1 %v4693_v26 }
 0x183   : > { %v4699_v30 = vpop.eup %3857 }
 0x184   : > { %5942 = vst [vmem:[#allocation32_spill] sm:$0xff] %v4699_v30  ;;  %v4701_v31 = vpop.eup %3859  ;;  %v3422_v32 = vpop.f32.mrb[26].mxu0 }
 0x185   : > { %5943 = vst [vmem:[#allocation33_spill] sm:$0xff] %v4701_v31  ;;  %3869 = vtanh.f32 %v3422_v32  ;;  %v614_v33 = vpop.f32.mrb[27].mxu0  ;;  %3539 = vmatprep.mubr.f32.mxu1 %v4701_v31 }
 0x186   : > { %3871 = vtanh.f32 %v614_v33  ;;  %3540 = vmatmul.mubr.f32.gmra.mrb[20].mxu1 %v4699_v30 }
 0x187   : > { %v4705_v34 = vpop.eup %3861 }
 0x188   : > { %5944 = vst [vmem:[#allocation34_spill] sm:$0xff] %v4705_v34  ;;  %v4707_v35 = vpop.eup %3863  ;;  %v3425_v36 = vpop.f32.mrb[28].mxu0 }
 0x189   : > { %5945 = vst [vmem:[#allocation35_spill] sm:$0xff] %v4707_v35  ;;  %3873 = vtanh.f32 %v3425_v36  ;;  %v624_v37 = vpop.f32.mrb[29].mxu0  ;;  %3542 = vmatprep.mubr.f32.mxu1 %v4707_v35 }
 0x18a   : > { %3875 = vtanh.f32 %v624_v37  ;;  %3543 = vmatmul.mubr.f32.gmra.mrb[22].mxu1 %v4705_v34 }
 0x18b   : > { %v4711_v38 = vpop.eup %3865 }
 0x18c   : > { %5946 = vst [vmem:[#allocation36_spill] sm:$0xff] %v4711_v38  ;;  %v4713_v39 = vpop.eup %3867  ;;  %v3428_v40 = vpop.f32.mrb[30].mxu0 }
 0x18d   : > { %5947 = vst [vmem:[#allocation37_spill] sm:$0xff] %v4713_v39  ;;  %3877 = vtanh.f32 %v3428_v40  ;;  %v634_v41 = vpop.f32.mrb[31].mxu0  ;;  %3545 = vmatprep.mubr.f32.mxu1 %v4713_v39 }
 0x18e   : > { %3879 = vtanh.f32 %v634_v41  ;;  %3546 = vmatmul.mubr.f32.gmra.mrb[24].mxu1 %v4711_v38 }
 0x18f   : > { %v4717_v42 = vpop.eup %3869 }
 0x190   : > { %5948 = vst [vmem:[#allocation38_spill] sm:$0xff] %v4717_v42  ;;  %v4719_v43 = vpop.eup %3871  ;;  %v3431_v44 = vpop.f32.mrb[32].mxu0 }
 0x191   : > { %5949 = vst [vmem:[#allocation39_spill] sm:$0xff] %v4719_v43  ;;  %3881 = vtanh.f32 %v3431_v44  ;;  %v644_v45 = vpop.f32.mrb[33].mxu0  ;;  %3548 = vmatprep.mubr.f32.mxu1 %v4719_v43 }
 0x192   : > { %3883 = vtanh.f32 %v644_v45  ;;  %3549 = vmatmul.mubr.f32.gmra.mrb[26].mxu1 %v4717_v42 }
 0x193   : > { %v4723_v46 = vpop.eup %3873 }
 0x194   : > { %5950 = vst [vmem:[#allocation40_spill] sm:$0xff] %v4723_v46  ;;  %v4725_v47 = vpop.eup %3875  ;;  %v3434_v48 = vpop.f32.mrb[34].mxu0 }
 0x195   : > { %5951 = vst [vmem:[#allocation41_spill] sm:$0xff] %v4725_v47  ;;  %3885 = vtanh.f32 %v3434_v48  ;;  %v654_v49 = vpop.f32.mrb[35].mxu0  ;;  %3551 = vmatprep.mubr.f32.mxu1 %v4725_v47 }
 0x196   : > { %3887 = vtanh.f32 %v654_v49  ;;  %3552 = vmatmul.mubr.f32.gmra.mrb[28].mxu1 %v4723_v46 }
 0x197   : > { %v4729_v50 = vpop.eup %3877 }
 0x198   : > { %5952 = vst [vmem:[#allocation42_spill] sm:$0xff] %v4729_v50  ;;  %v4731_v51 = vpop.eup %3879  ;;  %v3437_v52 = vpop.f32.mrb[36].mxu0 }
 0x199   : > { %5953 = vst [vmem:[#allocation43_spill] sm:$0xff] %v4731_v51  ;;  %3889 = vtanh.f32 %v3437_v52  ;;  %v664_v53 = vpop.f32.mrb[37].mxu0  ;;  %3554 = vmatprep.mubr.f32.mxu1 %v4731_v51 }
 0x19a   : > { %3891 = vtanh.f32 %v664_v53  ;;  %3555 = vmatmul.mubr.f32.gmra.mrb[30].mxu1 %v4729_v50 }
 0x19b   : > { %v4735_v55 = vpop.eup %3881 }
 0x19c   : > { %5954 = vst [vmem:[#allocation44_spill] sm:$0xff] %v4735_v55  ;;  %v4737_v57 = vpop.eup %3883  ;;  %v3440_v59 = vpop.f32.mrb[38].mxu0 }
 0x19d   : > { %5955 = vst [vmem:[#allocation45_spill] sm:$0xff] %v4737_v57  ;;  %3893 = vtanh.f32 %v3440_v59  ;;  %v674_v61 = vpop.f32.mrb[39].mxu0  ;;  %3557 = vmatprep.mubr.f32.mxu1 %v4737_v57 }
 0x19e   : > { %3895 = vtanh.f32 %v674_v61  ;;  %3558 = vmatmul.mubr.f32.gmra.mrb[32].mxu1 %v4735_v55 }
 0x19f   : > { %v4741_v0 = vpop.eup %3885 }
 0x1a0   : > { %5956 = vst [vmem:[#allocation46_spill] sm:$0xff] %v4741_v0  ;;  %v4743_v1 = vpop.eup %3887  ;;  %v3443_v4 = vpop.f32.mrb[40].mxu0 }
 0x1a1   : > { %5957 = vst [vmem:[#allocation47_spill] sm:$0xff] %v4743_v1  ;;  %3897 = vtanh.f32 %v3443_v4  ;;  %v684_v5 = vpop.f32.mrb[41].mxu0  ;;  %3560 = vmatprep.mubr.f32.mxu1 %v4743_v1 }
 0x1a2   : > { %3899 = vtanh.f32 %v684_v5  ;;  %3561 = vmatmul.mubr.f32.gmra.mrb[34].mxu1 %v4741_v0 }
 0x1a3   : > { %v4747_v8 = vpop.eup %3889 }
 0x1a4   : > { %5958 = vst [vmem:[#allocation48_spill] sm:$0xff] %v4747_v8  ;;  %v4749_v9 = vpop.eup %3891  ;;  %v3446_v12 = vpop.f32.mrb[42].mxu0 }
 0x1a5   : > { %5959 = vst [vmem:[#allocation49_spill] sm:$0xff] %v4749_v9  ;;  %3901 = vtanh.f32 %v3446_v12  ;;  %v694_v13 = vpop.f32.mrb[43].mxu0  ;;  %3563 = vmatprep.mubr.f32.mxu1 %v4749_v9 }
 0x1a6   : > { %3903 = vtanh.f32 %v694_v13  ;;  %3564 = vmatmul.mubr.f32.gmra.mrb[36].mxu1 %v4747_v8 }
 0x1a7   : > { %v4753_v16 = vpop.eup %3893 }
 0x1a8   : > { %5960 = vst [vmem:[#allocation50_spill] sm:$0xff] %v4753_v16  ;;  %v4755_v17 = vpop.eup %3895  ;;  %v3449_v20 = vpop.f32.mrb[44].mxu0 }
 0x1a9   : > { %5961 = vst [vmem:[#allocation51_spill] sm:$0xff] %v4755_v17  ;;  %3905 = vtanh.f32 %v3449_v20  ;;  %v704_v21 = vpop.f32.mrb[45].mxu0  ;;  %3566 = vmatprep.mubr.f32.mxu1 %v4755_v17 }
 0x1aa   : > { %3907 = vtanh.f32 %v704_v21  ;;  %3567 = vmatmul.mubr.f32.gmra.mrb[38].mxu1 %v4753_v16 }
 0x1ab   : > { %v4759_v24 = vpop.eup %3897 }
 0x1ac   : > { %5962 = vst [vmem:[#allocation52_spill] sm:$0xff] %v4759_v24  ;;  %v4761_v25 = vpop.eup %3899  ;;  %v3452_v28 = vpop.f32.mrb[46].mxu0 }
 0x1ad   : > { %5963 = vst [vmem:[#allocation53_spill] sm:$0xff] %v4761_v25  ;;  %3909 = vtanh.f32 %v3452_v28  ;;  %v714_v29 = vpop.f32.mrb[47].mxu0  ;;  %3569 = vmatprep.mubr.f32.mxu1 %v4761_v25 }
 0x1ae   : > { %3911 = vtanh.f32 %v714_v29  ;;  %3570 = vmatmul.mubr.f32.gmra.mrb[40].mxu1 %v4759_v24 }
 0x1af   : > { %v4765_v32 = vpop.eup %3901 }
 0x1b0   : > { %5964 = vst [vmem:[#allocation54_spill] sm:$0xff] %v4765_v32  ;;  %v4767_v33 = vpop.eup %3903  ;;  %v3455_v36 = vpop.f32.mrb[48].mxu0 }
 0x1b1   : > { %5965 = vst [vmem:[#allocation55_spill] sm:$0xff] %v4767_v33  ;;  %3913 = vtanh.f32 %v3455_v36  ;;  %v724_v37 = vpop.f32.mrb[49].mxu0  ;;  %3572 = vmatprep.mubr.f32.mxu1 %v4767_v33 }
 0x1b2   : > { %3915 = vtanh.f32 %v724_v37  ;;  %3573 = vmatmul.mubr.f32.gmra.mrb[42].mxu1 %v4765_v32 }
 0x1b3   : > { %v4771_v40 = vpop.eup %3905 }
 0x1b4   : > { %5966 = vst [vmem:[#allocation56_spill] sm:$0xff] %v4771_v40  ;;  %v4773_v41 = vpop.eup %3907  ;;  %v3458_v44 = vpop.f32.mrb[50].mxu0 }
 0x1b5   : > { %5967 = vst [vmem:[#allocation57_spill] sm:$0xff] %v4773_v41  ;;  %3917 = vtanh.f32 %v3458_v44  ;;  %v734_v45 = vpop.f32.mrb[51].mxu0  ;;  %3575 = vmatprep.mubr.f32.mxu1 %v4773_v41 }
 0x1b6   : > { %3919 = vtanh.f32 %v734_v45  ;;  %3576 = vmatmul.mubr.f32.gmra.mrb[44].mxu1 %v4771_v40 }
 0x1b7   : > { %v4777_v48 = vpop.eup %3909 }
 0x1b8   : > { %5968 = vst [vmem:[#allocation58_spill] sm:$0xff] %v4777_v48  ;;  %v4779_v49 = vpop.eup %3911  ;;  %v3461_v52 = vpop.f32.mrb[52].mxu0 }
 0x1b9   : > { %5969 = vst [vmem:[#allocation59_spill] sm:$0xff] %v4779_v49  ;;  %3921 = vtanh.f32 %v3461_v52  ;;  %v744_v53 = vpop.f32.mrb[53].mxu0  ;;  %3578 = vmatprep.mubr.f32.mxu1 %v4779_v49 }
 0x1ba   : > { %3923 = vtanh.f32 %v744_v53  ;;  %3579 = vmatmul.mubr.f32.gmra.mrb[46].mxu1 %v4777_v48 }
 0x1bb   : > { %v4783_v59 = vpop.eup %3913 }
 0x1bc   : > { %5970 = vst [vmem:[#allocation60_spill] sm:$0xff] %v4783_v59  ;;  %v4785_v61 = vpop.eup %3915  ;;  %v3464_v4 = vpop.f32.mrb[54].mxu0 }
 0x1bd   : > { %5971 = vst [vmem:[#allocation61_spill] sm:$0xff] %v4785_v61  ;;  %3925 = vtanh.f32 %v3464_v4  ;;  %v754_v5 = vpop.f32.mrb[55].mxu0  ;;  %3581 = vmatprep.mubr.f32.mxu1 %v4785_v61 }
 0x1be   : > { %3927 = vtanh.f32 %v754_v5  ;;  %3582 = vmatmul.mubr.f32.gmra.mrb[48].mxu1 %v4783_v59 }
 0x1bf   : > { %v4789_v12 = vpop.eup %3917 }
 0x1c0   : > { %5972 = vst [vmem:[#allocation62_spill] sm:$0xff] %v4789_v12  ;;  %v4791_v13 = vpop.eup %3919  ;;  %v3467_v20 = vpop.f32.mrb[56].mxu0 }
 0x1c1   : > { %5973 = vst [vmem:[#allocation63_spill] sm:$0xff] %v4791_v13  ;;  %3929 = vtanh.f32 %v3467_v20  ;;  %v764_v21 = vpop.f32.mrb[57].mxu0  ;;  %3584 = vmatprep.mubr.f32.mxu1 %v4791_v13 }
 0x1c2   : > { %3931 = vtanh.f32 %v764_v21  ;;  %3585 = vmatmul.mubr.f32.gmra.mrb[50].mxu1 %v4789_v12 }
 0x1c3   : > { %v4795_v28 = vpop.eup %3921 }
 0x1c4   : > { %5974 = vst [vmem:[#allocation64_spill] sm:$0xff] %v4795_v28  ;;  %v4797_v29 = vpop.eup %3923  ;;  %v3470_v36 = vpop.f32.mrb[58].mxu0 }
 0x1c5   : > { %5975 = vst [vmem:[#allocation65_spill] sm:$0xff] %v4797_v29  ;;  %3933 = vtanh.f32 %v3470_v36  ;;  %v774_v37 = vpop.f32.mrb[59].mxu0  ;;  %3587 = vmatprep.mubr.f32.mxu1 %v4797_v29 }
 0x1c6   : > { %3935 = vtanh.f32 %v774_v37  ;;  %3588 = vmatmul.mubr.f32.gmra.mrb[52].mxu1 %v4795_v28 }
 0x1c7   : > { %v4801_v44 = vpop.eup %3925 }
 0x1c8   : > { %5976 = vst [vmem:[#allocation66_spill] sm:$0xff] %v4801_v44  ;;  %v4803_v45 = vpop.eup %3927  ;;  %v3473_v52 = vpop.f32.mrb[60].mxu0 }
 0x1c9   : > { %5977 = vst [vmem:[#allocation67_spill] sm:$0xff] %v4803_v45  ;;  %3937 = vtanh.f32 %v3473_v52  ;;  %v784_v53 = vpop.f32.mrb[61].mxu0  ;;  %3590 = vmatprep.mubr.f32.mxu1 %v4803_v45 }
 0x1ca   : > { %3939 = vtanh.f32 %v784_v53  ;;  %3591 = vmatmul.mubr.f32.gmra.mrb[54].mxu1 %v4801_v44 }
 0x1cb   : > { %v4807_v4 = vpop.eup %3929 }
 0x1cc   : > { %5978 = vst [vmem:[#allocation68_spill] sm:$0xff] %v4807_v4  ;;  %v4809_v5 = vpop.eup %3931  ;;  %v3476_v20 = vpop.f32.mrb[62].mxu0 }
 0x1cd   : > { %5979 = vst [vmem:[#allocation69_spill] sm:$0xff] %v4809_v5  ;;  %3941 = vtanh.f32 %v3476_v20  ;;  %v794_v21 = vpop.f32.mrb[63].mxu0  ;;  %3593 = vmatprep.mubr.f32.mxu1 %v4809_v5 }
 0x1ce   : > { %3943 = vtanh.f32 %v794_v21  ;;  %3594 = vmatmul.mubr.f32.gmra.mrb[56].mxu1 %v4807_v4  ;;  %v4273_v4 = vmov 0  }
 0x1cf   : > { %v4813_v36 = vpop.eup %3933  ;;  %3815 = vset.pattern.permute.xlu0 %v4273_v4  ;;  %3816 = vset.pattern.permute.xlu1 %v4273_v4 }
 0x1d0   : > { %5980 = vst [vmem:[#allocation70_spill] sm:$0xff] %v4813_v36  ;;  %v4815_v37 = vpop.eup %3935 }
 0x1d1   : > { %5981 = vst [vmem:[#allocation71_spill] sm:$0xff] %v4815_v37  ;;  %3596 = vmatprep.mubr.f32.mxu1 %v4815_v37 }
 0x1d2   : > { %3597 = vmatmul.mubr.f32.gmra.mrb[58].mxu1 %v4813_v36 }
 0x1d3   : > { %v4819_v52 = vpop.eup %3937 }
 0x1d4   : > { %5982 = vst [vmem:[#allocation72_spill] sm:$0xff] %v4819_v52  ;;  %v4821_v53 = vpop.eup %3939 }
 0x1d5   : > { %5983 = vst [vmem:[#allocation73_spill] sm:$0xff] %v4821_v53  ;;  %3599 = vmatprep.mubr.f32.mxu1 %v4821_v53 }
 0x1d6   : > { %3600 = vmatmul.mubr.f32.gmra.mrb[60].mxu1 %v4819_v52 }
 0x1d7   : > { %v4825_v20 = vpop.eup %3941 }
 0x1d8   : > { %5984 = vst [vmem:[#allocation74_spill] sm:$0xff] %v4825_v20  ;;  %v4827_v21 = vpop.eup %3943 }
 0x1d9   : > { %5985 = vst [vmem:[#allocation75_spill] sm:$0xff] %v4827_v21  ;;  %3602 = vmatprep.mubr.f32.mxu1 %v4827_v21 }
 0x1da   : > { %3603 = vmatmul.mubr.f32.gmra.mrb[62].mxu1 %v4825_v20 }
 0x231   : > { %v3511_v36 = vpop.f32.mrb[0].mxu1 }
 0x232   : > { %v1270_v37 = vsel %vm1268_vm0, %v3511_v36, -inf  ;;  %v949_v5 = vpop.f32.mrb[1].mxu1 }
 0x233   : > { %v1269_v53 = vsel %vm1268_vm0, %v949_v5, -inf }
 0x234   : > { %v1271_v44 = vmax.f32 %v1269_v53, %v1270_v37 }
 0x235   : > { %v3514_v52 = vpop.f32.mrb[2].mxu1 }
 0x236   : > { %v1272_v45 = vrot.slane %v1271_v44, 4  ;;  %v1279_v29 = vsel %vm1268_vm0, %v3514_v52, -inf  ;;  %v959_v61 = vpop.f32.mrb[3].mxu1 }
 0x237   : > { %v1278_v21 = vsel %vm1268_vm0, %v959_v61, -inf }
 0x238   : > { %v1273_v28 = vmax.f32 %v1271_v44, %v1272_v45  ;;  %v1280_v20 = vmax.f32 %v1278_v21, %v1279_v29 }
 0x239   : > { %v4835_v13 = vpop.f32.mrb[4].mxu1 }
 0x23a   : > { %v1274_v4 = vrot.slane %v1273_v28, 2  ;;  %v1281_v59 = vrot.slane %v1280_v20, 4  ;;  %v1288_v12 = vsel %vm1268_vm0, %v4835_v13, -inf  ;;  %v969_v48 = vpop.f32.mrb[5].mxu1 }
 0x23b   : > { %v1287_v49 = vsel %vm1268_vm0, %v969_v48, -inf }
 0x23c   : > { %v1275_v37 = vmax.f32 %v1273_v28, %v1274_v4  ;;  %v1282_v53 = vmax.f32 %v1280_v20, %v1281_v59  ;;  %v1289_v40 = vmax.f32 %v1287_v49, %v1288_v12 }
 0x23d   : > { %v4840_v41 = vpop.f32.mrb[6].mxu1 }
 0x23e   : > { %v1276_v32 = vrot.slane %v1275_v37, 1  ;;  %v1283_v33 = vrot.slane %v1282_v53, 2  ;;  %v1290_v24 = vrot.slane %v1289_v40, 4  ;;  %v1297_v29 = vsel %vm1268_vm0, %v4840_v41, -inf  ;;  %v4844_v44 = vpop.f32.mrb[7].mxu1 }
 0x23f   : > { %v1296_v45 = vsel %vm1268_vm0, %v4844_v44, -inf }
 0x240   : > { %v1277_v21 = vmax.f32 %v1275_v37, %v1276_v32  ;;  %v1284_v25 = vmax.f32 %v1282_v53, %v1283_v33  ;;  %v1291_v16 = vmax.f32 %v1289_v40, %v1290_v24  ;;  %v1298_v17 = vmax.f32 %v1296_v45, %v1297_v29 }
 0x241   : > { %v4848_v28 = vpop.f32.mrb[8].mxu1 }
 0x242   : > { %v1557_v49 = vsub.f32 %v949_v5, %v1277_v21  ;;  %v1558_v59 = vsub.f32 %v3511_v36, %v1277_v21  ;;  %v1285_v12 = vrot.slane %v1284_v25, 1  ;;  %v1292_v20 = vrot.slane %v1291_v16, 2  ;;  %v4850_v4 = vpop.f32.mrb[9].mxu1 }
 0x243   : > { %v1299_v57 = vrot.slane %v1298_v17, 4  ;;  %v1306_v9 = vsel %vm1268_vm0, %v4848_v28, -inf  ;;  %v1305_v8 = vsel %vm1268_vm0, %v4850_v4, -inf }
 0x244   : > { %v1621_v1 = vmul.f32 1.442695, %v1557_v49  ;;  %v1623_v32 = vmul.f32 1.442695, %v1558_v59  ;;  %v1286_v33 = vmax.f32 %v1284_v25, %v1285_v12  ;;  %v1293_v24 = vmax.f32 %v1291_v16, %v1292_v20 }
 0x245   : > { %v1300_v40 = vmax.f32 %v1298_v17, %v1299_v57  ;;  %v1307_v37 = vmax.f32 %v1305_v8, %v1306_v9  ;;  %v4856_v53 = vpop.f32.mrb[10].mxu1 }
 0x246   : > { %3945 = vpow2.f32 %v1621_v1  ;;  %v1559_v5 = vsub.f32 %v959_v61, %v1286_v33  ;;  %v1560_v36 = vsub.f32 %v3514_v52, %v1286_v33  ;;  %v1294_v29 = vrot.slane %v1293_v24, 1  ;;  %v4858_v45 = vpop.f32.mrb[11].mxu1 }
 0x247   : > { %3947 = vpow2.f32 %v1623_v32  ;;  %v1301_v21 = vrot.slane %v1300_v40, 2  ;;  %v1308_v55 = vrot.slane %v1307_v37, 4  ;;  %v1315_v0 = vsel %vm1268_vm0, %v4856_v53, -inf }
 0x248   : > { %v1625_v49 = vmul.f32 1.442695, %v1559_v5  ;;  %v1627_v59 = vmul.f32 1.442695, %v1560_v36  ;;  %v1295_v25 = vmax.f32 %v1293_v24, %v1294_v29  ;;  %v1314_v57 = vsel %vm1268_vm0, %v4858_v45, -inf }
 0x249   : > { %v1302_v8 = vmax.f32 %v1300_v40, %v1301_v21  ;;  %v1309_v9 = vmax.f32 %v1307_v37, %v1308_v55  ;;  %v1316_v1 = vmax.f32 %v1314_v57, %v1315_v0  ;;  %v4864_v16 = vpop.f32.mrb[12].mxu1 }
 0x24a   : > { %3949 = vpow2.f32 %v1625_v49  ;;  %v1561_v17 = vsub.f32 %v969_v48, %v1295_v25  ;;  %v1562_v61 = vsub.f32 %v4835_v13, %v1295_v25  ;;  %v1324_v52 = vsel %vm1268_vm0, %v4864_v16, -inf  ;;  %v4869_v12 = vpop.f32.mrb[13].mxu1 }
 0x24b   : > { %3951 = vpow2.f32 %v1627_v59  ;;  %v1303_v20 = vrot.slane %v1302_v8, 1  ;;  %v1310_v32 = vrot.slane %v1309_v9, 2  ;;  %v1317_v33 = vrot.slane %v1316_v1, 4 }
 0x24c   : > { %v1629_v24 = vmul.f32 1.442695, %v1561_v17  ;;  %v1631_v5 = vmul.f32 1.442695, %v1562_v61  ;;  %v1323_v55 = vsel %vm1268_vm0, %v4869_v12, -inf }
 0x24d   : > { %v1304_v0 = vmax.f32 %v1302_v8, %v1303_v20  ;;  %v1311_v40 = vmax.f32 %v1309_v9, %v1310_v32  ;;  %v1318_v37 = vmax.f32 %v1316_v1, %v1317_v33  ;;  %v1325_v48 = vmax.f32 %v1323_v55, %v1324_v52  ;;  %v4873_v36 = vpop.f32.mrb[14].mxu1 }
 0x24e   : > { %3953 = vpow2.f32 %v1629_v24  ;;  %v1333_v13 = vsel %vm1268_vm0, %v4873_v36, -inf  ;;  %v4877_v29 = vpop.f32.mrb[15].mxu1 }
 0x24f   : > { %3955 = vpow2.f32 %v1631_v5  ;;  %v1563_v21 = vsub.f32 %v4844_v44, %v1304_v0  ;;  %v1564_v49 = vsub.f32 %v4840_v41, %v1304_v0  ;;  %v1312_v59 = vrot.slane %v1311_v40, 1 }
 0x250   : > { %v4881_v25 = vpop.eup %3945  ;;  %v1319_v57 = vrot.slane %v1318_v37, 2  ;;  %v1326_v8 = vrot.slane %v1325_v48, 4  ;;  %v1332_v9 = vsel %vm1268_vm0, %v4877_v29, -inf }
 0x251   : > { %v4885_v1 = vpop.eup %3947  ;;  %v1749_v17 = vsel %vm1268_vm0, %v4881_v25, 0.0  ;;  %v1633_v61 = vmul.f32 1.442695, %v1563_v21  ;;  %v1635_v52 = vmul.f32 1.442695, %v1564_v49  ;;  %v1313_v20 = vmax.f32 %v1311_v40, %v1312_v59  ;;  %v4889_v32 = vpop.f32.mrb[16].mxu1 }
 0x252   : > { %v1750_v41 = vsel %vm1268_vm0, %v4885_v1, 0.0  ;;  %v1320_v44 = vmax.f32 %v1318_v37, %v1319_v57  ;;  %v1327_v33 = vmax.f32 %v1325_v48, %v1326_v8  ;;  %v1334_v24 = vmax.f32 %v1332_v9, %v1333_v13  ;;  %v4893_v5 = vpop.f32.mrb[17].mxu1 }
 0x253   : > { %v1751_v55 = vadd.f32 %v1750_v41, %v1749_v17  ;;  %3957 = vpow2.f32 %v1633_v61  ;;  %v1565_v0 = vsub.f32 %v4850_v4, %v1313_v20  ;;  %v1566_v50 = vsub.f32 %v4848_v28, %v1313_v20 }
 0x254   : > { %v4897_v51 = vpop.eup %3949  ;;  %3959 = vpow2.f32 %v1635_v52  ;;  %v1321_v40 = vrot.slane %v1320_v44, 1  ;;  %v1328_v21 = vrot.slane %v1327_v33, 2  ;;  %v1335_v49 = vrot.slane %v1334_v24, 4 }
 0x255   : > { %v4899_v59 = vpop.eup %3951  ;;  %v1752_v46 = vrot.slane %v1751_v55, 4  ;;  %v1758_v37 = vsel %vm1268_vm0, %v4897_v51, 0.0  ;;  %v1637_v48 = vmul.f32 1.442695, %v1565_v0  ;;  %v1639_v13 = vmul.f32 1.442695, %v1566_v50 }
 0x256   : > { %v1759_v57 = vsel %vm1268_vm0, %v4899_v59, 0.0  ;;  %v1322_v4 = vmax.f32 %v1320_v44, %v1321_v40  ;;  %v1329_v8 = vmax.f32 %v1327_v33, %v1328_v21  ;;  %v1336_v28 = vmax.f32 %v1334_v24, %v1335_v49  ;;  %v4905_v9 = vpop.f32.mrb[18].mxu1 }
 0x257   : > { %v4907_v17 = vadd.f32 %v1752_v46, %v1751_v55  ;;  %v1760_v61 = vadd.f32 %v1759_v57, %v1758_v37  ;;  %3961 = vpow2.f32 %v1637_v48  ;;  %v1342_v52 = vsel %vm1268_vm0, %v4889_v32, -inf  ;;  %v4911_v20 = vpop.f32.mrb[19].mxu1 }
 0x258   : > { %v4913_v41 = vpop.eup %3953  ;;  %3963 = vpow2.f32 %v1639_v13  ;;  %v1567_v50 = vsub.f32 %v4858_v45, %v1322_v4  ;;  %v1568_v44 = vsub.f32 %v4856_v53, %v1322_v4  ;;  %v1330_v33 = vrot.slane %v1329_v8, 1 }
 0x259   : > { %v4917_v24 = vpop.eup %3955  ;;  %v1761_v0 = vrot.slane %v1760_v61, 4  ;;  %v1767_v46 = vsel %vm1268_vm0, %v4913_v41, 0.0  ;;  %v1337_v55 = vrot.slane %v1336_v28, 2  ;;  %v1341_v40 = vsel %vm1268_vm0, %v4893_v5, -inf  ;;  %v4923_v21 = vpop.f32.mrb[20].mxu1 }
 0x25a   : > { %v1768_v49 = vsel %vm1268_vm0, %v4917_v24, 0.0  ;;  %v1641_v37 = vmul.f32 1.442695, %v1567_v50  ;;  %v1643_v45 = vmul.f32 1.442695, %v1568_v44  ;;  %v1331_v48 = vmax.f32 %v1329_v8, %v1330_v33  ;;  %v4927_v53 = vpop.f32.mrb[21].mxu1 }
 0x25b   : > { %v4929_v13 = vadd.f32 %v1761_v0, %v1760_v61  ;;  %v1769_v57 = vadd.f32 %v1768_v49, %v1767_v46  ;;  %v1338_v4 = vmax.f32 %v1336_v28, %v1337_v55  ;;  %v1343_v47 = vmax.f32 %v1341_v40, %v1342_v52 }
 0x25c   : > { %3965 = vpow2.f32 %v1641_v37  ;;  %v1569_v42 = vsub.f32 %v4869_v12, %v1331_v48  ;;  %v1570_v43 = vsub.f32 %v4864_v16, %v1331_v48  ;;  %v1351_v39 = vsel %vm1268_vm0, %v4905_v9, -inf }
 0x25d   : > { %v4935_v35 = vpop.eup %3957  ;;  %v1770_v50 = vrot.slane %v1769_v57, 4  ;;  %3967 = vpow2.f32 %v1643_v45  ;;  %v1339_v8 = vrot.slane %v1338_v4, 1  ;;  %v1344_v44 = vrot.slane %v1343_v47, 4  ;;  %v4937_v33 = vpop.f32.mrb[22].mxu1 }
 0x25e   : > { %v4939_v61 = vpop.eup %3959  ;;  %v1776_v28 = vsel %vm1268_vm0, %v4935_v35, 0.0  ;;  %v1645_v52 = vmul.f32 1.442695, %v1569_v42  ;;  %v1647_v12 = vmul.f32 1.442695, %v1570_v43  ;;  %v1350_v16 = vsel %vm1268_vm0, %v4911_v20, -inf }
 0x25f   : > { %v4945_v0 = vadd.f32 %v1770_v50, %v1769_v57  ;;  %v1777_v46 = vsel %vm1268_vm0, %v4939_v61, 0.0  ;;  %v1340_v55 = vmax.f32 %v1338_v4, %v1339_v8  ;;  %v1345_v40 = vmax.f32 %v1343_v47, %v1344_v44  ;;  %v4949_v49 = vpop.f32.mrb[23].mxu1 }
 0x260   : > { %v1778_v37 = vadd.f32 %v1777_v46, %v1776_v28  ;;  %3969 = vpow2.f32 %v1645_v52  ;;  %v1352_v45 = vmax.f32 %v1350_v16, %v1351_v39  ;;  %v1360_v48 = vsel %vm1268_vm0, %v4923_v21, -inf }
 0x261   : > { %v4953_v42 = vpop.eup %3961  ;;  %3971 = vpow2.f32 %v1647_v12  ;;  %v1571_v57 = vsub.f32 %v4877_v29, %v1340_v55  ;;  %v1572_v50 = vsub.f32 %v4873_v36, %v1340_v55  ;;  %v4958_v23 = vpop.f32.mrb[24].mxu1  ;;  %v1346_v8 = vrot.slane %v1345_v40, 2 }
 0x262   : > { %v4960_v47 = vpop.eup %3963  ;;  %v1779_v4 = vrot.slane %v1778_v37, 4  ;;  %v1785_v39 = vsel %vm1268_vm0, %v4953_v42, 0.0  ;;  %v1353_v44 = vrot.slane %v1352_v45, 4  ;;  %v4964_v28 = vpop.f32.mrb[25].mxu1  ;;  %v1359_v36 = vsel %vm1268_vm0, %v4927_v53, -inf }
 0x263   : > { %v1786_v52 = vsel %vm1268_vm0, %v4960_v47, 0.0  ;;  %v1649_v12 = vmul.f32 1.442695, %v1571_v57  ;;  %v1651_v16 = vmul.f32 1.442695, %v1572_v50  ;;  %v1347_v55 = vmax.f32 %v1345_v40, %v1346_v8 }
 0x264   : > { %v4970_v29 = vadd.f32 %v1779_v4, %v1778_v37  ;;  %v1787_v46 = vadd.f32 %v1786_v52, %v1785_v39  ;;  %v1354_v43 = vmax.f32 %v1352_v45, %v1353_v44  ;;  %v1361_v38 = vmax.f32 %v1359_v36, %v1360_v48 }
 0x265   : > { %3973 = vpow2.f32 %v1649_v12  ;;  %v1369_v31 = vsel %vm1268_vm0, %v4937_v33, -inf  ;;  %v1368_v34 = vsel %vm1268_vm0, %v4949_v49, -inf  ;;  %v4976_v27 = vpop.f32.mrb[26].mxu1  ;;  %v1348_v37 = vrot.slane %v1347_v55, 1 }
 0x266   : > { %v4978_v57 = vpop.eup %3965  ;;  %v1788_v22 = vrot.slane %v1787_v46, 4  ;;  %3975 = vpow2.f32 %v1651_v16  ;;  %v4981_v4 = vpop.f32.mrb[27].mxu1  ;;  %v1355_v48 = vrot.slane %v1354_v43, 2  ;;  %v1362_v39 = vrot.slane %v1361_v38, 4 }
 0x267   : > { %v4983_v40 = vpop.eup %3967  ;;  %v1794_v45 = vsel %vm1268_vm0, %v4978_v57, 0.0  ;;  %v1370_v8 = vmax.f32 %v1368_v34, %v1369_v31  ;;  %v1349_v12 = vmax.f32 %v1347_v55, %v1348_v37  ;;  %v1378_v16 = vsel %vm1268_vm0, %v4958_v23, -inf }
 0x268   : > { %v4987_v44 = vadd.f32 %v1788_v22, %v1787_v46  ;;  %v1795_v52 = vsel %vm1268_vm0, %v4983_v40, 0.0  ;;  %v1356_v50 = vmax.f32 %v1354_v43, %v1355_v48  ;;  %v1363_v30 = vmax.f32 %v1361_v38, %v1362_v39 }
 0x269   : > { %v1796_v36 = vadd.f32 %v1795_v52, %v1794_v45  ;;  %v1371_v26 = vrot.slane %v1370_v8, 4  ;;  %v4993_v18 = vpop.f32.mrb[28].mxu1  ;;  %v1573_v22 = vsub.f32 %v4893_v5, %v1349_v12  ;;  %v1574_v31 = vsub.f32 %v4889_v32, %v1349_v12 }
 0x26a   : > { %v4995_v19 = vpop.eup %3969  ;;  %v1377_v34 = vsel %vm1268_vm0, %v4964_v28, -inf  ;;  %v5002_v46 = vpop.f32.mrb[29].mxu1  ;;  %v1357_v37 = vrot.slane %v1356_v50, 1  ;;  %v1364_v45 = vrot.slane %v1363_v30, 2  ;;  %v1387_v7 = vsel %vm1268_vm0, %v4976_v27, -inf }
 0x26b   : > { %v5004_v55 = vpop.eup %3971  ;;  %v1797_v43 = vrot.slane %v1796_v36, 4  ;;  %v1803_v38 = vsel %vm1268_vm0, %v4995_v19, 0.0  ;;  %v1653_v39 = vmul.f32 1.442695, %v1573_v22  ;;  %v1655_v5 = vmul.f32 1.442695, %v1574_v31 }
 0x26c   : > { %v1804_v48 = vsel %vm1268_vm0, %v5004_v55, 0.0  ;;  %v1372_v52 = vmax.f32 %v1370_v8, %v1371_v26  ;;  %v1358_v14 = vmax.f32 %v1356_v50, %v1357_v37  ;;  %v1365_v15 = vmax.f32 %v1363_v30, %v1364_v45 }
 0x26d   : > { %v5010_v32 = vadd.f32 %v1797_v43, %v1796_v36  ;;  %v1805_v12 = vadd.f32 %v1804_v48, %v1803_v38  ;;  %v5012_v10 = vpop.f32.mrb[30].mxu1  ;;  %3977 = vpow2.f32 %v1653_v39  ;;  %v1379_v6 = vmax.f32 %v1377_v34, %v1378_v16 }
 0x26e   : > { %v1373_v11 = vrot.slane %v1372_v52, 2  ;;  %v5016_v3 = vpop.f32.mrb[31].mxu1  ;;  %3979 = vpow2.f32 %v1655_v5  ;;  %v1575_v8 = vsub.f32 %v4911_v20, %v1358_v14  ;;  %v1576_v16 = vsub.f32 %v4905_v9, %v1358_v14 }
 0x26f   : > { %v5018_v63 = vpop.eup %3973  ;;  %v1806_v26 = vrot.slane %v1805_v12, 4  ;;  %v1366_v36 = vrot.slane %v1365_v15, 1  ;;  %v1380_v37 = vrot.slane %v1379_v6, 4 }
 0x270   : > { %v5022_v50 = vpop.eup %3975  ;;  %v1812_v30 = vsel %vm1268_vm0, %v5018_v63, 0.0  ;;  %v1374_v31 = vmax.f32 %v1372_v52, %v1373_v11  ;;  %v1657_v38 = vmul.f32 1.442695, %v1575_v8  ;;  %v1659_v20 = vmul.f32 1.442695, %v1576_v16 }
 0x271   : > { %5986 = vst [vmem:[#allocation76_spill] sm:$0xff] %v5022_v50  ;;  %v5027_v34 = vadd.f32 %v1806_v26, %v1805_v12  ;;  %v1813_v43 = vsel %vm1268_vm0, %v5022_v50, 0.0  ;;  %v5031_v45 = vpop.f32.mrb[32].mxu1  ;;  %v1367_v39 = vmax.f32 %v1365_v15, %v1366_v36  ;;  %v1381_v14 = vmax.f32 %v1379_v6, %v1380_v37 }
 0x272   : > { %v1814_v48 = vadd.f32 %v1813_v43, %v1812_v30  ;;  %v1375_v5 = vrot.slane %v1374_v31, 1  ;;  %v5033_v22 = vpop.f32.mrb[33].mxu1  ;;  %3981 = vpow2.f32 %v1657_v38  ;;  %v1386_v11 = vsel %vm1268_vm0, %v4981_v4, -inf }
 0x273   : > { %3983 = vpow2.f32 %v1659_v20  ;;  %v1577_v52 = vsub.f32 %v4927_v53, %v1367_v39  ;;  %v1578_v12 = vsub.f32 %v4923_v21, %v1367_v39  ;;  %v1382_v8 = vrot.slane %v1381_v14, 2 }
 0x274   : > { %v1815_v9 = vrot.slane %v1814_v48, 4  ;;  %v1376_v26 = vmax.f32 %v1374_v31, %v1375_v5  ;;  %v1388_v30 = vmax.f32 %v1386_v11, %v1387_v7  ;;  %v1396_v15 = vsel %vm1268_vm0, %v4993_v18, -inf }
 0x275   : > { %v5042_v16 = vpop.f32.mrb[34].mxu1  ;;  %v1661_v6 = vmul.f32 1.442695, %v1577_v52  ;;  %v1663_v43 = vmul.f32 1.442695, %v1578_v12  ;;  %v1395_v38 = vsel %vm1268_vm0, %v5002_v46, -inf  ;;  %v1383_v31 = vmax.f32 %v1381_v14, %v1382_v8 }
 0x276   : > { %v5044_v36 = vadd.f32 %v1815_v9, %v1814_v48  ;;  %v5048_v37 = vpop.f32.mrb[35].mxu1  ;;  %v1579_v53 = vsub.f32 %v4949_v49, %v1376_v26  ;;  %v1580_v21 = vsub.f32 %v4937_v33, %v1376_v26  ;;  %v1389_v7 = vrot.slane %v1388_v30, 4 }
 0x277   : > { %v5052_v20 = vpop.eup %3977  ;;  %3985 = vpow2.f32 %v1661_v6  ;;  %v1397_v48 = vmax.f32 %v1395_v38, %v1396_v15  ;;  %v1754_v5 = vrot.slane %v4907_v17, 2  ;;  %v1384_v14 = vrot.slane %v1383_v31, 1 }
 0x278   : > { %5987 = vst [vmem:[#allocation77_spill] sm:$0xff] %v5052_v20  ;;  %v5056_v11 = vpop.eup %3979  ;;  %v1821_v9 = vsel %vm1268_vm0, %v5052_v20, 0.0  ;;  %3987 = vpow2.f32 %v1663_v43  ;;  %v1665_v52 = vmul.f32 1.442695, %v1579_v53  ;;  %v1667_v49 = vmul.f32 1.442695, %v1580_v21 }
 0x279   : > { %5988 = vst [vmem:[#allocation78_spill] sm:$0xff] %v5056_v11  ;;  %v5060_v12 = vpop.f32.mrb[36].mxu1  ;;  %v1822_v33 = vsel %vm1268_vm0, %v5056_v11, 0.0  ;;  %v1390_v26 = vmax.f32 %v1388_v30, %v1389_v7  ;;  %v1398_v8 = vrot.slane %v1397_v48, 4  ;;  %v1755_v38 = vadd.f32 %v1754_v5, %v4907_v17 }
 0x27a   : > { %v5064_v6 = vpop.f32.mrb[37].mxu1  ;;  %v1823_v15 = vadd.f32 %v1822_v33, %v1821_v9  ;;  %3989 = vpow2.f32 %v1665_v52  ;;  %v1405_v39 = vsel %vm1268_vm0, %v5012_v10, -inf  ;;  %v1385_v43 = vmax.f32 %v1383_v31, %v1384_v14 }
 0x27b   : > { %3991 = vpow2.f32 %v1667_v49  ;;  %v1391_v53 = vrot.slane %v1390_v26, 2  ;;  %v1399_v21 = vmax.f32 %v1397_v48, %v1398_v8  ;;  %v1756_v58 = vrot.slane %v1755_v38, 1 }
 0x27c   : > { %v5069_v54 = vpop.eup %3981  ;;  %v1824_v2 = vrot.slane %v1823_v15, 4  ;;  %v1404_v30 = vsel %vm1268_vm0, %v5016_v3, -inf  ;;  %v1763_v7 = vrot.slane %v4929_v13, 2  ;;  %v1581_v31 = vsub.f32 %v4964_v28, %v1385_v43 }
 0x27d   : > { %5989 = vst [vmem:[#allocation79_spill] sm:$0xff] %v5069_v54  ;;  %v5074_v9 = vpop.f32.mrb[38].mxu1  ;;  %v5076_v52 = vpop.eup %3983  ;;  %v1830_v17 = vsel %vm1268_vm0, %v5069_v54, 0.0  ;;  %v1582_v48 = vsub.f32 %v4958_v23, %v1385_v43  ;;  %v1392_v5 = vmax.f32 %v1390_v26, %v1391_v53  ;;  %v1400_v8 = vrot.slane %v1399_v21, 2 }
 0x27e   : > { %5990 = vst [vmem:[#allocation80_spill] sm:$0xff] %v5076_v52  ;;  %v5082_v49 = vpop.f32.mrb[39].mxu1  ;;  %v5084_v33 = vadd.f32 %v1824_v2, %v1823_v15  ;;  %v1831_v14 = vsel %vm1268_vm0, %v5076_v52, 0.0  ;;  %v1757_v62 = vadd.f32 %v1756_v58, %v1755_v38  ;;  %v1669_v60 = vmul.f32 1.442695, %v1581_v31 }
 0x27f   : > { %v1832_v56 = vadd.f32 %v1831_v14, %v1830_v17  ;;  %v1671_v11 = vmul.f32 1.442695, %v1582_v48  ;;  %v1393_v20 = vrot.slane %v1392_v5, 1  ;;  %v1401_v50 = vmax.f32 %v1399_v21, %v1400_v8 }
 0x280   : > { %3993 = vrcp.f32 %v1757_v62  ;;  %v1406_v28 = vmax.f32 %v1404_v30, %v1405_v39  ;;  %v1764_v43 = vadd.f32 %v1763_v7, %v4929_v13 }
 0x281   : > { %v5089_v23 = vpop.f32.mrb[40].mxu1  ;;  %v5091_v26 = vpop.eup %3985  ;;  %v1833_v2 = vrot.slane %v1832_v56, 4  ;;  %3995 = vpow2.f32 %v1669_v60  ;;  %v1394_v15 = vmax.f32 %v1392_v5, %v1393_v20  ;;  %v1402_v21 = vrot.slane %v1401_v50, 1 }
 0x282   : > { %5991 = vst [vmem:[#allocation81_spill] sm:$0xff] %v5091_v26  ;;  %v5094_v53 = vpop.f32.mrb[41].mxu1  ;;  %v5096_v58 = vpop.eup %3987  ;;  %v1839_v38 = vsel %vm1268_vm0, %v5091_v26, 0.0  ;;  %3997 = vpow2.f32 %v1671_v11  ;;  %v1407_v62 = vrot.slane %v1406_v28, 4  ;;  %v1765_v48 = vrot.slane %v1764_v43, 1 }
 0x283   : > { %5992 = vst [vmem:[#allocation82_spill] sm:$0xff] %v5096_v58  ;;  %v5100_v39 = vadd.f32 %v1833_v2, %v1832_v56  ;;  %v1840_v30 = vsel %vm1268_vm0, %v5096_v58, 0.0  ;;  %v1583_v60 = vsub.f32 %v4981_v4, %v1394_v15  ;;  %v1584_v20 = vsub.f32 %v4976_v27, %v1394_v15 }
 0x284   : > { %v5106_v13 = vpop.eup %3989  ;;  %v1841_v7 = vadd.f32 %v1840_v30, %v1839_v38  ;;  %v1403_v17 = vmax.f32 %v1401_v50, %v1402_v21  ;;  %v1408_v31 = vmax.f32 %v1406_v28, %v1407_v62  ;;  %v1766_v62 = vadd.f32 %v1765_v48, %v1764_v43 }
 0x285   : > { %5993 = vst [vmem:[#allocation83_spill] sm:$0xff] %v5106_v13  ;;  %v5108_v5 = vpop.f32.mrb[42].mxu1  ;;  %v5110_v11 = vpop.eup %3991  ;;  %v1848_v14 = vsel %vm1268_vm0, %v5106_v13, 0.0  ;;  %v1673_v8 = vmul.f32 1.442695, %v1583_v60  ;;  %v1413_v43 = vsel %vm1268_vm0, %v5033_v22, -inf }
 0x286   : > { %5994 = vst [vmem:[#allocation84_spill] sm:$0xff] %v5110_v11  ;;  %v1675_v2 = vmul.f32 1.442695, %v1584_v20  ;;  %v1842_v4 = vrot.slane %v1841_v7, 4  ;;  %v1849_v27 = vsel %vm1268_vm0, %v5110_v11, 0.0  ;;  %v1585_v15 = vsub.f32 %v5002_v46, %v1403_v17  ;;  %v5119_v28 = vpop.f32.mrb[43].mxu1 }
 0x287   : > { %v1586_v50 = vsub.f32 %v4993_v18, %v1403_v17  ;;  %v1850_v38 = vadd.f32 %v1849_v27, %v1848_v14  ;;  %3999 = vpow2.f32 %v1673_v8  ;;  %v1409_v21 = vrot.slane %v1408_v31, 2 }
 0x288   : > { %v5121_v30 = vadd.f32 %v1842_v4, %v1841_v7  ;;  %4001 = vpow2.f32 %v1675_v2  ;;  %v1677_v56 = vmul.f32 1.442695, %v1585_v15  ;;  %v1414_v46 = vsel %vm1268_vm0, %v5031_v45, -inf }
 0x289   : > { %v1679_v60 = vmul.f32 1.442695, %v1586_v50  ;;  %v5123_v20 = vpop.f32.mrb[44].mxu1  ;;  %v1851_v54 = vrot.slane %v1850_v38, 4  ;;  %v1410_v13 = vmax.f32 %v1408_v31, %v1409_v21  ;;  %4003 = vrcp.f32 %v1766_v62 }
 0x28a   : > { %v5127_v18 = vpop.f32.mrb[45].mxu1  ;;  %v3994_v17 = vpop.eup %3993  ;;  %4005 = vpow2.f32 %v1677_v56  ;;  %v5995_v7 = vrot.slane %v4945_v0, 2  ;;  %v1415_v50 = vmax.f32 %v1413_v43, %v1414_v46 }
 0x28b   : > { %v5135_v8 = vpop.eup %3995  ;;  %v5137_v31 = vadd.f32 %v1851_v54, %v1850_v38  ;;  %4007 = vpow2.f32 %v1679_v60  ;;  %v2069_v2 = vmul.f32 %v3994_v17, %v4881_v25  ;;  %v1411_v4 = vrot.slane %v1410_v13, 1 }
 0x28c   : > { %v1773_v48 = vadd.f32 %v5995_v7, %v4945_v0  ;;  %5996 = vst [vmem:[#allocation85_spill] sm:$0xff] %v5135_v8  ;;  %v5140_v27 = vpop.eup %3997  ;;  %v1857_v56 = vsel %vm1268_vm0, %v5135_v8, 0.0  ;;  %v2070_v15 = vmul.f32 %v3994_v17, %v4885_v1  ;;  %v1423_v25 = vsel %vm1268_vm0, %v5042_v16, -inf }
 0x28d   : > { %5997 = vst [vmem:[#allocation86_spill] sm:$0xff] %v5140_v27  ;;  %v5145_v62 = vpop.f32.mrb[46].mxu1  ;;  %v1858_v54 = vsel %vm1268_vm0, %v5140_v27, 0.0  ;;  %2135 = vperm.xlu0 %3815, %v2069_v2   ;;  %v1412_v38 = vmax.f32 %v1410_v13, %v1411_v4  ;;  %v1416_v14 = vrot.slane %v1415_v50, 4  ;;  %v1422_v1 = vsel %vm1268_vm0, %v5048_v37, -inf }
 0x28e   : > { %v1774_v21 = vrot.slane %v1773_v48, 1  ;;  %v5152_v60 = vpop.f32.mrb[47].mxu1  ;;  %v1859_v7 = vadd.f32 %v1858_v54, %v1857_v56  ;;  %v1424_v43 = vmax.f32 %v1422_v1, %v1423_v25  ;;  %v5998_v2 = vrot.slane %v4970_v29, 2 }
 0x28f   : > { %v1587_v46 = vsub.f32 %v5016_v3, %v1412_v38  ;;  %v1588_v17 = vsub.f32 %v5012_v10, %v1412_v38  ;;  %v1417_v0 = vmax.f32 %v1415_v50, %v1416_v14  ;;  %v1432_v56 = vsel %vm1268_vm0, %v5060_v12, -inf }
 0x290   : > { %v1775_v8 = vadd.f32 %v1774_v21, %v1773_v48  ;;  %v1782_v13 = vadd.f32 %v5998_v2, %v4970_v29  ;;  %v1860_v4 = vrot.slane %v1859_v7, 4  ;;  %v1425_v3 = vrot.slane %v1424_v43, 4 }
 0x291   : > { %v5163_v54 = vpop.f32.mrb[48].mxu1  ;;  %v5165_v48 = vpop.eup %3999  ;;  %v1681_v21 = vmul.f32 1.442695, %v1587_v46  ;;  %v1683_v27 = vmul.f32 1.442695, %v1588_v17  ;;  %2140 = vperm.xlu0 %3815, %v2070_v15   ;;  %v1418_v14 = vrot.slane %v1417_v0, 2 }
 0x292   : > { %4009 = vrcp.f32 %v1775_v8  ;;  %5999 = vst [vmem:[#allocation87_spill] sm:$0xff] %v5165_v48  ;;  %v1783_v10 = vrot.slane %v1782_v13, 1  ;;  %v5167_v38 = vpop.eup %4001  ;;  %v5169_v25 = vadd.f32 %v1860_v4, %v1859_v7  ;;  %v1866_v29 = vsel %vm1268_vm0, %v5165_v48, 0.0  ;;  %v5175_v50 = vpop.f32.mrb[49].mxu1 }
 0x293   : > { %6000 = vst [vmem:[#allocation88_spill] sm:$0xff] %v5167_v38  ;;  %v1431_v8 = vsel %vm1268_vm0, %v5064_v6, -inf  ;;  %v4004_v1 = vpop.eup %4003  ;;  %v1867_v46 = vsel %vm1268_vm0, %v5167_v38, 0.0  ;;  %4011 = vpow2.f32 %v1681_v21  ;;  %v1426_v15 = vmax.f32 %v1424_v43, %v1425_v3 }
 0x294   : > { %6001 = vst [vmem:[#allocation89_spill] sm:$0xff] %v5169_v25  ;;  %v1784_v17 = vadd.f32 %v1783_v10, %v1782_v13  ;;  %v5179_v2 = vpop.eup %4005  ;;  %v1868_v4 = vadd.f32 %v1867_v46, %v1866_v29  ;;  %4013 = vpow2.f32 %v1683_v27  ;;  %v2071_v48 = vmul.f32 %v4004_v1, %v4897_v51 }
 0x295   : > { %6002 = vst [vmem:[#allocation90_spill] sm:$0xff] %v5179_v2  ;;  %v5183_v11 = vpop.f32.mrb[50].mxu1  ;;  %v5185_v58 = vpop.eup %4007  ;;  %v1875_v26 = vsel %vm1268_vm0, %v5179_v2, 0.0  ;;  %v1419_v52 = vmax.f32 %v1417_v0, %v1418_v14  ;;  %v2072_v21 = vmul.f32 %v4004_v1, %v4899_v59  ;;  %v1427_v43 = vrot.slane %v1426_v15, 2 }
 0x296   : > { %6003 = vst [vmem:[#allocation91_spill] sm:$0xff] %v5185_v58  ;;  %v5190_v13 = vpop.f32.mrb[51].mxu1  ;;  %v1869_v3 = vrot.slane %v1868_v4, 4  ;;  %v1876_v10 = vsel %vm1268_vm0, %v5185_v58, 0.0  ;;  %2145 = vperm.xlu1 %3816, %v2071_v48   ;;  %4015 = vrcp.f32 %v1784_v17  ;;  %v1433_v51 = vmax.f32 %v1431_v8, %v1432_v56 }
 0x297   : > { %v1877_v27 = vadd.f32 %v1876_v10, %v1875_v26  ;;  %v1420_v29 = vrot.slane %v1419_v52, 1  ;;  %v1428_v46 = vmax.f32 %v1426_v15, %v1427_v43  ;;  %v6004_v7 = vrot.slane %v4987_v44, 2 }
 0x298   : > { %v5197_v0 = vadd.f32 %v1869_v3, %v1868_v4  ;;  %v1434_v59 = vrot.slane %v1433_v51, 4  ;;  %v1441_v14 = vsel %vm1268_vm0, %v5074_v9, -inf  ;;  %v1440_v1 = vsel %vm1268_vm0, %v5082_v49, -inf }
 0x299   : > { %v1791_v2 = vadd.f32 %v6004_v7, %v4987_v44  ;;  %v5203_v58 = vpop.f32.mrb[52].mxu1  ;;  %v1878_v48 = vrot.slane %v1877_v27, 4  ;;  %v1421_v56 = vmax.f32 %v1419_v52, %v1420_v29  ;;  %v1429_v26 = vrot.slane %v1428_v46, 1 }
 0x29a   : > { %6005 = vst [vmem:[#allocation92_spill] sm:$0xff] %v5203_v58  ;;  %v5205_v15 = vpop.f32.mrb[53].mxu1  ;;  %2150 = vperm.xlu1 %3816, %v2072_v21   ;;  %v1435_v7 = vmax.f32 %v1433_v51, %v1434_v59  ;;  %v1442_v4 = vmax.f32 %v1440_v1, %v1441_v14  ;;  %v6007_v43 = vrot.slane %v5010_v32, 2 }
 0x29b   : > { %v1792_v8 = vrot.slane %v1791_v2, 1  ;;  %6006 = vst [vmem:[#allocation93_spill] sm:$0xff] %v5205_v15  ;;  %v5211_v10 = vadd.f32 %v1878_v48, %v1877_v27  ;;  %v1589_v38 = vsub.f32 %v5033_v22, %v1421_v56  ;;  %v1590_v52 = vsub.f32 %v5031_v45, %v1421_v56 }
 0x29c   : > { %v4010_v17 = vpop.eup %4009  ;;  %v1800_v3 = vadd.f32 %v6007_v43, %v5010_v32  ;;  %v1430_v25 = vmax.f32 %v1428_v46, %v1429_v26  ;;  %v1436_v58 = vrot.slane %v1435_v7, 2  ;;  %v1443_v14 = vrot.slane %v1442_v4, 4 }
 0x29d   : > { %v2073_v29 = vmul.f32 %v4010_v17, %v4913_v41  ;;  %v2074_v15 = vmul.f32 %v4010_v17, %v4917_v24  ;;  %v1793_v44 = vadd.f32 %v1792_v8, %v1791_v2  ;;  %v5217_v21 = vpop.f32.mrb[54].mxu1  ;;  %v5219_v51 = vpop.eup %4011  ;;  %v1685_v32 = vmul.f32 1.442695, %v1589_v38 }
 0x29e   : > { %v1687_v27 = vmul.f32 1.442695, %v1590_v52  ;;  %v5222_v22 = vpop.eup %4013  ;;  %v1884_v41 = vsel %vm1268_vm0, %v5219_v51, 0.0  ;;  %v1591_v45 = vsub.f32 %v5048_v37, %v1430_v25  ;;  %v1592_v24 = vsub.f32 %v5042_v16, %v1430_v25  ;;  %v5228_v46 = vpop.f32.mrb[55].mxu1 }
 0x29f   : > { %2155 = vperm.xlu0 %3815, %v2073_v29   ;;  %2160 = vperm.xlu1 %3816, %v2074_v15   ;;  %v1437_v2 = vmax.f32 %v1435_v7, %v1436_v58  ;;  %v1885_v1 = vsel %vm1268_vm0, %v5222_v22, 0.0  ;;  %4017 = vpow2.f32 %v1685_v32  ;;  %v1444_v38 = vmax.f32 %v1442_v4, %v1443_v14 }
 0x2a0   : > { %v1801_v48 = vrot.slane %v1800_v3, 1  ;;  %v4016_v56 = vpop.eup %4015  ;;  %v1886_v26 = vadd.f32 %v1885_v1, %v1884_v41  ;;  %4019 = vpow2.f32 %v1687_v27  ;;  %v1689_v8 = vmul.f32 1.442695, %v1591_v45 }
 0x2a1   : > { %v1691_v17 = vmul.f32 1.442695, %v1592_v24  ;;  %v5232_v43 = vpop.f32.mrb[56].mxu1  ;;  %v2075_v37 = vmul.f32 %v4016_v56, %v4935_v35  ;;  %v1438_v16 = vrot.slane %v1437_v2, 1  ;;  %v2076_v58 = vmul.f32 %v4016_v56, %v4939_v61 }
 0x2a2   : > { %4021 = vrcp.f32 %v1793_v44  ;;  %v5236_v25 = vpop.f32.mrb[57].mxu1  ;;  %v1887_v15 = vrot.slane %v1886_v26, 4  ;;  %v1445_v7 = vrot.slane %v1444_v38, 2  ;;  %v1802_v4 = vadd.f32 %v1801_v48, %v1800_v3 }
 0x2a3   : > { %4023 = vpow2.f32 %v1689_v8  ;;  %2165 = vperm.xlu0 %3815, %v2075_v37   ;;  %v1439_v52 = vmax.f32 %v1437_v2, %v1438_v16  ;;  %2170 = vperm.xlu1 %3816, %v2076_v58   ;;  %v1450_v29 = vsel %vm1268_vm0, %v5089_v23, -inf  ;;  %v1449_v35 = vsel %vm1268_vm0, %v5094_v53, -inf }
 0x2a4   : > { %4025 = vpow2.f32 %v1691_v17  ;;  %v5242_v32 = vadd.f32 %v1887_v15, %v1886_v26  ;;  %v1446_v61 = vmax.f32 %v1444_v38, %v1445_v7  ;;  %v1451_v44 = vmax.f32 %v1449_v35, %v1450_v29 }
 0x2a5   : > { %4027 = vrcp.f32 %v1802_v4  ;;  %v5244_v27 = vpop.f32.mrb[58].mxu1  ;;  %v1593_v14 = vsub.f32 %v5064_v6, %v1439_v52  ;;  %v1594_v3 = vsub.f32 %v5060_v12, %v1439_v52  ;;  %v6008_v41 = vrot.slane %v5027_v34, 2 }
 0x2a6   : > { %v1459_v24 = vsel %vm1268_vm0, %v5108_v5, -inf  ;;  %v5253_v2 = vpop.f32.mrb[59].mxu1  ;;  %v1447_v38 = vrot.slane %v1446_v61, 1  ;;  %v1452_v48 = vrot.slane %v1451_v44, 4  ;;  %v1458_v56 = vsel %vm1268_vm0, %v5119_v28, -inf }
 0x2a7   : > { %v1809_v45 = vadd.f32 %v6008_v41, %v5027_v34  ;;  %v1693_v26 = vmul.f32 1.442695, %v1593_v14  ;;  %v1695_v6 = vmul.f32 1.442695, %v1594_v3  ;;  %v1460_v12 = vmax.f32 %v1458_v56, %v1459_v24 }
 0x2a8   : > { %v1448_v17 = vmax.f32 %v1446_v61, %v1447_v38  ;;  %v1453_v37 = vmax.f32 %v1451_v44, %v1452_v48  ;;  %v6009_v34 = vrot.slane %v5044_v36, 2  ;;  %v1468_v58 = vsel %vm1268_vm0, %v5123_v20, -inf }
 0x2a9   : > { %v1810_v8 = vrot.slane %v1809_v45, 1  ;;  %v5263_v15 = vpop.f32.mrb[60].mxu1  ;;  %v5265_v7 = vpop.eup %4017  ;;  %4029 = vpow2.f32 %v1693_v26  ;;  %v1461_v52 = vrot.slane %v1460_v12, 4  ;;  %v1467_v29 = vsel %vm1268_vm0, %v5127_v18, -inf }
 0x2aa   : > { %v1818_v16 = vadd.f32 %v6009_v34, %v5044_v36  ;;  %v5269_v35 = vpop.f32.mrb[61].mxu1  ;;  %v5271_v61 = vpop.eup %4019  ;;  %v1893_v36 = vsel %vm1268_vm0, %v5265_v7, 0.0  ;;  %4031 = vpow2.f32 %v1695_v6  ;;  %v1595_v44 = vsub.f32 %v5082_v49, %v1448_v17 }
 0x2ab   : > { %v1811_v4 = vadd.f32 %v1810_v8, %v1809_v45  ;;  %6010 = vst [vmem:[#allocation94_spill] sm:$0xff] %v5271_v61  ;;  %v1596_v14 = vsub.f32 %v5074_v9, %v1448_v17  ;;  %v1894_v41 = vsel %vm1268_vm0, %v5271_v61, 0.0  ;;  %v1454_v45 = vrot.slane %v1453_v37, 2 }
 0x2ac   : > { %v4022_v3 = vpop.eup %4021  ;;  %v1462_v24 = vmax.f32 %v1460_v12, %v1461_v52  ;;  %v1895_v48 = vadd.f32 %v1894_v41, %v1893_v36  ;;  %v1697_v26 = vmul.f32 1.442695, %v1595_v44  ;;  %v1819_v36 = vrot.slane %v1818_v16, 1 }
 0x2ad   : > { %4033 = vrcp.f32 %v1811_v4  ;;  %v5279_v38 = vpop.eup %4023  ;;  %v2077_v56 = vmul.f32 %v4022_v3, %v4953_v42  ;;  %v1699_v8 = vmul.f32 1.442695, %v1596_v14  ;;  %v5282_v34 = vpop.f32.mrb[62].mxu1  ;;  %v2078_v49 = vmul.f32 %v4022_v3, %v4960_v47 }
 0x2ae   : > { %6011 = vst [vmem:[#allocation95_spill] sm:$0xff] %v5279_v38  ;;  %v5284_v6 = vpop.eup %4025  ;;  %v1902_v9 = vsel %vm1268_vm0, %v5279_v38, 0.0  ;;  %v1455_v17 = vmax.f32 %v1453_v37, %v1454_v45  ;;  %v1463_v1 = vrot.slane %v1462_v24, 2  ;;  %v5289_v4 = vpop.f32.mrb[63].mxu1  ;;  %v1896_v52 = vrot.slane %v1895_v48, 4 }
 0x2af   : > { %v4028_v12 = vpop.eup %4027  ;;  %v1903_v42 = vsel %vm1268_vm0, %v5284_v6, 0.0  ;;  %2175 = vperm.xlu0 %3815, %v2077_v56   ;;  %4035 = vpow2.f32 %v1697_v26  ;;  %2180 = vperm.xlu1 %3816, %v2078_v49   ;;  %v1820_v3 = vadd.f32 %v1819_v36, %v1818_v16  ;;  %v1469_v61 = vmax.f32 %v1467_v29, %v1468_v58 }
 0x2b0   : > { %v1904_v44 = vadd.f32 %v1903_v42, %v1902_v9  ;;  %4037 = vpow2.f32 %v1699_v8  ;;  %v2079_v14 = vmul.f32 %v4028_v12, %v4978_v57  ;;  %v1456_v41 = vrot.slane %v1455_v17, 1 }
 0x2b1   : > { %v5294_v59 = vadd.f32 %v1896_v52, %v1895_v48  ;;  %v2080_v47 = vmul.f32 %v4028_v12, %v4983_v40  ;;  %v1464_v37 = vmax.f32 %v1462_v24, %v1463_v1  ;;  %v6012_v56 = vrot.slane %v5084_v33, 2 }
 0x2b2   : > { %v1905_v45 = vrot.slane %v1904_v44, 4  ;;  %v1457_v38 = vmax.f32 %v1455_v17, %v1456_v41  ;;  %4039 = vrcp.f32 %v1820_v3  ;;  %v1477_v57 = vsel %vm1268_vm0, %v5145_v62, -inf }
 0x2b3   : > { %v1827_v26 = vadd.f32 %v6012_v56, %v5084_v33  ;;  %2185 = vperm.xlu0 %3815, %v2079_v14   ;;  %v1465_v8 = vrot.slane %v1464_v37, 1  ;;  %v5303_v48 = vpop.eup %4029  ;;  %2190 = vperm.xlu1 %3816, %v2080_v47   ;;  %v1470_v58 = vrot.slane %v1469_v61, 4  ;;  %v1476_v17 = vsel %vm1268_vm0, %v5152_v60, -inf }
 0x2b4   : > { %v5305_v40 = vadd.f32 %v1905_v45, %v1904_v44  ;;  %v1597_v1 = vsub.f32 %v5094_v53, %v1457_v38  ;;  %v1598_v16 = vsub.f32 %v5089_v23, %v1457_v38  ;;  %v5309_v29 = vpop.eup %4031  ;;  %v1911_v33 = vsel %vm1268_vm0, %v5303_v48, 0.0 }
 0x2b5   : > { %v1466_v24 = vmax.f32 %v1464_v37, %v1465_v8  ;;  %v1828_v49 = vrot.slane %v1827_v26, 1  ;;  %v1912_v53 = vsel %vm1268_vm0, %v5309_v29, 0.0  ;;  %v1471_v47 = vmax.f32 %v1469_v61, %v1470_v58 }
 0x2b6   : > { %v1701_v42 = vmul.f32 1.442695, %v1597_v1  ;;  %v1703_v23 = vmul.f32 1.442695, %v1598_v16  ;;  %v1913_v38 = vadd.f32 %v1912_v53, %v1911_v33  ;;  %v6013_v61 = vrot.slane %v5100_v39, 2 }
 0x2b7   : > { %v4034_v12 = vpop.eup %4033  ;;  %v1599_v44 = vsub.f32 %v5119_v28, %v1466_v24  ;;  %v1600_v14 = vsub.f32 %v5108_v5, %v1466_v24  ;;  %v1829_v37 = vadd.f32 %v1828_v49, %v1827_v26  ;;  %v1472_v28 = vrot.slane %v1471_v47, 2 }
 0x2b8   : > { %v2081_v36 = vmul.f32 %v4034_v12, %v4995_v19  ;;  %4041 = vpow2.f32 %v1701_v42  ;;  %v2082_v41 = vmul.f32 %v4034_v12, %v5004_v55  ;;  %v1914_v45 = vrot.slane %v1913_v38, 4  ;;  %v2761_v42 = vld [vmem:[%s5820_s5] sm:$0xff] }
 0x2b9   : > { %v5322_v3 = vpop.eup %4035  ;;  %4043 = vpow2.f32 %v1703_v23  ;;  %v1705_v56 = vmul.f32 1.442695, %v1599_v44  ;;  %v1707_v8 = vmul.f32 1.442695, %v1600_v14  ;;  %v1478_v5 = vmax.f32 %v1476_v17, %v1477_v57  ;;  %3605 = vmatprep.subr.mxu1 %v2761_v42 }
 0x2ba   : > { %2195 = vperm.xlu0 %3815, %v2081_v36   ;;  %v5324_v1 = vpop.eup %4037  ;;  %v1920_v19 = vsel %vm1268_vm0, %v5322_v3, 0.0  ;;  %2200 = vperm.xlu1 %3816, %v2082_v41   ;;  %4045 = vrcp.f32 %v1829_v37  ;;  %v5328_v16 = vadd.f32 %v1914_v45, %v1913_v38  ;;  %v1836_v26 = vadd.f32 %v6013_v61, %v5100_v39  ;;  %v6014_v36 = vld [vmem:[#allocation76_spill] sm:$0xff] }
 0x2bb   : > { %v1921_v55 = vsel %vm1268_vm0, %v5324_v1, 0.0  ;;  %4047 = vpow2.f32 %v1705_v56  ;;  %v1473_v33 = vmax.f32 %v1471_v47, %v1472_v28  ;;  %v1479_v24 = vrot.slane %v1478_v5, 4  ;;  %3606 = vmatpush3.msra.mxu1 %v2761_v42 }
 0x2bc   : > { %v1922_v58 = vadd.f32 %v1921_v55, %v1920_v19  ;;  %4049 = vpow2.f32 %v1707_v8  ;;  %v4040_v49 = vpop.eup %4039  ;;  %v1837_v53 = vrot.slane %v1836_v26, 1  ;;  %v1486_v57 = vsel %vm1268_vm0, %v5163_v54, -inf }
 0x2bd   : > { %v1485_v17 = vsel %vm1268_vm0, %v5175_v50, -inf  ;;  %v2083_v39 = vmul.f32 %v4040_v49, %v5018_v63  ;;  %v1474_v38 = vrot.slane %v1473_v33, 1  ;;  %v2084_v44 = vmul.f32 %v4040_v49, %v6014_v36 }
 0x2be   : > { %v1923_v23 = vrot.slane %v1922_v58, 4  ;;  %v1480_v14 = vmax.f32 %v1478_v5, %v1479_v24  ;;  %v1838_v41 = vadd.f32 %v1837_v53, %v1836_v26  ;;  %v1487_v47 = vmax.f32 %v1485_v17, %v1486_v57 }
 0x2bf   : > { %v6015_v37 = vrot.slane %v5121_v30, 2  ;;  %2205 = vperm.xlu0 %3815, %v2083_v39   ;;  %v1475_v8 = vmax.f32 %v1473_v33, %v1474_v38  ;;  %2210 = vperm.xlu1 %3816, %v2084_v44   ;;  %v1495_v63 = vsel %vm1268_vm0, %v5183_v11, -inf  ;;  %v1494_v19 = vsel %vm1268_vm0, %v5190_v13, -inf }
 0x2c0   : > { %v5348_v56 = vadd.f32 %v1923_v23, %v1922_v58  ;;  %v1481_v28 = vrot.slane %v1480_v14, 2  ;;  %4051 = vrcp.f32 %v1838_v41  ;;  %v1488_v5 = vrot.slane %v1487_v47, 4 }
 0x2c1   : > { %v1845_v45 = vadd.f32 %v6015_v37, %v5121_v30  ;;  %v1601_v26 = vsub.f32 %v5127_v18, %v1475_v8  ;;  %v1602_v58 = vsub.f32 %v5123_v20, %v1475_v8  ;;  %v1496_v33 = vmax.f32 %v1494_v19, %v1495_v63  ;;  %v6016_v20 = vld [vmem:[#allocation77_spill] sm:$0xff]  ;;  %v6017_v8 = vld [vmem:[#allocation78_spill] sm:$0xff] }
 0x2c2   : > { %v5354_v61 = vpop.eup %4041  ;;  %v1482_v53 = vmax.f32 %v1480_v14, %v1481_v28  ;;  %v1489_v57 = vmax.f32 %v1487_v47, %v1488_v5 }
 0x2c3   : > { %v1846_v55 = vrot.slane %v1845_v45, 1  ;;  %v5359_v24 = vpop.eup %4043  ;;  %v1929_v49 = vsel %vm1268_vm0, %v5354_v61, 0.0  ;;  %v1709_v39 = vmul.f32 1.442695, %v1601_v26  ;;  %v1711_v38 = vmul.f32 1.442695, %v1602_v58 }
 0x2c4   : > { %v4046_v42 = vpop.eup %4045  ;;  %v1930_v23 = vsel %vm1268_vm0, %v5359_v24, 0.0  ;;  %v1497_v36 = vrot.slane %v1496_v33, 4  ;;  %v1483_v37 = vrot.slane %v1482_v53, 1  ;;  %v1490_v47 = vrot.slane %v1489_v57, 2 }
 0x2c5   : > { %v1847_v17 = vadd.f32 %v1846_v55, %v1845_v45  ;;  %v5365_v44 = vpop.eup %4047  ;;  %v1931_v18 = vadd.f32 %v1930_v23, %v1929_v49  ;;  %v2085_v41 = vmul.f32 %v4046_v42, %v6016_v20  ;;  %v2086_v63 = vmul.f32 %v4046_v42, %v6017_v8 }
 0x2c6   : > { %v5369_v19 = vpop.eup %4049  ;;  %v1938_v14 = vsel %vm1268_vm0, %v5365_v44, 0.0  ;;  %4053 = vpow2.f32 %v1709_v39  ;;  %v1498_v45 = vmax.f32 %v1496_v33, %v1497_v36  ;;  %v1484_v55 = vmax.f32 %v1482_v53, %v1483_v37 }
 0x2c7   : > { %v1932_v28 = vrot.slane %v1931_v18, 4  ;;  %v1939_v5 = vsel %vm1268_vm0, %v5369_v19, 0.0  ;;  %4055 = vpow2.f32 %v1711_v38  ;;  %2215 = vperm.xlu0 %3815, %v2085_v41   ;;  %2220 = vperm.xlu1 %3816, %v2086_v63   ;;  %v1491_v58 = vmax.f32 %v1489_v57, %v1490_v47  ;;  %v6019_v41 = vld [vmem:[#allocation92_spill] sm:$0xff] }
 0x2c8   : > { %v1940_v26 = vadd.f32 %v1939_v5, %v1938_v14  ;;  %4057 = vrcp.f32 %v1847_v17  ;;  %v1499_v49 = vrot.slane %v1498_v45, 2  ;;  %v1603_v23 = vsub.f32 %v5152_v60, %v1484_v55  ;;  %v6020_v60 = vld [vmem:[#allocation79_spill] sm:$0xff] }
 0x2c9   : > { %v5375_v42 = vadd.f32 %v1932_v28, %v1931_v18  ;;  %v1604_v39 = vsub.f32 %v5145_v62, %v1484_v55  ;;  %v6018_v33 = vrot.slane %v5137_v31, 2  ;;  %v1492_v8 = vrot.slane %v1491_v58, 1  ;;  %v6021_v28 = vld [vmem:[#allocation80_spill] sm:$0xff] }
 0x2ca   : > { %v1941_v20 = vrot.slane %v1940_v26, 4  ;;  %v1500_v38 = vmax.f32 %v1498_v45, %v1499_v49  ;;  %v1504_v53 = vsel %vm1268_vm0, %v6019_v41, -inf  ;;  %v4052_v37 = vpop.eup %4051  ;;  %v1713_v17 = vmul.f32 1.442695, %v1603_v23  ;;  %v6022_v45 = vld [vmem:[#allocation93_spill] sm:$0xff] }
 0x2cb   : > { %v1854_v36 = vadd.f32 %v6018_v33, %v5137_v31  ;;  %v1715_v18 = vmul.f32 1.442695, %v1604_v39  ;;  %v2087_v62 = vmul.f32 %v4052_v37, %v6020_v60  ;;  %v1493_v47 = vmax.f32 %v1491_v58, %v1492_v8 }
 0x2cc   : > { %v5385_v14 = vadd.f32 %v1941_v20, %v1940_v26  ;;  %v2088_v5 = vmul.f32 %v4052_v37, %v6021_v28  ;;  %4059 = vpow2.f32 %v1713_v17  ;;  %v1501_v31 = vrot.slane %v1500_v38, 1  ;;  %v6023_v20 = vld [vmem:[#allocation89_spill] sm:$0xff] }
 0x2cd   : > { %v1855_v63 = vrot.slane %v1854_v36, 1  ;;  %v1503_v49 = vsel %vm1268_vm0, %v6022_v45, -inf  ;;  %4061 = vpow2.f32 %v1715_v18  ;;  %2225 = vperm.xlu0 %3815, %v2087_v62   ;;  %v1605_v23 = vsub.f32 %v5175_v50, %v1493_v47 }
 0x2ce   : > { %v1606_v26 = vsub.f32 %v5163_v54, %v1493_v47  ;;  %2230 = vperm.xlu1 %3816, %v2088_v5   ;;  %v1502_v39 = vmax.f32 %v1500_v38, %v1501_v31  ;;  %v1505_v58 = vmax.f32 %v1503_v49, %v1504_v53  ;;  %v6024_v8 = vrot.slane %v6023_v20, 2  ;;  %v6025_v49 = vld [vmem:[#allocation81_spill] sm:$0xff] }
 0x2cf   : > { %v1856_v55 = vadd.f32 %v1855_v63, %v1854_v36  ;;  %v1717_v17 = vmul.f32 1.442695, %v1605_v23  ;;  %v1513_v18 = vsel %vm1268_vm0, %v5217_v21, -inf  ;;  %v1512_v50 = vsel %vm1268_vm0, %v5228_v46, -inf }
 0x2d0   : > { %v1863_v37 = vadd.f32 %v6024_v8, %v6023_v20  ;;  %v5397_v36 = vpop.eup %4053  ;;  %v1719_v63 = vmul.f32 1.442695, %v1606_v26  ;;  %v1607_v38 = vsub.f32 %v5190_v13, %v1502_v39  ;;  %v1608_v53 = vsub.f32 %v5183_v11, %v1502_v39  ;;  %v6026_v8 = vld [vmem:[#allocation82_spill] sm:$0xff] }
 0x2d1   : > { %4063 = vrcp.f32 %v1856_v55  ;;  %v5403_v60 = vpop.eup %4055  ;;  %v1947_v54 = vsel %vm1268_vm0, %v5397_v36, 0.0  ;;  %v1506_v62 = vrot.slane %v1505_v58, 4  ;;  %v1514_v31 = vmax.f32 %v1512_v50, %v1513_v18 }
 0x2d2   : > { %v4058_v47 = vpop.eup %4057  ;;  %v1948_v28 = vsel %vm1268_vm0, %v5403_v60, 0.0  ;;  %4065 = vpow2.f32 %v1717_v17  ;;  %v1864_v5 = vrot.slane %v1863_v37, 1  ;;  %v1721_v26 = vmul.f32 1.442695, %v1607_v38 }
 0x2d3   : > { %v1949_v55 = vadd.f32 %v1948_v28, %v1947_v54  ;;  %4067 = vpow2.f32 %v1719_v63  ;;  %v2089_v23 = vmul.f32 %v4058_v47, %v6025_v49  ;;  %v1723_v20 = vmul.f32 1.442695, %v1608_v53 }
 0x2d4   : > { %v2090_v33 = vmul.f32 %v4058_v47, %v6026_v8  ;;  %v1507_v57 = vmax.f32 %v1505_v58, %v1506_v62  ;;  %v1865_v13 = vadd.f32 %v1864_v5, %v1863_v37  ;;  %4069 = vpow2.f32 %v1721_v26  ;;  %v6029_v26 = vld [vmem:[#allocation83_spill] sm:$0xff] }
 0x2d5   : > { %v1950_v30 = vrot.slane %v1949_v55, 4  ;;  %2235 = vperm.xlu0 %3815, %v2089_v23   ;;  %v1515_v11 = vrot.slane %v1514_v31, 4  ;;  %v6027_v39 = vrot.slane %v5197_v0, 2  ;;  %4071 = vpow2.f32 %v1723_v20 }
 0x2d6   : > { %2240 = vperm.xlu1 %3816, %v2090_v33   ;;  %v1508_v18 = vrot.slane %v1507_v57, 2  ;;  %v1522_v63 = vsel %vm1268_vm0, %v5232_v43, -inf  ;;  %v1521_v50 = vsel %vm1268_vm0, %v5236_v25, -inf  ;;  %v5420_v54 = vpop.eup %4059  ;;  %4073 = vrcp.f32 %v1865_v13  ;;  %v6030_v13 = vld [vmem:[#allocation84_spill] sm:$0xff] }
 0x2d7   : > { %v1872_v17 = vadd.f32 %v6027_v39, %v5197_v0  ;;  %v5422_v58 = vadd.f32 %v1950_v30, %v1949_v55  ;;  %v1516_v37 = vmax.f32 %v1514_v31, %v1515_v11  ;;  %v5424_v53 = vpop.eup %4061  ;;  %v1956_v0 = vsel %vm1268_vm0, %v5420_v54, 0.0 }
 0x2d8   : > { %v1509_v33 = vmax.f32 %v1507_v57, %v1508_v18  ;;  %v1523_v62 = vmax.f32 %v1521_v50, %v1522_v63  ;;  %v6028_v47 = vrot.slane %v5211_v10, 2  ;;  %v1957_v30 = vsel %vm1268_vm0, %v5424_v53, 0.0 }
 0x2d9   : > { %v1873_v38 = vrot.slane %v1872_v17, 1  ;;  %v1517_v55 = vrot.slane %v1516_v37, 2  ;;  %v1958_v23 = vadd.f32 %v1957_v30, %v1956_v0 }
 0x2da   : > { %v1881_v28 = vadd.f32 %v6028_v47, %v5211_v10  ;;  %v1510_v8 = vrot.slane %v1509_v33, 1  ;;  %v1524_v39 = vrot.slane %v1523_v62, 4  ;;  %v1531_v47 = vsel %vm1268_vm0, %v5244_v27, -inf }
 0x2db   : > { %v4064_v5 = vpop.eup %4063  ;;  %v1874_v31 = vadd.f32 %v1873_v38, %v1872_v17  ;;  %v1518_v57 = vmax.f32 %v1516_v37, %v1517_v55  ;;  %v1959_v10 = vrot.slane %v1958_v23, 4  ;;  %v1530_v17 = vsel %vm1268_vm0, %v5253_v2, -inf }
 0x2dc   : > { %v2091_v20 = vmul.f32 %v4064_v5, %v6029_v26  ;;  %v2092_v11 = vmul.f32 %v4064_v5, %v6030_v13  ;;  %v1882_v18 = vrot.slane %v1881_v28, 1  ;;  %v5436_v63 = vpop.eup %4065  ;;  %v1511_v50 = vmax.f32 %v1509_v33, %v1510_v8 }
 0x2dd   : > { %4075 = vrcp.f32 %v1874_v31  ;;  %v5442_v38 = vpop.eup %4067  ;;  %v1965_v37 = vsel %vm1268_vm0, %v5436_v63, 0.0  ;;  %v1519_v0 = vrot.slane %v1518_v57, 1  ;;  %v1525_v5 = vmax.f32 %v1523_v62, %v1524_v39 }
 0x2de   : > { %2245 = vperm.xlu0 %3815, %v2091_v20   ;;  %2250 = vperm.xlu1 %3816, %v2092_v11   ;;  %v1883_v30 = vadd.f32 %v1882_v18, %v1881_v28  ;;  %v5446_v55 = vadd.f32 %v1959_v10, %v1958_v23  ;;  %v1966_v33 = vsel %vm1268_vm0, %v5442_v38, 0.0  ;;  %v1609_v31 = vsub.f32 %v6022_v45, %v1511_v50  ;;  %v5452_v20 = vpop.eup %4069 }
 0x2df   : > { %v1610_v26 = vsub.f32 %v6019_v41, %v1511_v50  ;;  %v1967_v8 = vadd.f32 %v1966_v33, %v1965_v37  ;;  %v1520_v13 = vmax.f32 %v1518_v57, %v1519_v0  ;;  %v1526_v11 = vrot.slane %v1525_v5, 2  ;;  %v5454_v49 = vpop.eup %4071  ;;  %v6031_v37 = vld [vmem:[#allocation85_spill] sm:$0xff] }
 0x2e0   : > { %4077 = vrcp.f32 %v1883_v30  ;;  %v1974_v28 = vsel %vm1268_vm0, %v5452_v20, 0.0  ;;  %v1725_v23 = vmul.f32 1.442695, %v1609_v31  ;;  %v4074_v18 = vpop.eup %4073  ;;  %v1975_v41 = vsel %vm1268_vm0, %v5454_v49, 0.0  ;;  %v6032_v30 = vld [vmem:[#allocation86_spill] sm:$0xff] }
 0x2e1   : > { %v1727_v39 = vmul.f32 1.442695, %v1610_v26  ;;  %v1968_v10 = vrot.slane %v1967_v8, 4  ;;  %v1611_v45 = vsub.f32 %v5228_v46, %v1520_v13  ;;  %v1612_v57 = vsub.f32 %v5217_v21, %v1520_v13 }
 0x2e2   : > { %v1976_v50 = vadd.f32 %v1975_v41, %v1974_v28  ;;  %4079 = vpow2.f32 %v1725_v23  ;;  %v2093_v0 = vmul.f32 %v4074_v18, %v6031_v37  ;;  %v2094_v33 = vmul.f32 %v4074_v18, %v6032_v30  ;;  %v6034_v18 = vld [vmem:[#allocation87_spill] sm:$0xff] }
 0x2e3   : > { %v5465_v62 = vadd.f32 %v1968_v10, %v1967_v8  ;;  %4081 = vpow2.f32 %v1727_v39  ;;  %v1729_v31 = vmul.f32 1.442695, %v1611_v45  ;;  %v1731_v26 = vmul.f32 1.442695, %v1612_v57 }
 0x2e4   : > { %v1977_v12 = vrot.slane %v1976_v50, 4  ;;  %2255 = vperm.xlu0 %3815, %v2093_v0   ;;  %2260 = vperm.xlu1 %3816, %v2094_v33   ;;  %v1527_v52 = vmax.f32 %v1525_v5, %v1526_v11  ;;  %v1532_v9 = vmax.f32 %v1530_v17, %v1531_v47  ;;  %v6033_v46 = vrot.slane %v5242_v32, 2  ;;  %v6035_v17 = vld [vmem:[#allocation88_spill] sm:$0xff] }
 0x2e5   : > { %v1970_v28 = vrot.slane %v5465_v62, 2  ;;  %4083 = vpow2.f32 %v1729_v31  ;;  %v1540_v8 = vsel %vm1268_vm0, %v5263_v15, -inf  ;;  %v1539_v23 = vsel %vm1268_vm0, %v5269_v35, -inf }
 0x2e6   : > { %v1890_v21 = vadd.f32 %v6033_v46, %v5242_v32  ;;  %v5475_v39 = vadd.f32 %v1977_v12, %v1976_v50  ;;  %4085 = vpow2.f32 %v1731_v26  ;;  %v1528_v47 = vrot.slane %v1527_v52, 1 }
 0x2e7   : > { %v4076_v13 = vpop.eup %4075  ;;  %v1533_v10 = vrot.slane %v1532_v9, 4  ;;  %v1541_v41 = vmax.f32 %v1539_v23, %v1540_v8  ;;  %v6036_v37 = vrot.slane %v5294_v59, 2  ;;  %v1549_v12 = vsel %vm1268_vm0, %v5282_v34, -inf  ;;  %v6038_v23 = vld [vmem:[#allocation91_spill] sm:$0xff] }
 0x2e8   : > { %v2095_v5 = vmul.f32 %v4076_v13, %v6034_v18  ;;  %v2096_v11 = vmul.f32 %v4076_v13, %v6035_v17  ;;  %v1891_v32 = vrot.slane %v1890_v21, 1  ;;  %v1979_v45 = vrot.slane %v5475_v39, 2 }
 0x2e9   : > { %v1529_v57 = vmax.f32 %v1527_v52, %v1528_v47  ;;  %v1899_v0 = vadd.f32 %v6036_v37, %v5294_v59  ;;  %v1534_v30 = vmax.f32 %v1532_v9, %v1533_v10  ;;  %v1542_v31 = vrot.slane %v1541_v41, 4  ;;  %v6037_v52 = vld [vmem:[#allocation90_spill] sm:$0xff] }
 0x2ea   : > { %2265 = vperm.xlu0 %3815, %v2095_v5   ;;  %v4078_v50 = vpop.eup %4077  ;;  %2270 = vperm.xlu1 %3816, %v2096_v11   ;;  %v1892_v33 = vadd.f32 %v1891_v32, %v1890_v21  ;;  %v1548_v26 = vsel %vm1268_vm0, %v5289_v4, -inf  ;;  %v6039_v10 = vrot.slane %v5305_v40, 2 }
 0x2eb   : > { %v1613_v46 = vsub.f32 %v5236_v25, %v1529_v57  ;;  %v1614_v13 = vsub.f32 %v5232_v43, %v1529_v57  ;;  %v2097_v8 = vmul.f32 %v4078_v50, %v6037_v52  ;;  %v2098_v18 = vmul.f32 %v4078_v50, %v6038_v23 }
 0x2ec   : > { %v1535_v59 = vrot.slane %v1534_v30, 2  ;;  %4087 = vrcp.f32 %v1892_v33  ;;  %v1543_v5 = vmax.f32 %v1541_v41, %v1542_v31  ;;  %v1900_v47 = vrot.slane %v1899_v0, 1  ;;  %v5491_v17 = vpop.eup %4079 }
 0x2ed   : > { %v1733_v9 = vmul.f32 1.442695, %v1613_v46  ;;  %v1735_v21 = vmul.f32 1.442695, %v1614_v13  ;;  %v1550_v11 = vmax.f32 %v1548_v26, %v1549_v12  ;;  %v1908_v25 = vadd.f32 %v6039_v10, %v5305_v40  ;;  %v5496_v32 = vpop.eup %4081 }
 0x2ee   : > { %2275 = vperm.xlu0 %3815, %v2097_v8   ;;  %v1983_v43 = vsel %vm1268_vm0, %v5491_v17, 0.0  ;;  %v1536_v57 = vmax.f32 %v1534_v30, %v1535_v59  ;;  %2280 = vperm.xlu1 %3816, %v2098_v18   ;;  %v1544_v37 = vrot.slane %v1543_v5, 2  ;;  %v1901_v41 = vadd.f32 %v1900_v47, %v1899_v0 }
 0x2ef   : > { %v1984_v50 = vsel %vm1268_vm0, %v5496_v32, 0.0  ;;  %4089 = vpow2.f32 %v1733_v9  ;;  %v1551_v33 = vrot.slane %v1550_v11, 4  ;;  %v1909_v31 = vrot.slane %v1908_v25, 1  ;;  %v5502_v12 = vpop.eup %4083 }
 0x2f0   : > { %v1985_v26 = vadd.f32 %v1984_v50, %v1983_v43  ;;  %4091 = vpow2.f32 %v1735_v21  ;;  %v1537_v40 = vrot.slane %v1536_v57, 1  ;;  %v1545_v46 = vmax.f32 %v1543_v5, %v1544_v37  ;;  %v5504_v13 = vpop.eup %4085 }
 0x2f1   : > { %v1992_v30 = vsel %vm1268_vm0, %v5502_v12, 0.0  ;;  %4093 = vrcp.f32 %v1901_v41  ;;  %v1552_v52 = vmax.f32 %v1550_v11, %v1551_v33  ;;  %v1910_v0 = vadd.f32 %v1909_v31, %v1908_v25 }
 0x2f2   : > { %v1986_v8 = vrot.slane %v1985_v26, 4  ;;  %v1993_v23 = vsel %vm1268_vm0, %v5504_v13, 0.0  ;;  %v1538_v18 = vmax.f32 %v1536_v57, %v1537_v40  ;;  %v1546_v59 = vrot.slane %v1545_v46, 1 }
 0x2f3   : > { %v1994_v47 = vadd.f32 %v1993_v23, %v1992_v30  ;;  %v1553_v9 = vrot.slane %v1552_v52, 2  ;;  %4095 = vrcp.f32 %v1910_v0  ;;  %v6040_v5 = vrot.slane %v5328_v16, 2 }
 0x2f4   : > { %v5513_v10 = vadd.f32 %v1986_v8, %v1985_v26  ;;  %v1615_v43 = vsub.f32 %v5253_v2, %v1538_v18  ;;  %v1616_v11 = vsub.f32 %v5244_v27, %v1538_v18  ;;  %v1547_v25 = vmax.f32 %v1545_v46, %v1546_v59 }
 0x2f5   : > { %v1917_v21 = vadd.f32 %v6040_v5, %v5328_v16  ;;  %v1995_v37 = vrot.slane %v1994_v47, 4  ;;  %v1554_v41 = vmax.f32 %v1552_v52, %v1553_v9  ;;  %v6041_v57 = vrot.slane %v5348_v56, 2 }
 0x2f6   : > { %v4088_v31 = vpop.eup %4087  ;;  %v1988_v40 = vrot.slane %v5513_v10, 2  ;;  %v1737_v30 = vmul.f32 1.442695, %v1615_v43  ;;  %v1739_v0 = vmul.f32 1.442695, %v1616_v11  ;;  %v1617_v16 = vsub.f32 %v5269_v35, %v1547_v25 }
 0x2f7   : > { %v1918_v50 = vrot.slane %v1917_v21, 1  ;;  %v1926_v33 = vadd.f32 %v6041_v57, %v5348_v56  ;;  %v5522_v26 = vadd.f32 %v1995_v37, %v1994_v47  ;;  %v2099_v2 = vmul.f32 %v4088_v31, %v5219_v51 }
 0x2f8   : > { %v1618_v27 = vsub.f32 %v5263_v15, %v1547_v25  ;;  %v2100_v46 = vmul.f32 %v4088_v31, %v5222_v22  ;;  %4097 = vpow2.f32 %v1737_v30  ;;  %v1741_v52 = vmul.f32 1.442695, %v1617_v16  ;;  %v6044_v30 = vld [vmem:[#allocation94_spill] sm:$0xff] }
 0x2f9   : > { %v1555_v8 = vrot.slane %v1554_v41, 1  ;;  %v1919_v23 = vadd.f32 %v1918_v50, %v1917_v21  ;;  %v5527_v56 = vpop.eup %4089  ;;  %v1997_v18 = vrot.slane %v5522_v26, 2  ;;  %4099 = vpow2.f32 %v1739_v0  ;;  %2285 = vperm.xlu0 %3815, %v2099_v2  }
 0x2fa   : > { %v1743_v59 = vmul.f32 1.442695, %v1618_v27  ;;  %2290 = vperm.xlu1 %3816, %v2100_v46   ;;  %v1927_v35 = vrot.slane %v1926_v33, 1  ;;  %v5530_v47 = vpop.eup %4091  ;;  %v2001_v51 = vsel %vm1268_vm0, %v5527_v56, 0.0  ;;  %4101 = vpow2.f32 %v1741_v52  ;;  %v6045_v46 = vld [vmem:[#allocation95_spill] sm:$0xff] }
 0x2fb   : > { %v1556_v22 = vmax.f32 %v1554_v41, %v1555_v8  ;;  %v6042_v15 = vrot.slane %v5375_v42, 2  ;;  %v4094_v5 = vpop.eup %4093  ;;  %v2002_v21 = vsel %vm1268_vm0, %v5530_v47, 0.0  ;;  %v6043_v11 = vrot.slane %v5385_v14, 2 }
 0x2fc   : > { %4103 = vpow2.f32 %v1743_v59  ;;  %v1928_v43 = vadd.f32 %v1927_v35, %v1926_v33  ;;  %v2003_v37 = vadd.f32 %v2002_v21, %v2001_v51  ;;  %v2101_v50 = vmul.f32 %v4094_v5, %v5265_v7 }
 0x2fd   : > { %v1935_v9 = vadd.f32 %v6042_v15, %v5375_v42  ;;  %v1944_v25 = vadd.f32 %v6043_v11, %v5385_v14  ;;  %v1619_v57 = vsub.f32 %v5289_v4, %v1556_v22  ;;  %v1620_v41 = vsub.f32 %v5282_v34, %v1556_v22  ;;  %v4096_v31 = vpop.eup %4095 }
 0x2fe   : > { %v2102_v42 = vmul.f32 %v4094_v5, %v6044_v30  ;;  %4105 = vrcp.f32 %v1919_v23  ;;  %v2004_v2 = vrot.slane %v2003_v37, 4  ;;  %2295 = vperm.xlu0 %3815, %v2101_v50   ;;  %v2103_v52 = vmul.f32 %v4096_v31, %v6045_v46 }
 0x2ff   : > { %v1936_v0 = vrot.slane %v1935_v9, 1  ;;  %v1945_v16 = vrot.slane %v1944_v25, 1  ;;  %v1745_v33 = vmul.f32 1.442695, %v1619_v57  ;;  %v1747_v27 = vmul.f32 1.442695, %v1620_v41 }
 0x300   : > { %2300 = vperm.xlu1 %3816, %v2102_v42   ;;  %v2104_v14 = vmul.f32 %v4096_v31, %v5284_v6  ;;  %4107 = vrcp.f32 %v1928_v43  ;;  %v2005_v8 = vadd.f32 %v2004_v2, %v2003_v37  ;;  %v6046_v34 = vrot.slane %v5422_v58, 2 }
 0x301   : > { %v1937_v7 = vadd.f32 %v1936_v0, %v1935_v9  ;;  %v1946_v4 = vadd.f32 %v1945_v16, %v1944_v25  ;;  %4109 = vpow2.f32 %v1745_v33  ;;  %v6047_v59 = vrot.slane %v5446_v55, 2 }
 0x302   : > { %v1953_v23 = vadd.f32 %v6046_v34, %v5422_v58  ;;  %4111 = vpow2.f32 %v1747_v27  ;;  %v1971_v51 = vadd.f32 %v1970_v28, %v5465_v62  ;;  %v1980_v6 = vadd.f32 %v1979_v45, %v5475_v39  ;;  %v5561_v15 = vpop.eup %4097  ;;  %2305 = vperm.xlu0 %3815, %v2103_v52   ;;  %v2741_v34 = vld [vmem:[#allocation6] sm:$0xff] }
 0x303   : > { %v1962_v35 = vadd.f32 %v6047_v59, %v5446_v55  ;;  %v1989_v22 = vadd.f32 %v1988_v40, %v5513_v10  ;;  %v2006_v9 = vrot.slane %v2005_v8, 2  ;;  %4113 = vrcp.f32 %v1937_v7  ;;  %v5563_v21 = vpop.eup %4099 }
 0x304   : > { %v1954_v58 = vrot.slane %v1953_v23, 1  ;;  %v2010_v55 = vsel %vm1268_vm0, %v5561_v15, 0.0  ;;  %2310 = vperm.xlu1 %3816, %v2104_v14   ;;  %4115 = vrcp.f32 %v1946_v4  ;;  %v1972_v62 = vrot.slane %v1971_v51, 1  ;;  %v5567_v43 = vpop.eup %4101 }
 0x305   : > { %v1963_v5 = vrot.slane %v1962_v35, 1  ;;  %v1981_v28 = vrot.slane %v1980_v6, 1  ;;  %v2011_v39 = vsel %vm1268_vm0, %v5563_v21, 0.0  ;;  %v1990_v40 = vrot.slane %v1989_v22, 1 }
 0x306   : > { %v1955_v45 = vadd.f32 %v1954_v58, %v1953_v23  ;;  %v5571_v11 = vpop.eup %4103  ;;  %v2012_v25 = vadd.f32 %v2011_v39, %v2010_v55  ;;  %v2019_v37 = vsel %vm1268_vm0, %v5567_v43, 0.0  ;;  %v1973_v50 = vadd.f32 %v1972_v62, %v1971_v51  ;;  %v2742_v23 = vld [vmem:[#allocation6 + $0x8] sm:$0xff]  ;;  %v2744_v58 = vld [vmem:[#allocation6 + $0x18] sm:$0xff] }
 0x307   : > { %v1964_v10 = vadd.f32 %v1963_v5, %v1962_v35  ;;  %v1982_v57 = vadd.f32 %v1981_v28, %v1980_v6  ;;  %v2020_v41 = vsel %vm1268_vm0, %v5571_v11, 0.0  ;;  %v1991_v31 = vadd.f32 %v1990_v40, %v1989_v22 }
 0x308   : > { %4117 = vrcp.f32 %v1955_v45  ;;  %v1998_v30 = vadd.f32 %v1997_v18, %v5522_v26  ;;  %v4106_v42 = vpop.eup %4105  ;;  %v2013_v0 = vrot.slane %v2012_v25, 4  ;;  %v2021_v16 = vadd.f32 %v2020_v41, %v2019_v37  ;;  %v2745_v45 = vld [vmem:[#allocation6 + $0x20] sm:$0xff] }
 0x309   : > { %4119 = vrcp.f32 %v1964_v10  ;;  %v2007_v2 = vadd.f32 %v2006_v9, %v2005_v8  ;;  %v2105_v33 = vmul.f32 %v4106_v42, %v5303_v48  ;;  %v2106_v27 = vmul.f32 %v4106_v42, %v5309_v29  ;;  %v2743_v9 = vld [vmem:[#allocation6 + $0x10] sm:$0xff]  ;;  %v2746_v10 = vld [vmem:[#allocation6 + $0x28] sm:$0xff] }
 0x30a   : > { %4121 = vrcp.f32 %v1973_v50  ;;  %v1999_v46 = vrot.slane %v1998_v30, 1  ;;  %v4108_v52 = vpop.eup %4107  ;;  %v2014_v14 = vadd.f32 %v2013_v0, %v2012_v25  ;;  %v2022_v7 = vrot.slane %v2021_v16, 4 }
 0x30b   : > { %4123 = vrcp.f32 %v1982_v57  ;;  %v2008_v4 = vrot.slane %v2007_v2, 1  ;;  %v5582_v26 = vpop.eup %4109  ;;  %2315 = vperm.xlu0 %3815, %v2105_v33   ;;  %2320 = vperm.xlu1 %3816, %v2106_v27   ;;  %v2107_v18 = vmul.f32 %v4108_v52, %v5322_v3  ;;  %v2108_v48 = vmul.f32 %v4108_v52, %v5324_v1 }
 0x30c   : > { %4125 = vrcp.f32 %v1991_v31  ;;  %v2000_v29 = vadd.f32 %v1999_v46, %v1998_v30  ;;  %v5587_v8 = vpop.eup %4111  ;;  %v2015_v59 = vrot.slane %v2014_v14, 2  ;;  %v2023_v35 = vadd.f32 %v2022_v7, %v2021_v16 }
 0x30d   : > { %v2028_v51 = vsel %vm1268_vm0, %v5582_v26, 0.0  ;;  %v2009_v6 = vadd.f32 %v2008_v4, %v2007_v2  ;;  %v4114_v22 = vpop.eup %4113  ;;  %v2029_v3 = vsel %vm1268_vm0, %v5587_v8, 0.0  ;;  %v3715_v1 = vpack.c.bf16 %v2742_v23, %v2741_v34 }
 0x30e   : > { %4127 = vrcp.f32 %v2000_v29  ;;  %v4116_v5 = vpop.eup %4115  ;;  %v2024_v55 = vrot.slane %v2023_v35, 2  ;;  %v2030_v62 = vadd.f32 %v2029_v3, %v2028_v51  ;;  %v2109_v28 = vmul.f32 %v4114_v22, %v5354_v61  ;;  %v5635_v29 = vpop.permute.xlu0 %2135 }
 0x30f   : > { %v2110_v39 = vmul.f32 %v4114_v22, %v5359_v24  ;;  %2325 = vperm.xlu0 %3815, %v2107_v18   ;;  %2330 = vperm.xlu1 %3816, %v2108_v48   ;;  %v2111_v40 = vmul.f32 %v4116_v5, %v5365_v44  ;;  %v2112_v25 = vmul.f32 %v4116_v5, %v5369_v19  ;;  %4129 = vrcp.f32 %v2009_v6  ;;  %v2757_v6 = vld [vmem:[%s5627_s16] sm:$0xff] }
 0x310   : > { %v2016_v37 = vadd.f32 %v2015_v59, %v2014_v14  ;;  %v2031_v50 = vrot.slane %v2030_v62, 4  ;;  %v2025_v57 = vadd.f32 %v2024_v55, %v2023_v35  ;;  %3716 = vmatprep.subr.bf16.mxu0 %v3715_v1  ;;  %v3719_v41 = vpack.c.bf16 %v2744_v58, %v2743_v9  ;;  %v2758_v9 = vld [vmem:[%s5627_s16 + $0x8] sm:$0xff]  ;;  %v2752_v58 = vld [vmem:[#allocation6 + $0x58] sm:$0xff]  ;;  %3607 = vmatprep.mubr.msk.f32.mxu1 %vm2762_vm1, %v2757_v6 }
 0x311   : > { %3718 = vmatpush3.bf16.msra.mxu0 %v3715_v1  ;;  %v3723_v31 = vpack.c.bf16 %v2746_v10, %v2745_v45  ;;  %3608 = vmatmul.mubr.msk.f32.vlgmr.msra.gmra.mrb[64].mxu1 %vm2762_vm1, %v2758_v9 }
 0x312   : > { %v4118_v61 = vpop.eup %4117  ;;  %v2017_v24 = vrot.slane %v2016_v37, 1  ;;  %v2032_v42 = vadd.f32 %v2031_v50, %v2030_v62  ;;  %v2026_v0 = vrot.slane %v2025_v57, 1  ;;  %3720 = vmatprep.subr.bf16.mxu0 %v3719_v41  ;;  %v2753_v62 = vld [vmem:[#allocation6 + $0x60] sm:$0xff]  ;;  %v2755_v50 = vld [vmem:[#allocation6 + $0x70] sm:$0xff] }
 0x313   : > { %v4120_v30 = vpop.eup %4119  ;;  %v2113_v44 = vmul.f32 %v4118_v61, %v5397_v36  ;;  %v2114_v19 = vmul.f32 %v4118_v61, %v5403_v60  ;;  %2335 = vperm.xlu0 %3815, %v2109_v28   ;;  %2340 = vperm.xlu1 %3816, %v2110_v39   ;;  %v2754_v28 = vld [vmem:[#allocation6 + $0x68] sm:$0xff] }
 0x314   : > { %v4122_v16 = vpop.eup %4121  ;;  %v2115_v2 = vmul.f32 %v4120_v30, %v5420_v54  ;;  %v2116_v33 = vmul.f32 %v4120_v30, %v5424_v53  ;;  %v2018_v27 = vadd.f32 %v2017_v24, %v2016_v37  ;;  %v2033_v52 = vrot.slane %v2032_v42, 2  ;;  %v2747_v54 = vld [vmem:[#allocation6 + $0x30] sm:$0xff]  ;;  %v2748_v53 = vld [vmem:[#allocation6 + $0x38] sm:$0xff] }
 0x315   : > { %v4124_v46 = vpop.eup %4123  ;;  %v2117_v14 = vmul.f32 %v4122_v16, %v5436_v63  ;;  %v2118_v7 = vmul.f32 %v4122_v16, %v5442_v38  ;;  %v2027_v36 = vadd.f32 %v2026_v0, %v2025_v57  ;;  %3722 = vmatpush3.bf16.msra.mxu0 %v3719_v41  ;;  %v2749_v38 = vld [vmem:[#allocation6 + $0x40] sm:$0xff]  ;;  %v3727_v59 = vpack.c.bf16 %v2748_v53, %v2747_v54  ;;  %v2146_v51 = vpop.permute.xlu1 %2145  ;;  %v2756_v57 = vld [vmem:[#allocation6 + $0x78] sm:$0xff] }
 0x316   : > { %v4126_v4 = vpop.eup %4125  ;;  %v5613_v60 = vmul.f32 %v4124_v46, %v5452_v20  ;;  %v5616_v34 = vmul.f32 %v4124_v46, %v5454_v49  ;;  %4131 = vrcp.f32 %v2018_v27  ;;  %v2034_v63 = vadd.f32 %v2033_v52, %v2032_v42  ;;  %3724 = vmatprep.subr.bf16.mxu0 %v3723_v31  ;;  %v2750_v20 = vld [vmem:[#allocation6 + $0x48] sm:$0xff]  ;;  %v6049_v30 = vld [vmem:[#allocation15_spill] sm:$0xff]  ;;  %v6051_v0 = vld [vmem:[#allocation16_spill] sm:$0xff] }
 0x317   : > { %v5619_v23 = vmul.f32 %v4126_v4, %v5491_v17  ;;  %v5622_v18 = vmul.f32 %v4126_v4, %v5496_v32  ;;  %4133 = vrcp.f32 %v2027_v36  ;;  %2345 = vperm.xlu0 %3815, %v2111_v40   ;;  %2350 = vperm.xlu1 %3816, %v2112_v25   ;;  %v3739_v37 = vpack.c.bf16 %v2754_v28, %v2753_v62  ;;  %v6055_v52 = vld [vmem:[#allocation17_spill] sm:$0xff]  ;;  %v6056_v36 = vld [vmem:[#allocation19_spill] sm:$0xff] }
 0x318   : > { %v4128_v49 = vpop.eup %4127  ;;  %v2035_v48 = vrot.slane %v2034_v63, 1 }
 0x319   : > { %v5630_v17 = vmul.f32 %v4128_v49, %v5502_v12  ;;  %v5633_v32 = vmul.f32 %v4128_v49, %v5504_v13  ;;  %v4130_v35 = vpop.eup %4129  ;;  %3726 = vmatpush3.bf16.msra.mxu0 %v3723_v31  ;;  %v3731_v12 = vpack.c.bf16 %v2750_v20, %v2749_v38  ;;  %v2751_v13 = vld [vmem:[#allocation6 + $0x50] sm:$0xff]  ;;  %v2151_v55 = vpop.permute.xlu1 %2150  ;;  %v6058_v49 = vld [vmem:[#allocation20_spill] sm:$0xff] }
 0x31a   : > { %v5639_v22 = vmul.f32 %v4130_v35, %v5527_v56  ;;  %v5642_v3 = vmul.f32 %v4130_v35, %v5530_v47  ;;  %v2036_v1 = vadd.f32 %v2035_v48, %v2034_v63  ;;  %3728 = vmatprep.subr.bf16.mxu0 %v3727_v59  ;;  %v2141_v56 = vpop.permute.xlu0 %2140  ;;  %v3735_v5 = vpack.c.bf16 %v2752_v58, %v2751_v13 }
 0x31b   : > { %2355 = vperm.xlu0 %3815, %v2113_v44   ;;  %2360 = vperm.xlu1 %3816, %v2114_v19   ;;  %v2456_v42 = vmul.f32 %v6049_v30, %v2151_v55  ;;  %v6050_v44 = vld [vmem:[#allocation13_spill] sm:$0xff] }
 0x31c   : > { %4135 = vrcp.f32 %v2036_v1  ;;  %v2454_v19 = vmul.f32 %v6050_v44, %v2141_v56  ;;  %v6060_v1 = vld [vmem:[#allocation22_spill] sm:$0xff] }
 0x31d   : > { %3730 = vmatpush3.bf16.msra.mxu0 %v3727_v59 }
 0x31e   : > { %3732 = vmatprep.subr.bf16.mxu0 %v3731_v12  ;;  %v2156_v41 = vpop.permute.xlu0 %2155  ;;  %v2161_v61 = vpop.permute.xlu1 %2160 }
 0x31f   : > { %2365 = vperm.xlu0 %3815, %v2115_v2   ;;  %2370 = vperm.xlu1 %3816, %v2116_v33   ;;  %v2458_v16 = vmul.f32 %v6051_v0, %v2161_v61  ;;  %v6052_v2 = vld [vmem:[#allocation14_spill] sm:$0xff] }
 0x320   : > { %v4132_v47 = vpop.eup %4131  ;;  %v2455_v33 = vmul.f32 %v6052_v2, %v2146_v51  ;;  %v6059_v51 = vld [vmem:[#allocation23_spill] sm:$0xff] }
 0x321   : > { %v4134_v39 = vpop.eup %4133  ;;  %v2127_v45 = vmul.f32 %v4132_v47, %v5561_v15  ;;  %v2128_v10 = vmul.f32 %v4132_v47, %v5563_v21  ;;  %3734 = vmatpush3.bf16.msra.mxu0 %v3731_v12  ;;  %v3743_v15 = vpack.c.bf16 %v2756_v57, %v2755_v50 }
 0x322   : > { %v5650_v40 = vmul.f32 %v4134_v39, %v5567_v43  ;;  %v5653_v25 = vmul.f32 %v4134_v39, %v5571_v11  ;;  %3736 = vmatprep.subr.bf16.mxu0 %v3735_v5  ;;  %v2166_v11 = vpop.permute.xlu0 %2165  ;;  %v2171_v31 = vpop.permute.xlu1 %2170 }
 0x323   : > { %2375 = vperm.xlu0 %3815, %v2117_v14   ;;  %2380 = vperm.xlu1 %3816, %v2118_v7   ;;  %v2457_v14 = vmul.f32 %v6055_v52, %v2156_v41  ;;  %v2524_v7 = vadd.f32 %v2456_v42, %v2455_v33  ;;  %v2459_v4 = vmul.f32 %v6056_v36, %v2166_v11  ;;  %v6064_v33 = vld [vmem:[#allocation26_spill] sm:$0xff] }
 0x325   : > { %3738 = vmatpush3.bf16.msra.mxu0 %v3735_v5  ;;  %v2531_v54 = vadd.f32 %v2458_v16, %v2457_v14  ;;  %v2525_v20 = vrot.slane %v2524_v7, 4  ;;  %v6063_v16 = vld [vmem:[#allocation27_spill] sm:$0xff] }
 0x326   : > { %v4136_v24 = vpop.eup %4135  ;;  %3740 = vmatprep.subr.bf16.mxu0 %v3739_v37 }
 0x327   : > { %2385 = vperm.xlu0 %3815, %v5613_v60   ;;  %2390 = vperm.xlu1 %3816, %v5616_v34   ;;  %v2131_v21 = vmul.f32 %v4136_v24, %v5582_v26  ;;  %v2132_v43 = vmul.f32 %v4136_v24, %v5587_v8  ;;  %v6053_v26 = vld [vmem:[#allocation18_spill] sm:$0xff]  ;;  %v6054_v8 = vld [vmem:[#allocation12_spill] sm:$0xff]  ;;  %v2526_v13 = vadd.f32 %v2525_v20, %v2524_v7 }
 0x328   : > { %v2460_v27 = vmul.f32 %v6053_v26, %v2171_v31  ;;  %v2453_v46 = vmul.f32 %v6054_v8, %v5635_v29  ;;  %v2532_v29 = vrot.slane %v2531_v54, 4 }
 0x329   : > { %3742 = vmatpush3.bf16.msra.mxu0 %v3739_v37  ;;  %v2527_v28 = vrot.slane %v2526_v13, 2  ;;  %v6061_v37 = vld [vmem:[#allocation25_spill] sm:$0xff] }
 0x32a   : > { %3744 = vmatprep.subr.bf16.mxu0 %v3743_v15  ;;  %v2517_v34 = vadd.f32 %v2454_v19, %v2453_v46 }
 0x32b   : > { %2395 = vperm.xlu0 %3815, %v5619_v23   ;;  %2400 = vperm.xlu1 %3816, %v5622_v18   ;;  %v2538_v23 = vadd.f32 %v2460_v27, %v2459_v4  ;;  %v6057_v18 = vld [vmem:[#allocation21_spill] sm:$0xff]  ;;  %v2528_v11 = vadd.f32 %v2527_v28, %v2526_v13 }
 0x32c   : > { %v2518_v48 = vrot.slane %v2517_v34, 4 }
 0x32d   : > { %3746 = vmatpush3.bf16.msra.mxu0 %v3743_v15  ;;  %v2539_v35 = vrot.slane %v2538_v23, 4  ;;  %v2529_v8 = vrot.slane %v2528_v11, 1 }
 0x32e   : > { %v2176_v60 = vpop.permute.xlu0 %2175  ;;  %v2181_v53 = vpop.permute.xlu1 %2180  ;;  %v2519_v56 = vadd.f32 %v2518_v48, %v2517_v34 }
 0x32f   : > { %2405 = vperm.xlu0 %3815, %v5630_v17   ;;  %2410 = vperm.xlu1 %3816, %v5633_v32   ;;  %v2461_v63 = vmul.f32 %v6057_v18, %v2176_v60  ;;  %v2462_v38 = vmul.f32 %v6058_v49, %v2181_v53  ;;  %v2540_v5 = vadd.f32 %v2539_v35, %v2538_v23  ;;  %v2760_v49 = vld [vmem:[%s5627_s16 + $0x18] sm:$0xff] }
 0x330   : > { %v2520_v57 = vrot.slane %v2519_v56, 2  ;;  %v2530_v34 = vadd.f32 %v2529_v8, %v2528_v11 }
 0x331   : > { %v2545_v17 = vadd.f32 %v2462_v38, %v2461_v63  ;;  %v2541_v61 = vrot.slane %v2540_v5, 2  ;;  %v2759_v63 = vld [vmem:[%s5627_s16 + $0x10] sm:$0xff] }
 0x332   : > { %v2186_v32 = vpop.permute.xlu0 %2185  ;;  %v2191_v59 = vpop.permute.xlu1 %2190  ;;  %v2521_v30 = vadd.f32 %v2520_v57, %v2519_v56  ;;  %3610 = vmatprep.mubr.msk.f32.mxu1 %vm2762_vm1, %v2759_v63  ;;  %v6066_v57 = vld [vmem:[#allocation32_spill] sm:$0xff] }
 0x333   : > { %2415 = vperm.xlu0 %3815, %v5639_v22   ;;  %2420 = vperm.xlu1 %3816, %v5642_v3   ;;  %v2463_v6 = vmul.f32 %v6059_v51, %v2186_v32  ;;  %v2464_v12 = vmul.f32 %v6060_v1, %v2191_v59  ;;  %v2546_v9 = vrot.slane %v2545_v17, 4  ;;  %v2533_v22 = vadd.f32 %v2532_v29, %v2531_v54 }
 0x334   : > { %v2542_v19 = vadd.f32 %v2541_v61, %v2540_v5  ;;  %v2522_v14 = vrot.slane %v2521_v30, 1  ;;  %3611 = vmatmul.mubr.msk.f32.gmra.mrb[66].mxu1 %vm2762_vm1, %v2760_v49 }
 0x335   : > { %v2552_v58 = vadd.f32 %v2464_v12, %v2463_v6  ;;  %v2547_v55 = vadd.f32 %v2546_v9, %v2545_v17  ;;  %v2534_v41 = vrot.slane %v2533_v22, 2 }
 0x336   : > { %v2543_v7 = vrot.slane %v2542_v19, 1  ;;  %v2523_v38 = vadd.f32 %v2522_v14, %v2521_v30  ;;  %v6069_v30 = vld [vmem:[#allocation34_spill] sm:$0xff] }
 0x337   : > { %2425 = vperm.xlu0 %3815, %v2127_v45   ;;  %2430 = vperm.xlu1 %3816, %v2128_v10   ;;  %v2553_v3 = vrot.slane %v2552_v58, 4  ;;  %v6062_v45 = vld [vmem:[#allocation24_spill] sm:$0xff]  ;;  %v2548_v15 = vrot.slane %v2547_v55, 2 }
 0x338   : > { %v2544_v20 = vadd.f32 %v2543_v7, %v2542_v19  ;;  %v2893_v48 = vsel %vm2892_vm2, %v2530_v34, %v2523_v38  ;;  %v6071_v19 = vld [vmem:[#allocation36_spill] sm:$0xff]  ;;  %v6076_v34 = vld [vmem:[#allocation38_spill] sm:$0xff] }
 0x339   : > { %v2196_v47 = vpop.permute.xlu0 %2195  ;;  %v2201_v62 = vpop.permute.xlu1 %2200  ;;  %v2554_v39 = vadd.f32 %v2553_v3, %v2552_v58  ;;  %v2549_v27 = vadd.f32 %v2548_v15, %v2547_v55  ;;  %v3017_v55 = vstv %s3016_s8  ;;  %v6067_v15 = vld [vmem:[#allocation28_spill] sm:$0xff] }
 0x33a   : > { %v2465_v50 = vmul.f32 %v6061_v37, %v2196_v47  ;;  %v2466_v10 = vmul.f32 %v6062_v45, %v2201_v62  ;;  %4137 = vrcp.f32 %v3017_v55  ;;  %v6065_v45 = vld [vmem:[#allocation30_spill] sm:$0xff] }
 0x33b   : > { %2435 = vperm.xlu0 %3815, %v5650_v40   ;;  %2440 = vperm.xlu1 %3816, %v5653_v25   ;;  %v2555_v31 = vrot.slane %v2554_v39, 2  ;;  %v2535_v25 = vadd.f32 %v2534_v41, %v2533_v22  ;;  %v2550_v60 = vrot.slane %v2549_v27, 1 }
 0x33c   : > { %v2559_v24 = vadd.f32 %v2466_v10, %v2465_v50 }
 0x33d   : > { %v2556_v46 = vadd.f32 %v2555_v31, %v2554_v39  ;;  %v2536_v52 = vrot.slane %v2535_v25, 1  ;;  %v2551_v32 = vadd.f32 %v2550_v60, %v2549_v27  ;;  %v6068_v31 = vld [vmem:[#allocation31_spill] sm:$0xff] }
 0x33e   : > { %v2560_v40 = vrot.slane %v2559_v24, 4  ;;  %v2206_v42 = vpop.permute.xlu0 %2205  ;;  %v2211_v44 = vpop.permute.xlu1 %2210 }
 0x33f   : > { %2445 = vperm.xlu0 %3815, %v2131_v21   ;;  %2450 = vperm.xlu1 %3816, %v2132_v43   ;;  %v2467_v2 = vmul.f32 %v6063_v16, %v2206_v42  ;;  %v2468_v26 = vmul.f32 %v6064_v33, %v2211_v44  ;;  %v2557_v54 = vrot.slane %v2556_v46, 1  ;;  %v2537_v23 = vadd.f32 %v2536_v52, %v2535_v25  ;;  %v6070_v42 = vld [vmem:[#allocation33_spill] sm:$0xff] }
 0x340   : > { %v2561_v0 = vadd.f32 %v2560_v40, %v2559_v24  ;;  %v6072_v16 = vld [vmem:[#allocation29_spill] sm:$0xff] }
 0x341   : > { %v2566_v43 = vadd.f32 %v2468_v26, %v2467_v2  ;;  %v2558_v29 = vadd.f32 %v2557_v54, %v2556_v46  ;;  %v2895_v1 = vsel %vm2894_vm3, %v2537_v23, %v2893_v48  ;;  %v6073_v26 = vld [vmem:[#allocation35_spill] sm:$0xff]  ;;  %v6074_v46 = vld [vmem:[#allocation37_spill] sm:$0xff] }
 0x342   : > { %v2562_v21 = vrot.slane %v2561_v0, 2  ;;  %v2897_v9 = vsel %vm2896_vm4, %v2544_v20, %v2895_v1 }
 0x343   : > { %v2567_v4 = vrot.slane %v2566_v43, 4  ;;  %v2899_v13 = vsel %vm2898_vm5, %v2551_v32, %v2897_v9  ;;  %v6077_v32 = vld [vmem:[#allocation41_spill] sm:$0xff] }
 0x344   : > { %v2563_v36 = vadd.f32 %v2562_v21, %v2561_v0  ;;  %v2901_v56 = vsel %vm2900_vm6, %v2558_v29, %v2899_v13  ;;  %v4138_v50 = vpop.eup %4137  ;;  %v6078_v29 = vld [vmem:[#allocation40_spill] sm:$0xff] }
 0x345   : > { %v2568_v53 = vadd.f32 %v2567_v4, %v2566_v43  ;;  %3751 = vpush %v4138_v50  ;;  %v6075_v4 = vld [vmem:[#allocation39_spill] sm:$0xff] }
 0x346   : > { %v2564_v18 = vrot.slane %v2563_v36, 1  ;;  %v2216_v35 = vpop.permute.xlu0 %2215  ;;  %v2221_v51 = vpop.permute.xlu1 %2220 }
 0x347   : > { %v2569_v17 = vrot.slane %v2568_v53, 2  ;;  %v2470_v11 = vmul.f32 %v6067_v15, %v2221_v51  ;;  %v2469_v2 = vmul.f32 %v6072_v16, %v2216_v35  ;;  %v6080_v15 = vld [vmem:[#allocation42_spill] sm:$0xff] }
 0x348   : > { %v2565_v6 = vadd.f32 %v2564_v18, %v2563_v36 }
 0x349   : > { %v2570_v59 = vadd.f32 %v2569_v17, %v2568_v53  ;;  %v2573_v52 = vadd.f32 %v2470_v11, %v2469_v2 }
 0x34a   : > { %v2903_v22 = vsel %vm2902_vm7, %v2565_v6, %v2901_v56 }
 0x34b   : > { %v2571_v12 = vrot.slane %v2570_v59, 1  ;;  %v2574_v49 = vrot.slane %v2573_v52, 4 }
 0x34c   : > { %v2226_v3 = vpop.permute.xlu0 %2225 }
 0x34d   : > { %v2572_v58 = vadd.f32 %v2571_v12, %v2570_v59  ;;  %v2231_v47 = vpop.permute.xlu1 %2230  ;;  %v2471_v40 = vmul.f32 %v6068_v31, %v2226_v3  ;;  %v2575_v12 = vadd.f32 %v2574_v49, %v2573_v52 }
 0x34e   : > { %v2472_v10 = vmul.f32 %v6065_v45, %v2231_v47 }
 0x34f   : > { %v2905_v5 = vsel %vm2904_vm8, %v2572_v58, %v2903_v22  ;;  %v2576_v47 = vrot.slane %v2575_v12, 2 }
 0x350   : > { %3645 = vmatprep.mubr.f32.mxu0 %v2905_v5  ;;  %v2580_v33 = vadd.f32 %v2472_v10, %v2471_v40 }
 0x352   : > { %v2581_v53 = vrot.slane %v2580_v33, 4 }
 0x354   : > { %v2236_v62 = vpop.permute.xlu0 %2235  ;;  %v2582_v35 = vadd.f32 %v2581_v53, %v2580_v33 }
 0x355   : > { %v2241_v28 = vpop.permute.xlu1 %2240  ;;  %v2473_v44 = vmul.f32 %v6070_v42, %v2236_v62 }
 0x356   : > { %v2474_v41 = vmul.f32 %v6066_v57, %v2241_v28  ;;  %v2583_v56 = vrot.slane %v2582_v35, 2  ;;  %v2577_v57 = vadd.f32 %v2576_v47, %v2575_v12  ;;  %v6083_v12 = vld [vmem:[#allocation47_spill] sm:$0xff] }
 0x358   : > { %v2587_v8 = vadd.f32 %v2474_v41, %v2473_v44  ;;  %v2584_v28 = vadd.f32 %v2583_v56, %v2582_v35  ;;  %v6085_v56 = vld [vmem:[#allocation49_spill] sm:$0xff] }
 0x35a   : > { %v2588_v23 = vrot.slane %v2587_v8, 4  ;;  %v2585_v40 = vrot.slane %v2584_v28, 1 }
 0x35c   : > { %v2589_v6 = vadd.f32 %v2588_v23, %v2587_v8 }
 0x35d   : > { %v2246_v39 = vpop.permute.xlu0 %2245  ;;  %v2251_v37 = vpop.permute.xlu1 %2250 }
 0x35e   : > { %v2476_v25 = vmul.f32 %v6069_v30, %v2251_v37  ;;  %v2475_v27 = vmul.f32 %v6073_v26, %v2246_v39  ;;  %v2590_v5 = vrot.slane %v2589_v6, 2 }
 0x360   : > { %v2594_v14 = vadd.f32 %v2476_v25, %v2475_v27  ;;  %v2591_v37 = vadd.f32 %v2590_v5, %v2589_v6  ;;  %v2586_v27 = vadd.f32 %v2585_v40, %v2584_v28  ;;  %v6082_v6 = vld [vmem:[#allocation44_spill] sm:$0xff]  ;;  %v6086_v5 = vld [vmem:[#allocation45_spill] sm:$0xff] }
 0x362   : > { %v2595_v38 = vrot.slane %v2594_v14, 4  ;;  %v2592_v42 = vrot.slane %v2591_v37, 1 }
 0x363   : > { %v2256_v61 = vpop.permute.xlu0 %2255  ;;  %v2261_v24 = vpop.permute.xlu1 %2260 }
 0x364   : > { %v2478_v0 = vmul.f32 %v6071_v19, %v2261_v24  ;;  %v2477_v21 = vmul.f32 %v6074_v46, %v2256_v61  ;;  %v2596_v9 = vadd.f32 %v2595_v38, %v2594_v14  ;;  %v6079_v61 = vld [vmem:[#allocation43_spill] sm:$0xff]  ;;  %v2578_v19 = vrot.slane %v2577_v57, 1 }
 0x366   : > { %v2601_v36 = vadd.f32 %v2478_v0, %v2477_v21  ;;  %v2597_v55 = vrot.slane %v2596_v9, 2  ;;  %v2593_v21 = vadd.f32 %v2592_v42, %v2591_v37  ;;  %v2579_v52 = vadd.f32 %v2578_v19, %v2577_v57  ;;  %v6087_v37 = vld [vmem:[#allocation51_spill] sm:$0xff] }
 0x368   : > { %v2602_v17 = vrot.slane %v2601_v36, 4  ;;  %v2598_v41 = vadd.f32 %v2597_v55, %v2596_v9 }
 0x369   : > { %v2266_v43 = vpop.permute.xlu0 %2265  ;;  %v2271_v7 = vpop.permute.xlu1 %2270 }
 0x36a   : > { %v2479_v60 = vmul.f32 %v6075_v4, %v2266_v43  ;;  %v2480_v54 = vmul.f32 %v6076_v34, %v2271_v7  ;;  %v2603_v13 = vadd.f32 %v2602_v17, %v2601_v36  ;;  %v2599_v0 = vrot.slane %v2598_v41, 1 }
 0x36b   : > { %v2906_v4 = vsel %vm2892_vm2, %v2586_v27, %v2579_v52 }
 0x36c   : > { %v2608_v18 = vadd.f32 %v2480_v54, %v2479_v60  ;;  %v2604_v62 = vrot.slane %v2603_v13, 2  ;;  %v2600_v14 = vadd.f32 %v2599_v0, %v2598_v41  ;;  %v2907_v23 = vsel %vm2894_vm3, %v2593_v21, %v2906_v4  ;;  %v6092_v21 = vld [vmem:[#allocation54_spill] sm:$0xff] }
 0x36d   : > { %v2276_v63 = vpop.permute.xlu0 %2275  ;;  %v2281_v20 = vpop.permute.xlu1 %2280 }
 0x36e   : > { %v2481_v48 = vmul.f32 %v6077_v32, %v2276_v63  ;;  %v2482_v59 = vmul.f32 %v6078_v29, %v2281_v20  ;;  %v2609_v51 = vrot.slane %v2608_v18, 4  ;;  %v2605_v31 = vadd.f32 %v2604_v62, %v2603_v13  ;;  %v6081_v32 = vld [vmem:[#allocation46_spill] sm:$0xff]  ;;  %v6084_v13 = vld [vmem:[#allocation48_spill] sm:$0xff] }
 0x36f   : > { %v2908_v63 = vsel %vm2896_vm4, %v2600_v14, %v2907_v23  ;;  %v6094_v23 = vld [vmem:[#allocation56_spill] sm:$0xff] }
 0x370   : > { %v2615_v1 = vadd.f32 %v2482_v59, %v2481_v48  ;;  %v2610_v22 = vadd.f32 %v2609_v51, %v2608_v18  ;;  %v2606_v33 = vrot.slane %v2605_v31, 1 }
 0x372   : > { %v2616_v58 = vrot.slane %v2615_v1, 4  ;;  %v2611_v39 = vrot.slane %v2610_v22, 2  ;;  %v2607_v36 = vadd.f32 %v2606_v33, %v2605_v31  ;;  %v6089_v31 = vld [vmem:[#allocation53_spill] sm:$0xff] }
 0x374   : > { %v2617_v3 = vadd.f32 %v2616_v58, %v2615_v1  ;;  %v2612_v30 = vadd.f32 %v2611_v39, %v2610_v22  ;;  %v2909_v38 = vsel %vm2898_vm5, %v2607_v36, %v2908_v63 }
 0x376   : > { %v2618_v50 = vrot.slane %v2617_v3, 2  ;;  %v2613_v8 = vrot.slane %v2612_v30, 1  ;;  %s3752_s11 = spop %3751 }
 0x378   : > { %v2286_v45 = vpop.permute.xlu0 %2285  ;;  %v2619_v44 = vadd.f32 %v2618_v50, %v2617_v3  ;;  %v2614_v60 = vadd.f32 %v2613_v8, %v2612_v30  ;;  %v6090_v30 = vld [vmem:[#allocation52_spill] sm:$0xff]  ;;  %v6091_v8 = vld [vmem:[#allocation55_spill] sm:$0xff] }
 0x379   : > { %v2291_v10 = vpop.permute.xlu1 %2290  ;;  %v2483_v24 = vmul.f32 %v6079_v61, %v2286_v45  ;;  %v6088_v45 = vld [vmem:[#allocation50_spill] sm:$0xff] }
 0x37a   : > { %v2484_v11 = vmul.f32 %v6080_v15, %v2291_v10  ;;  %v2620_v43 = vrot.slane %v2619_v44, 1  ;;  %v2910_v17 = vsel %vm2900_vm6, %v2614_v60, %v2909_v38 }
 0x37c   : > { %v2622_v25 = vadd.f32 %v2484_v11, %v2483_v24  ;;  %v2621_v18 = vadd.f32 %v2620_v43, %v2619_v44 }
 0x37d   : > { %v2296_v2 = vpop.permute.xlu0 %2295 }
 0x37e   : > { %v2623_v16 = vrot.slane %v2622_v25, 4  ;;  %v2911_v29 = vsel %vm2902_vm7, %v2621_v18, %v2910_v17  ;;  %v2485_v3 = vmul.f32 %v6086_v5, %v2296_v2 }
 0x37f   : > { %v2301_v26 = vpop.permute.xlu1 %2300 }
 0x380   : > { %v2624_v46 = vadd.f32 %v2623_v16, %v2622_v25  ;;  %v2486_v1 = vmul.f32 %v6082_v6, %v2301_v26  ;;  %v6095_v6 = vld [vmem:[#allocation59_spill] sm:$0xff] }
 0x381   : > { %v2306_v54 = vpop.permute.xlu0 %2305 }
 0x382   : > { %v2625_v7 = vrot.slane %v2624_v46, 2  ;;  %v2487_v9 = vmul.f32 %v6083_v12, %v2306_v54  ;;  %v2629_v39 = vadd.f32 %v2486_v1, %v2485_v3  ;;  %v6093_v54 = vld [vmem:[#allocation57_spill] sm:$0xff]  ;;  %v6096_v12 = vld [vmem:[#allocation58_spill] sm:$0xff] }
 0x383   : > { %v2311_v53 = vpop.permute.xlu1 %2310 }
 0x384   : > { %v2626_v34 = vadd.f32 %v2625_v7, %v2624_v46  ;;  %v2488_v48 = vmul.f32 %v6081_v32, %v2311_v53  ;;  %v2630_v11 = vrot.slane %v2629_v39, 4 }
 0x386   : > { %v2627_v49 = vrot.slane %v2626_v34, 1  ;;  %v2636_v47 = vadd.f32 %v2488_v48, %v2487_v9  ;;  %v2631_v33 = vadd.f32 %v2630_v11, %v2629_v39 }
 0x388   : > { %v2628_v20 = vadd.f32 %v2627_v49, %v2626_v34  ;;  %v2637_v57 = vrot.slane %v2636_v47, 4  ;;  %v2632_v34 = vrot.slane %v2631_v33, 2 }
 0x38a   : > { %v2316_v59 = vpop.permute.xlu0 %2315  ;;  %v2321_v35 = vpop.permute.xlu1 %2320  ;;  %v2912_v51 = vsel %vm2904_vm8, %v2628_v20, %v2911_v29  ;;  %v2638_v44 = vadd.f32 %v2637_v57, %v2636_v47 }
 0x38b   : > { %v2490_v58 = vmul.f32 %v6084_v13, %v2321_v35  ;;  %3646 = vmatmul.mubr.f32.vlgmr.msra.gmra.mrb[64].mxu0 %v2912_v51  ;;  %v2489_v22 = vmul.f32 %v6085_v56, %v2316_v59  ;;  %v2633_v35 = vadd.f32 %v2632_v34, %v2631_v33 }
 0x38c   : > { %v2639_v52 = vrot.slane %v2638_v44, 2 }
 0x38d   : > { %v2643_v55 = vadd.f32 %v2490_v58, %v2489_v22  ;;  %v2634_v39 = vrot.slane %v2633_v35, 1 }
 0x38e   : > { %v2326_v62 = vpop.permute.xlu0 %2325  ;;  %v2331_v28 = vpop.permute.xlu1 %2330  ;;  %v2640_v38 = vadd.f32 %v2639_v52, %v2638_v44 }
 0x38f   : > { %v2491_v50 = vmul.f32 %v6087_v37, %v2326_v62  ;;  %v2492_v10 = vmul.f32 %v6088_v45, %v2331_v28  ;;  %v2644_v61 = vrot.slane %v2643_v55, 4 }
 0x390   : > { %v2641_v56 = vrot.slane %v2640_v38, 1 }
 0x391   : > { %v2650_v41 = vadd.f32 %v2492_v10, %v2491_v50  ;;  %v2645_v0 = vadd.f32 %v2644_v61, %v2643_v55 }
 0x392   : > { %v2336_v24 = vpop.permute.xlu0 %2335  ;;  %v2341_v15 = vpop.permute.xlu1 %2340  ;;  %v2642_v10 = vadd.f32 %v2641_v56, %v2640_v38 }
 0x393   : > { %v2493_v40 = vmul.f32 %v6089_v31, %v2336_v24  ;;  %v2494_v25 = vmul.f32 %v6090_v30, %v2341_v15  ;;  %v2651_v42 = vrot.slane %v2650_v41, 4  ;;  %v2646_v7 = vrot.slane %v2645_v0, 2 }
 0x395   : > { %v2657_v19 = vadd.f32 %v2494_v25, %v2493_v40  ;;  %v2652_v27 = vadd.f32 %v2651_v42, %v2650_v41  ;;  %v2647_v32 = vadd.f32 %v2646_v7, %v2645_v0  ;;  %v2635_v40 = vadd.f32 %v2634_v39, %v2633_v35  ;;  %v6104_v35 = vld [vmem:[#allocation66_spill] sm:$0xff] }
 0x396   : > { %v2346_v16 = vpop.permute.xlu0 %2345  ;;  %v2351_v2 = vpop.permute.xlu1 %2350 }
 0x397   : > { %v2658_v26 = vrot.slane %v2657_v19, 4  ;;  %v2495_v46 = vmul.f32 %v6091_v8, %v2346_v16  ;;  %v2496_v43 = vmul.f32 %v6092_v21, %v2351_v2  ;;  %v2653_v63 = vrot.slane %v2652_v27, 2  ;;  %v6097_v16 = vld [vmem:[#allocation62_spill] sm:$0xff] }
 0x398   : > { %v2648_v47 = vrot.slane %v2647_v32, 1  ;;  %v2913_v44 = vsel %vm2892_vm2, %v2642_v10, %v2635_v40 }
 0x399   : > { %v2659_v14 = vadd.f32 %v2658_v26, %v2657_v19  ;;  %v2664_v36 = vadd.f32 %v2496_v43, %v2495_v46  ;;  %v2654_v13 = vadd.f32 %v2653_v63, %v2652_v27  ;;  %v6098_v26 = vld [vmem:[#allocation60_spill] sm:$0xff]  ;;  %v6099_v43 = vld [vmem:[#allocation63_spill] sm:$0xff] }
 0x39a   : > { %v2356_v4 = vpop.permute.xlu0 %2355  ;;  %v2361_v60 = vpop.permute.xlu1 %2360  ;;  %v2649_v24 = vadd.f32 %v2648_v47, %v2647_v32 }
 0x39b   : > { %v2497_v53 = vmul.f32 %v6093_v54, %v2356_v4  ;;  %v2498_v18 = vmul.f32 %v6094_v23, %v2361_v60  ;;  %v2665_v49 = vrot.slane %v2664_v36, 4  ;;  %v2660_v20 = vrot.slane %v2659_v14, 2  ;;  %v6101_v60 = vld [vmem:[#allocation61_spill] sm:$0xff] }
 0x39c   : > { %v2655_v45 = vrot.slane %v2654_v13, 1  ;;  %v2914_v21 = vsel %vm2894_vm3, %v2649_v24, %v2913_v44  ;;  %v6102_v54 = vld [vmem:[#allocation65_spill] sm:$0xff] }
 0x39d   : > { %v2671_v17 = vadd.f32 %v2498_v18, %v2497_v53  ;;  %v2666_v48 = vadd.f32 %v2665_v49, %v2664_v36  ;;  %v2661_v22 = vadd.f32 %v2660_v20, %v2659_v14  ;;  %v6100_v14 = vld [vmem:[#allocation64_spill] sm:$0xff] }
 0x39e   : > { %v2366_v29 = vpop.permute.xlu0 %2365  ;;  %v2371_v59 = vpop.permute.xlu1 %2370  ;;  %v2656_v42 = vadd.f32 %v2655_v45, %v2654_v13 }
 0x39f   : > { %v2672_v51 = vrot.slane %v2671_v17, 4  ;;  %v2499_v1 = vmul.f32 %v6095_v6, %v2366_v29  ;;  %v2500_v9 = vmul.f32 %v6096_v12, %v2371_v59  ;;  %v2667_v58 = vrot.slane %v2666_v48, 2  ;;  %v6103_v29 = vld [vmem:[#allocation67_spill] sm:$0xff] }
 0x3a0   : > { %v2662_v57 = vrot.slane %v2661_v22, 1  ;;  %v2915_v23 = vsel %vm2896_vm4, %v2656_v42, %v2914_v21 }
 0x3a1   : > { %v2673_v5 = vadd.f32 %v2672_v51, %v2671_v17  ;;  %v2678_v3 = vadd.f32 %v2500_v9, %v2499_v1  ;;  %v2668_v55 = vadd.f32 %v2667_v58, %v2666_v48 }
 0x3a2   : > { %v2376_v62 = vpop.permute.xlu0 %2375  ;;  %v2381_v28 = vpop.permute.xlu1 %2380  ;;  %v2663_v19 = vadd.f32 %v2662_v57, %v2661_v22 }
 0x3a3   : > { %v2674_v37 = vrot.slane %v2673_v5, 2  ;;  %v2679_v50 = vrot.slane %v2678_v3, 4  ;;  %v2669_v15 = vrot.slane %v2668_v55, 1  ;;  %v2502_v27 = vmul.f32 %v6098_v26, %v2381_v28 }
 0x3a4   : > { %v2501_v34 = vmul.f32 %v6101_v60, %v2376_v62  ;;  %v2916_v49 = vsel %vm2898_vm5, %v2663_v19, %v2915_v23 }
 0x3a5   : > { %v2675_v41 = vadd.f32 %v2674_v37, %v2673_v5  ;;  %v2680_v61 = vadd.f32 %v2679_v50, %v2678_v3  ;;  %v2670_v33 = vadd.f32 %v2669_v15, %v2668_v55  ;;  %v6105_v3 = vld [vmem:[#allocation69_spill] sm:$0xff]  ;;  %v6106_v55 = vld [vmem:[#allocation68_spill] sm:$0xff]  ;;  %v6108_v15 = vld [vmem:[#allocation70_spill] sm:$0xff] }
 0x3a6   : > { %v2386_v11 = vpop.permute.xlu0 %2385  ;;  %v2391_v31 = vpop.permute.xlu1 %2390  ;;  %v2685_v38 = vadd.f32 %v2502_v27, %v2501_v34  ;;  %v6111_v34 = vld [vmem:[#allocation75_spill] sm:$0xff] }
 0x3a7   : > { %v2676_v30 = vrot.slane %v2675_v41, 1  ;;  %v2681_v25 = vrot.slane %v2680_v61, 2  ;;  %v2504_v2 = vmul.f32 %v6097_v16, %v2391_v31  ;;  %v2503_v52 = vmul.f32 %v6099_v43, %v2386_v11  ;;  %v6109_v16 = vld [vmem:[#allocation73_spill] sm:$0xff] }
 0x3a8   : > { %v2917_v48 = vsel %vm2900_vm6, %v2670_v33, %v2916_v49  ;;  %v2686_v13 = vrot.slane %v2685_v38, 4  ;;  %v6110_v33 = vld [vmem:[#allocation72_spill] sm:$0xff] }
 0x3a9   : > { %v2682_v0 = vadd.f32 %v2681_v25, %v2680_v61  ;;  %v2677_v36 = vadd.f32 %v2676_v30, %v2675_v41  ;;  %v2692_v18 = vadd.f32 %v2504_v2, %v2503_v52  ;;  %v6107_v61 = vld [vmem:[#allocation71_spill] sm:$0xff] }
 0x3aa   : > { %v2396_v8 = vpop.permute.xlu0 %2395  ;;  %v2401_v46 = vpop.permute.xlu1 %2400  ;;  %v2687_v37 = vadd.f32 %v2686_v13, %v2685_v38 }
 0x3ab   : > { %v2506_v7 = vmul.f32 %v6100_v14, %v2401_v46  ;;  %v2683_v4 = vrot.slane %v2682_v0, 1  ;;  %v2505_v53 = vmul.f32 %v6102_v54, %v2396_v8  ;;  %v2918_v6 = vsel %vm2902_vm7, %v2677_v36, %v2917_v48 }
 0x3ac   : > { %v2693_v12 = vrot.slane %v2692_v18, 4  ;;  %v2688_v30 = vrot.slane %v2687_v37, 2 }
 0x3ad   : > { %v2684_v63 = vadd.f32 %v2683_v4, %v2682_v0  ;;  %v2699_v20 = vadd.f32 %v2506_v7, %v2505_v53  ;;  %v6112_v53 = vld [vmem:[#allocation74_spill] sm:$0xff] }
 0x3ae   : > { %v2406_v17 = vpop.permute.xlu0 %2405  ;;  %v2411_v32 = vpop.permute.xlu1 %2410  ;;  %v2694_v28 = vadd.f32 %v2693_v12, %v2692_v18  ;;  %v2689_v43 = vadd.f32 %v2688_v30, %v2687_v37  ;;  %v3020_v30 = vstv %s3752_s11 }
 0x3af   : > { %v2507_v59 = vmul.f32 %v6103_v29, %v2406_v17  ;;  %v2508_v51 = vmul.f32 %v6104_v35, %v2411_v32  ;;  %v2919_v1 = vsel %vm2904_vm8, %v2684_v63, %v2918_v6  ;;  %v2700_v58 = vrot.slane %v2699_v20, 4 }
 0x3b0   : > { %3648 = vmatprep.mubr.f32.mxu0 %v2919_v1  ;;  %v2695_v31 = vrot.slane %v2694_v28, 2  ;;  %v2690_v48 = vrot.slane %v2689_v43, 1 }
 0x3b1   : > { %v2706_v9 = vadd.f32 %v2508_v51, %v2507_v59  ;;  %v2701_v50 = vadd.f32 %v2700_v58, %v2699_v20 }
 0x3b2   : > { %v2416_v56 = vpop.permute.xlu0 %2415  ;;  %v2421_v22 = vpop.permute.xlu1 %2420  ;;  %v2696_v46 = vadd.f32 %v2695_v31, %v2694_v28  ;;  %v2691_v58 = vadd.f32 %v2690_v48, %v2689_v43 }
 0x3b3   : > { %v2707_v5 = vrot.slane %v2706_v9, 4  ;;  %v2509_v47 = vmul.f32 %v6105_v3, %v2416_v56  ;;  %v2510_v62 = vmul.f32 %v6106_v55, %v2421_v22  ;;  %v2702_v25 = vrot.slane %v2701_v50, 2 }
 0x3b4   : > { %v2697_v49 = vrot.slane %v2696_v46, 1 }
 0x3b5   : > { %v2713_v39 = vadd.f32 %v2510_v62, %v2509_v47  ;;  %v2708_v57 = vadd.f32 %v2707_v5, %v2706_v9  ;;  %v2703_v52 = vadd.f32 %v2702_v25, %v2701_v50 }
 0x3b6   : > { %v2426_v45 = vpop.permute.xlu0 %2425  ;;  %v2431_v10 = vpop.permute.xlu1 %2430  ;;  %v2698_v6 = vadd.f32 %v2697_v49, %v2696_v46 }
 0x3b7   : > { %v2714_v41 = vrot.slane %v2713_v39, 4  ;;  %v2511_v24 = vmul.f32 %v6107_v61, %v2426_v45  ;;  %v2512_v11 = vmul.f32 %v6108_v15, %v2431_v10  ;;  %v2709_v0 = vrot.slane %v2708_v57, 2 }
 0x3b8   : > { %v2704_v17 = vrot.slane %v2703_v52, 1  ;;  %v2920_v47 = vsel %vm2892_vm2, %v2698_v6, %v2691_v58 }
 0x3b9   : > { %v2715_v40 = vadd.f32 %v2714_v41, %v2713_v39  ;;  %v2720_v42 = vadd.f32 %v2512_v11, %v2511_v24  ;;  %v2710_v4 = vadd.f32 %v2709_v0, %v2708_v57 }
 0x3ba   : > { %v2436_v44 = vpop.permute.xlu0 %2435  ;;  %v2441_v19 = vpop.permute.xlu1 %2440  ;;  %v2705_v13 = vadd.f32 %v2704_v17, %v2703_v52 }
 0x3bb   : > { %v2513_v2 = vmul.f32 %v6109_v16, %v2436_v44  ;;  %v2514_v26 = vmul.f32 %v6110_v33, %v2441_v19  ;;  %v2716_v27 = vrot.slane %v2715_v40, 2  ;;  %v2721_v8 = vrot.slane %v2720_v42, 4 }
 0x3bc   : > { %v2711_v29 = vrot.slane %v2710_v4, 1  ;;  %v2921_v39 = vsel %vm2894_vm3, %v2705_v13, %v2920_v47 }
 0x3bd   : > { %v2727_v21 = vadd.f32 %v2514_v26, %v2513_v2  ;;  %v2722_v14 = vadd.f32 %v2721_v8, %v2720_v42  ;;  %v2717_v18 = vadd.f32 %v2716_v27, %v2715_v40 }
 0x3be   : > { %v2446_v7 = vpop.permute.xlu0 %2445  ;;  %v2451_v36 = vpop.permute.xlu1 %2450  ;;  %v2712_v56 = vadd.f32 %v2711_v29, %v2710_v4 }
 0x3bf   : > { %v2728_v60 = vrot.slane %v2727_v21, 4  ;;  %v2515_v54 = vmul.f32 %v6111_v34, %v2446_v7  ;;  %v2516_v23 = vmul.f32 %v6112_v53, %v2451_v36  ;;  %v2723_v63 = vrot.slane %v2722_v14, 2 }
 0x3c0   : > { %v2718_v51 = vrot.slane %v2717_v18, 1  ;;  %v2922_v50 = vsel %vm2896_vm4, %v2712_v56, %v2921_v39 }
 0x3c1   : > { %v2729_v38 = vadd.f32 %v2728_v60, %v2727_v21  ;;  %v2734_v20 = vadd.f32 %v2516_v23, %v2515_v54  ;;  %v2724_v32 = vadd.f32 %v2723_v63, %v2722_v14 }
 0x3c2   : > { %v2719_v3 = vadd.f32 %v2718_v51, %v2717_v18 }
 0x3c3   : > { %v2730_v59 = vrot.slane %v2729_v38, 2  ;;  %v2735_v35 = vrot.slane %v2734_v20, 4  ;;  %v2725_v1 = vrot.slane %v2724_v32, 1 }
 0x3c4   : > { %v2923_v45 = vsel %vm2898_vm5, %v2719_v3, %v2922_v50 }
 0x3c5   : > { %v2731_v12 = vadd.f32 %v2730_v59, %v2729_v38  ;;  %v2736_v9 = vadd.f32 %v2735_v35, %v2734_v20  ;;  %v2726_v55 = vadd.f32 %v2725_v1, %v2724_v32 }
 0x3c7   : > { %v2732_v22 = vrot.slane %v2731_v12, 1  ;;  %v2737_v5 = vrot.slane %v2736_v9, 2  ;;  %v2924_v57 = vsel %vm2900_vm6, %v2726_v55, %v2923_v45 }
 0x3c9   : > { %v2738_v62 = vadd.f32 %v2737_v5, %v2736_v9  ;;  %v2733_v28 = vadd.f32 %v2732_v22, %v2731_v12 }
 0x3cb   : > { %v2739_v37 = vrot.slane %v2738_v62, 1  ;;  %v2925_v41 = vsel %vm2902_vm7, %v2733_v28, %v2924_v57 }
 0x3cd   : > { %v2740_v10 = vadd.f32 %v2739_v37, %v2738_v62 }
 0x3cf   : > { %v2926_v61 = vsel %vm2904_vm8, %v2740_v10, %v2925_v41 }
 0x3d0   : > { %3649 = vmatmul.mubr.f32.gmra.mrb[66].mxu0 %v2926_v61 }
 0x3e4   : > { %v3609_v24 = vpop.f32.mrb[64].mxu1 }
 0x3e5   : > { %v2841_v15 = vpop.f32.mrb[65].mxu1 }
 0x407   : > { %v3612_v11 = vpop.f32.mrb[66].mxu1 }
 0x408   : > { %v2851_v31 = vpop.f32.mrb[67].mxu1 }
 0x45e   : > { %v3647_v40 = vpop.f32.mrb[64].mxu0 }
 0x45f   : > { %v3003_v25 = vadd.f32 %v3647_v40, %v3609_v24  ;;  %v2997_v42 = vpop.f32.mrb[65].mxu0 }
 0x460   : > { %v2998_v44 = vadd.f32 %v2997_v42, %v2841_v15 }
 0x461   : > { %v3022_v19 = vmul.f32 %v3020_v30, %v3003_v25 }
 0x462   : > { %v3021_v0 = vmul.f32 %v3020_v30, %v2998_v44 }
 0x463   : > { %3026 = vst [vmem:[%s329_s21 + $0x8] sm:$0xff] %v3022_v19 }
 0x464   : > { %3025 = vst [vmem:[%s329_s21] sm:$0xff] %v3021_v0 }
 0x4a3   : > { %v3650_v16 = vpop.f32.mrb[66].mxu0 }
 0x4a4   : > { %v3013_v2 = vadd.f32 %v3650_v16, %v3612_v11  ;;  %v3007_v33 = vpop.f32.mrb[67].mxu0 }
 0x4a5   : > { %v3008_v26 = vadd.f32 %v3007_v33, %v2851_v31 }
 0x4a6   : > { %v3024_v27 = vmul.f32 %v3020_v30, %v3013_v2 }
 0x4a7   : > { %v3023_v8 = vmul.f32 %v3020_v30, %v3008_v26 }
 0x4a8   : > { %3028 = vst [vmem:[%s329_s21 + $0x18] sm:$0xff] %v3024_v27 }
 0x4a9   : > { %3027 = vst [vmem:[%s329_s21 + $0x10] sm:$0xff] %v3023_v8 }
 0x4aa   : > { %4210 = shalt.err (!%p4207_p9)
}
 0x4ab   : > { %s4211_s16 = scalar_lea.hbm %s5771_s10, 512  ;;  %s4215_s20 = scalar_lea.hbm %s5822_s7, 1024 }
 0x4ac   : > { %p4212_p1 = scmp.ne.s32.totalorder %s5771_s10, %s4211_s16  ;;  %p4216_p11 = scmp.lt.u32.totalorder %s5771_s10, %s5822_s7 }
 0x4ad   : > { %p4217_p2 = scmp.lt.u32.totalorder %s4215_s20, %s4211_s16  ;;  %p4219_p6 = scmp.lt.u32.totalorder %s4211_s16, %s5771_s10 }
 0x4ae   : > { %p4213_p0 = pnand %p4212_p1, %p4414_p12 }
 0x4af   : > { %p4218_p4 = por %p4217_p2, %p4216_p11 }
 0x4b0   : > { %p4214_p5 = pneg %p4213_p0 }
 0x4b1   : > { %p4220_p8 = por %p4219_p6, %p4218_p4 }
 0x4b3   : > { %p4221_p10 = pnand %p4220_p8, %p4214_p5 }
 0x4b5   : > { %4224 = shalt.err (!%p4221_p10)
}
 0x4b6   : > { %s4275_s13 = smov 128   ;;  %s4276_s12 = smov 8  }
 0x4b7   : > { %3759 = dma.vmem_to_hbm [thread:$0]  (%p4414_p12), %s5766_s23, 512, %s5771_s10, %s3030_s25, %s4275_s13, %s4275_s13, %s4276_s12  }
 0x4b8 PF: > { %s3058_s30 = sand.u32 1, %s4255_s26   ;;  %p6113_p13 = scmp.ne.s32.totalorder %s5912_s9, 0 }
 0x4b9   : > { %p6114_p3 = scmp.ge.s32.totalorder %s4267_s29, 2  ;;  %s3059_s6 = scalar_lea.sflag [#allocation5], %s3058_s30 }
 0x4bb   : > { %p3770_p7 = pnand %p6114_p3, %p6113_p13 }
 0x4bd   : > { %4250 = dma.done.wait (!%p3770_p7), %s3059_s6, 512  }
 0x4be   : > { %4252 = vsyncadd (!%p3770_p7), %s3059_s6, 4294966784  ;;  %p22_p9 = scmp.ge.s32.totalorder %s4376_s14, 4   ;;  %s6115_s26 = smov %s4259_s27 }
 0x4bf   : > { %s6116_s27 = smov %s4263_s28  ;;  %s6117_s28 = smov %s4410_s18 }
 0x4c0   : > { %s6118_s29 = smov %s4376_s14  ;;  %24 = sbr.rel (!%p22_p9) target bundleno = 8 (0x8), region = 100 }
 0x4c7   :  { %3064 = vsyncpa [#allocation4], 1 }
 0x4c8   :  { %3066 = vsyncpa [#allocation4 + $0x1], 1 }
 0x4c9   :  { %3067 = vsyncpa [#allocation7], 1 }
 0x4ca   :  { %3068 = vsyncpa [#allocation5], 1 }
 0x4cb   :  { %3070 = vsyncpa [#allocation5 + $0x1], 1 }

</bundles_post_ra>
